<compile_context>
chip_gen: v6e
topology: v6e:2x2x1
jax: 0.10.0
libtpu: 0.0.40
codegen_flags: <defaults>
</compile_context>

<pallas_src>
import functools

import jax
import jax.numpy as jnp
from jax.experimental import pallas as pl
from jax.experimental.pallas import tpu as pltpu

_LANE = 128
_F32 = 4
_VMEM_BUDGET = 20 * 1024 * 1024      # per-step working-set target (all gens)
_VMEM_LIMIT = 32 * 1024 * 1024       # scoped-VMEM request passed to Mosaic


def _round_up(x, m):
    return (x + m - 1) // m * m


def _mbconv_kernel(x_ref, w1_ref, dw_ref, b2_ref, w2_ref, b3_ref, o_ref,
                   hs_ref, *, K, pad, has_expand, fold_b3):
    """Processes Nb images per grid step.

    Channel dims are lane-padded and BN scales/biases are folded on the host:
      * x carries an extra constant-1 channel so w1's last row is the b1 bias.
      * b2 initializes the depthwise accumulator.
      * when Cmid < Cmid_p, lane `Cmid` of the accumulator is forced to 1.0 and
        row `Cmid` of w2 holds b3, so the point_linear bias rides the matmul.
    """
    Nb, H, W, Cx = x_ref.shape
    Cmid_p = hs_ref.shape[-1]
    Cout = o_ref.shape[-1]

    # ---- stage 1: 1x1 expand (BN scale + bias folded) + ReLU6 ---------------
    if has_expand:
        xf = x_ref[...].astype(jnp.float32).reshape(Nb * H * W, Cx)
        h = jnp.dot(xf, w1_ref[...], preferred_element_type=jnp.float32)
        h = jnp.clip(h, 0.0, 6.0).reshape(Nb, H, W, Cmid_p)
    else:
        # expand_ratio == 1: no inverted_bottleneck; x was zero-padded to
        # Cmid_p lanes on the host (explicit zeros, not scratch garbage).
        h = x_ref[...].astype(jnp.float32)

    # ---- stage 2 prep: K width-shifted, edge-masked copies of h -------------
    # W shifts go through the XLU (pltpu.roll) instead of a zero-padded halo
    # scratch: no misaligned window copies and no per-step border zeroing.
    # Copy kx occupies rows [kx*H, (kx+1)*H) of hs_ref (fully overwritten each
    # step, so no dependence on scratch initialization).
    col = jax.lax.broadcasted_iota(jnp.int32, (1, 1, W, Cmid_p), 2)
    for kx in range(K):
        dx = kx - pad
        if dx == 0:
            sh = h
        else:
            sh = pltpu.roll(h, shift=(-dx) % W, axis=2)     # sh[..,c,:]=h[..,c+dx,:]
            valid = jnp.logical_and(col + dx >= 0, col + dx < W)
            sh = jnp.where(valid, sh, 0.0)                  # same-padding zeros
        hs_ref[:, kx * H:(kx + 1) * H, :, :] = sh

    # ---- stages 2+3: per-row depthwise conv (vreg-resident accumulator,
    #      bias-initialised, all K*K taps before any store) + ReLU6, then the
    #      1x1 point_linear matmul and the (unpadded) output store. -----------
    dwv = dw_ref[...]                                        # (K*K, Cmid_p)
    taps = [dwv[i:i + 1, :].reshape(1, 1, 1, Cmid_p) for i in range(K * K)]
    acc0 = jnp.broadcast_to(b2_ref[...].reshape(1, 1, 1, Cmid_p),
                            (Nb, 1, W, Cmid_p))              # hoisted broadcast
    w2v = w2_ref[...]                                        # (Cmid_p, Cout)
    b3v = None
    if not fold_b3:
        b3v = b3_ref[...]                                    # (1, Cout)

    for r in range(H):                                       # stride 1 => Ho == H
        acc = acc0
        for ky in range(K):
            rin = r + ky - pad
            if 0 <= rin < H:                                 # H-halo taps skipped
                for kx in range(K):
                    row = hs_ref[:, kx * H + rin:kx * H + rin + 1, :, :]
                    acc = acc + row * taps[ky * K + kx]
        acc = jnp.clip(acc, 0.0, 6.0)                        # ReLU6 (b2 in init)
        y = jnp.dot(acc.reshape(Nb * W, Cmid_p), w2v,
                    preferred_element_type=jnp.float32)      # point_linear
        if b3v is not None:
            y = y + b3v
        o_ref[:, r:r + 1, :, :] = y.reshape(Nb, 1, W, Cout)


def mbconv_forward(x_nhwc, w1, s1, b1, dw, s2, b2, w2, s3, b3, *,
                   kernel_size=3, stride=1, expand_ratio=6, batch_block=None):
    assert stride == 1, "TODO(synk): stride > 1 not implemented in the kernel"
    N, H, W, Cin = x_nhwc.shape
    Cmid = dw.shape[1]
    Cout = w2.shape[1]
    K = kernel_size
    pad = K // 2                         # get_same_padding(kernel_size)
    has_expand = expand_ratio != 1
    if not has_expand:
        assert Cmid == Cin, "expand_ratio == 1 requires feature_dim == in_channels"

    Cmid_p = _round_up(Cmid, _LANE)
    fold_b3 = Cmid < Cmid_p              # spare lane available for the b3 fold

    # ---- host-side constant folding: BN scales / biases into the weights ----
    def pad_last(a, n):
        return jnp.pad(a, [(0, 0)] * (a.ndim - 1) + [(0, n - a.shape[-1])])

    if has_expand:
        # b1 folded as an extra weight row fed by a host-appended ones channel.
        w1f = pad_last(jnp.concatenate([w1 * s1, b1], axis=0), Cmid_p)  # (Cin+1, Cmid_p)
        x_in = jnp.concatenate(
            [x_nhwc, jnp.ones((N, H, W, 1), x_nhwc.dtype)], axis=-1)    # (N,H,W,Cin+1)
    else:
        w1f = jnp.zeros((1, Cmid_p), jnp.float32)                       # unused
        x_in = pad_last(x_nhwc, Cmid_p)     # explicit zero lane padding (bug fix)

    dwf = pad_last(dw * s2, Cmid_p)                                     # (K*K, Cmid_p)
    b2f = pad_last(b2, Cmid_p)                                          # (1, Cmid_p)
    w2f = jnp.pad(w2 * s3, ((0, Cmid_p - Cmid), (0, 0)))                # (Cmid_p, Cout)
    if fold_b3:
        b2f = b2f.at[0, Cmid].set(1.0)       # constant-1 rides through ReLU6
        w2f = w2f.at[Cmid, :].set(b3[0])     # ... and selects the b3 row
        b3f = jnp.zeros_like(b3)
    else:
        b3f = b3
    Cx = x_in.shape[-1]

    # ---- explicit per-step VMEM accounting & batch tile selection -----------
    def vmem_bytes(nb):
        x_blk = 2 * nb * H * W * Cx * _F32                    # double-buffered
        o_blk = 2 * nb * H * W * Cout * _F32                  # double-buffered
        wts = 2 * int(w1f.size + dwf.size + b2f.size + w2f.size + b3f.size) * _F32
        hs = nb * K * H * W * Cmid_p * _F32                   # shifted-copy scratch
        tmp = 2 * nb * H * W * Cmid_p * _F32                  # expand result + roll temps
        return x_blk + o_blk + wts + hs + tmp

    if batch_block is None:
        # Largest divisor of N (<= 8 images) that fits the VMEM budget,
        # preferring an even number of grid steps (v7x has 2 TensorCores) and
        # >= 2 steps.  NOTE: prime N > 8 falls back to Nb = 1 (correct, just
        # more per-step overhead).
        cands = [d for d in range(1, min(N, 8) + 1)
                 if N % d == 0 and vmem_bytes(d) <= _VMEM_BUDGET]
        if not cands:
            cands = [1]

        def score(d):
            steps = N // d
            return (steps >= 2 and steps % 2 == 0, steps >= 2, d)

        batch_block = max(cands, key=score)
    Nb = batch_block
    assert N % Nb == 0, "batch_block must divide the batch size"

    kernel = functools.partial(_mbconv_kernel, K=K, pad=pad,
                               has_expand=has_expand, fold_b3=fold_b3)

    flops = 2 * N * H * W * Cmid * (K * K + Cout)
    if has_expand:
        flops += 2 * N * H * W * Cx * Cmid
    bytes_accessed = _F32 * int(x_in.size + w1f.size + dwf.size + b2f.size +
                                w2f.size + b3f.size + N * H * W * Cout)

    return pl.pallas_call(
        kernel,
        out_shape=jax.ShapeDtypeStruct((N, H, W, Cout), jnp.float32),
        grid_spec=pltpu.PrefetchScalarGridSpec(
            num_scalar_prefetch=0,
            grid=(N // Nb,),
            in_specs=[
                pl.BlockSpec((Nb, H, W, Cx), lambda n: (n, 0, 0, 0)),
                pl.BlockSpec(w1f.shape, lambda n: (0, 0)),
                pl.BlockSpec(dwf.shape, lambda n: (0, 0)),
                pl.BlockSpec(b2f.shape, lambda n: (0, 0)),
                pl.BlockSpec(w2f.shape, lambda n: (0, 0)),
                pl.BlockSpec(b3f.shape, lambda n: (0, 0)),
            ],
            out_specs=pl.BlockSpec((Nb, H, W, Cout), lambda n: (n, 0, 0, 0)),
            scratch_shapes=[
                # K width-shifted copies of the expanded activation, stacked
                # along the row axis (copy kx lives in rows [kx*H, (kx+1)*H)).
                pltpu.VMEM((Nb, K * H, W, Cmid_p), jnp.float32),
            ],
        ),
        compiler_params=pltpu.CompilerParams(
            dimension_semantics=("parallel",),
            vmem_limit_bytes=_VMEM_LIMIT),
        cost_estimate=pl.CostEstimate(flops=flops, transcendentals=0,
                                      bytes_accessed=bytes_accessed),
    )(x_in, w1f, dwf, b2f, w2f, b3f)


def _mbconv_ref(x_nhwc, w1, s1, b1, dw, s2, b2, w2, s3, b3, K, pad):
    """Pure-JAX reference (NHWC), same eval-mode BN folding."""
    Cmid = dw.shape[1]
    h = jnp.einsum('nhwc,cm->nhwm', x_nhwc, w1)
    h = jnp.clip(h * s1[0] + b1[0], 0.0, 6.0)
    dw4 = dw.reshape(K, K, 1, Cmid)                    # HWIO, depthwise
    y = jax.lax.conv_general_dilated(
        h, dw4, window_strides=(1, 1),
        padding=((pad, pad), (pad, pad)),
        dimension_numbers=('NHWC', 'HWIO', 'NHWC'),
        feature_group_count=Cmid)
    y = jnp.clip(y * s2[0] + b2[0], 0.0, 6.0)
    z = jnp.einsum('nhwc,co->nhwo', y, w2)
    return z * s3[0] + b3[0]


def _fold_bn(kg, kb, km, kv, C, eps=1e-5):
    """Deterministic eval-mode BatchNorm params folded to (scale, bias)."""
    gamma = 1.0 + 0.1 * jax.random.normal(kg, (C,), jnp.float32)
    beta = 0.1 * jax.random.normal(kb, (C,), jnp.float32)
    mean = 0.1 * jax.random.normal(km, (C,), jnp.float32)
    var = jnp.abs(jax.random.normal(kv, (C,), jnp.float32)) + 0.5
    scale = gamma * jax.lax.rsqrt(var + eps)
    bias = beta - mean * scale
    return scale.reshape(1, C), bias.reshape(1, C)


if __name__ == "__main__":
    # Module config: MBConvLayer(in_channels=4, out_channels=8, kernel_size=3,
    #                            stride=1, expand_ratio=6)  -> feature_dim=24
    N, Cin, H, W = 4, 4, 16, 16
    Cout, K, expand_ratio = 8, 3, 6
    Cmid = round(Cin * expand_ratio)
    pad = K // 2

    key = jax.random.PRNGKey(0)
    ks = jax.random.split(key, 16)

    # deterministic synthetic weights (not a checkpoint)
    w1 = 0.1 * jax.random.normal(ks[0], (Cin, Cmid), jnp.float32)    # 1x1 expand
    dw = 0.1 * jax.random.normal(ks[1], (K * K, Cmid), jnp.float32)  # depthwise taps
    w2 = 0.1 * jax.random.normal(ks[2], (Cmid, Cout), jnp.float32)   # 1x1 project
    s1, b1 = _fold_bn(ks[3], ks[4], ks[5], ks[6], Cmid)
    s2, b2 = _fold_bn(ks[7], ks[8], ks[9], ks[10], Cmid)
    s3, b3 = _fold_bn(ks[11], ks[12], ks[13], ks[14], Cout)

    # input in PyTorch NCHW convention, converted to NHWC for the kernel
    x_nchw = jax.random.normal(ks[15], (N, Cin, H, W), jnp.float32)
    x_nhwc = jnp.transpose(x_nchw, (0, 2, 3, 1))

    out = mbconv_forward(x_nhwc, w1, s1, b1, dw, s2, b2, w2, s3, b3,
                         kernel_size=K, stride=1, expand_ratio=expand_ratio)
    out = jax.block_until_ready(out)

    ref = _mbconv_ref(x_nhwc, w1, s1, b1, dw, s2, b2, w2, s3, b3, K, pad)
    assert out.shape == (N, H, W, Cout), out.shape
    max_err = float(jnp.max(jnp.abs(out - ref)))
    assert jnp.allclose(out, ref, atol=1e-3, rtol=1e-3), (
        f"mismatch vs JAX reference (max abs err {max_err})")

    print("KERNEL_OK")
</pallas_src>

<mosaic_0001>
module attributes {stable_mosaic.version = 11 : i64} {
  func.func @_mbconv_kernel(%arg0: i32, %arg1: memref<2x16x16x5xf32, #tpu.memory_space<vmem>>, %arg2: memref<5x128xf32, #tpu.memory_space<vmem>>, %arg3: memref<9x128xf32, #tpu.memory_space<vmem>>, %arg4: memref<1x128xf32, #tpu.memory_space<vmem>>, %arg5: memref<128x8xf32, #tpu.memory_space<vmem>>, %arg6: memref<1x8xf32, #tpu.memory_space<vmem>>, %arg7: memref<2x16x16x8xf32, #tpu.memory_space<vmem>>, %arg8: memref<2x48x16x128xf32, #tpu.memory_space<vmem>>) attributes {dimension_semantics = [#tpu.dimension_semantics<parallel>], iteration_bounds = array<i64: 2>, scalar_prefetch = 0 : i64, scratch_operands = 1 : i64, tpu.core_type = #tpu.core_type<tc>, window_params = [{transform_indices = @transform_0, window_bounds = array<i64: 2, 16, 16, 5>}, {pipeline_mode = #tpu.pipeline_mode<synchronous>, transform_indices = @transform_1, window_bounds = array<i64: 5, 128>}, {pipeline_mode = #tpu.pipeline_mode<synchronous>, transform_indices = @transform_2, window_bounds = array<i64: 9, 128>}, {pipeline_mode = #tpu.pipeline_mode<synchronous>, transform_indices = @transform_3, window_bounds = array<i64: 1, 128>}, {pipeline_mode = #tpu.pipeline_mode<synchronous>, transform_indices = @transform_4, window_bounds = array<i64: 128, 8>}, {pipeline_mode = #tpu.pipeline_mode<synchronous>, transform_indices = @transform_5, window_bounds = array<i64: 1, 8>}, {transform_indices = @transform_6, window_bounds = array<i64: 2, 16, 16, 8>}]} {
    %c0 = arith.constant 0 : index
    %c0_0 = arith.constant 0 : index
    %c0_1 = arith.constant 0 : index
    %c0_2 = arith.constant 0 : index
    %0 = vector.load %arg1[%c0, %c0_0, %c0_1, %c0_2] : memref<2x16x16x5xf32, #tpu.memory_space<vmem>>, vector<2x16x16x5xf32>
    %1 = vector.shape_cast %0 : vector<2x16x16x5xf32> to vector<512x5xf32>
    %c0_3 = arith.constant 0 : index
    %c0_4 = arith.constant 0 : index
    %2 = vector.load %arg2[%c0_3, %c0_4] : memref<5x128xf32, #tpu.memory_space<vmem>>, vector<5x128xf32>
    %cst = arith.constant dense<0.000000e+00> : vector<512x128xf32>
    %3 = tpu.matmul %1, %2, %cst {dimension_numbers = #tpu.dot_dimension_numbers<[1], [0], [0], [1], [0, 0, 1, 1], [], []>} : vector<512x5xf32>, vector<5x128xf32>, vector<512x128xf32> -> vector<512x128xf32>
    %cst_5 = arith.constant 0.000000e+00 : f32
    %cst_6 = arith.constant 6.000000e+00 : f32
    %4 = vector.broadcast %cst_5 : f32 to vector<512x128xf32>
    %5 = arith.maximumf %4, %3 : vector<512x128xf32>
    %6 = vector.broadcast %cst_6 : f32 to vector<512x128xf32>
    %7 = arith.minimumf %6, %5 : vector<512x128xf32>
    %8 = vector.shape_cast %7 : vector<512x128xf32> to vector<2x16x16x128xf32>
    %9 = tpu.iota {dimensions = array<i32: 2>} : vector<1x1x16x128xi32>
    %c1_i32 = arith.constant 1 : i32
    %10 = tpu.dynamic_rotate %8 by %c1_i32 dim 2 : vector<2x16x16x128xf32>, i32 -> vector<2x16x16x128xf32>
    %c-1_i32 = arith.constant -1 : i32
    %11 = vector.broadcast %c-1_i32 : i32 to vector<1x1x16x128xi32>
    %12 = arith.addi %9, %11 : vector<1x1x16x128xi32>
    %c0_i32 = arith.constant 0 : i32
    %13 = vector.broadcast %c0_i32 : i32 to vector<1x1x16x128xi32>
    %14 = arith.cmpi sge, %12, %13 : vector<1x1x16x128xi32>
    %c-1_i32_7 = arith.constant -1 : i32
    %15 = vector.broadcast %c-1_i32_7 : i32 to vector<1x1x16x128xi32>
    %16 = arith.addi %9, %15 : vector<1x1x16x128xi32>
    %c16_i32 = arith.constant 16 : i32
    %17 = vector.broadcast %c16_i32 : i32 to vector<1x1x16x128xi32>
    %18 = arith.cmpi slt, %16, %17 : vector<1x1x16x128xi32>
    %19 = arith.andi %14, %18 : vector<1x1x16x128xi1>
    %cst_8 = arith.constant 0.000000e+00 : f32
    %20 = vector.shape_cast %19 : vector<1x1x16x128xi1> to vector<1x1x16x128xi1>
    %21 = vector.broadcast %20 : vector<1x1x16x128xi1> to vector<2x16x16x128xi1>
    %22 = vector.broadcast %cst_8 : f32 to vector<2x16x16x128xf32>
    %23 = arith.select %21, %10, %22 : vector<2x16x16x128xi1>, vector<2x16x16x128xf32>
    %c0_9 = arith.constant 0 : index
    %c0_10 = arith.constant 0 : index
    %c0_11 = arith.constant 0 : index
    %c0_12 = arith.constant 0 : index
    %24 = vector.load %arg8[%c0_9, %c0_10, %c0_11, %c0_12] : memref<2x48x16x128xf32, #tpu.memory_space<vmem>>, vector<2x16x16x128xf32>
    tpu.vector_store %arg8[%c0_9, %c0_10, %c0_11, %c0_12], %23 {strides = array<i32>} : memref<2x48x16x128xf32, #tpu.memory_space<vmem>>, vector<2x16x16x128xf32>,
    %c0_13 = arith.constant 0 : index
    %c16 = arith.constant 16 : index
    %c0_14 = arith.constant 0 : index
    %c0_15 = arith.constant 0 : index
    %25 = vector.load %arg8[%c0_13, %c16, %c0_14, %c0_15] : memref<2x48x16x128xf32, #tpu.memory_space<vmem>>, vector<2x16x16x128xf32>
    tpu.vector_store %arg8[%c0_13, %c16, %c0_14, %c0_15], %8 {strides = array<i32>} : memref<2x48x16x128xf32, #tpu.memory_space<vmem>>, vector<2x16x16x128xf32>,
    %c15_i32 = arith.constant 15 : i32
    %26 = tpu.dynamic_rotate %8 by %c15_i32 dim 2 : vector<2x16x16x128xf32>, i32 -> vector<2x16x16x128xf32>
    %c1_i32_16 = arith.constant 1 : i32
    %27 = vector.broadcast %c1_i32_16 : i32 to vector<1x1x16x128xi32>
    %28 = arith.addi %9, %27 : vector<1x1x16x128xi32>
    %c0_i32_17 = arith.constant 0 : i32
    %29 = vector.broadcast %c0_i32_17 : i32 to vector<1x1x16x128xi32>
    %30 = arith.cmpi sge, %28, %29 : vector<1x1x16x128xi32>
    %c1_i32_18 = arith.constant 1 : i32
    %31 = vector.broadcast %c1_i32_18 : i32 to vector<1x1x16x128xi32>
    %32 = arith.addi %9, %31 : vector<1x1x16x128xi32>
    %c16_i32_19 = arith.constant 16 : i32
    %33 = vector.broadcast %c16_i32_19 : i32 to vector<1x1x16x128xi32>
    %34 = arith.cmpi slt, %32, %33 : vector<1x1x16x128xi32>
    %35 = arith.andi %30, %34 : vector<1x1x16x128xi1>
    %cst_20 = arith.constant 0.000000e+00 : f32
    %36 = vector.shape_cast %35 : vector<1x1x16x128xi1> to vector<1x1x16x128xi1>
    %37 = vector.broadcast %36 : vector<1x1x16x128xi1> to vector<2x16x16x128xi1>
    %38 = vector.broadcast %cst_20 : f32 to vector<2x16x16x128xf32>
    %39 = arith.select %37, %26, %38 : vector<2x16x16x128xi1>, vector<2x16x16x128xf32>
    %c0_21 = arith.constant 0 : index
    %c32 = arith.constant 32 : index
    %c0_22 = arith.constant 0 : index
    %c0_23 = arith.constant 0 : index
    %40 = vector.load %arg8[%c0_21, %c32, %c0_22, %c0_23] : memref<2x48x16x128xf32, #tpu.memory_space<vmem>>, vector<2x16x16x128xf32>
    tpu.vector_store %arg8[%c0_21, %c32, %c0_22, %c0_23], %39 {strides = array<i32>} : memref<2x48x16x128xf32, #tpu.memory_space<vmem>>, vector<2x16x16x128xf32>,
    %c0_24 = arith.constant 0 : index
    %c0_25 = arith.constant 0 : index
    %41 = vector.load %arg3[%c0_24, %c0_25] : memref<9x128xf32, #tpu.memory_space<vmem>>, vector<9x128xf32>
    %42 = vector.extract_strided_slice %41 {offsets = [0, 0], sizes = [1, 128], strides = [1, 1]} : vector<9x128xf32> to vector<1x128xf32>
    %43 = vector.shape_cast %42 : vector<1x128xf32> to vector<1x1x1x128xf32>
    %44 = vector.extract_strided_slice %41 {offsets = [1, 0], sizes = [1, 128], strides = [1, 1]} : vector<9x128xf32> to vector<1x128xf32>
    %45 = vector.shape_cast %44 : vector<1x128xf32> to vector<1x1x1x128xf32>
    %46 = vector.extract_strided_slice %41 {offsets = [2, 0], sizes = [1, 128], strides = [1, 1]} : vector<9x128xf32> to vector<1x128xf32>
    %47 = vector.shape_cast %46 : vector<1x128xf32> to vector<1x1x1x128xf32>
    %48 = vector.extract_strided_slice %41 {offsets = [3, 0], sizes = [1, 128], strides = [1, 1]} : vector<9x128xf32> to vector<1x128xf32>
    %49 = vector.shape_cast %48 : vector<1x128xf32> to vector<1x1x1x128xf32>
    %50 = vector.extract_strided_slice %41 {offsets = [4, 0], sizes = [1, 128], strides = [1, 1]} : vector<9x128xf32> to vector<1x128xf32>
    %51 = vector.shape_cast %50 : vector<1x128xf32> to vector<1x1x1x128xf32>
    %52 = vector.extract_strided_slice %41 {offsets = [5, 0], sizes = [1, 128], strides = [1, 1]} : vector<9x128xf32> to vector<1x128xf32>
    %53 = vector.shape_cast %52 : vector<1x128xf32> to vector<1x1x1x128xf32>
    %54 = vector.extract_strided_slice %41 {offsets = [6, 0], sizes = [1, 128], strides = [1, 1]} : vector<9x128xf32> to vector<1x128xf32>
    %55 = vector.shape_cast %54 : vector<1x128xf32> to vector<1x1x1x128xf32>
    %56 = vector.extract_strided_slice %41 {offsets = [7, 0], sizes = [1, 128], strides = [1, 1]} : vector<9x128xf32> to vector<1x128xf32>
    %57 = vector.shape_cast %56 : vector<1x128xf32> to vector<1x1x1x128xf32>
    %58 = vector.extract_strided_slice %41 {offsets = [8, 0], sizes = [1, 128], strides = [1, 1]} : vector<9x128xf32> to vector<1x128xf32>
    %59 = vector.shape_cast %58 : vector<1x128xf32> to vector<1x1x1x128xf32>
    %c0_26 = arith.constant 0 : index
    %c0_27 = arith.constant 0 : index
    %60 = vector.load %arg4[%c0_26, %c0_27] : memref<1x128xf32, #tpu.memory_space<vmem>>, vector<1x128xf32>
    %61 = vector.shape_cast %60 : vector<1x128xf32> to vector<1x1x1x128xf32>
    %62 = vector.shape_cast %61 : vector<1x1x1x128xf32> to vector<1x1x1x128xf32>
    %63 = vector.broadcast %62 : vector<1x1x1x128xf32> to vector<2x1x16x128xf32>
    %c0_28 = arith.constant 0 : index
    %c0_29 = arith.constant 0 : index
    %64 = vector.load %arg5[%c0_28, %c0_29] : memref<128x8xf32, #tpu.memory_space<vmem>>, vector<128x8xf32>
    %c0_30 = arith.constant 0 : index
    %c0_31 = arith.constant 0 : index
    %c0_32 = arith.constant 0 : index
    %c0_33 = arith.constant 0 : index
    %65 = vector.load %arg8[%c0_30, %c0_31, %c0_32, %c0_33] : memref<2x48x16x128xf32, #tpu.memory_space<vmem>>, vector<2x1x16x128xf32>
    %66 = vector.broadcast %49 : vector<1x1x1x128xf32> to vector<2x1x16x128xf32>
    %67 = arith.mulf %65, %66 : vector<2x1x16x128xf32>
    %68 = arith.addf %63, %67 : vector<2x1x16x128xf32>
    %c0_34 = arith.constant 0 : index
    %c16_35 = arith.constant 16 : index
    %c0_36 = arith.constant 0 : index
    %c0_37 = arith.constant 0 : index
    %69 = vector.load %arg8[%c0_34, %c16_35, %c0_36, %c0_37] : memref<2x48x16x128xf32, #tpu.memory_space<vmem>>, vector<2x1x16x128xf32>
    %70 = vector.broadcast %51 : vector<1x1x1x128xf32> to vector<2x1x16x128xf32>
    %71 = arith.mulf %69, %70 : vector<2x1x16x128xf32>
    %72 = arith.addf %68, %71 : vector<2x1x16x128xf32>
    %c0_38 = arith.constant 0 : index
    %c32_39 = arith.constant 32 : index
    %c0_40 = arith.constant 0 : index
    %c0_41 = arith.constant 0 : index
    %73 = vector.load %arg8[%c0_38, %c32_39, %c0_40, %c0_41] : memref<2x48x16x128xf32, #tpu.memory_space<vmem>>, vector<2x1x16x128xf32>
    %74 = vector.broadcast %53 : vector<1x1x1x128xf32> to vector<2x1x16x128xf32>
    %75 = arith.mulf %73, %74 : vector<2x1x16x128xf32>
    %76 = arith.addf %72, %75 : vector<2x1x16x128xf32>
    %c0_42 = arith.constant 0 : index
    %c1 = arith.constant 1 : index
    %c0_43 = arith.constant 0 : index
    %c0_44 = arith.constant 0 : index
    %77 = vector.load %arg8[%c0_42, %c1, %c0_43, %c0_44] : memref<2x48x16x128xf32, #tpu.memory_space<vmem>>, vector<2x1x16x128xf32>
    %78 = vector.broadcast %55 : vector<1x1x1x128xf32> to vector<2x1x16x128xf32>
    %79 = arith.mulf %77, %78 : vector<2x1x16x128xf32>
    %80 = arith.addf %76, %79 : vector<2x1x16x128xf32>
    %c0_45 = arith.constant 0 : index
    %c17 = arith.constant 17 : index
    %c0_46 = arith.constant 0 : index
    %c0_47 = arith.constant 0 : index
    %81 = vector.load %arg8[%c0_45, %c17, %c0_46, %c0_47] : memref<2x48x16x128xf32, #tpu.memory_space<vmem>>, vector<2x1x16x128xf32>
    %82 = vector.broadcast %57 : vector<1x1x1x128xf32> to vector<2x1x16x128xf32>
    %83 = arith.mulf %81, %82 : vector<2x1x16x128xf32>
    %84 = arith.addf %80, %83 : vector<2x1x16x128xf32>
    %c0_48 = arith.constant 0 : index
    %c33 = arith.constant 33 : index
    %c0_49 = arith.constant 0 : index
    %c0_50 = arith.constant 0 : index
    %85 = vector.load %arg8[%c0_48, %c33, %c0_49, %c0_50] : memref<2x48x16x128xf32, #tpu.memory_space<vmem>>, vector<2x1x16x128xf32>
    %86 = vector.broadcast %59 : vector<1x1x1x128xf32> to vector<2x1x16x128xf32>
    %87 = arith.mulf %85, %86 : vector<2x1x16x128xf32>
    %88 = arith.addf %84, %87 : vector<2x1x16x128xf32>
    %cst_51 = arith.constant 0.000000e+00 : f32
    %cst_52 = arith.constant 6.000000e+00 : f32
    %89 = vector.broadcast %cst_51 : f32 to vector<2x1x16x128xf32>
    %90 = arith.maximumf %89, %88 : vector<2x1x16x128xf32>
    %91 = vector.broadcast %cst_52 : f32 to vector<2x1x16x128xf32>
    %92 = arith.minimumf %91, %90 : vector<2x1x16x128xf32>
    %93 = vector.shape_cast %92 : vector<2x1x16x128xf32> to vector<32x128xf32>
    %cst_53 = arith.constant dense<0.000000e+00> : vector<32x8xf32>
    %94 = tpu.matmul %93, %64, %cst_53 {dimension_numbers = #tpu.dot_dimension_numbers<[1], [0], [0], [1], [0, 0, 1, 1], [], []>} : vector<32x128xf32>, vector<128x8xf32>, vector<32x8xf32> -> vector<32x8xf32>
    %95 = vector.shape_cast %94 : vector<32x8xf32> to vector<2x1x16x8xf32>
    %c0_54 = arith.constant 0 : index
    %c0_55 = arith.constant 0 : index
    %c0_56 = arith.constant 0 : index
    %c0_57 = arith.constant 0 : index
    %96 = vector.load %arg7[%c0_54, %c0_55, %c0_56, %c0_57] : memref<2x16x16x8xf32, #tpu.memory_space<vmem>>, vector<2x1x16x8xf32>
    tpu.vector_store %arg7[%c0_54, %c0_55, %c0_56, %c0_57], %95 {strides = array<i32>} : memref<2x16x16x8xf32, #tpu.memory_space<vmem>>, vector<2x1x16x8xf32>,
    %c0_58 = arith.constant 0 : index
    %c0_59 = arith.constant 0 : index
    %c0_60 = arith.constant 0 : index
    %c0_61 = arith.constant 0 : index
    %97 = vector.load %arg8[%c0_58, %c0_59, %c0_60, %c0_61] : memref<2x48x16x128xf32, #tpu.memory_space<vmem>>, vector<2x1x16x128xf32>
    %98 = vector.broadcast %43 : vector<1x1x1x128xf32> to vector<2x1x16x128xf32>
    %99 = arith.mulf %97, %98 : vector<2x1x16x128xf32>
    %100 = arith.addf %63, %99 : vector<2x1x16x128xf32>
    %c0_62 = arith.constant 0 : index
    %c16_63 = arith.constant 16 : index
    %c0_64 = arith.constant 0 : index
    %c0_65 = arith.constant 0 : index
    %101 = vector.load %arg8[%c0_62, %c16_63, %c0_64, %c0_65] : memref<2x48x16x128xf32, #tpu.memory_space<vmem>>, vector<2x1x16x128xf32>
    %102 = vector.broadcast %45 : vector<1x1x1x128xf32> to vector<2x1x16x128xf32>
    %103 = arith.mulf %101, %102 : vector<2x1x16x128xf32>
    %104 = arith.addf %100, %103 : vector<2x1x16x128xf32>
    %c0_66 = arith.constant 0 : index
    %c32_67 = arith.constant 32 : index
    %c0_68 = arith.constant 0 : index
    %c0_69 = arith.constant 0 : index
    %105 = vector.load %arg8[%c0_66, %c32_67, %c0_68, %c0_69] : memref<2x48x16x128xf32, #tpu.memory_space<vmem>>, vector<2x1x16x128xf32>
    %106 = vector.broadcast %47 : vector<1x1x1x128xf32> to vector<2x1x16x128xf32>
    %107 = arith.mulf %105, %106 : vector<2x1x16x128xf32>
    %108 = arith.addf %104, %107 : vector<2x1x16x128xf32>
    %c0_70 = arith.constant 0 : index
    %c1_71 = arith.constant 1 : index
    %c0_72 = arith.constant 0 : index
    %c0_73 = arith.constant 0 : index
    %109 = vector.load %arg8[%c0_70, %c1_71, %c0_72, %c0_73] : memref<2x48x16x128xf32, #tpu.memory_space<vmem>>, vector<2x1x16x128xf32>
    %110 = vector.broadcast %49 : vector<1x1x1x128xf32> to vector<2x1x16x128xf32>
    %111 = arith.mulf %109, %110 : vector<2x1x16x128xf32>
    %112 = arith.addf %108, %111 : vector<2x1x16x128xf32>
    %c0_74 = arith.constant 0 : index
    %c17_75 = arith.constant 17 : index
    %c0_76 = arith.constant 0 : index
    %c0_77 = arith.constant 0 : index
    %113 = vector.load %arg8[%c0_74, %c17_75, %c0_76, %c0_77] : memref<2x48x16x128xf32, #tpu.memory_space<vmem>>, vector<2x1x16x128xf32>
    %114 = vector.broadcast %51 : vector<1x1x1x128xf32> to vector<2x1x16x128xf32>
    %115 = arith.mulf %113, %114 : vector<2x1x16x128xf32>
    %116 = arith.addf %112, %115 : vector<2x1x16x128xf32>
    %c0_78 = arith.constant 0 : index
    %c33_79 = arith.constant 33 : index
    %c0_80 = arith.constant 0 : index
    %c0_81 = arith.constant 0 : index
    %117 = vector.load %arg8[%c0_78, %c33_79, %c0_80, %c0_81] : memref<2x48x16x128xf32, #tpu.memory_space<vmem>>, vector<2x1x16x128xf32>
    %118 = vector.broadcast %53 : vector<1x1x1x128xf32> to vector<2x1x16x128xf32>
    %119 = arith.mulf %117, %118 : vector<2x1x16x128xf32>
    %120 = arith.addf %116, %119 : vector<2x1x16x128xf32>
    %c0_82 = arith.constant 0 : index
    %c2 = arith.constant 2 : index
    %c0_83 = arith.constant 0 : index
    %c0_84 = arith.constant 0 : index
    %121 = vector.load %arg8[%c0_82, %c2, %c0_83, %c0_84] : memref<2x48x16x128xf32, #tpu.memory_space<vmem>>, vector<2x1x16x128xf32>
    %122 = vector.broadcast %55 : vector<1x1x1x128xf32> to vector<2x1x16x128xf32>
    %123 = arith.mulf %121, %122 : vector<2x1x16x128xf32>
    %124 = arith.addf %120, %123 : vector<2x1x16x128xf32>
    %c0_85 = arith.constant 0 : index
    %c18 = arith.constant 18 : index
    %c0_86 = arith.constant 0 : index
    %c0_87 = arith.constant 0 : index
    %125 = vector.load %arg8[%c0_85, %c18, %c0_86, %c0_87] : memref<2x48x16x128xf32, #tpu.memory_space<vmem>>, vector<2x1x16x128xf32>
    %126 = vector.broadcast %57 : vector<1x1x1x128xf32> to vector<2x1x16x128xf32>
    %127 = arith.mulf %125, %126 : vector<2x1x16x128xf32>
    %128 = arith.addf %124, %127 : vector<2x1x16x128xf32>
    %c0_88 = arith.constant 0 : index
    %c34 = arith.constant 34 : index
    %c0_89 = arith.constant 0 : index
    %c0_90 = arith.constant 0 : index
    %129 = vector.load %arg8[%c0_88, %c34, %c0_89, %c0_90] : memref<2x48x16x128xf32, #tpu.memory_space<vmem>>, vector<2x1x16x128xf32>
    %130 = vector.broadcast %59 : vector<1x1x1x128xf32> to vector<2x1x16x128xf32>
    %131 = arith.mulf %129, %130 : vector<2x1x16x128xf32>
    %132 = arith.addf %128, %131 : vector<2x1x16x128xf32>
    %cst_91 = arith.constant 0.000000e+00 : f32
    %cst_92 = arith.constant 6.000000e+00 : f32
    %133 = vector.broadcast %cst_91 : f32 to vector<2x1x16x128xf32>
    %134 = arith.maximumf %133, %132 : vector<2x1x16x128xf32>
    %135 = vector.broadcast %cst_92 : f32 to vector<2x1x16x128xf32>
    %136 = arith.minimumf %135, %134 : vector<2x1x16x128xf32>
    %137 = vector.shape_cast %136 : vector<2x1x16x128xf32> to vector<32x128xf32>
    %cst_93 = arith.constant dense<0.000000e+00> : vector<32x8xf32>
    %138 = tpu.matmul %137, %64, %cst_93 {dimension_numbers = #tpu.dot_dimension_numbers<[1], [0], [0], [1], [0, 0, 1, 1], [], []>} : vector<32x128xf32>, vector<128x8xf32>, vector<32x8xf32> -> vector<32x8xf32>
    %139 = vector.shape_cast %138 : vector<32x8xf32> to vector<2x1x16x8xf32>
    %c0_94 = arith.constant 0 : index
    %c1_95 = arith.constant 1 : index
    %c0_96 = arith.constant 0 : index
    %c0_97 = arith.constant 0 : index
    %140 = vector.load %arg7[%c0_94, %c1_95, %c0_96, %c0_97] : memref<2x16x16x8xf32, #tpu.memory_space<vmem>>, vector<2x1x16x8xf32>
    tpu.vector_store %arg7[%c0_94, %c1_95, %c0_96, %c0_97], %139 {strides = array<i32>} : memref<2x16x16x8xf32, #tpu.memory_space<vmem>>, vector<2x1x16x8xf32>,
    %c0_98 = arith.constant 0 : index
    %c1_99 = arith.constant 1 : index
    %c0_100 = arith.constant 0 : index
    %c0_101 = arith.constant 0 : index
    %141 = vector.load %arg8[%c0_98, %c1_99, %c0_100, %c0_101] : memref<2x48x16x128xf32, #tpu.memory_space<vmem>>, vector<2x1x16x128xf32>
    %142 = vector.broadcast %43 : vector<1x1x1x128xf32> to vector<2x1x16x128xf32>
    %143 = arith.mulf %141, %142 : vector<2x1x16x128xf32>
    %144 = arith.addf %63, %143 : vector<2x1x16x128xf32>
    %c0_102 = arith.constant 0 : index
    %c17_103 = arith.constant 17 : index
    %c0_104 = arith.constant 0 : index
    %c0_105 = arith.constant 0 : index
    %145 = vector.load %arg8[%c0_102, %c17_103, %c0_104, %c0_105] : memref<2x48x16x128xf32, #tpu.memory_space<vmem>>, vector<2x1x16x128xf32>
    %146 = vector.broadcast %45 : vector<1x1x1x128xf32> to vector<2x1x16x128xf32>
    %147 = arith.mulf %145, %146 : vector<2x1x16x128xf32>
    %148 = arith.addf %144, %147 : vector<2x1x16x128xf32>
    %c0_106 = arith.constant 0 : index
    %c33_107 = arith.constant 33 : index
    %c0_108 = arith.constant 0 : index
    %c0_109 = arith.constant 0 : index
    %149 = vector.load %arg8[%c0_106, %c33_107, %c0_108, %c0_109] : memref<2x48x16x128xf32, #tpu.memory_space<vmem>>, vector<2x1x16x128xf32>
    %150 = vector.broadcast %47 : vector<1x1x1x128xf32> to vector<2x1x16x128xf32>
    %151 = arith.mulf %149, %150 : vector<2x1x16x128xf32>
    %152 = arith.addf %148, %151 : vector<2x1x16x128xf32>
    %c0_110 = arith.constant 0 : index
    %c2_111 = arith.constant 2 : index
    %c0_112 = arith.constant 0 : index
    %c0_113 = arith.constant 0 : index
    %153 = vector.load %arg8[%c0_110, %c2_111, %c0_112, %c0_113] : memref<2x48x16x128xf32, #tpu.memory_space<vmem>>, vector<2x1x16x128xf32>
    %154 = vector.broadcast %49 : vector<1x1x1x128xf32> to vector<2x1x16x128xf32>
    %155 = arith.mulf %153, %154 : vector<2x1x16x128xf32>
    %156 = arith.addf %152, %155 : vector<2x1x16x128xf32>
    %c0_114 = arith.constant 0 : index
    %c18_115 = arith.constant 18 : index
    %c0_116 = arith.constant 0 : index
    %c0_117 = arith.constant 0 : index
    %157 = vector.load %arg8[%c0_114, %c18_115, %c0_116, %c0_117] : memref<2x48x16x128xf32, #tpu.memory_space<vmem>>, vector<2x1x16x128xf32>
    %158 = vector.broadcast %51 : vector<1x1x1x128xf32> to vector<2x1x16x128xf32>
    %159 = arith.mulf %157, %158 : vector<2x1x16x128xf32>
    %160 = arith.addf %156, %159 : vector<2x1x16x128xf32>
    %c0_118 = arith.constant 0 : index
    %c34_119 = arith.constant 34 : index
    %c0_120 = arith.constant 0 : index
    %c0_121 = arith.constant 0 : index
    %161 = vector.load %arg8[%c0_118, %c34_119, %c0_120, %c0_121] : memref<2x48x16x128xf32, #tpu.memory_space<vmem>>, vector<2x1x16x128xf32>
    %162 = vector.broadcast %53 : vector<1x1x1x128xf32> to vector<2x1x16x128xf32>
    %163 = arith.mulf %161, %162 : vector<2x1x16x128xf32>
    %164 = arith.addf %160, %163 : vector<2x1x16x128xf32>
    %c0_122 = arith.constant 0 : index
    %c3 = arith.constant 3 : index
    %c0_123 = arith.constant 0 : index
    %c0_124 = arith.constant 0 : index
    %165 = vector.load %arg8[%c0_122, %c3, %c0_123, %c0_124] : memref<2x48x16x128xf32, #tpu.memory_space<vmem>>, vector<2x1x16x128xf32>
    %166 = vector.broadcast %55 : vector<1x1x1x128xf32> to vector<2x1x16x128xf32>
    %167 = arith.mulf %165, %166 : vector<2x1x16x128xf32>
    %168 = arith.addf %164, %167 : vector<2x1x16x128xf32>
    %c0_125 = arith.constant 0 : index
    %c19 = arith.constant 19 : index
    %c0_126 = arith.constant 0 : index
    %c0_127 = arith.constant 0 : index
    %169 = vector.load %arg8[%c0_125, %c19, %c0_126, %c0_127] : memref<2x48x16x128xf32, #tpu.memory_space<vmem>>, vector<2x1x16x128xf32>
    %170 = vector.broadcast %57 : vector<1x1x1x128xf32> to vector<2x1x16x128xf32>
    %171 = arith.mulf %169, %170 : vector<2x1x16x128xf32>
    %172 = arith.addf %168, %171 : vector<2x1x16x128xf32>
    %c0_128 = arith.constant 0 : index
    %c35 = arith.constant 35 : index
    %c0_129 = arith.constant 0 : index
    %c0_130 = arith.constant 0 : index
    %173 = vector.load %arg8[%c0_128, %c35, %c0_129, %c0_130] : memref<2x48x16x128xf32, #tpu.memory_space<vmem>>, vector<2x1x16x128xf32>
    %174 = vector.broadcast %59 : vector<1x1x1x128xf32> to vector<2x1x16x128xf32>
    %175 = arith.mulf %173, %174 : vector<2x1x16x128xf32>
    %176 = arith.addf %172, %175 : vector<2x1x16x128xf32>
    %cst_131 = arith.constant 0.000000e+00 : f32
    %cst_132 = arith.constant 6.000000e+00 : f32
    %177 = vector.broadcast %cst_131 : f32 to vector<2x1x16x128xf32>
    %178 = arith.maximumf %177, %176 : vector<2x1x16x128xf32>
    %179 = vector.broadcast %cst_132 : f32 to vector<2x1x16x128xf32>
    %180 = arith.minimumf %179, %178 : vector<2x1x16x128xf32>
    %181 = vector.shape_cast %180 : vector<2x1x16x128xf32> to vector<32x128xf32>
    %cst_133 = arith.constant dense<0.000000e+00> : vector<32x8xf32>
    %182 = tpu.matmul %181, %64, %cst_133 {dimension_numbers = #tpu.dot_dimension_numbers<[1], [0], [0], [1], [0, 0, 1, 1], [], []>} : vector<32x128xf32>, vector<128x8xf32>, vector<32x8xf32> -> vector<32x8xf32>
    %183 = vector.shape_cast %182 : vector<32x8xf32> to vector<2x1x16x8xf32>
    %c0_134 = arith.constant 0 : index
    %c2_135 = arith.constant 2 : index
    %c0_136 = arith.constant 0 : index
    %c0_137 = arith.constant 0 : index
    %184 = vector.load %arg7[%c0_134, %c2_135, %c0_136, %c0_137] : memref<2x16x16x8xf32, #tpu.memory_space<vmem>>, vector<2x1x16x8xf32>
    tpu.vector_store %arg7[%c0_134, %c2_135, %c0_136, %c0_137], %183 {strides = array<i32>} : memref<2x16x16x8xf32, #tpu.memory_space<vmem>>, vector<2x1x16x8xf32>,
    %c0_138 = arith.constant 0 : index
    %c2_139 = arith.constant 2 : index
    %c0_140 = arith.constant 0 : index
    %c0_141 = arith.constant 0 : index
    %185 = vector.load %arg8[%c0_138, %c2_139, %c0_140, %c0_141] : memref<2x48x16x128xf32, #tpu.memory_space<vmem>>, vector<2x1x16x128xf32>
    %186 = vector.broadcast %43 : vector<1x1x1x128xf32> to vector<2x1x16x128xf32>
    %187 = arith.mulf %185, %186 : vector<2x1x16x128xf32>
    %188 = arith.addf %63, %187 : vector<2x1x16x128xf32>
    %c0_142 = arith.constant 0 : index
    %c18_143 = arith.constant 18 : index
    %c0_144 = arith.constant 0 : index
    %c0_145 = arith.constant 0 : index
    %189 = vector.load %arg8[%c0_142, %c18_143, %c0_144, %c0_145] : memref<2x48x16x128xf32, #tpu.memory_space<vmem>>, vector<2x1x16x128xf32>
    %190 = vector.broadcast %45 : vector<1x1x1x128xf32> to vector<2x1x16x128xf32>
    %191 = arith.mulf %189, %190 : vector<2x1x16x128xf32>
    %192 = arith.addf %188, %191 : vector<2x1x16x128xf32>
    %c0_146 = arith.constant 0 : index
    %c34_147 = arith.constant 34 : index
    %c0_148 = arith.constant 0 : index
    %c0_149 = arith.constant 0 : index
    %193 = vector.load %arg8[%c0_146, %c34_147, %c0_148, %c0_149] : memref<2x48x16x128xf32, #tpu.memory_space<vmem>>, vector<2x1x16x128xf32>
    %194 = vector.broadcast %47 : vector<1x1x1x128xf32> to vector<2x1x16x128xf32>
    %195 = arith.mulf %193, %194 : vector<2x1x16x128xf32>
    %196 = arith.addf %192, %195 : vector<2x1x16x128xf32>
    %c0_150 = arith.constant 0 : index
    %c3_151 = arith.constant 3 : index
    %c0_152 = arith.constant 0 : index
    %c0_153 = arith.constant 0 : index
    %197 = vector.load %arg8[%c0_150, %c3_151, %c0_152, %c0_153] : memref<2x48x16x128xf32, #tpu.memory_space<vmem>>, vector<2x1x16x128xf32>
    %198 = vector.broadcast %49 : vector<1x1x1x128xf32> to vector<2x1x16x128xf32>
    %199 = arith.mulf %197, %198 : vector<2x1x16x128xf32>
    %200 = arith.addf %196, %199 : vector<2x1x16x128xf32>
    %c0_154 = arith.constant 0 : index
    %c19_155 = arith.constant 19 : index
    %c0_156 = arith.constant 0 : index
    %c0_157 = arith.constant 0 : index
    %201 = vector.load %arg8[%c0_154, %c19_155, %c0_156, %c0_157] : memref<2x48x16x128xf32, #tpu.memory_space<vmem>>, vector<2x1x16x128xf32>
    %202 = vector.broadcast %51 : vector<1x1x1x128xf32> to vector<2x1x16x128xf32>
    %203 = arith.mulf %201, %202 : vector<2x1x16x128xf32>
    %204 = arith.addf %200, %203 : vector<2x1x16x128xf32>
    %c0_158 = arith.constant 0 : index
    %c35_159 = arith.constant 35 : index
    %c0_160 = arith.constant 0 : index
    %c0_161 = arith.constant 0 : index
    %205 = vector.load %arg8[%c0_158, %c35_159, %c0_160, %c0_161] : memref<2x48x16x128xf32, #tpu.memory_space<vmem>>, vector<2x1x16x128xf32>
    %206 = vector.broadcast %53 : vector<1x1x1x128xf32> to vector<2x1x16x128xf32>
    %207 = arith.mulf %205, %206 : vector<2x1x16x128xf32>
    %208 = arith.addf %204, %207 : vector<2x1x16x128xf32>
    %c0_162 = arith.constant 0 : index
    %c4 = arith.constant 4 : index
    %c0_163 = arith.constant 0 : index
    %c0_164 = arith.constant 0 : index
    %209 = vector.load %arg8[%c0_162, %c4, %c0_163, %c0_164] : memref<2x48x16x128xf32, #tpu.memory_space<vmem>>, vector<2x1x16x128xf32>
    %210 = vector.broadcast %55 : vector<1x1x1x128xf32> to vector<2x1x16x128xf32>
    %211 = arith.mulf %209, %210 : vector<2x1x16x128xf32>
    %212 = arith.addf %208, %211 : vector<2x1x16x128xf32>
    %c0_165 = arith.constant 0 : index
    %c20 = arith.constant 20 : index
    %c0_166 = arith.constant 0 : index
    %c0_167 = arith.constant 0 : index
    %213 = vector.load %arg8[%c0_165, %c20, %c0_166, %c0_167] : memref<2x48x16x128xf32, #tpu.memory_space<vmem>>, vector<2x1x16x128xf32>
    %214 = vector.broadcast %57 : vector<1x1x1x128xf32> to vector<2x1x16x128xf32>
    %215 = arith.mulf %213, %214 : vector<2x1x16x128xf32>
    %216 = arith.addf %212, %215 : vector<2x1x16x128xf32>
    %c0_168 = arith.constant 0 : index
    %c36 = arith.constant 36 : index
    %c0_169 = arith.constant 0 : index
    %c0_170 = arith.constant 0 : index
    %217 = vector.load %arg8[%c0_168, %c36, %c0_169, %c0_170] : memref<2x48x16x128xf32, #tpu.memory_space<vmem>>, vector<2x1x16x128xf32>
    %218 = vector.broadcast %59 : vector<1x1x1x128xf32> to vector<2x1x16x128xf32>
    %219 = arith.mulf %217, %218 : vector<2x1x16x128xf32>
    %220 = arith.addf %216, %219 : vector<2x1x16x128xf32>
    %cst_171 = arith.constant 0.000000e+00 : f32
    %cst_172 = arith.constant 6.000000e+00 : f32
    %221 = vector.broadcast %cst_171 : f32 to vector<2x1x16x128xf32>
    %222 = arith.maximumf %221, %220 : vector<2x1x16x128xf32>
    %223 = vector.broadcast %cst_172 : f32 to vector<2x1x16x128xf32>
    %224 = arith.minimumf %223, %222 : vector<2x1x16x128xf32>
    %225 = vector.shape_cast %224 : vector<2x1x16x128xf32> to vector<32x128xf32>
    %cst_173 = arith.constant dense<0.000000e+00> : vector<32x8xf32>
    %226 = tpu.matmul %225, %64, %cst_173 {dimension_numbers = #tpu.dot_dimension_numbers<[1], [0], [0], [1], [0, 0, 1, 1], [], []>} : vector<32x128xf32>, vector<128x8xf32>, vector<32x8xf32> -> vector<32x8xf32>
    %227 = vector.shape_cast %226 : vector<32x8xf32> to vector<2x1x16x8xf32>
    %c0_174 = arith.constant 0 : index
    %c3_175 = arith.constant 3 : index
    %c0_176 = arith.constant 0 : index
    %c0_177 = arith.constant 0 : index
    %228 = vector.load %arg7[%c0_174, %c3_175, %c0_176, %c0_177] : memref<2x16x16x8xf32, #tpu.memory_space<vmem>>, vector<2x1x16x8xf32>
    tpu.vector_store %arg7[%c0_174, %c3_175, %c0_176, %c0_177], %227 {strides = array<i32>} : memref<2x16x16x8xf32, #tpu.memory_space<vmem>>, vector<2x1x16x8xf32>,
    %c0_178 = arith.constant 0 : index
    %c3_179 = arith.constant 3 : index
    %c0_180 = arith.constant 0 : index
    %c0_181 = arith.constant 0 : index
    %229 = vector.load %arg8[%c0_178, %c3_179, %c0_180, %c0_181] : memref<2x48x16x128xf32, #tpu.memory_space<vmem>>, vector<2x1x16x128xf32>
    %230 = vector.broadcast %43 : vector<1x1x1x128xf32> to vector<2x1x16x128xf32>
    %231 = arith.mulf %229, %230 : vector<2x1x16x128xf32>
    %232 = arith.addf %63, %231 : vector<2x1x16x128xf32>
    %c0_182 = arith.constant 0 : index
    %c19_183 = arith.constant 19 : index
    %c0_184 = arith.constant 0 : index
    %c0_185 = arith.constant 0 : index
    %233 = vector.load %arg8[%c0_182, %c19_183, %c0_184, %c0_185] : memref<2x48x16x128xf32, #tpu.memory_space<vmem>>, vector<2x1x16x128xf32>
    %234 = vector.broadcast %45 : vector<1x1x1x128xf32> to vector<2x1x16x128xf32>
    %235 = arith.mulf %233, %234 : vector<2x1x16x128xf32>
    %236 = arith.addf %232, %235 : vector<2x1x16x128xf32>
    %c0_186 = arith.constant 0 : index
    %c35_187 = arith.constant 35 : index
    %c0_188 = arith.constant 0 : index
    %c0_189 = arith.constant 0 : index
    %237 = vector.load %arg8[%c0_186, %c35_187, %c0_188, %c0_189] : memref<2x48x16x128xf32, #tpu.memory_space<vmem>>, vector<2x1x16x128xf32>
    %238 = vector.broadcast %47 : vector<1x1x1x128xf32> to vector<2x1x16x128xf32>
    %239 = arith.mulf %237, %238 : vector<2x1x16x128xf32>
    %240 = arith.addf %236, %239 : vector<2x1x16x128xf32>
    %c0_190 = arith.constant 0 : index
    %c4_191 = arith.constant 4 : index
    %c0_192 = arith.constant 0 : index
    %c0_193 = arith.constant 0 : index
    %241 = vector.load %arg8[%c0_190, %c4_191, %c0_192, %c0_193] : memref<2x48x16x128xf32, #tpu.memory_space<vmem>>, vector<2x1x16x128xf32>
    %242 = vector.broadcast %49 : vector<1x1x1x128xf32> to vector<2x1x16x128xf32>
    %243 = arith.mulf %241, %242 : vector<2x1x16x128xf32>
    %244 = arith.addf %240, %243 : vector<2x1x16x128xf32>
    %c0_194 = arith.constant 0 : index
    %c20_195 = arith.constant 20 : index
    %c0_196 = arith.constant 0 : index
    %c0_197 = arith.constant 0 : index
    %245 = vector.load %arg8[%c0_194, %c20_195, %c0_196, %c0_197] : memref<2x48x16x128xf32, #tpu.memory_space<vmem>>, vector<2x1x16x128xf32>
    %246 = vector.broadcast %51 : vector<1x1x1x128xf32> to vector<2x1x16x128xf32>
    %247 = arith.mulf %245, %246 : vector<2x1x16x128xf32>
    %248 = arith.addf %244, %247 : vector<2x1x16x128xf32>
    %c0_198 = arith.constant 0 : index
    %c36_199 = arith.constant 36 : index
    %c0_200 = arith.constant 0 : index
    %c0_201 = arith.constant 0 : index
    %249 = vector.load %arg8[%c0_198, %c36_199, %c0_200, %c0_201] : memref<2x48x16x128xf32, #tpu.memory_space<vmem>>, vector<2x1x16x128xf32>
    %250 = vector.broadcast %53 : vector<1x1x1x128xf32> to vector<2x1x16x128xf32>
    %251 = arith.mulf %249, %250 : vector<2x1x16x128xf32>
    %252 = arith.addf %248, %251 : vector<2x1x16x128xf32>
    %c0_202 = arith.constant 0 : index
    %c5 = arith.constant 5 : index
    %c0_203 = arith.constant 0 : index
    %c0_204 = arith.constant 0 : index
    %253 = vector.load %arg8[%c0_202, %c5, %c0_203, %c0_204] : memref<2x48x16x128xf32, #tpu.memory_space<vmem>>, vector<2x1x16x128xf32>
    %254 = vector.broadcast %55 : vector<1x1x1x128xf32> to vector<2x1x16x128xf32>
    %255 = arith.mulf %253, %254 : vector<2x1x16x128xf32>
    %256 = arith.addf %252, %255 : vector<2x1x16x128xf32>
    %c0_205 = arith.constant 0 : index
    %c21 = arith.constant 21 : index
    %c0_206 = arith.constant 0 : index
    %c0_207 = arith.constant 0 : index
    %257 = vector.load %arg8[%c0_205, %c21, %c0_206, %c0_207] : memref<2x48x16x128xf32, #tpu.memory_space<vmem>>, vector<2x1x16x128xf32>
    %258 = vector.broadcast %57 : vector<1x1x1x128xf32> to vector<2x1x16x128xf32>
    %259 = arith.mulf %257, %258 : vector<2x1x16x128xf32>
    %260 = arith.addf %256, %259 : vector<2x1x16x128xf32>
    %c0_208 = arith.constant 0 : index
    %c37 = arith.constant 37 : index
    %c0_209 = arith.constant 0 : index
    %c0_210 = arith.constant 0 : index
    %261 = vector.load %arg8[%c0_208, %c37, %c0_209, %c0_210] : memref<2x48x16x128xf32, #tpu.memory_space<vmem>>, vector<2x1x16x128xf32>
    %262 = vector.broadcast %59 : vector<1x1x1x128xf32> to vector<2x1x16x128xf32>
    %263 = arith.mulf %261, %262 : vector<2x1x16x128xf32>
    %264 = arith.addf %260, %263 : vector<2x1x16x128xf32>
    %cst_211 = arith.constant 0.000000e+00 : f32
    %cst_212 = arith.constant 6.000000e+00 : f32
    %265 = vector.broadcast %cst_211 : f32 to vector<2x1x16x128xf32>
    %266 = arith.maximumf %265, %264 : vector<2x1x16x128xf32>
    %267 = vector.broadcast %cst_212 : f32 to vector<2x1x16x128xf32>
    %268 = arith.minimumf %267, %266 : vector<2x1x16x128xf32>
    %269 = vector.shape_cast %268 : vector<2x1x16x128xf32> to vector<32x128xf32>
    %cst_213 = arith.constant dense<0.000000e+00> : vector<32x8xf32>
    %270 = tpu.matmul %269, %64, %cst_213 {dimension_numbers = #tpu.dot_dimension_numbers<[1], [0], [0], [1], [0, 0, 1, 1], [], []>} : vector<32x128xf32>, vector<128x8xf32>, vector<32x8xf32> -> vector<32x8xf32>
    %271 = vector.shape_cast %270 : vector<32x8xf32> to vector<2x1x16x8xf32>
    %c0_214 = arith.constant 0 : index
    %c4_215 = arith.constant 4 : index
    %c0_216 = arith.constant 0 : index
    %c0_217 = arith.constant 0 : index
    %272 = vector.load %arg7[%c0_214, %c4_215, %c0_216, %c0_217] : memref<2x16x16x8xf32, #tpu.memory_space<vmem>>, vector<2x1x16x8xf32>
    tpu.vector_store %arg7[%c0_214, %c4_215, %c0_216, %c0_217], %271 {strides = array<i32>} : memref<2x16x16x8xf32, #tpu.memory_space<vmem>>, vector<2x1x16x8xf32>,
    %c0_218 = arith.constant 0 : index
    %c4_219 = arith.constant 4 : index
    %c0_220 = arith.constant 0 : index
    %c0_221 = arith.constant 0 : index
    %273 = vector.load %arg8[%c0_218, %c4_219, %c0_220, %c0_221] : memref<2x48x16x128xf32, #tpu.memory_space<vmem>>, vector<2x1x16x128xf32>
    %274 = vector.broadcast %43 : vector<1x1x1x128xf32> to vector<2x1x16x128xf32>
    %275 = arith.mulf %273, %274 : vector<2x1x16x128xf32>
    %276 = arith.addf %63, %275 : vector<2x1x16x128xf32>
    %c0_222 = arith.constant 0 : index
    %c20_223 = arith.constant 20 : index
    %c0_224 = arith.constant 0 : index
    %c0_225 = arith.constant 0 : index
    %277 = vector.load %arg8[%c0_222, %c20_223, %c0_224, %c0_225] : memref<2x48x16x128xf32, #tpu.memory_space<vmem>>, vector<2x1x16x128xf32>
    %278 = vector.broadcast %45 : vector<1x1x1x128xf32> to vector<2x1x16x128xf32>
    %279 = arith.mulf %277, %278 : vector<2x1x16x128xf32>
    %280 = arith.addf %276, %279 : vector<2x1x16x128xf32>
    %c0_226 = arith.constant 0 : index
    %c36_227 = arith.constant 36 : index
    %c0_228 = arith.constant 0 : index
    %c0_229 = arith.constant 0 : index
    %281 = vector.load %arg8[%c0_226, %c36_227, %c0_228, %c0_229] : memref<2x48x16x128xf32, #tpu.memory_space<vmem>>, vector<2x1x16x128xf32>
    %282 = vector.broadcast %47 : vector<1x1x1x128xf32> to vector<2x1x16x128xf32>
    %283 = arith.mulf %281, %282 : vector<2x1x16x128xf32>
    %284 = arith.addf %280, %283 : vector<2x1x16x128xf32>
    %c0_230 = arith.constant 0 : index
    %c5_231 = arith.constant 5 : index
    %c0_232 = arith.constant 0 : index
    %c0_233 = arith.constant 0 : index
    %285 = vector.load %arg8[%c0_230, %c5_231, %c0_232, %c0_233] : memref<2x48x16x128xf32, #tpu.memory_space<vmem>>, vector<2x1x16x128xf32>
    %286 = vector.broadcast %49 : vector<1x1x1x128xf32> to vector<2x1x16x128xf32>
    %287 = arith.mulf %285, %286 : vector<2x1x16x128xf32>
    %288 = arith.addf %284, %287 : vector<2x1x16x128xf32>
    %c0_234 = arith.constant 0 : index
    %c21_235 = arith.constant 21 : index
    %c0_236 = arith.constant 0 : index
    %c0_237 = arith.constant 0 : index
    %289 = vector.load %arg8[%c0_234, %c21_235, %c0_236, %c0_237] : memref<2x48x16x128xf32, #tpu.memory_space<vmem>>, vector<2x1x16x128xf32>
    %290 = vector.broadcast %51 : vector<1x1x1x128xf32> to vector<2x1x16x128xf32>
    %291 = arith.mulf %289, %290 : vector<2x1x16x128xf32>
    %292 = arith.addf %288, %291 : vector<2x1x16x128xf32>
    %c0_238 = arith.constant 0 : index
    %c37_239 = arith.constant 37 : index
    %c0_240 = arith.constant 0 : index
    %c0_241 = arith.constant 0 : index
    %293 = vector.load %arg8[%c0_238, %c37_239, %c0_240, %c0_241] : memref<2x48x16x128xf32, #tpu.memory_space<vmem>>, vector<2x1x16x128xf32>
    %294 = vector.broadcast %53 : vector<1x1x1x128xf32> to vector<2x1x16x128xf32>
    %295 = arith.mulf %293, %294 : vector<2x1x16x128xf32>
    %296 = arith.addf %292, %295 : vector<2x1x16x128xf32>
    %c0_242 = arith.constant 0 : index
    %c6 = arith.constant 6 : index
    %c0_243 = arith.constant 0 : index
    %c0_244 = arith.constant 0 : index
    %297 = vector.load %arg8[%c0_242, %c6, %c0_243, %c0_244] : memref<2x48x16x128xf32, #tpu.memory_space<vmem>>, vector<2x1x16x128xf32>
    %298 = vector.broadcast %55 : vector<1x1x1x128xf32> to vector<2x1x16x128xf32>
    %299 = arith.mulf %297, %298 : vector<2x1x16x128xf32>
    %300 = arith.addf %296, %299 : vector<2x1x16x128xf32>
    %c0_245 = arith.constant 0 : index
    %c22 = arith.constant 22 : index
    %c0_246 = arith.constant 0 : index
    %c0_247 = arith.constant 0 : index
    %301 = vector.load %arg8[%c0_245, %c22, %c0_246, %c0_247] : memref<2x48x16x128xf32, #tpu.memory_space<vmem>>, vector<2x1x16x128xf32>
    %302 = vector.broadcast %57 : vector<1x1x1x128xf32> to vector<2x1x16x128xf32>
    %303 = arith.mulf %301, %302 : vector<2x1x16x128xf32>
    %304 = arith.addf %300, %303 : vector<2x1x16x128xf32>
    %c0_248 = arith.constant 0 : index
    %c38 = arith.constant 38 : index
    %c0_249 = arith.constant 0 : index
    %c0_250 = arith.constant 0 : index
    %305 = vector.load %arg8[%c0_248, %c38, %c0_249, %c0_250] : memref<2x48x16x128xf32, #tpu.memory_space<vmem>>, vector<2x1x16x128xf32>
    %306 = vector.broadcast %59 : vector<1x1x1x128xf32> to vector<2x1x16x128xf32>
    %307 = arith.mulf %305, %306 : vector<2x1x16x128xf32>
    %308 = arith.addf %304, %307 : vector<2x1x16x128xf32>
    %cst_251 = arith.constant 0.000000e+00 : f32
    %cst_252 = arith.constant 6.000000e+00 : f32
    %309 = vector.broadcast %cst_251 : f32 to vector<2x1x16x128xf32>
    %310 = arith.maximumf %309, %308 : vector<2x1x16x128xf32>
    %311 = vector.broadcast %cst_252 : f32 to vector<2x1x16x128xf32>
    %312 = arith.minimumf %311, %310 : vector<2x1x16x128xf32>
    %313 = vector.shape_cast %312 : vector<2x1x16x128xf32> to vector<32x128xf32>
    %cst_253 = arith.constant dense<0.000000e+00> : vector<32x8xf32>
    %314 = tpu.matmul %313, %64, %cst_253 {dimension_numbers = #tpu.dot_dimension_numbers<[1], [0], [0], [1], [0, 0, 1, 1], [], []>} : vector<32x128xf32>, vector<128x8xf32>, vector<32x8xf32> -> vector<32x8xf32>
    %315 = vector.shape_cast %314 : vector<32x8xf32> to vector<2x1x16x8xf32>
    %c0_254 = arith.constant 0 : index
    %c5_255 = arith.constant 5 : index
    %c0_256 = arith.constant 0 : index
    %c0_257 = arith.constant 0 : index
    %316 = vector.load %arg7[%c0_254, %c5_255, %c0_256, %c0_257] : memref<2x16x16x8xf32, #tpu.memory_space<vmem>>, vector<2x1x16x8xf32>
    tpu.vector_store %arg7[%c0_254, %c5_255, %c0_256, %c0_257], %315 {strides = array<i32>} : memref<2x16x16x8xf32, #tpu.memory_space<vmem>>, vector<2x1x16x8xf32>,
    %c0_258 = arith.constant 0 : index
    %c5_259 = arith.constant 5 : index
    %c0_260 = arith.constant 0 : index
    %c0_261 = arith.constant 0 : index
    %317 = vector.load %arg8[%c0_258, %c5_259, %c0_260, %c0_261] : memref<2x48x16x128xf32, #tpu.memory_space<vmem>>, vector<2x1x16x128xf32>
    %318 = vector.broadcast %43 : vector<1x1x1x128xf32> to vector<2x1x16x128xf32>
    %319 = arith.mulf %317, %318 : vector<2x1x16x128xf32>
    %320 = arith.addf %63, %319 : vector<2x1x16x128xf32>
    %c0_262 = arith.constant 0 : index
    %c21_263 = arith.constant 21 : index
    %c0_264 = arith.constant 0 : index
    %c0_265 = arith.constant 0 : index
    %321 = vector.load %arg8[%c0_262, %c21_263, %c0_264, %c0_265] : memref<2x48x16x128xf32, #tpu.memory_space<vmem>>, vector<2x1x16x128xf32>
    %322 = vector.broadcast %45 : vector<1x1x1x128xf32> to vector<2x1x16x128xf32>
    %323 = arith.mulf %321, %322 : vector<2x1x16x128xf32>
    %324 = arith.addf %320, %323 : vector<2x1x16x128xf32>
    %c0_266 = arith.constant 0 : index
    %c37_267 = arith.constant 37 : index
    %c0_268 = arith.constant 0 : index
    %c0_269 = arith.constant 0 : index
    %325 = vector.load %arg8[%c0_266, %c37_267, %c0_268, %c0_269] : memref<2x48x16x128xf32, #tpu.memory_space<vmem>>, vector<2x1x16x128xf32>
    %326 = vector.broadcast %47 : vector<1x1x1x128xf32> to vector<2x1x16x128xf32>
    %327 = arith.mulf %325, %326 : vector<2x1x16x128xf32>
    %328 = arith.addf %324, %327 : vector<2x1x16x128xf32>
    %c0_270 = arith.constant 0 : index
    %c6_271 = arith.constant 6 : index
    %c0_272 = arith.constant 0 : index
    %c0_273 = arith.constant 0 : index
    %329 = vector.load %arg8[%c0_270, %c6_271, %c0_272, %c0_273] : memref<2x48x16x128xf32, #tpu.memory_space<vmem>>, vector<2x1x16x128xf32>
    %330 = vector.broadcast %49 : vector<1x1x1x128xf32> to vector<2x1x16x128xf32>
    %331 = arith.mulf %329, %330 : vector<2x1x16x128xf32>
    %332 = arith.addf %328, %331 : vector<2x1x16x128xf32>
    %c0_274 = arith.constant 0 : index
    %c22_275 = arith.constant 22 : index
    %c0_276 = arith.constant 0 : index
    %c0_277 = arith.constant 0 : index
    %333 = vector.load %arg8[%c0_274, %c22_275, %c0_276, %c0_277] : memref<2x48x16x128xf32, #tpu.memory_space<vmem>>, vector<2x1x16x128xf32>
    %334 = vector.broadcast %51 : vector<1x1x1x128xf32> to vector<2x1x16x128xf32>
    %335 = arith.mulf %333, %334 : vector<2x1x16x128xf32>
    %336 = arith.addf %332, %335 : vector<2x1x16x128xf32>
    %c0_278 = arith.constant 0 : index
    %c38_279 = arith.constant 38 : index
    %c0_280 = arith.constant 0 : index
    %c0_281 = arith.constant 0 : index
    %337 = vector.load %arg8[%c0_278, %c38_279, %c0_280, %c0_281] : memref<2x48x16x128xf32, #tpu.memory_space<vmem>>, vector<2x1x16x128xf32>
    %338 = vector.broadcast %53 : vector<1x1x1x128xf32> to vector<2x1x16x128xf32>
    %339 = arith.mulf %337, %338 : vector<2x1x16x128xf32>
    %340 = arith.addf %336, %339 : vector<2x1x16x128xf32>
    %c0_282 = arith.constant 0 : index
    %c7 = arith.constant 7 : index
    %c0_283 = arith.constant 0 : index
    %c0_284 = arith.constant 0 : index
    %341 = vector.load %arg8[%c0_282, %c7, %c0_283, %c0_284] : memref<2x48x16x128xf32, #tpu.memory_space<vmem>>, vector<2x1x16x128xf32>
    %342 = vector.broadcast %55 : vector<1x1x1x128xf32> to vector<2x1x16x128xf32>
    %343 = arith.mulf %341, %342 : vector<2x1x16x128xf32>
    %344 = arith.addf %340, %343 : vector<2x1x16x128xf32>
    %c0_285 = arith.constant 0 : index
    %c23 = arith.constant 23 : index
    %c0_286 = arith.constant 0 : index
    %c0_287 = arith.constant 0 : index
    %345 = vector.load %arg8[%c0_285, %c23, %c0_286, %c0_287] : memref<2x48x16x128xf32, #tpu.memory_space<vmem>>, vector<2x1x16x128xf32>
    %346 = vector.broadcast %57 : vector<1x1x1x128xf32> to vector<2x1x16x128xf32>
    %347 = arith.mulf %345, %346 : vector<2x1x16x128xf32>
    %348 = arith.addf %344, %347 : vector<2x1x16x128xf32>
    %c0_288 = arith.constant 0 : index
    %c39 = arith.constant 39 : index
    %c0_289 = arith.constant 0 : index
    %c0_290 = arith.constant 0 : index
    %349 = vector.load %arg8[%c0_288, %c39, %c0_289, %c0_290] : memref<2x48x16x128xf32, #tpu.memory_space<vmem>>, vector<2x1x16x128xf32>
    %350 = vector.broadcast %59 : vector<1x1x1x128xf32> to vector<2x1x16x128xf32>
    %351 = arith.mulf %349, %350 : vector<2x1x16x128xf32>
    %352 = arith.addf %348, %351 : vector<2x1x16x128xf32>
    %cst_291 = arith.constant 0.000000e+00 : f32
    %cst_292 = arith.constant 6.000000e+00 : f32
    %353 = vector.broadcast %cst_291 : f32 to vector<2x1x16x128xf32>
    %354 = arith.maximumf %353, %352 : vector<2x1x16x128xf32>
    %355 = vector.broadcast %cst_292 : f32 to vector<2x1x16x128xf32>
    %356 = arith.minimumf %355, %354 : vector<2x1x16x128xf32>
    %357 = vector.shape_cast %356 : vector<2x1x16x128xf32> to vector<32x128xf32>
    %cst_293 = arith.constant dense<0.000000e+00> : vector<32x8xf32>
    %358 = tpu.matmul %357, %64, %cst_293 {dimension_numbers = #tpu.dot_dimension_numbers<[1], [0], [0], [1], [0, 0, 1, 1], [], []>} : vector<32x128xf32>, vector<128x8xf32>, vector<32x8xf32> -> vector<32x8xf32>
    %359 = vector.shape_cast %358 : vector<32x8xf32> to vector<2x1x16x8xf32>
    %c0_294 = arith.constant 0 : index
    %c6_295 = arith.constant 6 : index
    %c0_296 = arith.constant 0 : index
    %c0_297 = arith.constant 0 : index
    %360 = vector.load %arg7[%c0_294, %c6_295, %c0_296, %c0_297] : memref<2x16x16x8xf32, #tpu.memory_space<vmem>>, vector<2x1x16x8xf32>
    tpu.vector_store %arg7[%c0_294, %c6_295, %c0_296, %c0_297], %359 {strides = array<i32>} : memref<2x16x16x8xf32, #tpu.memory_space<vmem>>, vector<2x1x16x8xf32>,
    %c0_298 = arith.constant 0 : index
    %c6_299 = arith.constant 6 : index
    %c0_300 = arith.constant 0 : index
    %c0_301 = arith.constant 0 : index
    %361 = vector.load %arg8[%c0_298, %c6_299, %c0_300, %c0_301] : memref<2x48x16x128xf32, #tpu.memory_space<vmem>>, vector<2x1x16x128xf32>
    %362 = vector.broadcast %43 : vector<1x1x1x128xf32> to vector<2x1x16x128xf32>
    %363 = arith.mulf %361, %362 : vector<2x1x16x128xf32>
    %364 = arith.addf %63, %363 : vector<2x1x16x128xf32>
    %c0_302 = arith.constant 0 : index
    %c22_303 = arith.constant 22 : index
    %c0_304 = arith.constant 0 : index
    %c0_305 = arith.constant 0 : index
    %365 = vector.load %arg8[%c0_302, %c22_303, %c0_304, %c0_305] : memref<2x48x16x128xf32, #tpu.memory_space<vmem>>, vector<2x1x16x128xf32>
    %366 = vector.broadcast %45 : vector<1x1x1x128xf32> to vector<2x1x16x128xf32>
    %367 = arith.mulf %365, %366 : vector<2x1x16x128xf32>
    %368 = arith.addf %364, %367 : vector<2x1x16x128xf32>
    %c0_306 = arith.constant 0 : index
    %c38_307 = arith.constant 38 : index
    %c0_308 = arith.constant 0 : index
    %c0_309 = arith.constant 0 : index
    %369 = vector.load %arg8[%c0_306, %c38_307, %c0_308, %c0_309] : memref<2x48x16x128xf32, #tpu.memory_space<vmem>>, vector<2x1x16x128xf32>
    %370 = vector.broadcast %47 : vector<1x1x1x128xf32> to vector<2x1x16x128xf32>
    %371 = arith.mulf %369, %370 : vector<2x1x16x128xf32>
    %372 = arith.addf %368, %371 : vector<2x1x16x128xf32>
    %c0_310 = arith.constant 0 : index
    %c7_311 = arith.constant 7 : index
    %c0_312 = arith.constant 0 : index
    %c0_313 = arith.constant 0 : index
    %373 = vector.load %arg8[%c0_310, %c7_311, %c0_312, %c0_313] : memref<2x48x16x128xf32, #tpu.memory_space<vmem>>, vector<2x1x16x128xf32>
    %374 = vector.broadcast %49 : vector<1x1x1x128xf32> to vector<2x1x16x128xf32>
    %375 = arith.mulf %373, %374 : vector<2x1x16x128xf32>
    %376 = arith.addf %372, %375 : vector<2x1x16x128xf32>
    %c0_314 = arith.constant 0 : index
    %c23_315 = arith.constant 23 : index
    %c0_316 = arith.constant 0 : index
    %c0_317 = arith.constant 0 : index
    %377 = vector.load %arg8[%c0_314, %c23_315, %c0_316, %c0_317] : memref<2x48x16x128xf32, #tpu.memory_space<vmem>>, vector<2x1x16x128xf32>
    %378 = vector.broadcast %51 : vector<1x1x1x128xf32> to vector<2x1x16x128xf32>
    %379 = arith.mulf %377, %378 : vector<2x1x16x128xf32>
    %380 = arith.addf %376, %379 : vector<2x1x16x128xf32>
    %c0_318 = arith.constant 0 : index
    %c39_319 = arith.constant 39 : index
    %c0_320 = arith.constant 0 : index
    %c0_321 = arith.constant 0 : index
    %381 = vector.load %arg8[%c0_318, %c39_319, %c0_320, %c0_321] : memref<2x48x16x128xf32, #tpu.memory_space<vmem>>, vector<2x1x16x128xf32>
    %382 = vector.broadcast %53 : vector<1x1x1x128xf32> to vector<2x1x16x128xf32>
    %383 = arith.mulf %381, %382 : vector<2x1x16x128xf32>
    %384 = arith.addf %380, %383 : vector<2x1x16x128xf32>
    %c0_322 = arith.constant 0 : index
    %c8 = arith.constant 8 : index
    %c0_323 = arith.constant 0 : index
    %c0_324 = arith.constant 0 : index
    %385 = vector.load %arg8[%c0_322, %c8, %c0_323, %c0_324] : memref<2x48x16x128xf32, #tpu.memory_space<vmem>>, vector<2x1x16x128xf32>
    %386 = vector.broadcast %55 : vector<1x1x1x128xf32> to vector<2x1x16x128xf32>
    %387 = arith.mulf %385, %386 : vector<2x1x16x128xf32>
    %388 = arith.addf %384, %387 : vector<2x1x16x128xf32>
    %c0_325 = arith.constant 0 : index
    %c24 = arith.constant 24 : index
    %c0_326 = arith.constant 0 : index
    %c0_327 = arith.constant 0 : index
    %389 = vector.load %arg8[%c0_325, %c24, %c0_326, %c0_327] : memref<2x48x16x128xf32, #tpu.memory_space<vmem>>, vector<2x1x16x128xf32>
    %390 = vector.broadcast %57 : vector<1x1x1x128xf32> to vector<2x1x16x128xf32>
    %391 = arith.mulf %389, %390 : vector<2x1x16x128xf32>
    %392 = arith.addf %388, %391 : vector<2x1x16x128xf32>
    %c0_328 = arith.constant 0 : index
    %c40 = arith.constant 40 : index
    %c0_329 = arith.constant 0 : index
    %c0_330 = arith.constant 0 : index
    %393 = vector.load %arg8[%c0_328, %c40, %c0_329, %c0_330] : memref<2x48x16x128xf32, #tpu.memory_space<vmem>>, vector<2x1x16x128xf32>
    %394 = vector.broadcast %59 : vector<1x1x1x128xf32> to vector<2x1x16x128xf32>
    %395 = arith.mulf %393, %394 : vector<2x1x16x128xf32>
    %396 = arith.addf %392, %395 : vector<2x1x16x128xf32>
    %cst_331 = arith.constant 0.000000e+00 : f32
    %cst_332 = arith.constant 6.000000e+00 : f32
    %397 = vector.broadcast %cst_331 : f32 to vector<2x1x16x128xf32>
    %398 = arith.maximumf %397, %396 : vector<2x1x16x128xf32>
    %399 = vector.broadcast %cst_332 : f32 to vector<2x1x16x128xf32>
    %400 = arith.minimumf %399, %398 : vector<2x1x16x128xf32>
    %401 = vector.shape_cast %400 : vector<2x1x16x128xf32> to vector<32x128xf32>
    %cst_333 = arith.constant dense<0.000000e+00> : vector<32x8xf32>
    %402 = tpu.matmul %401, %64, %cst_333 {dimension_numbers = #tpu.dot_dimension_numbers<[1], [0], [0], [1], [0, 0, 1, 1], [], []>} : vector<32x128xf32>, vector<128x8xf32>, vector<32x8xf32> -> vector<32x8xf32>
    %403 = vector.shape_cast %402 : vector<32x8xf32> to vector<2x1x16x8xf32>
    %c0_334 = arith.constant 0 : index
    %c7_335 = arith.constant 7 : index
    %c0_336 = arith.constant 0 : index
    %c0_337 = arith.constant 0 : index
    %404 = vector.load %arg7[%c0_334, %c7_335, %c0_336, %c0_337] : memref<2x16x16x8xf32, #tpu.memory_space<vmem>>, vector<2x1x16x8xf32>
    tpu.vector_store %arg7[%c0_334, %c7_335, %c0_336, %c0_337], %403 {strides = array<i32>} : memref<2x16x16x8xf32, #tpu.memory_space<vmem>>, vector<2x1x16x8xf32>,
    %c0_338 = arith.constant 0 : index
    %c7_339 = arith.constant 7 : index
    %c0_340 = arith.constant 0 : index
    %c0_341 = arith.constant 0 : index
    %405 = vector.load %arg8[%c0_338, %c7_339, %c0_340, %c0_341] : memref<2x48x16x128xf32, #tpu.memory_space<vmem>>, vector<2x1x16x128xf32>
    %406 = vector.broadcast %43 : vector<1x1x1x128xf32> to vector<2x1x16x128xf32>
    %407 = arith.mulf %405, %406 : vector<2x1x16x128xf32>
    %408 = arith.addf %63, %407 : vector<2x1x16x128xf32>
    %c0_342 = arith.constant 0 : index
    %c23_343 = arith.constant 23 : index
    %c0_344 = arith.constant 0 : index
    %c0_345 = arith.constant 0 : index
    %409 = vector.load %arg8[%c0_342, %c23_343, %c0_344, %c0_345] : memref<2x48x16x128xf32, #tpu.memory_space<vmem>>, vector<2x1x16x128xf32>
    %410 = vector.broadcast %45 : vector<1x1x1x128xf32> to vector<2x1x16x128xf32>
    %411 = arith.mulf %409, %410 : vector<2x1x16x128xf32>
    %412 = arith.addf %408, %411 : vector<2x1x16x128xf32>
    %c0_346 = arith.constant 0 : index
    %c39_347 = arith.constant 39 : index
    %c0_348 = arith.constant 0 : index
    %c0_349 = arith.constant 0 : index
    %413 = vector.load %arg8[%c0_346, %c39_347, %c0_348, %c0_349] : memref<2x48x16x128xf32, #tpu.memory_space<vmem>>, vector<2x1x16x128xf32>
    %414 = vector.broadcast %47 : vector<1x1x1x128xf32> to vector<2x1x16x128xf32>
    %415 = arith.mulf %413, %414 : vector<2x1x16x128xf32>
    %416 = arith.addf %412, %415 : vector<2x1x16x128xf32>
    %c0_350 = arith.constant 0 : index
    %c8_351 = arith.constant 8 : index
    %c0_352 = arith.constant 0 : index
    %c0_353 = arith.constant 0 : index
    %417 = vector.load %arg8[%c0_350, %c8_351, %c0_352, %c0_353] : memref<2x48x16x128xf32, #tpu.memory_space<vmem>>, vector<2x1x16x128xf32>
    %418 = vector.broadcast %49 : vector<1x1x1x128xf32> to vector<2x1x16x128xf32>
    %419 = arith.mulf %417, %418 : vector<2x1x16x128xf32>
    %420 = arith.addf %416, %419 : vector<2x1x16x128xf32>
    %c0_354 = arith.constant 0 : index
    %c24_355 = arith.constant 24 : index
    %c0_356 = arith.constant 0 : index
    %c0_357 = arith.constant 0 : index
    %421 = vector.load %arg8[%c0_354, %c24_355, %c0_356, %c0_357] : memref<2x48x16x128xf32, #tpu.memory_space<vmem>>, vector<2x1x16x128xf32>
    %422 = vector.broadcast %51 : vector<1x1x1x128xf32> to vector<2x1x16x128xf32>
    %423 = arith.mulf %421, %422 : vector<2x1x16x128xf32>
    %424 = arith.addf %420, %423 : vector<2x1x16x128xf32>
    %c0_358 = arith.constant 0 : index
    %c40_359 = arith.constant 40 : index
    %c0_360 = arith.constant 0 : index
    %c0_361 = arith.constant 0 : index
    %425 = vector.load %arg8[%c0_358, %c40_359, %c0_360, %c0_361] : memref<2x48x16x128xf32, #tpu.memory_space<vmem>>, vector<2x1x16x128xf32>
    %426 = vector.broadcast %53 : vector<1x1x1x128xf32> to vector<2x1x16x128xf32>
    %427 = arith.mulf %425, %426 : vector<2x1x16x128xf32>
    %428 = arith.addf %424, %427 : vector<2x1x16x128xf32>
    %c0_362 = arith.constant 0 : index
    %c9 = arith.constant 9 : index
    %c0_363 = arith.constant 0 : index
    %c0_364 = arith.constant 0 : index
    %429 = vector.load %arg8[%c0_362, %c9, %c0_363, %c0_364] : memref<2x48x16x128xf32, #tpu.memory_space<vmem>>, vector<2x1x16x128xf32>
    %430 = vector.broadcast %55 : vector<1x1x1x128xf32> to vector<2x1x16x128xf32>
    %431 = arith.mulf %429, %430 : vector<2x1x16x128xf32>
    %432 = arith.addf %428, %431 : vector<2x1x16x128xf32>
    %c0_365 = arith.constant 0 : index
    %c25 = arith.constant 25 : index
    %c0_366 = arith.constant 0 : index
    %c0_367 = arith.constant 0 : index
    %433 = vector.load %arg8[%c0_365, %c25, %c0_366, %c0_367] : memref<2x48x16x128xf32, #tpu.memory_space<vmem>>, vector<2x1x16x128xf32>
    %434 = vector.broadcast %57 : vector<1x1x1x128xf32> to vector<2x1x16x128xf32>
    %435 = arith.mulf %433, %434 : vector<2x1x16x128xf32>
    %436 = arith.addf %432, %435 : vector<2x1x16x128xf32>
    %c0_368 = arith.constant 0 : index
    %c41 = arith.constant 41 : index
    %c0_369 = arith.constant 0 : index
    %c0_370 = arith.constant 0 : index
    %437 = vector.load %arg8[%c0_368, %c41, %c0_369, %c0_370] : memref<2x48x16x128xf32, #tpu.memory_space<vmem>>, vector<2x1x16x128xf32>
    %438 = vector.broadcast %59 : vector<1x1x1x128xf32> to vector<2x1x16x128xf32>
    %439 = arith.mulf %437, %438 : vector<2x1x16x128xf32>
    %440 = arith.addf %436, %439 : vector<2x1x16x128xf32>
    %cst_371 = arith.constant 0.000000e+00 : f32
    %cst_372 = arith.constant 6.000000e+00 : f32
    %441 = vector.broadcast %cst_371 : f32 to vector<2x1x16x128xf32>
    %442 = arith.maximumf %441, %440 : vector<2x1x16x128xf32>
    %443 = vector.broadcast %cst_372 : f32 to vector<2x1x16x128xf32>
    %444 = arith.minimumf %443, %442 : vector<2x1x16x128xf32>
    %445 = vector.shape_cast %444 : vector<2x1x16x128xf32> to vector<32x128xf32>
    %cst_373 = arith.constant dense<0.000000e+00> : vector<32x8xf32>
    %446 = tpu.matmul %445, %64, %cst_373 {dimension_numbers = #tpu.dot_dimension_numbers<[1], [0], [0], [1], [0, 0, 1, 1], [], []>} : vector<32x128xf32>, vector<128x8xf32>, vector<32x8xf32> -> vector<32x8xf32>
    %447 = vector.shape_cast %446 : vector<32x8xf32> to vector<2x1x16x8xf32>
    %c0_374 = arith.constant 0 : index
    %c8_375 = arith.constant 8 : index
    %c0_376 = arith.constant 0 : index
    %c0_377 = arith.constant 0 : index
    %448 = vector.load %arg7[%c0_374, %c8_375, %c0_376, %c0_377] : memref<2x16x16x8xf32, #tpu.memory_space<vmem>>, vector<2x1x16x8xf32>
    tpu.vector_store %arg7[%c0_374, %c8_375, %c0_376, %c0_377], %447 {strides = array<i32>} : memref<2x16x16x8xf32, #tpu.memory_space<vmem>>, vector<2x1x16x8xf32>,
    %c0_378 = arith.constant 0 : index
    %c8_379 = arith.constant 8 : index
    %c0_380 = arith.constant 0 : index
    %c0_381 = arith.constant 0 : index
    %449 = vector.load %arg8[%c0_378, %c8_379, %c0_380, %c0_381] : memref<2x48x16x128xf32, #tpu.memory_space<vmem>>, vector<2x1x16x128xf32>
    %450 = vector.broadcast %43 : vector<1x1x1x128xf32> to vector<2x1x16x128xf32>
    %451 = arith.mulf %449, %450 : vector<2x1x16x128xf32>
    %452 = arith.addf %63, %451 : vector<2x1x16x128xf32>
    %c0_382 = arith.constant 0 : index
    %c24_383 = arith.constant 24 : index
    %c0_384 = arith.constant 0 : index
    %c0_385 = arith.constant 0 : index
    %453 = vector.load %arg8[%c0_382, %c24_383, %c0_384, %c0_385] : memref<2x48x16x128xf32, #tpu.memory_space<vmem>>, vector<2x1x16x128xf32>
    %454 = vector.broadcast %45 : vector<1x1x1x128xf32> to vector<2x1x16x128xf32>
    %455 = arith.mulf %453, %454 : vector<2x1x16x128xf32>
    %456 = arith.addf %452, %455 : vector<2x1x16x128xf32>
    %c0_386 = arith.constant 0 : index
    %c40_387 = arith.constant 40 : index
    %c0_388 = arith.constant 0 : index
    %c0_389 = arith.constant 0 : index
    %457 = vector.load %arg8[%c0_386, %c40_387, %c0_388, %c0_389] : memref<2x48x16x128xf32, #tpu.memory_space<vmem>>, vector<2x1x16x128xf32>
    %458 = vector.broadcast %47 : vector<1x1x1x128xf32> to vector<2x1x16x128xf32>
    %459 = arith.mulf %457, %458 : vector<2x1x16x128xf32>
    %460 = arith.addf %456, %459 : vector<2x1x16x128xf32>
    %c0_390 = arith.constant 0 : index
    %c9_391 = arith.constant 9 : index
    %c0_392 = arith.constant 0 : index
    %c0_393 = arith.constant 0 : index
    %461 = vector.load %arg8[%c0_390, %c9_391, %c0_392, %c0_393] : memref<2x48x16x128xf32, #tpu.memory_space<vmem>>, vector<2x1x16x128xf32>
    %462 = vector.broadcast %49 : vector<1x1x1x128xf32> to vector<2x1x16x128xf32>
    %463 = arith.mulf %461, %462 : vector<2x1x16x128xf32>
    %464 = arith.addf %460, %463 : vector<2x1x16x128xf32>
    %c0_394 = arith.constant 0 : index
    %c25_395 = arith.constant 25 : index
    %c0_396 = arith.constant 0 : index
    %c0_397 = arith.constant 0 : index
    %465 = vector.load %arg8[%c0_394, %c25_395, %c0_396, %c0_397] : memref<2x48x16x128xf32, #tpu.memory_space<vmem>>, vector<2x1x16x128xf32>
    %466 = vector.broadcast %51 : vector<1x1x1x128xf32> to vector<2x1x16x128xf32>
    %467 = arith.mulf %465, %466 : vector<2x1x16x128xf32>
    %468 = arith.addf %464, %467 : vector<2x1x16x128xf32>
    %c0_398 = arith.constant 0 : index
    %c41_399 = arith.constant 41 : index
    %c0_400 = arith.constant 0 : index
    %c0_401 = arith.constant 0 : index
    %469 = vector.load %arg8[%c0_398, %c41_399, %c0_400, %c0_401] : memref<2x48x16x128xf32, #tpu.memory_space<vmem>>, vector<2x1x16x128xf32>
    %470 = vector.broadcast %53 : vector<1x1x1x128xf32> to vector<2x1x16x128xf32>
    %471 = arith.mulf %469, %470 : vector<2x1x16x128xf32>
    %472 = arith.addf %468, %471 : vector<2x1x16x128xf32>
    %c0_402 = arith.constant 0 : index
    %c10 = arith.constant 10 : index
    %c0_403 = arith.constant 0 : index
    %c0_404 = arith.constant 0 : index
    %473 = vector.load %arg8[%c0_402, %c10, %c0_403, %c0_404] : memref<2x48x16x128xf32, #tpu.memory_space<vmem>>, vector<2x1x16x128xf32>
    %474 = vector.broadcast %55 : vector<1x1x1x128xf32> to vector<2x1x16x128xf32>
    %475 = arith.mulf %473, %474 : vector<2x1x16x128xf32>
    %476 = arith.addf %472, %475 : vector<2x1x16x128xf32>
    %c0_405 = arith.constant 0 : index
    %c26 = arith.constant 26 : index
    %c0_406 = arith.constant 0 : index
    %c0_407 = arith.constant 0 : index
    %477 = vector.load %arg8[%c0_405, %c26, %c0_406, %c0_407] : memref<2x48x16x128xf32, #tpu.memory_space<vmem>>, vector<2x1x16x128xf32>
    %478 = vector.broadcast %57 : vector<1x1x1x128xf32> to vector<2x1x16x128xf32>
    %479 = arith.mulf %477, %478 : vector<2x1x16x128xf32>
    %480 = arith.addf %476, %479 : vector<2x1x16x128xf32>
    %c0_408 = arith.constant 0 : index
    %c42 = arith.constant 42 : index
    %c0_409 = arith.constant 0 : index
    %c0_410 = arith.constant 0 : index
    %481 = vector.load %arg8[%c0_408, %c42, %c0_409, %c0_410] : memref<2x48x16x128xf32, #tpu.memory_space<vmem>>, vector<2x1x16x128xf32>
    %482 = vector.broadcast %59 : vector<1x1x1x128xf32> to vector<2x1x16x128xf32>
    %483 = arith.mulf %481, %482 : vector<2x1x16x128xf32>
    %484 = arith.addf %480, %483 : vector<2x1x16x128xf32>
    %cst_411 = arith.constant 0.000000e+00 : f32
    %cst_412 = arith.constant 6.000000e+00 : f32
    %485 = vector.broadcast %cst_411 : f32 to vector<2x1x16x128xf32>
    %486 = arith.maximumf %485, %484 : vector<2x1x16x128xf32>
    %487 = vector.broadcast %cst_412 : f32 to vector<2x1x16x128xf32>
    %488 = arith.minimumf %487, %486 : vector<2x1x16x128xf32>
    %489 = vector.shape_cast %488 : vector<2x1x16x128xf32> to vector<32x128xf32>
    %cst_413 = arith.constant dense<0.000000e+00> : vector<32x8xf32>
    %490 = tpu.matmul %489, %64, %cst_413 {dimension_numbers = #tpu.dot_dimension_numbers<[1], [0], [0], [1], [0, 0, 1, 1], [], []>} : vector<32x128xf32>, vector<128x8xf32>, vector<32x8xf32> -> vector<32x8xf32>
    %491 = vector.shape_cast %490 : vector<32x8xf32> to vector<2x1x16x8xf32>
    %c0_414 = arith.constant 0 : index
    %c9_415 = arith.constant 9 : index
    %c0_416 = arith.constant 0 : index
    %c0_417 = arith.constant 0 : index
    %492 = vector.load %arg7[%c0_414, %c9_415, %c0_416, %c0_417] : memref<2x16x16x8xf32, #tpu.memory_space<vmem>>, vector<2x1x16x8xf32>
    tpu.vector_store %arg7[%c0_414, %c9_415, %c0_416, %c0_417], %491 {strides = array<i32>} : memref<2x16x16x8xf32, #tpu.memory_space<vmem>>, vector<2x1x16x8xf32>,
    %c0_418 = arith.constant 0 : index
    %c9_419 = arith.constant 9 : index
    %c0_420 = arith.constant 0 : index
    %c0_421 = arith.constant 0 : index
    %493 = vector.load %arg8[%c0_418, %c9_419, %c0_420, %c0_421] : memref<2x48x16x128xf32, #tpu.memory_space<vmem>>, vector<2x1x16x128xf32>
    %494 = vector.broadcast %43 : vector<1x1x1x128xf32> to vector<2x1x16x128xf32>
    %495 = arith.mulf %493, %494 : vector<2x1x16x128xf32>
    %496 = arith.addf %63, %495 : vector<2x1x16x128xf32>
    %c0_422 = arith.constant 0 : index
    %c25_423 = arith.constant 25 : index
    %c0_424 = arith.constant 0 : index
    %c0_425 = arith.constant 0 : index
    %497 = vector.load %arg8[%c0_422, %c25_423, %c0_424, %c0_425] : memref<2x48x16x128xf32, #tpu.memory_space<vmem>>, vector<2x1x16x128xf32>
    %498 = vector.broadcast %45 : vector<1x1x1x128xf32> to vector<2x1x16x128xf32>
    %499 = arith.mulf %497, %498 : vector<2x1x16x128xf32>
    %500 = arith.addf %496, %499 : vector<2x1x16x128xf32>
    %c0_426 = arith.constant 0 : index
    %c41_427 = arith.constant 41 : index
    %c0_428 = arith.constant 0 : index
    %c0_429 = arith.constant 0 : index
    %501 = vector.load %arg8[%c0_426, %c41_427, %c0_428, %c0_429] : memref<2x48x16x128xf32, #tpu.memory_space<vmem>>, vector<2x1x16x128xf32>
    %502 = vector.broadcast %47 : vector<1x1x1x128xf32> to vector<2x1x16x128xf32>
    %503 = arith.mulf %501, %502 : vector<2x1x16x128xf32>
    %504 = arith.addf %500, %503 : vector<2x1x16x128xf32>
    %c0_430 = arith.constant 0 : index
    %c10_431 = arith.constant 10 : index
    %c0_432 = arith.constant 0 : index
    %c0_433 = arith.constant 0 : index
    %505 = vector.load %arg8[%c0_430, %c10_431, %c0_432, %c0_433] : memref<2x48x16x128xf32, #tpu.memory_space<vmem>>, vector<2x1x16x128xf32>
    %506 = vector.broadcast %49 : vector<1x1x1x128xf32> to vector<2x1x16x128xf32>
    %507 = arith.mulf %505, %506 : vector<2x1x16x128xf32>
    %508 = arith.addf %504, %507 : vector<2x1x16x128xf32>
    %c0_434 = arith.constant 0 : index
    %c26_435 = arith.constant 26 : index
    %c0_436 = arith.constant 0 : index
    %c0_437 = arith.constant 0 : index
    %509 = vector.load %arg8[%c0_434, %c26_435, %c0_436, %c0_437] : memref<2x48x16x128xf32, #tpu.memory_space<vmem>>, vector<2x1x16x128xf32>
    %510 = vector.broadcast %51 : vector<1x1x1x128xf32> to vector<2x1x16x128xf32>
    %511 = arith.mulf %509, %510 : vector<2x1x16x128xf32>
    %512 = arith.addf %508, %511 : vector<2x1x16x128xf32>
    %c0_438 = arith.constant 0 : index
    %c42_439 = arith.constant 42 : index
    %c0_440 = arith.constant 0 : index
    %c0_441 = arith.constant 0 : index
    %513 = vector.load %arg8[%c0_438, %c42_439, %c0_440, %c0_441] : memref<2x48x16x128xf32, #tpu.memory_space<vmem>>, vector<2x1x16x128xf32>
    %514 = vector.broadcast %53 : vector<1x1x1x128xf32> to vector<2x1x16x128xf32>
    %515 = arith.mulf %513, %514 : vector<2x1x16x128xf32>
    %516 = arith.addf %512, %515 : vector<2x1x16x128xf32>
    %c0_442 = arith.constant 0 : index
    %c11 = arith.constant 11 : index
    %c0_443 = arith.constant 0 : index
    %c0_444 = arith.constant 0 : index
    %517 = vector.load %arg8[%c0_442, %c11, %c0_443, %c0_444] : memref<2x48x16x128xf32, #tpu.memory_space<vmem>>, vector<2x1x16x128xf32>
    %518 = vector.broadcast %55 : vector<1x1x1x128xf32> to vector<2x1x16x128xf32>
    %519 = arith.mulf %517, %518 : vector<2x1x16x128xf32>
    %520 = arith.addf %516, %519 : vector<2x1x16x128xf32>
    %c0_445 = arith.constant 0 : index
    %c27 = arith.constant 27 : index
    %c0_446 = arith.constant 0 : index
    %c0_447 = arith.constant 0 : index
    %521 = vector.load %arg8[%c0_445, %c27, %c0_446, %c0_447] : memref<2x48x16x128xf32, #tpu.memory_space<vmem>>, vector<2x1x16x128xf32>
    %522 = vector.broadcast %57 : vector<1x1x1x128xf32> to vector<2x1x16x128xf32>
    %523 = arith.mulf %521, %522 : vector<2x1x16x128xf32>
    %524 = arith.addf %520, %523 : vector<2x1x16x128xf32>
    %c0_448 = arith.constant 0 : index
    %c43 = arith.constant 43 : index
    %c0_449 = arith.constant 0 : index
    %c0_450 = arith.constant 0 : index
    %525 = vector.load %arg8[%c0_448, %c43, %c0_449, %c0_450] : memref<2x48x16x128xf32, #tpu.memory_space<vmem>>, vector<2x1x16x128xf32>
    %526 = vector.broadcast %59 : vector<1x1x1x128xf32> to vector<2x1x16x128xf32>
    %527 = arith.mulf %525, %526 : vector<2x1x16x128xf32>
    %528 = arith.addf %524, %527 : vector<2x1x16x128xf32>
    %cst_451 = arith.constant 0.000000e+00 : f32
    %cst_452 = arith.constant 6.000000e+00 : f32
    %529 = vector.broadcast %cst_451 : f32 to vector<2x1x16x128xf32>
    %530 = arith.maximumf %529, %528 : vector<2x1x16x128xf32>
    %531 = vector.broadcast %cst_452 : f32 to vector<2x1x16x128xf32>
    %532 = arith.minimumf %531, %530 : vector<2x1x16x128xf32>
    %533 = vector.shape_cast %532 : vector<2x1x16x128xf32> to vector<32x128xf32>
    %cst_453 = arith.constant dense<0.000000e+00> : vector<32x8xf32>
    %534 = tpu.matmul %533, %64, %cst_453 {dimension_numbers = #tpu.dot_dimension_numbers<[1], [0], [0], [1], [0, 0, 1, 1], [], []>} : vector<32x128xf32>, vector<128x8xf32>, vector<32x8xf32> -> vector<32x8xf32>
    %535 = vector.shape_cast %534 : vector<32x8xf32> to vector<2x1x16x8xf32>
    %c0_454 = arith.constant 0 : index
    %c10_455 = arith.constant 10 : index
    %c0_456 = arith.constant 0 : index
    %c0_457 = arith.constant 0 : index
    %536 = vector.load %arg7[%c0_454, %c10_455, %c0_456, %c0_457] : memref<2x16x16x8xf32, #tpu.memory_space<vmem>>, vector<2x1x16x8xf32>
    tpu.vector_store %arg7[%c0_454, %c10_455, %c0_456, %c0_457], %535 {strides = array<i32>} : memref<2x16x16x8xf32, #tpu.memory_space<vmem>>, vector<2x1x16x8xf32>,
    %c0_458 = arith.constant 0 : index
    %c10_459 = arith.constant 10 : index
    %c0_460 = arith.constant 0 : index
    %c0_461 = arith.constant 0 : index
    %537 = vector.load %arg8[%c0_458, %c10_459, %c0_460, %c0_461] : memref<2x48x16x128xf32, #tpu.memory_space<vmem>>, vector<2x1x16x128xf32>
    %538 = vector.broadcast %43 : vector<1x1x1x128xf32> to vector<2x1x16x128xf32>
    %539 = arith.mulf %537, %538 : vector<2x1x16x128xf32>
    %540 = arith.addf %63, %539 : vector<2x1x16x128xf32>
    %c0_462 = arith.constant 0 : index
    %c26_463 = arith.constant 26 : index
    %c0_464 = arith.constant 0 : index
    %c0_465 = arith.constant 0 : index
    %541 = vector.load %arg8[%c0_462, %c26_463, %c0_464, %c0_465] : memref<2x48x16x128xf32, #tpu.memory_space<vmem>>, vector<2x1x16x128xf32>
    %542 = vector.broadcast %45 : vector<1x1x1x128xf32> to vector<2x1x16x128xf32>
    %543 = arith.mulf %541, %542 : vector<2x1x16x128xf32>
    %544 = arith.addf %540, %543 : vector<2x1x16x128xf32>
    %c0_466 = arith.constant 0 : index
    %c42_467 = arith.constant 42 : index
    %c0_468 = arith.constant 0 : index
    %c0_469 = arith.constant 0 : index
    %545 = vector.load %arg8[%c0_466, %c42_467, %c0_468, %c0_469] : memref<2x48x16x128xf32, #tpu.memory_space<vmem>>, vector<2x1x16x128xf32>
    %546 = vector.broadcast %47 : vector<1x1x1x128xf32> to vector<2x1x16x128xf32>
    %547 = arith.mulf %545, %546 : vector<2x1x16x128xf32>
    %548 = arith.addf %544, %547 : vector<2x1x16x128xf32>
    %c0_470 = arith.constant 0 : index
    %c11_471 = arith.constant 11 : index
    %c0_472 = arith.constant 0 : index
    %c0_473 = arith.constant 0 : index
    %549 = vector.load %arg8[%c0_470, %c11_471, %c0_472, %c0_473] : memref<2x48x16x128xf32, #tpu.memory_space<vmem>>, vector<2x1x16x128xf32>
    %550 = vector.broadcast %49 : vector<1x1x1x128xf32> to vector<2x1x16x128xf32>
    %551 = arith.mulf %549, %550 : vector<2x1x16x128xf32>
    %552 = arith.addf %548, %551 : vector<2x1x16x128xf32>
    %c0_474 = arith.constant 0 : index
    %c27_475 = arith.constant 27 : index
    %c0_476 = arith.constant 0 : index
    %c0_477 = arith.constant 0 : index
    %553 = vector.load %arg8[%c0_474, %c27_475, %c0_476, %c0_477] : memref<2x48x16x128xf32, #tpu.memory_space<vmem>>, vector<2x1x16x128xf32>
    %554 = vector.broadcast %51 : vector<1x1x1x128xf32> to vector<2x1x16x128xf32>
    %555 = arith.mulf %553, %554 : vector<2x1x16x128xf32>
    %556 = arith.addf %552, %555 : vector<2x1x16x128xf32>
    %c0_478 = arith.constant 0 : index
    %c43_479 = arith.constant 43 : index
    %c0_480 = arith.constant 0 : index
    %c0_481 = arith.constant 0 : index
    %557 = vector.load %arg8[%c0_478, %c43_479, %c0_480, %c0_481] : memref<2x48x16x128xf32, #tpu.memory_space<vmem>>, vector<2x1x16x128xf32>
    %558 = vector.broadcast %53 : vector<1x1x1x128xf32> to vector<2x1x16x128xf32>
    %559 = arith.mulf %557, %558 : vector<2x1x16x128xf32>
    %560 = arith.addf %556, %559 : vector<2x1x16x128xf32>
    %c0_482 = arith.constant 0 : index
    %c12 = arith.constant 12 : index
    %c0_483 = arith.constant 0 : index
    %c0_484 = arith.constant 0 : index
    %561 = vector.load %arg8[%c0_482, %c12, %c0_483, %c0_484] : memref<2x48x16x128xf32, #tpu.memory_space<vmem>>, vector<2x1x16x128xf32>
    %562 = vector.broadcast %55 : vector<1x1x1x128xf32> to vector<2x1x16x128xf32>
    %563 = arith.mulf %561, %562 : vector<2x1x16x128xf32>
    %564 = arith.addf %560, %563 : vector<2x1x16x128xf32>
    %c0_485 = arith.constant 0 : index
    %c28 = arith.constant 28 : index
    %c0_486 = arith.constant 0 : index
    %c0_487 = arith.constant 0 : index
    %565 = vector.load %arg8[%c0_485, %c28, %c0_486, %c0_487] : memref<2x48x16x128xf32, #tpu.memory_space<vmem>>, vector<2x1x16x128xf32>
    %566 = vector.broadcast %57 : vector<1x1x1x128xf32> to vector<2x1x16x128xf32>
    %567 = arith.mulf %565, %566 : vector<2x1x16x128xf32>
    %568 = arith.addf %564, %567 : vector<2x1x16x128xf32>
    %c0_488 = arith.constant 0 : index
    %c44 = arith.constant 44 : index
    %c0_489 = arith.constant 0 : index
    %c0_490 = arith.constant 0 : index
    %569 = vector.load %arg8[%c0_488, %c44, %c0_489, %c0_490] : memref<2x48x16x128xf32, #tpu.memory_space<vmem>>, vector<2x1x16x128xf32>
    %570 = vector.broadcast %59 : vector<1x1x1x128xf32> to vector<2x1x16x128xf32>
    %571 = arith.mulf %569, %570 : vector<2x1x16x128xf32>
    %572 = arith.addf %568, %571 : vector<2x1x16x128xf32>
    %cst_491 = arith.constant 0.000000e+00 : f32
    %cst_492 = arith.constant 6.000000e+00 : f32
    %573 = vector.broadcast %cst_491 : f32 to vector<2x1x16x128xf32>
    %574 = arith.maximumf %573, %572 : vector<2x1x16x128xf32>
    %575 = vector.broadcast %cst_492 : f32 to vector<2x1x16x128xf32>
    %576 = arith.minimumf %575, %574 : vector<2x1x16x128xf32>
    %577 = vector.shape_cast %576 : vector<2x1x16x128xf32> to vector<32x128xf32>
    %cst_493 = arith.constant dense<0.000000e+00> : vector<32x8xf32>
    %578 = tpu.matmul %577, %64, %cst_493 {dimension_numbers = #tpu.dot_dimension_numbers<[1], [0], [0], [1], [0, 0, 1, 1], [], []>} : vector<32x128xf32>, vector<128x8xf32>, vector<32x8xf32> -> vector<32x8xf32>
    %579 = vector.shape_cast %578 : vector<32x8xf32> to vector<2x1x16x8xf32>
    %c0_494 = arith.constant 0 : index
    %c11_495 = arith.constant 11 : index
    %c0_496 = arith.constant 0 : index
    %c0_497 = arith.constant 0 : index
    %580 = vector.load %arg7[%c0_494, %c11_495, %c0_496, %c0_497] : memref<2x16x16x8xf32, #tpu.memory_space<vmem>>, vector<2x1x16x8xf32>
    tpu.vector_store %arg7[%c0_494, %c11_495, %c0_496, %c0_497], %579 {strides = array<i32>} : memref<2x16x16x8xf32, #tpu.memory_space<vmem>>, vector<2x1x16x8xf32>,
    %c0_498 = arith.constant 0 : index
    %c11_499 = arith.constant 11 : index
    %c0_500 = arith.constant 0 : index
    %c0_501 = arith.constant 0 : index
    %581 = vector.load %arg8[%c0_498, %c11_499, %c0_500, %c0_501] : memref<2x48x16x128xf32, #tpu.memory_space<vmem>>, vector<2x1x16x128xf32>
    %582 = vector.broadcast %43 : vector<1x1x1x128xf32> to vector<2x1x16x128xf32>
    %583 = arith.mulf %581, %582 : vector<2x1x16x128xf32>
    %584 = arith.addf %63, %583 : vector<2x1x16x128xf32>
    %c0_502 = arith.constant 0 : index
    %c27_503 = arith.constant 27 : index
    %c0_504 = arith.constant 0 : index
    %c0_505 = arith.constant 0 : index
    %585 = vector.load %arg8[%c0_502, %c27_503, %c0_504, %c0_505] : memref<2x48x16x128xf32, #tpu.memory_space<vmem>>, vector<2x1x16x128xf32>
    %586 = vector.broadcast %45 : vector<1x1x1x128xf32> to vector<2x1x16x128xf32>
    %587 = arith.mulf %585, %586 : vector<2x1x16x128xf32>
    %588 = arith.addf %584, %587 : vector<2x1x16x128xf32>
    %c0_506 = arith.constant 0 : index
    %c43_507 = arith.constant 43 : index
    %c0_508 = arith.constant 0 : index
    %c0_509 = arith.constant 0 : index
    %589 = vector.load %arg8[%c0_506, %c43_507, %c0_508, %c0_509] : memref<2x48x16x128xf32, #tpu.memory_space<vmem>>, vector<2x1x16x128xf32>
    %590 = vector.broadcast %47 : vector<1x1x1x128xf32> to vector<2x1x16x128xf32>
    %591 = arith.mulf %589, %590 : vector<2x1x16x128xf32>
    %592 = arith.addf %588, %591 : vector<2x1x16x128xf32>
    %c0_510 = arith.constant 0 : index
    %c12_511 = arith.constant 12 : index
    %c0_512 = arith.constant 0 : index
    %c0_513 = arith.constant 0 : index
    %593 = vector.load %arg8[%c0_510, %c12_511, %c0_512, %c0_513] : memref<2x48x16x128xf32, #tpu.memory_space<vmem>>, vector<2x1x16x128xf32>
    %594 = vector.broadcast %49 : vector<1x1x1x128xf32> to vector<2x1x16x128xf32>
    %595 = arith.mulf %593, %594 : vector<2x1x16x128xf32>
    %596 = arith.addf %592, %595 : vector<2x1x16x128xf32>
    %c0_514 = arith.constant 0 : index
    %c28_515 = arith.constant 28 : index
    %c0_516 = arith.constant 0 : index
    %c0_517 = arith.constant 0 : index
    %597 = vector.load %arg8[%c0_514, %c28_515, %c0_516, %c0_517] : memref<2x48x16x128xf32, #tpu.memory_space<vmem>>, vector<2x1x16x128xf32>
    %598 = vector.broadcast %51 : vector<1x1x1x128xf32> to vector<2x1x16x128xf32>
    %599 = arith.mulf %597, %598 : vector<2x1x16x128xf32>
    %600 = arith.addf %596, %599 : vector<2x1x16x128xf32>
    %c0_518 = arith.constant 0 : index
    %c44_519 = arith.constant 44 : index
    %c0_520 = arith.constant 0 : index
    %c0_521 = arith.constant 0 : index
    %601 = vector.load %arg8[%c0_518, %c44_519, %c0_520, %c0_521] : memref<2x48x16x128xf32, #tpu.memory_space<vmem>>, vector<2x1x16x128xf32>
    %602 = vector.broadcast %53 : vector<1x1x1x128xf32> to vector<2x1x16x128xf32>
    %603 = arith.mulf %601, %602 : vector<2x1x16x128xf32>
    %604 = arith.addf %600, %603 : vector<2x1x16x128xf32>
    %c0_522 = arith.constant 0 : index
    %c13 = arith.constant 13 : index
    %c0_523 = arith.constant 0 : index
    %c0_524 = arith.constant 0 : index
    %605 = vector.load %arg8[%c0_522, %c13, %c0_523, %c0_524] : memref<2x48x16x128xf32, #tpu.memory_space<vmem>>, vector<2x1x16x128xf32>
    %606 = vector.broadcast %55 : vector<1x1x1x128xf32> to vector<2x1x16x128xf32>
    %607 = arith.mulf %605, %606 : vector<2x1x16x128xf32>
    %608 = arith.addf %604, %607 : vector<2x1x16x128xf32>
    %c0_525 = arith.constant 0 : index
    %c29 = arith.constant 29 : index
    %c0_526 = arith.constant 0 : index
    %c0_527 = arith.constant 0 : index
    %609 = vector.load %arg8[%c0_525, %c29, %c0_526, %c0_527] : memref<2x48x16x128xf32, #tpu.memory_space<vmem>>, vector<2x1x16x128xf32>
    %610 = vector.broadcast %57 : vector<1x1x1x128xf32> to vector<2x1x16x128xf32>
    %611 = arith.mulf %609, %610 : vector<2x1x16x128xf32>
    %612 = arith.addf %608, %611 : vector<2x1x16x128xf32>
    %c0_528 = arith.constant 0 : index
    %c45 = arith.constant 45 : index
    %c0_529 = arith.constant 0 : index
    %c0_530 = arith.constant 0 : index
    %613 = vector.load %arg8[%c0_528, %c45, %c0_529, %c0_530] : memref<2x48x16x128xf32, #tpu.memory_space<vmem>>, vector<2x1x16x128xf32>
    %614 = vector.broadcast %59 : vector<1x1x1x128xf32> to vector<2x1x16x128xf32>
    %615 = arith.mulf %613, %614 : vector<2x1x16x128xf32>
    %616 = arith.addf %612, %615 : vector<2x1x16x128xf32>
    %cst_531 = arith.constant 0.000000e+00 : f32
    %cst_532 = arith.constant 6.000000e+00 : f32
    %617 = vector.broadcast %cst_531 : f32 to vector<2x1x16x128xf32>
    %618 = arith.maximumf %617, %616 : vector<2x1x16x128xf32>
    %619 = vector.broadcast %cst_532 : f32 to vector<2x1x16x128xf32>
    %620 = arith.minimumf %619, %618 : vector<2x1x16x128xf32>
    %621 = vector.shape_cast %620 : vector<2x1x16x128xf32> to vector<32x128xf32>
    %cst_533 = arith.constant dense<0.000000e+00> : vector<32x8xf32>
    %622 = tpu.matmul %621, %64, %cst_533 {dimension_numbers = #tpu.dot_dimension_numbers<[1], [0], [0], [1], [0, 0, 1, 1], [], []>} : vector<32x128xf32>, vector<128x8xf32>, vector<32x8xf32> -> vector<32x8xf32>
    %623 = vector.shape_cast %622 : vector<32x8xf32> to vector<2x1x16x8xf32>
    %c0_534 = arith.constant 0 : index
    %c12_535 = arith.constant 12 : index
    %c0_536 = arith.constant 0 : index
    %c0_537 = arith.constant 0 : index
    %624 = vector.load %arg7[%c0_534, %c12_535, %c0_536, %c0_537] : memref<2x16x16x8xf32, #tpu.memory_space<vmem>>, vector<2x1x16x8xf32>
    tpu.vector_store %arg7[%c0_534, %c12_535, %c0_536, %c0_537], %623 {strides = array<i32>} : memref<2x16x16x8xf32, #tpu.memory_space<vmem>>, vector<2x1x16x8xf32>,
    %c0_538 = arith.constant 0 : index
    %c12_539 = arith.constant 12 : index
    %c0_540 = arith.constant 0 : index
    %c0_541 = arith.constant 0 : index
    %625 = vector.load %arg8[%c0_538, %c12_539, %c0_540, %c0_541] : memref<2x48x16x128xf32, #tpu.memory_space<vmem>>, vector<2x1x16x128xf32>
    %626 = vector.broadcast %43 : vector<1x1x1x128xf32> to vector<2x1x16x128xf32>
    %627 = arith.mulf %625, %626 : vector<2x1x16x128xf32>
    %628 = arith.addf %63, %627 : vector<2x1x16x128xf32>
    %c0_542 = arith.constant 0 : index
    %c28_543 = arith.constant 28 : index
    %c0_544 = arith.constant 0 : index
    %c0_545 = arith.constant 0 : index
    %629 = vector.load %arg8[%c0_542, %c28_543, %c0_544, %c0_545] : memref<2x48x16x128xf32, #tpu.memory_space<vmem>>, vector<2x1x16x128xf32>
    %630 = vector.broadcast %45 : vector<1x1x1x128xf32> to vector<2x1x16x128xf32>
    %631 = arith.mulf %629, %630 : vector<2x1x16x128xf32>
    %632 = arith.addf %628, %631 : vector<2x1x16x128xf32>
    %c0_546 = arith.constant 0 : index
    %c44_547 = arith.constant 44 : index
    %c0_548 = arith.constant 0 : index
    %c0_549 = arith.constant 0 : index
    %633 = vector.load %arg8[%c0_546, %c44_547, %c0_548, %c0_549] : memref<2x48x16x128xf32, #tpu.memory_space<vmem>>, vector<2x1x16x128xf32>
    %634 = vector.broadcast %47 : vector<1x1x1x128xf32> to vector<2x1x16x128xf32>
    %635 = arith.mulf %633, %634 : vector<2x1x16x128xf32>
    %636 = arith.addf %632, %635 : vector<2x1x16x128xf32>
    %c0_550 = arith.constant 0 : index
    %c13_551 = arith.constant 13 : index
    %c0_552 = arith.constant 0 : index
    %c0_553 = arith.constant 0 : index
    %637 = vector.load %arg8[%c0_550, %c13_551, %c0_552, %c0_553] : memref<2x48x16x128xf32, #tpu.memory_space<vmem>>, vector<2x1x16x128xf32>
    %638 = vector.broadcast %49 : vector<1x1x1x128xf32> to vector<2x1x16x128xf32>
    %639 = arith.mulf %637, %638 : vector<2x1x16x128xf32>
    %640 = arith.addf %636, %639 : vector<2x1x16x128xf32>
    %c0_554 = arith.constant 0 : index
    %c29_555 = arith.constant 29 : index
    %c0_556 = arith.constant 0 : index
    %c0_557 = arith.constant 0 : index
    %641 = vector.load %arg8[%c0_554, %c29_555, %c0_556, %c0_557] : memref<2x48x16x128xf32, #tpu.memory_space<vmem>>, vector<2x1x16x128xf32>
    %642 = vector.broadcast %51 : vector<1x1x1x128xf32> to vector<2x1x16x128xf32>
    %643 = arith.mulf %641, %642 : vector<2x1x16x128xf32>
    %644 = arith.addf %640, %643 : vector<2x1x16x128xf32>
    %c0_558 = arith.constant 0 : index
    %c45_559 = arith.constant 45 : index
    %c0_560 = arith.constant 0 : index
    %c0_561 = arith.constant 0 : index
    %645 = vector.load %arg8[%c0_558, %c45_559, %c0_560, %c0_561] : memref<2x48x16x128xf32, #tpu.memory_space<vmem>>, vector<2x1x16x128xf32>
    %646 = vector.broadcast %53 : vector<1x1x1x128xf32> to vector<2x1x16x128xf32>
    %647 = arith.mulf %645, %646 : vector<2x1x16x128xf32>
    %648 = arith.addf %644, %647 : vector<2x1x16x128xf32>
    %c0_562 = arith.constant 0 : index
    %c14 = arith.constant 14 : index
    %c0_563 = arith.constant 0 : index
    %c0_564 = arith.constant 0 : index
    %649 = vector.load %arg8[%c0_562, %c14, %c0_563, %c0_564] : memref<2x48x16x128xf32, #tpu.memory_space<vmem>>, vector<2x1x16x128xf32>
    %650 = vector.broadcast %55 : vector<1x1x1x128xf32> to vector<2x1x16x128xf32>
    %651 = arith.mulf %649, %650 : vector<2x1x16x128xf32>
    %652 = arith.addf %648, %651 : vector<2x1x16x128xf32>
    %c0_565 = arith.constant 0 : index
    %c30 = arith.constant 30 : index
    %c0_566 = arith.constant 0 : index
    %c0_567 = arith.constant 0 : index
    %653 = vector.load %arg8[%c0_565, %c30, %c0_566, %c0_567] : memref<2x48x16x128xf32, #tpu.memory_space<vmem>>, vector<2x1x16x128xf32>
    %654 = vector.broadcast %57 : vector<1x1x1x128xf32> to vector<2x1x16x128xf32>
    %655 = arith.mulf %653, %654 : vector<2x1x16x128xf32>
    %656 = arith.addf %652, %655 : vector<2x1x16x128xf32>
    %c0_568 = arith.constant 0 : index
    %c46 = arith.constant 46 : index
    %c0_569 = arith.constant 0 : index
    %c0_570 = arith.constant 0 : index
    %657 = vector.load %arg8[%c0_568, %c46, %c0_569, %c0_570] : memref<2x48x16x128xf32, #tpu.memory_space<vmem>>, vector<2x1x16x128xf32>
    %658 = vector.broadcast %59 : vector<1x1x1x128xf32> to vector<2x1x16x128xf32>
    %659 = arith.mulf %657, %658 : vector<2x1x16x128xf32>
    %660 = arith.addf %656, %659 : vector<2x1x16x128xf32>
    %cst_571 = arith.constant 0.000000e+00 : f32
    %cst_572 = arith.constant 6.000000e+00 : f32
    %661 = vector.broadcast %cst_571 : f32 to vector<2x1x16x128xf32>
    %662 = arith.maximumf %661, %660 : vector<2x1x16x128xf32>
    %663 = vector.broadcast %cst_572 : f32 to vector<2x1x16x128xf32>
    %664 = arith.minimumf %663, %662 : vector<2x1x16x128xf32>
    %665 = vector.shape_cast %664 : vector<2x1x16x128xf32> to vector<32x128xf32>
    %cst_573 = arith.constant dense<0.000000e+00> : vector<32x8xf32>
    %666 = tpu.matmul %665, %64, %cst_573 {dimension_numbers = #tpu.dot_dimension_numbers<[1], [0], [0], [1], [0, 0, 1, 1], [], []>} : vector<32x128xf32>, vector<128x8xf32>, vector<32x8xf32> -> vector<32x8xf32>
    %667 = vector.shape_cast %666 : vector<32x8xf32> to vector<2x1x16x8xf32>
    %c0_574 = arith.constant 0 : index
    %c13_575 = arith.constant 13 : index
    %c0_576 = arith.constant 0 : index
    %c0_577 = arith.constant 0 : index
    %668 = vector.load %arg7[%c0_574, %c13_575, %c0_576, %c0_577] : memref<2x16x16x8xf32, #tpu.memory_space<vmem>>, vector<2x1x16x8xf32>
    tpu.vector_store %arg7[%c0_574, %c13_575, %c0_576, %c0_577], %667 {strides = array<i32>} : memref<2x16x16x8xf32, #tpu.memory_space<vmem>>, vector<2x1x16x8xf32>,
    %c0_578 = arith.constant 0 : index
    %c13_579 = arith.constant 13 : index
    %c0_580 = arith.constant 0 : index
    %c0_581 = arith.constant 0 : index
    %669 = vector.load %arg8[%c0_578, %c13_579, %c0_580, %c0_581] : memref<2x48x16x128xf32, #tpu.memory_space<vmem>>, vector<2x1x16x128xf32>
    %670 = vector.broadcast %43 : vector<1x1x1x128xf32> to vector<2x1x16x128xf32>
    %671 = arith.mulf %669, %670 : vector<2x1x16x128xf32>
    %672 = arith.addf %63, %671 : vector<2x1x16x128xf32>
    %c0_582 = arith.constant 0 : index
    %c29_583 = arith.constant 29 : index
    %c0_584 = arith.constant 0 : index
    %c0_585 = arith.constant 0 : index
    %673 = vector.load %arg8[%c0_582, %c29_583, %c0_584, %c0_585] : memref<2x48x16x128xf32, #tpu.memory_space<vmem>>, vector<2x1x16x128xf32>
    %674 = vector.broadcast %45 : vector<1x1x1x128xf32> to vector<2x1x16x128xf32>
    %675 = arith.mulf %673, %674 : vector<2x1x16x128xf32>
    %676 = arith.addf %672, %675 : vector<2x1x16x128xf32>
    %c0_586 = arith.constant 0 : index
    %c45_587 = arith.constant 45 : index
    %c0_588 = arith.constant 0 : index
    %c0_589 = arith.constant 0 : index
    %677 = vector.load %arg8[%c0_586, %c45_587, %c0_588, %c0_589] : memref<2x48x16x128xf32, #tpu.memory_space<vmem>>, vector<2x1x16x128xf32>
    %678 = vector.broadcast %47 : vector<1x1x1x128xf32> to vector<2x1x16x128xf32>
    %679 = arith.mulf %677, %678 : vector<2x1x16x128xf32>
    %680 = arith.addf %676, %679 : vector<2x1x16x128xf32>
    %c0_590 = arith.constant 0 : index
    %c14_591 = arith.constant 14 : index
    %c0_592 = arith.constant 0 : index
    %c0_593 = arith.constant 0 : index
    %681 = vector.load %arg8[%c0_590, %c14_591, %c0_592, %c0_593] : memref<2x48x16x128xf32, #tpu.memory_space<vmem>>, vector<2x1x16x128xf32>
    %682 = vector.broadcast %49 : vector<1x1x1x128xf32> to vector<2x1x16x128xf32>
    %683 = arith.mulf %681, %682 : vector<2x1x16x128xf32>
    %684 = arith.addf %680, %683 : vector<2x1x16x128xf32>
    %c0_594 = arith.constant 0 : index
    %c30_595 = arith.constant 30 : index
    %c0_596 = arith.constant 0 : index
    %c0_597 = arith.constant 0 : index
    %685 = vector.load %arg8[%c0_594, %c30_595, %c0_596, %c0_597] : memref<2x48x16x128xf32, #tpu.memory_space<vmem>>, vector<2x1x16x128xf32>
    %686 = vector.broadcast %51 : vector<1x1x1x128xf32> to vector<2x1x16x128xf32>
    %687 = arith.mulf %685, %686 : vector<2x1x16x128xf32>
    %688 = arith.addf %684, %687 : vector<2x1x16x128xf32>
    %c0_598 = arith.constant 0 : index
    %c46_599 = arith.constant 46 : index
    %c0_600 = arith.constant 0 : index
    %c0_601 = arith.constant 0 : index
    %689 = vector.load %arg8[%c0_598, %c46_599, %c0_600, %c0_601] : memref<2x48x16x128xf32, #tpu.memory_space<vmem>>, vector<2x1x16x128xf32>
    %690 = vector.broadcast %53 : vector<1x1x1x128xf32> to vector<2x1x16x128xf32>
    %691 = arith.mulf %689, %690 : vector<2x1x16x128xf32>
    %692 = arith.addf %688, %691 : vector<2x1x16x128xf32>
    %c0_602 = arith.constant 0 : index
    %c15 = arith.constant 15 : index
    %c0_603 = arith.constant 0 : index
    %c0_604 = arith.constant 0 : index
    %693 = vector.load %arg8[%c0_602, %c15, %c0_603, %c0_604] : memref<2x48x16x128xf32, #tpu.memory_space<vmem>>, vector<2x1x16x128xf32>
    %694 = vector.broadcast %55 : vector<1x1x1x128xf32> to vector<2x1x16x128xf32>
    %695 = arith.mulf %693, %694 : vector<2x1x16x128xf32>
    %696 = arith.addf %692, %695 : vector<2x1x16x128xf32>
    %c0_605 = arith.constant 0 : index
    %c31 = arith.constant 31 : index
    %c0_606 = arith.constant 0 : index
    %c0_607 = arith.constant 0 : index
    %697 = vector.load %arg8[%c0_605, %c31, %c0_606, %c0_607] : memref<2x48x16x128xf32, #tpu.memory_space<vmem>>, vector<2x1x16x128xf32>
    %698 = vector.broadcast %57 : vector<1x1x1x128xf32> to vector<2x1x16x128xf32>
    %699 = arith.mulf %697, %698 : vector<2x1x16x128xf32>
    %700 = arith.addf %696, %699 : vector<2x1x16x128xf32>
    %c0_608 = arith.constant 0 : index
    %c47 = arith.constant 47 : index
    %c0_609 = arith.constant 0 : index
    %c0_610 = arith.constant 0 : index
    %701 = vector.load %arg8[%c0_608, %c47, %c0_609, %c0_610] : memref<2x48x16x128xf32, #tpu.memory_space<vmem>>, vector<2x1x16x128xf32>
    %702 = vector.broadcast %59 : vector<1x1x1x128xf32> to vector<2x1x16x128xf32>
    %703 = arith.mulf %701, %702 : vector<2x1x16x128xf32>
    %704 = arith.addf %700, %703 : vector<2x1x16x128xf32>
    %cst_611 = arith.constant 0.000000e+00 : f32
    %cst_612 = arith.constant 6.000000e+00 : f32
    %705 = vector.broadcast %cst_611 : f32 to vector<2x1x16x128xf32>
    %706 = arith.maximumf %705, %704 : vector<2x1x16x128xf32>
    %707 = vector.broadcast %cst_612 : f32 to vector<2x1x16x128xf32>
    %708 = arith.minimumf %707, %706 : vector<2x1x16x128xf32>
    %709 = vector.shape_cast %708 : vector<2x1x16x128xf32> to vector<32x128xf32>
    %cst_613 = arith.constant dense<0.000000e+00> : vector<32x8xf32>
    %710 = tpu.matmul %709, %64, %cst_613 {dimension_numbers = #tpu.dot_dimension_numbers<[1], [0], [0], [1], [0, 0, 1, 1], [], []>} : vector<32x128xf32>, vector<128x8xf32>, vector<32x8xf32> -> vector<32x8xf32>
    %711 = vector.shape_cast %710 : vector<32x8xf32> to vector<2x1x16x8xf32>
    %c0_614 = arith.constant 0 : index
    %c14_615 = arith.constant 14 : index
    %c0_616 = arith.constant 0 : index
    %c0_617 = arith.constant 0 : index
    %712 = vector.load %arg7[%c0_614, %c14_615, %c0_616, %c0_617] : memref<2x16x16x8xf32, #tpu.memory_space<vmem>>, vector<2x1x16x8xf32>
    tpu.vector_store %arg7[%c0_614, %c14_615, %c0_616, %c0_617], %711 {strides = array<i32>} : memref<2x16x16x8xf32, #tpu.memory_space<vmem>>, vector<2x1x16x8xf32>,
    %c0_618 = arith.constant 0 : index
    %c14_619 = arith.constant 14 : index
    %c0_620 = arith.constant 0 : index
    %c0_621 = arith.constant 0 : index
    %713 = vector.load %arg8[%c0_618, %c14_619, %c0_620, %c0_621] : memref<2x48x16x128xf32, #tpu.memory_space<vmem>>, vector<2x1x16x128xf32>
    %714 = vector.broadcast %43 : vector<1x1x1x128xf32> to vector<2x1x16x128xf32>
    %715 = arith.mulf %713, %714 : vector<2x1x16x128xf32>
    %716 = arith.addf %63, %715 : vector<2x1x16x128xf32>
    %c0_622 = arith.constant 0 : index
    %c30_623 = arith.constant 30 : index
    %c0_624 = arith.constant 0 : index
    %c0_625 = arith.constant 0 : index
    %717 = vector.load %arg8[%c0_622, %c30_623, %c0_624, %c0_625] : memref<2x48x16x128xf32, #tpu.memory_space<vmem>>, vector<2x1x16x128xf32>
    %718 = vector.broadcast %45 : vector<1x1x1x128xf32> to vector<2x1x16x128xf32>
    %719 = arith.mulf %717, %718 : vector<2x1x16x128xf32>
    %720 = arith.addf %716, %719 : vector<2x1x16x128xf32>
    %c0_626 = arith.constant 0 : index
    %c46_627 = arith.constant 46 : index
    %c0_628 = arith.constant 0 : index
    %c0_629 = arith.constant 0 : index
    %721 = vector.load %arg8[%c0_626, %c46_627, %c0_628, %c0_629] : memref<2x48x16x128xf32, #tpu.memory_space<vmem>>, vector<2x1x16x128xf32>
    %722 = vector.broadcast %47 : vector<1x1x1x128xf32> to vector<2x1x16x128xf32>
    %723 = arith.mulf %721, %722 : vector<2x1x16x128xf32>
    %724 = arith.addf %720, %723 : vector<2x1x16x128xf32>
    %c0_630 = arith.constant 0 : index
    %c15_631 = arith.constant 15 : index
    %c0_632 = arith.constant 0 : index
    %c0_633 = arith.constant 0 : index
    %725 = vector.load %arg8[%c0_630, %c15_631, %c0_632, %c0_633] : memref<2x48x16x128xf32, #tpu.memory_space<vmem>>, vector<2x1x16x128xf32>
    %726 = vector.broadcast %49 : vector<1x1x1x128xf32> to vector<2x1x16x128xf32>
    %727 = arith.mulf %725, %726 : vector<2x1x16x128xf32>
    %728 = arith.addf %724, %727 : vector<2x1x16x128xf32>
    %c0_634 = arith.constant 0 : index
    %c31_635 = arith.constant 31 : index
    %c0_636 = arith.constant 0 : index
    %c0_637 = arith.constant 0 : index
    %729 = vector.load %arg8[%c0_634, %c31_635, %c0_636, %c0_637] : memref<2x48x16x128xf32, #tpu.memory_space<vmem>>, vector<2x1x16x128xf32>
    %730 = vector.broadcast %51 : vector<1x1x1x128xf32> to vector<2x1x16x128xf32>
    %731 = arith.mulf %729, %730 : vector<2x1x16x128xf32>
    %732 = arith.addf %728, %731 : vector<2x1x16x128xf32>
    %c0_638 = arith.constant 0 : index
    %c47_639 = arith.constant 47 : index
    %c0_640 = arith.constant 0 : index
    %c0_641 = arith.constant 0 : index
    %733 = vector.load %arg8[%c0_638, %c47_639, %c0_640, %c0_641] : memref<2x48x16x128xf32, #tpu.memory_space<vmem>>, vector<2x1x16x128xf32>
    %734 = vector.broadcast %53 : vector<1x1x1x128xf32> to vector<2x1x16x128xf32>
    %735 = arith.mulf %733, %734 : vector<2x1x16x128xf32>
    %736 = arith.addf %732, %735 : vector<2x1x16x128xf32>
    %cst_642 = arith.constant 0.000000e+00 : f32
    %cst_643 = arith.constant 6.000000e+00 : f32
    %737 = vector.broadcast %cst_642 : f32 to vector<2x1x16x128xf32>
    %738 = arith.maximumf %737, %736 : vector<2x1x16x128xf32>
    %739 = vector.broadcast %cst_643 : f32 to vector<2x1x16x128xf32>
    %740 = arith.minimumf %739, %738 : vector<2x1x16x128xf32>
    %741 = vector.shape_cast %740 : vector<2x1x16x128xf32> to vector<32x128xf32>
    %cst_644 = arith.constant dense<0.000000e+00> : vector<32x8xf32>
    %742 = tpu.matmul %741, %64, %cst_644 {dimension_numbers = #tpu.dot_dimension_numbers<[1], [0], [0], [1], [0, 0, 1, 1], [], []>} : vector<32x128xf32>, vector<128x8xf32>, vector<32x8xf32> -> vector<32x8xf32>
    %743 = vector.shape_cast %742 : vector<32x8xf32> to vector<2x1x16x8xf32>
    %c0_645 = arith.constant 0 : index
    %c15_646 = arith.constant 15 : index
    %c0_647 = arith.constant 0 : index
    %c0_648 = arith.constant 0 : index
    %744 = vector.load %arg7[%c0_645, %c15_646, %c0_647, %c0_648] : memref<2x16x16x8xf32, #tpu.memory_space<vmem>>, vector<2x1x16x8xf32>
    tpu.vector_store %arg7[%c0_645, %c15_646, %c0_647, %c0_648], %743 {strides = array<i32>} : memref<2x16x16x8xf32, #tpu.memory_space<vmem>>, vector<2x1x16x8xf32>,
    return
  }
  func.func @transform_0(%arg0: i32) -> (i32, i32, i32, i32) {
    %c0_i32 = arith.constant 0 : i32
    %c0_i32_0 = arith.constant 0 : i32
    %c0_i32_1 = arith.constant 0 : i32
    %c0_i32_2 = arith.constant 0 : i32
    return %arg0, %c0_i32, %c0_i32_0, %c0_i32_1 : i32, i32, i32, i32
  }
  func.func @transform_1(%arg0: i32) -> (i32, i32) {
    %c0_i32 = arith.constant 0 : i32
    %c0_i32_0 = arith.constant 0 : i32
    %c0_i32_1 = arith.constant 0 : i32
    return %c0_i32, %c0_i32_0 : i32, i32
  }
  func.func @transform_2(%arg0: i32) -> (i32, i32) {
    %c0_i32 = arith.constant 0 : i32
    %c0_i32_0 = arith.constant 0 : i32
    %c0_i32_1 = arith.constant 0 : i32
    return %c0_i32, %c0_i32_0 : i32, i32
  }
  func.func @transform_3(%arg0: i32) -> (i32, i32) {
    %c0_i32 = arith.constant 0 : i32
    %c0_i32_0 = arith.constant 0 : i32
    %c0_i32_1 = arith.constant 0 : i32
    return %c0_i32, %c0_i32_0 : i32, i32
  }
  func.func @transform_4(%arg0: i32) -> (i32, i32) {
    %c0_i32 = arith.constant 0 : i32
    %c0_i32_0 = arith.constant 0 : i32
    %c0_i32_1 = arith.constant 0 : i32
    return %c0_i32, %c0_i32_0 : i32, i32
  }
  func.func @transform_5(%arg0: i32) -> (i32, i32) {
    %c0_i32 = arith.constant 0 : i32
    %c0_i32_0 = arith.constant 0 : i32
    %c0_i32_1 = arith.constant 0 : i32
    return %c0_i32, %c0_i32_0 : i32, i32
  }
  func.func @transform_6(%arg0: i32) -> (i32, i32, i32, i32) {
    %c0_i32 = arith.constant 0 : i32
    %c0_i32_0 = arith.constant 0 : i32
    %c0_i32_1 = arith.constant 0 : i32
    %c0_i32_2 = arith.constant 0 : i32
    return %arg0, %c0_i32, %c0_i32_0, %c0_i32_1 : i32, i32, i32, i32
  }
}

</mosaic_0001>

<bundles_post_ra>
// kernel: tpu_custom_call.1
= control target key start
LH: loop header
LB: loop body
LE: loop exit
PB: predicated region body
PF: predicated region fallthrough
CT: control target
= control target key end

     0   :  { %s6417_s21 = smov 0   ;;  %s10789_s0 = inlined_call_operand.vmem [shape: f32[4,16,16,5], index: 0, kind: input, shape index: {}]   ;;  %s10790_s1 = inlined_call_operand.vmem [shape: f32[5,128], index: 1, kind: input, shape index: {}]   ;;  %s10791_s2 = inlined_call_operand.vmem [shape: f32[9,128], index: 2, kind: input, shape index: {}]   ;;  %s10792_s3 = inlined_call_operand.vmem [shape: f32[1,128], index: 3, kind: input, shape index: {}]   ;;  %s10793_s4 = inlined_call_operand.vmem [shape: f32[128,8], index: 4, kind: input, shape index: {}]   ;;  %s10794_s5 = inlined_call_operand.vmem [shape: f32[1,8], index: 5, kind: input, shape index: {}]   ;;  %s10795_s6 = inlined_call_operand.vmem [shape: f32[4,16,16,8], index: 6, kind: output, shape index: {}]  }
   0x1 LB: > { %s5030_s22 = sadd.s32 4294967295, %s6380_s21   ;;  %p5034_p0 = scmp.ge.s32.totalorder %s6380_s21, 1  ;;  %s6380_s21 = sphi %s6417_s21, %s16_s21  }
   0x2   : > { %p214_p1 = scmp.lt.s32.totalorder %s6380_s21, 3 }
   0x4   : > { %p215_p2 = pnand %p5034_p0, %p214_p1 }
   0x6   : > { %218 = sbr.rel (%p215_p2) target bundleno = 937 (0x3a9), region = 44 }
   0xb   : > { %v324_v0 = vld [vmem:[%s10790_s1] sm:$0x1f]  ;;  %vm518_vm0 = vcmask 1044480   ;;  %s5035_s24 = sshll.u32 %s5030_s22, 1  ;;  %v6431_v1 = vld [vmem:[%s10793_s4 + $0x78] sm:$0xff]  ;;  %vm325_vm1 = vcmask 39936  }
   0xc   : > { %5557 = vmatprep.subr.msk.mxu0 %vm518_vm0, %v324_v0  ;;  %p247_p3 = scmp.lt.s32.totalorder %s5035_s24, 3  ;;  %5655 = vmatprep.subr.mxu1 %v6431_v1  ;;  %v6518_v37 = vld [vmem:[%s10793_s4 + $0x70] sm:$0xff]  ;;  %v6529_v40 = vld [vmem:[%s10793_s4 + $0x68] sm:$0xff]  ;;  %v6543_v43 = vld [vmem:[%s10793_s4 + $0x60] sm:$0xff]  ;;  %vm1859_vm6 = vcmask 64512  }
   0xd   : > { %5558 = vmatpush3.msk.msra.mxu0 %vm518_vm0, %v324_v0  ;;  %5656 = vmatpush3.msra.mxu1 %v6431_v1  ;;  %v6553_v44 = vld [vmem:[%s10793_s4 + $0x58] sm:$0xff]  ;;  %v6563_v47 = vld [vmem:[%s10793_s4 + $0x50] sm:$0xff]  ;;  %v6573_v48 = vld [vmem:[%s10793_s4 + $0x48] sm:$0xff] }
   0xe   : > { %s11797_s24 = smov (!%p247_p3, %s5035_s24), 3  ;;  %5807 = vmatprep.subr.mxu0 %v6431_v1  ;;  %5657 = vmatprep.subr.mxu1 %v6518_v37  ;;  %v6583_v51 = vld [vmem:[%s10793_s4 + $0x40] sm:$0xff]  ;;  %v6593_v52 = vld [vmem:[%s10793_s4 + $0x38] sm:$0xff]  ;;  %v6606_v55 = vld [vmem:[%s10793_s4 + $0x30] sm:$0xff] }
   0xf   : > { %s5170_s27 = sshll.u32 %s11797_s24, 8  ;;  %5658 = vmatpush3.msra.mxu1 %v6518_v37  ;;  %11026 = vst [vmem:[#allocation3_spill] sm:$0xff] %v6583_v51  ;;  %11027 = vst [vmem:[#allocation4_spill] sm:$0xff] %v6593_v52  ;;  %v6619_v58 = vld [vmem:[%s10793_s4 + $0x28] sm:$0xff]  ;;  %v6632_v61 = vld [vmem:[%s10793_s4 + $0x20] sm:$0xff] }
  0x10   : > { %s6444_s30 = scalar_lea.vmem %s10789_s0, %s5170_s27  ;;  %5659 = vmatprep.subr.mxu1 %v6529_v40  ;;  %11028 = vst [vmem:[#allocation5_spill] sm:$0xff] %v6606_v55  ;;  %11029 = vst [vmem:[#allocation6_spill] sm:$0xff] %v6619_v58  ;;  %v6643_v0 = vld [vmem:[%s10793_s4 + $0x18] sm:$0xff]  ;;  %s9766_s12 = scalar_lea.vmem %s10795_s6, %s5170_s27 }
  0x11   : > { %v260_v2 = vld [vmem:[%s6444_s30] sm:$0xff]  ;;  %v261_v3 = vld [vmem:[%s6444_s30 + $0x8] sm:$0xff]  ;;  %v262_v4 = vld [vmem:[%s6444_s30 + $0x10] sm:$0xff]  ;;  %5660 = vmatpush3.msra.mxu1 %v6529_v40  ;;  %11030 = vst [vmem:[#allocation7_spill] sm:$0xff] %v6632_v61 }
  0x12   : > { %5559 = vmatprep.mubr.msk.f32.mxu0 %vm325_vm1, %v260_v2  ;;  %v263_v5 = vld [vmem:[%s6444_s30 + $0x18] sm:$0xff]  ;;  %v264_v6 = vld [vmem:[%s6444_s30 + $0x20] sm:$0xff]  ;;  %v265_v7 = vld [vmem:[%s6444_s30 + $0x28] sm:$0xff]  ;;  %5661 = vmatprep.subr.mxu1 %v6543_v43  ;;  %11031 = vst [vmem:[#allocation8_spill] sm:$0xff] %v6643_v0 }
  0x13   : > { %5560 = vmatmul.mubr.msk.f32.vlgmr.msra.gmra.mxu0 %vm325_vm1, %v261_v3  ;;  %v266_v8 = vld [vmem:[%s6444_s30 + $0x30] sm:$0xff]  ;;  %v267_v9 = vld [vmem:[%s6444_s30 + $0x38] sm:$0xff]  ;;  %v268_v10 = vld [vmem:[%s6444_s30 + $0x40] sm:$0xff]  ;;  %5662 = vmatpush3.msra.mxu1 %v6543_v43 }
  0x14   : > { %5562 = vmatprep.mubr.msk.f32.mxu0 %vm325_vm1, %v262_v4  ;;  %5808 = vmatpush3.msra.mxu0 %v6431_v1  ;;  %v269_v11 = vld [vmem:[%s6444_s30 + $0x48] sm:$0xff]  ;;  %v270_v12 = vld [vmem:[%s6444_s30 + $0x50] sm:$0xff]  ;;  %v271_v13 = vld [vmem:[%s6444_s30 + $0x58] sm:$0xff] }
  0x15   : > { %v272_v14 = vld [vmem:[%s6444_s30 + $0x60] sm:$0xff]  ;;  %v273_v15 = vld [vmem:[%s6444_s30 + $0x68] sm:$0xff]  ;;  %v274_v16 = vld [vmem:[%s6444_s30 + $0x70] sm:$0xff]  ;;  %5809 = vmatprep.subr.mxu0 %v6518_v37  ;;  %5663 = vmatprep.subr.mxu1 %v6553_v44 }
  0x16   : > { %v275_v17 = vld [vmem:[%s6444_s30 + $0x78] sm:$0xff]  ;;  %v276_v18 = vld [vmem:[%s6444_s30 + $0x80] sm:$0xff]  ;;  %v277_v19 = vld [vmem:[%s6444_s30 + $0x88] sm:$0xff]  ;;  %5810 = vmatpush3.msra.mxu0 %v6518_v37  ;;  %5664 = vmatpush3.msra.mxu1 %v6553_v44 }
  0x17   : > { %5563 = vmatmul.mubr.msk.f32.gmra.mxu0 %vm325_vm1, %v263_v5  ;;  %v278_v20 = vld [vmem:[%s6444_s30 + $0x90] sm:$0xff]  ;;  %v279_v21 = vld [vmem:[%s6444_s30 + $0x98] sm:$0xff]  ;;  %v280_v22 = vld [vmem:[%s6444_s30 + $0xa0] sm:$0xff]  ;;  %5811 = vmatprep.subr.mxu0 %v6529_v40 }
  0x18   : > { %5565 = vmatprep.mubr.msk.f32.mxu0 %vm325_vm1, %v264_v6  ;;  %v281_v23 = vld [vmem:[%s6444_s30 + $0xa8] sm:$0xff]  ;;  %v282_v24 = vld [vmem:[%s6444_s30 + $0xb0] sm:$0xff]  ;;  %v283_v25 = vld [vmem:[%s6444_s30 + $0xb8] sm:$0xff]  ;;  %5812 = vmatpush3.msra.mxu0 %v6529_v40 }
  0x19   : > { %v284_v26 = vld [vmem:[%s6444_s30 + $0xc0] sm:$0xff]  ;;  %v285_v27 = vld [vmem:[%s6444_s30 + $0xc8] sm:$0xff]  ;;  %v286_v28 = vld [vmem:[%s6444_s30 + $0xd0] sm:$0xff]  ;;  %5813 = vmatprep.subr.mxu0 %v6543_v43  ;;  %5665 = vmatprep.subr.mxu1 %v6563_v47 }
  0x1a   : > { %v287_v29 = vld [vmem:[%s6444_s30 + $0xd8] sm:$0xff]  ;;  %v288_v30 = vld [vmem:[%s6444_s30 + $0xe0] sm:$0xff]  ;;  %v289_v31 = vld [vmem:[%s6444_s30 + $0xe8] sm:$0xff]  ;;  %5814 = vmatpush3.msra.mxu0 %v6543_v43  ;;  %5666 = vmatpush3.msra.mxu1 %v6563_v47 }
  0x1b   : > { %5566 = vmatmul.mubr.msk.f32.gmra.mxu0 %vm325_vm1, %v265_v7  ;;  %v290_v32 = vld [vmem:[%s6444_s30 + $0xf0] sm:$0xff]  ;;  %v291_v33 = vld [vmem:[%s6444_s30 + $0xf8] sm:$0xff]  ;;  %v292_v34 = vld [vmem:[%s6444_s30 + $0x100] sm:$0xff]  ;;  %5815 = vmatprep.subr.mxu0 %v6553_v44 }
  0x1c   : > { %5568 = vmatprep.mubr.msk.f32.mxu0 %vm325_vm1, %v266_v8  ;;  %v293_v35 = vld [vmem:[%s6444_s30 + $0x108] sm:$0xff]  ;;  %v294_v36 = vld [vmem:[%s6444_s30 + $0x110] sm:$0xff]  ;;  %v295_v38 = vld [vmem:[%s6444_s30 + $0x118] sm:$0xff]  ;;  %5667 = vmatprep.subr.mxu1 %v6573_v48 }
  0x1d   : > { %v296_v39 = vld [vmem:[%s6444_s30 + $0x120] sm:$0xff]  ;;  %v297_v41 = vld [vmem:[%s6444_s30 + $0x128] sm:$0xff]  ;;  %v298_v42 = vld [vmem:[%s6444_s30 + $0x130] sm:$0xff]  ;;  %5668 = vmatpush3.msra.mxu1 %v6573_v48  ;;  %5816 = vmatpush3.msra.mxu0 %v6553_v44 }
  0x1e   : > { %v299_v45 = vld [vmem:[%s6444_s30 + $0x138] sm:$0xff]  ;;  %v300_v46 = vld [vmem:[%s6444_s30 + $0x140] sm:$0xff]  ;;  %v301_v49 = vld [vmem:[%s6444_s30 + $0x148] sm:$0xff]  ;;  %5669 = vmatprep.subr.mxu1 %v6583_v51  ;;  %5817 = vmatprep.subr.mxu0 %v6563_v47 }
  0x1f   : > { %5569 = vmatmul.mubr.msk.f32.gmra.mxu0 %vm325_vm1, %v267_v9  ;;  %v302_v50 = vld [vmem:[%s6444_s30 + $0x150] sm:$0xff]  ;;  %5670 = vmatpush3.msra.mxu1 %v6583_v51  ;;  %v303_v53 = vld [vmem:[%s6444_s30 + $0x158] sm:$0xff]  ;;  %v304_v54 = vld [vmem:[%s6444_s30 + $0x160] sm:$0xff] }
  0x20   : > { %5571 = vmatprep.mubr.msk.f32.mxu0 %vm325_vm1, %v268_v10  ;;  %5671 = vmatprep.subr.mxu1 %v6593_v52  ;;  %v305_v56 = vld [vmem:[%s6444_s30 + $0x168] sm:$0xff]  ;;  %v306_v57 = vld [vmem:[%s6444_s30 + $0x170] sm:$0xff]  ;;  %v307_v59 = vld [vmem:[%s6444_s30 + $0x178] sm:$0xff] }
  0x21   : > { %5672 = vmatpush3.msra.mxu1 %v6593_v52  ;;  %5818 = vmatpush3.msra.mxu0 %v6563_v47  ;;  %v308_v60 = vld [vmem:[%s6444_s30 + $0x180] sm:$0xff]  ;;  %v309_v62 = vld [vmem:[%s6444_s30 + $0x188] sm:$0xff]  ;;  %v310_v63 = vld [vmem:[%s6444_s30 + $0x190] sm:$0xff] }
  0x22   : > { %5819 = vmatprep.subr.mxu0 %v6573_v48  ;;  %5673 = vmatprep.subr.mxu1 %v6606_v55  ;;  %v311_v2 = vld [vmem:[%s6444_s30 + $0x198] sm:$0xff]  ;;  %v6654_v3 = vld [vmem:[%s10793_s4 + $0x10] sm:$0xff]  ;;  %v312_v4 = vld [vmem:[%s6444_s30 + $0x1a0] sm:$0xff] }
  0x23   : > { %5572 = vmatmul.mubr.msk.f32.gmra.mxu0 %vm325_vm1, %v269_v11  ;;  %5674 = vmatpush3.msra.mxu1 %v6606_v55  ;;  %11032 = vst [vmem:[#allocation9_spill] sm:$0xff] %v6654_v3  ;;  %v6663_v5 = vld [vmem:[%s10793_s4 + $0x8] sm:$0xff]  ;;  %v314_v7 = vld [vmem:[%s6444_s30 + $0x1b0] sm:$0xff]  ;;  %v6676_v8 = vld [vmem:[%s10793_s4] sm:$0xff] }
  0x24   : > { %5574 = vmatprep.mubr.msk.f32.mxu0 %vm325_vm1, %v270_v12  ;;  %5820 = vmatpush3.msra.mxu0 %v6573_v48  ;;  %11033 = vst [vmem:[#allocation10_spill] sm:$0xff] %v6663_v5  ;;  %v313_v6 = vld [vmem:[%s6444_s30 + $0x1a8] sm:$0xff]  ;;  %11034 = vst [vmem:[#allocation11_spill] sm:$0xff] %v6676_v8  ;;  %v315_v9 = vld [vmem:[%s6444_s30 + $0x1b8] sm:$0xff] }
  0x25   : > { %5821 = vmatprep.subr.mxu0 %v6583_v51  ;;  %5675 = vmatprep.subr.mxu1 %v6619_v58  ;;  %v316_v10 = vld [vmem:[%s6444_s30 + $0x1c0] sm:$0xff]  ;;  %v317_v11 = vld [vmem:[%s6444_s30 + $0x1c8] sm:$0xff]  ;;  %v318_v12 = vld [vmem:[%s6444_s30 + $0x1d0] sm:$0xff] }
  0x26   : > { %5676 = vmatpush3.msra.mxu1 %v6619_v58  ;;  %5822 = vmatpush3.msra.mxu0 %v6583_v51 }
  0x27   : > { %5575 = vmatmul.mubr.msk.f32.gmra.mxu0 %vm325_vm1, %v271_v13  ;;  %5823 = vmatprep.subr.mxu0 %v6593_v52  ;;  %v319_v13 = vld [vmem:[%s6444_s30 + $0x1d8] sm:$0xff] }
  0x28   : > { %5577 = vmatprep.mubr.msk.f32.mxu0 %vm325_vm1, %v272_v14  ;;  %5677 = vmatprep.subr.mxu1 %v6632_v61  ;;  %v320_v14 = vld [vmem:[%s6444_s30 + $0x1e0] sm:$0xff] }
  0x29   : > { %5678 = vmatpush3.msra.mxu1 %v6632_v61  ;;  %5824 = vmatpush3.msra.mxu0 %v6593_v52 }
  0x2a   : > { %5825 = vmatprep.subr.mxu0 %v6606_v55  ;;  %5679 = vmatprep.subr.mxu1 %v6643_v0 }
  0x2b   : > { %5578 = vmatmul.mubr.msk.f32.gmra.mxu0 %vm325_vm1, %v273_v15  ;;  %5680 = vmatpush3.msra.mxu1 %v6643_v0  ;;  %v321_v15 = vld [vmem:[%s6444_s30 + $0x1e8] sm:$0xff] }
  0x2c   : > { %5580 = vmatprep.mubr.msk.f32.mxu0 %vm325_vm1, %v274_v16  ;;  %5681 = vmatprep.subr.mxu1 %v6654_v3  ;;  %v322_v16 = vld [vmem:[%s6444_s30 + $0x1f0] sm:$0xff] }
  0x2d   : > { %5826 = vmatpush3.msra.mxu0 %v6606_v55  ;;  %5682 = vmatpush3.msra.mxu1 %v6654_v3 }
  0x2e   : > { %5827 = vmatprep.subr.mxu0 %v6619_v58  ;;  %5683 = vmatprep.subr.mxu1 %v6663_v5 }
  0x2f   : > { %5581 = vmatmul.mubr.msk.f32.gmra.mxu0 %vm325_vm1, %v275_v17  ;;  %5684 = vmatpush3.msra.mxu1 %v6663_v5  ;;  %v323_v17 = vld [vmem:[%s6444_s30 + $0x1f8] sm:$0xff] }
  0x30   : > { %5583 = vmatprep.mubr.msk.f32.mxu0 %vm325_vm1, %v276_v18  ;;  %5828 = vmatpush3.msra.mxu0 %v6619_v58  ;;  %v1035_v18 = vlaneseq }
  0x31   : > { %5829 = vmatprep.subr.mxu0 %v6632_v61  ;;  %5685 = vmatprep.subr.mxu1 %v6676_v8 }
  0x32   : > { %5686 = vmatpush3.msra.mxu1 %v6676_v8  ;;  %5830 = vmatpush3.msra.mxu0 %v6632_v61 }
  0x33   : > { %5584 = vmatmul.mubr.msk.f32.gmra.mxu0 %vm325_vm1, %v277_v19  ;;  %5693 = vmatprep.subr.mxu1 %v6431_v1  ;;  %v6712_v19 = vshrl.u32 %v1035_v18, 7 }
  0x34   : > { %5586 = vmatprep.mubr.msk.f32.mxu0 %vm325_vm1, %v278_v20  ;;  %5831 = vmatprep.subr.mxu0 %v6643_v0 }
  0x35   : > { %5832 = vmatpush3.msra.mxu0 %v6643_v0  ;;  %vm1102_vm2 = vcmp.lt.s32.totalorder %v6712_v19, 1  ;;  %vm1436_vm4 = vcmp.lt.s32.totalorder %v6712_v19, 7 }
  0x36   : > { %5833 = vmatprep.subr.mxu0 %v6654_v3 }
  0x37   : > { %5587 = vmatmul.mubr.msk.f32.gmra.mxu0 %vm325_vm1, %v279_v21 }
  0x38   : > { %5589 = vmatprep.mubr.msk.f32.mxu0 %vm325_vm1, %v280_v22  ;;  %5834 = vmatpush3.msra.mxu0 %v6654_v3 }
  0x39   : > { %5835 = vmatprep.subr.mxu0 %v6663_v5 }
  0x3a   : > { %5836 = vmatpush3.msra.mxu0 %v6663_v5 }
  0x3b   : > { %5590 = vmatmul.mubr.msk.f32.gmra.mxu0 %vm325_vm1, %v281_v23  ;;  %5837 = vmatprep.subr.mxu0 %v6676_v8  ;;  %v1689_v23 = vsub.s32 4, %v6712_v19 }
  0x3c   : > { %5592 = vmatprep.mubr.msk.f32.mxu0 %vm325_vm1, %v282_v24  ;;  %5838 = vmatpush3.msra.mxu0 %v6676_v8  ;;  %v1870_v24 = vsub.s32 0, %v6712_v19 }
  0x3d   : > { %5883 = vmatprep.subr.mxu0 %v6431_v1 }
  0x3f   : > { %5593 = vmatmul.mubr.msk.f32.gmra.mxu0 %vm325_vm1, %v283_v25 }
  0x40   : > { %5595 = vmatprep.mubr.msk.f32.mxu0 %vm325_vm1, %v284_v26  ;;  %v1642_v26 = vld [vmem:[%s10791_s2] sm:$0xff] }
  0x43   : > { %5596 = vmatmul.mubr.msk.f32.gmra.mxu0 %vm325_vm1, %v285_v27  ;;  %v6722_v27 = vadd.s32 4294967295, %v6712_v19 }
  0x44   : > { %5598 = vmatprep.mubr.msk.f32.mxu0 %vm325_vm1, %v286_v28 }
  0x45   : > { %vm1169_vm3 = vcmp.ge.s32.totalorder %v6722_v27, 0 }
  0x47   : > { %5599 = vmatmul.mubr.msk.f32.gmra.mxu0 %vm325_vm1, %v287_v29  ;;  %v1886_v29 = vsub.s32 1, %v6712_v19 }
  0x48   : > { %5601 = vmatprep.mubr.msk.f32.mxu0 %vm325_vm1, %v288_v30  ;;  %v1673_v30 = vsub.s32 3, %v6712_v19 }
  0x4b   : > { %5602 = vmatmul.mubr.msk.f32.gmra.mxu0 %vm325_vm1, %v289_v31  ;;  %v1739_v31 = vsub.s32 7, %v6712_v19 }
  0x4c   : > { %5604 = vmatprep.mubr.msk.f32.mxu0 %vm325_vm1, %v290_v32 }
  0x4f   : > { %5605 = vmatmul.mubr.msk.f32.gmra.mxu0 %vm325_vm1, %v291_v33 }
  0x50   : > { %5607 = vmatprep.mubr.msk.f32.mxu0 %vm325_vm1, %v292_v34  ;;  %v1037_v34 = vadd.s32 8, %v6712_v19 }
  0x53   : > { %5608 = vmatmul.mubr.msk.f32.gmra.mxu0 %vm325_vm1, %v293_v35  ;;  %v6728_v35 = vrot.slane %v1642_v26, %v1689_v23 }
  0x54   : > { %5610 = vmatprep.mubr.msk.f32.mxu0 %vm325_vm1, %v294_v36  ;;  %v6731_v36 = vrot.slane %v1642_v26, %v1870_v24 }
  0x57   : > { %5611 = vmatmul.mubr.msk.f32.gmra.mxu0 %vm325_vm1, %v295_v38  ;;  %v1902_v38 = vsub.s32 2, %v6712_v19 }
  0x58   : > { %5613 = vmatprep.mubr.msk.f32.mxu0 %vm325_vm1, %v296_v39 }
  0x5b   : > { %5614 = vmatmul.mubr.msk.f32.gmra.mxu0 %vm325_vm1, %v297_v41 }
  0x5c   : > { %5616 = vmatprep.mubr.msk.f32.mxu0 %vm325_vm1, %v298_v42 }
  0x5f   : > { %5617 = vmatmul.mubr.msk.f32.gmra.mxu0 %vm325_vm1, %v299_v45 }
  0x60   : > { %5619 = vmatprep.mubr.msk.f32.mxu0 %vm325_vm1, %v300_v46  ;;  %v6736_v46 = vrot.slane %v1642_v26, %v1886_v29 }
  0x62   : > { %11035 = vst [vmem:[#allocation12_spill] sm:$0xff] %v6736_v46 }
  0x63   : > { %5620 = vmatmul.mubr.msk.f32.gmra.mxu0 %vm325_vm1, %v301_v49  ;;  %v6739_v49 = vrot.slane %v1642_v26, %v1673_v30 }
  0x64   : > { %5622 = vmatprep.mubr.msk.f32.mxu0 %vm325_vm1, %v302_v50  ;;  %v6741_v50 = vrot.slane %v1642_v26, %v1739_v31 }
  0x67   : > { %5623 = vmatmul.mubr.msk.f32.gmra.mxu0 %vm325_vm1, %v303_v53 }
  0x68   : > { %5625 = vmatprep.mubr.msk.f32.mxu0 %vm325_vm1, %v304_v54 }
  0x6b   : > { %5626 = vmatmul.mubr.msk.f32.gmra.mxu0 %vm325_vm1, %v305_v56  ;;  %v6750_v56 = vld [vmem:[%s10792_s3] ss:$0 sm:$0xff] }
  0x6c   : > { %5628 = vmatprep.mubr.msk.f32.mxu0 %vm325_vm1, %v306_v57 }
  0x6f   : > { %5629 = vmatmul.mubr.msk.f32.gmra.mxu0 %vm325_vm1, %v307_v59 }
  0x70   : > { %5631 = vmatprep.mubr.msk.f32.mxu0 %vm325_vm1, %v308_v60  ;;  %v6752_v60 = vadd.s32 1, %v1037_v34 }
  0x72   : > { %vm1506_vm5 = vcmp.lt.s32.totalorder %v6752_v60, 16 }
  0x73   : > { %5632 = vmatmul.mubr.msk.f32.gmra.mxu0 %vm325_vm1, %v309_v62 }
  0x74   : > { %5634 = vmatprep.mubr.msk.f32.mxu0 %vm325_vm1, %v310_v63 }
  0x77   : > { %5635 = vmatmul.mubr.msk.f32.gmra.mxu0 %vm325_vm1, %v311_v2 }
  0x78   : > { %5637 = vmatprep.mubr.msk.f32.mxu0 %vm325_vm1, %v312_v4  ;;  %v1705_v4 = vsub.s32 5, %v6712_v19 }
  0x7a   : > { %v6779_v24 = vrot.slane %v1642_v26, %v1705_v4 }
  0x7b   : > { %5638 = vmatmul.mubr.msk.f32.gmra.mxu0 %vm325_vm1, %v313_v6 }
  0x7c   : > { %5640 = vmatprep.mubr.msk.f32.mxu0 %vm325_vm1, %v314_v7 }
  0x7f   : > { %5641 = vmatmul.mubr.msk.f32.gmra.mxu0 %vm325_vm1, %v315_v9 }
  0x80   : > { %5643 = vmatprep.mubr.msk.f32.mxu0 %vm325_vm1, %v316_v10  ;;  %v6764_v10 = vrot.slane %v1642_v26, %v1902_v38 }
  0x83   : > { %5644 = vmatmul.mubr.msk.f32.gmra.mxu0 %vm325_vm1, %v317_v11  ;;  %v1722_v11 = vsub.s32 6, %v6712_v19 }
  0x84   : > { %5646 = vmatprep.mubr.msk.f32.mxu0 %vm325_vm1, %v318_v12 }
  0x87   : > { %5647 = vmatmul.mubr.msk.f32.gmra.mxu0 %vm325_vm1, %v319_v13 }
  0x88   : > { %5649 = vmatprep.mubr.msk.f32.mxu0 %vm325_vm1, %v320_v14 }
  0x8b   : > { %5650 = vmatmul.mubr.msk.f32.gmra.mxu0 %vm325_vm1, %v321_v15 }
  0x8c   : > { %5652 = vmatprep.mubr.msk.f32.mxu0 %vm325_vm1, %v322_v16 }
  0x8f   : > { %5653 = vmatmul.mubr.msk.f32.gmra.mxu0 %vm325_vm1, %v323_v17 }
  0xd3   : > { %v5561_v20 = vpop.f32.mrf.mxu0 }
  0xd4   : > { %v908_v21 = vmax.f32 %v5561_v20, 0.0 }
  0xd5   : > { %v588_v22 = vpop.f32.mrf.mxu0 }
  0xd6   : > { %v907_v1 = vmax.f32 %v588_v22, 0.0  ;;  %v6716_v25 = vmin.f32 %v908_v21, 6.0 }
  0xd7   : > { %v5564_v28 = vpop.f32.mrf.mxu0 }
  0xd8   : > { %v971_v32 = vmin.f32 %v907_v1, 6.0  ;;  %v1070_v39 = vrot.slane %v6716_v25, 7  ;;  %v910_v57 = vmax.f32 %v5564_v28, 0.0  ;;  %v1889_v12 = vmul.f32 %v6736_v46, %v6716_v25 }
  0xd9   : > { %v598_v33 = vpop.f32.mrf.mxu0  ;;  %v1404_v22 = vrot.slane %v6716_v25, 1  ;;  %v6790_v34 = vmul.f32 %v6728_v35, %v6716_v25 }
  0xda   : > { %v1038_v41 = vrot.slane %v971_v32, 7  ;;  %v909_v42 = vmax.f32 %v598_v33, 0.0  ;;  %v1372_v13 = vrot.slane %v971_v32, 1  ;;  %v1888_v17 = vmul.f32 %v6736_v46, %v971_v32 }
  0xdb   : > { %v5567_v45 = vpop.f32.mrf.mxu0  ;;  %v6772_v18 = vmin.f32 %v910_v57, 6.0  ;;  %v6786_v33 = vrot.slane %v1642_v26, %v1722_v11 }
  0xdc   : > { %v1103_v53 = vsel %vm1102_vm2, %v1038_v41, %v1070_v39  ;;  %v1135_v54 = vsel %vm1102_vm2, %v1070_v39, %v1038_v41  ;;  %v912_v2 = vmax.f32 %v5567_v45, 0.0  ;;  %v6762_v7 = vmin.f32 %v909_v42, 6.0 }
  0xdd   : > { %v608_v59 = vpop.f32.mrf.mxu0  ;;  %v6756_v62 = vsel %vm1169_vm3, %v1135_v54, 0.0  ;;  %v1873_v63 = vmul.f32 %v6731_v36, %v1103_v53  ;;  %v6794_v38 = vsel %vm1436_vm4, %v1404_v22, %v1372_v13  ;;  %v6797_v39 = vmul.f32 %v6728_v35, %v971_v32 }
  0xde   : > { %v1872_v6 = vmul.f32 %v6731_v36, %v6756_v62  ;;  %v911_v15 = vmax.f32 %v608_v59, 0.0  ;;  %v6777_v1 = vmin.f32 %v912_v2, 6.0  ;;  %v10796_v29 = vrot.slane %v6762_v7, 7 }
  0xdf   : > { %v5570_v9 = vpop.f32.mrf.mxu0  ;;  %v1877_v14 = vadd.f32 %v6750_v56, %v1873_v63  ;;  %v10797_v42 = vrot.slane %v6772_v18, 7  ;;  %v6805_v57 = vsel %vm1436_vm4, %v1372_v13, %v1404_v22  ;;  %v6808_v25 = vmul.f32 %v6739_v49, %v1103_v53 }
  0xe0   : > { %v1876_v16 = vadd.f32 %v6750_v56, %v1872_v6  ;;  %v914_v20 = vmax.f32 %v5570_v9, 0.0  ;;  %11036 = vst [vmem:[#allocation13_spill] sm:$0xff] %v6777_v1  ;;  %v6784_v30 = vmin.f32 %v911_v15, 6.0  ;;  %v6812_v59 = vmul.f32 %v6728_v35, %v6772_v18 }
  0xe1   : > { %v618_v21 = vpop.f32.mrf.mxu0  ;;  %v6775_v23 = vadd.f32 %v1889_v12, %v1877_v14  ;;  %v6816_v32 = vmul.f32 %v6736_v46, %v6772_v18  ;;  %v10798_v63 = vrot.slane %v6777_v1, 7  ;;  %v1136_v53 = vsel %vm1102_vm2, %v10797_v42, %v10796_v29 }
  0xe2   : > { %v6781_v28 = vadd.f32 %v1888_v17, %v1876_v16  ;;  %11037 = vst [vmem:[#allocation14_spill] sm:$0xff] %v6784_v30  ;;  %v913_v41 = vmax.f32 %v618_v21, 0.0  ;;  %v10799_v45 = vrot.slane %v6784_v30, 7  ;;  %v6801_v54 = vmin.f32 %v914_v20, 6.0 }
  0xe3   : > { %v5573_v31 = vpop.f32.mrf.mxu0  ;;  %v6831_v12 = vmul.f32 %v6741_v50, %v6777_v1  ;;  %v6845_v15 = vmul.f32 %v6728_v35, %v6777_v1  ;;  %v6849_v16 = vmul.f32 %v6736_v46, %v6777_v1  ;;  %v6857_v29 = vsel %vm1169_vm3, %v1136_v53, 0.0 }
  0xe4   : > { %v6819_v2 = vmin.f32 %v913_v41, 6.0  ;;  %v916_v4 = vmax.f32 %v5573_v31, 0.0  ;;  %v6839_v13 = vsel %vm1102_vm2, %v10799_v45, %v10798_v63  ;;  %v1073_v17 = vrot.slane %v6801_v54, 7 }
  0xe5   : > { %v628_v26 = vpop.f32.mrf.mxu0  ;;  %11039 = vst [vmem:[#allocation16_spill] sm:$0xff] %v6831_v12  ;;  %11040 = vst [vmem:[#allocation17_spill] sm:$0xff] %v6849_v16  ;;  %v2299_v42 = vmul.f32 %v6731_v36, %v6839_v13  ;;  %v6875_v53 = vmul.f32 %v6736_v46, %v6784_v30  ;;  %v1407_v11 = vrot.slane %v6801_v54, 1  ;;  %v6880_v22 = vmul.f32 %v6741_v50, %v6801_v54 }
  0xe6   : > { %11038 = vst [vmem:[#allocation15_spill] sm:$0xff] %v6819_v2  ;;  %v1041_v20 = vrot.slane %v6819_v2, 7  ;;  %v1375_v31 = vrot.slane %v6819_v2, 1  ;;  %v915_v41 = vmax.f32 %v628_v26, 0.0  ;;  %v6867_v63 = vmin.f32 %v916_v4, 6.0 }
  0xe7   : > { %v5576_v6 = vpop.f32.mrf.mxu0  ;;  %v6871_v26 = vmul.f32 %v6728_v35, %v6784_v30  ;;  %11044 = vst [vmem:[#allocation21_spill] sm:$0xff] %v6875_v53  ;;  %11045 = vst [vmem:[#allocation22_spill] sm:$0xff] %v6880_v22  ;;  %v11048_v53 = vrot.slane %v6784_v30, 1  ;;  %v11049_v12 = vrot.slane %v6777_v1, 1  ;;  %v6907_v5 = vadd.f32 %v6750_v56, %v2299_v42 }
  0xe8   : > { %v6863_v9 = vsel %vm1102_vm2, %v1041_v20, %v1073_v17  ;;  %v1138_v14 = vsel %vm1102_vm2, %v1073_v17, %v1041_v20  ;;  %11042 = vst [vmem:[#allocation19_spill] sm:$0xff] %v6867_v63  ;;  %v6884_v17 = vmul.f32 %v6728_v35, %v6801_v54  ;;  %v6904_v8 = vmin.f32 %v915_v41, 6.0 }
  0xe9   : > { %v638_v21 = vpop.f32.mrf.mxu0  ;;  %11041 = vst [vmem:[#allocation18_spill] sm:$0xff] %v6863_v9  ;;  %11043 = vst [vmem:[#allocation20_spill] sm:$0xff] %v6871_v26  ;;  %v6888_v4 = vsel %vm1169_vm3, %v1138_v14, 0.0  ;;  %v2508_v20 = vmul.f32 %v6731_v36, %v6863_v9  ;;  %v918_v26 = vmax.f32 %v5576_v6, 0.0  ;;  %v6898_v22 = vsel %vm1436_vm4, %v11049_v12, %v11048_v53 }
  0xea   : > { %11046 = vst [vmem:[#allocation23_spill] sm:$0xff] %v6884_v17  ;;  %11047 = vst [vmem:[#allocation24_spill] sm:$0xff] %v6888_v4  ;;  %v2520_v17 = vmul.f32 %v6736_v46, %v6801_v54  ;;  %v1472_v14 = vsel %vm1436_vm4, %v1407_v11, %v1375_v31  ;;  %v6911_v6 = vmul.f32 %v6728_v35, %v6819_v2  ;;  %v1074_v12 = vrot.slane %v6867_v63, 7 }
  0xeb   : > { %v5579_v45 = vpop.f32.mrf.mxu0  ;;  %11050 = vst [vmem:[#allocation25_spill] sm:$0xff] %v6898_v22  ;;  %11051 = vst [vmem:[#allocation26_spill] sm:$0xff] %v6904_v8  ;;  %v2519_v3 = vmul.f32 %v6736_v46, %v6819_v2  ;;  %v2507_v54 = vmul.f32 %v6731_v36, %v6888_v4  ;;  %v1042_v22 = vrot.slane %v6904_v8, 7  ;;  %v10819_v42 = vrot.slane %v6904_v8, 1 }
  0xec   : > { %11052 = vst [vmem:[#allocation27_spill] sm:$0xff] %v6907_v5  ;;  %11053 = vst [vmem:[#allocation28_spill] sm:$0xff] %v6911_v6  ;;  %v6925_v5 = vsel %vm1506_vm5, %v1472_v14, 0.0  ;;  %v2512_v6 = vadd.f32 %v6750_v56, %v2508_v20  ;;  %v6928_v2 = vmin.f32 %v918_v26, 6.0  ;;  %v917_v0 = vmax.f32 %v638_v21, 0.0 }
  0xed   : > { %v648_v16 = vpop.f32.mrf.mxu0  ;;  %11054 = vst [vmem:[#allocation29_spill] sm:$0xff] %v6925_v5  ;;  %v6934_v4 = vsel %vm1102_vm2, %v1042_v22, %v1074_v12  ;;  %v1139_v41 = vsel %vm1102_vm2, %v1074_v12, %v1042_v22  ;;  %v11057_v58 = vrot.slane %v6867_v63, 1  ;;  %v920_v20 = vmax.f32 %v5579_v45, 0.0 }
  0xee   : > { %11055 = vst [vmem:[#allocation30_spill] sm:$0xff] %v6928_v2  ;;  %11056 = vst [vmem:[#allocation31_spill] sm:$0xff] %v6934_v4  ;;  %v6946_v21 = vsel %vm1169_vm3, %v1139_v41, 0.0  ;;  %v2717_v55 = vmul.f32 %v6731_v36, %v6934_v4  ;;  %v919_v22 = vmax.f32 %v648_v16, 0.0  ;;  %v6958_v52 = vsel %vm1436_vm4, %v1375_v31, %v1407_v11 }
  0xef   : > { %v6916_v53 = vpop.f32.mrf.mxu0  ;;  %v1473_v14 = vsel %vm1436_vm4, %v11057_v58, %v10819_v42  ;;  %11058 = vst [vmem:[#allocation32_spill] sm:$0xff] %v6946_v21  ;;  %11060 = vst [vmem:[#allocation34_spill] sm:$0xff] %v6958_v52  ;;  %v6962_v58 = vmul.f32 %v6739_v49, %v6863_v9  ;;  %v2511_v45 = vadd.f32 %v6750_v56, %v2507_v54  ;;  %v6972_v51 = vmin.f32 %v917_v0, 6.0 }
  0xf0   : > { %v6950_v26 = vsel %vm1506_vm5, %v1473_v14, 0.0  ;;  %v6967_v41 = vmul.f32 %v6741_v50, %v6867_v63  ;;  %v2524_v14 = vadd.f32 %v2520_v17, %v2512_v6  ;;  %v2729_v16 = vmul.f32 %v6736_v46, %v6867_v63 }
  0xf1   : > { %v6930_v61 = vpop.f32.mrf.mxu0  ;;  %11059 = vst [vmem:[#allocation33_spill] sm:$0xff] %v6950_v26  ;;  %11061 = vst [vmem:[#allocation35_spill] sm:$0xff] %v6962_v58  ;;  %v2721_v42 = vadd.f32 %v6750_v56, %v2717_v55  ;;  %v2532_v31 = vmul.f32 %v6764_v10, %v6925_v5  ;;  %v2716_v54 = vmul.f32 %v6731_v36, %v6946_v21  ;;  %v10831_v17 = vrot.slane %v6928_v2, 7 }
  0xf2   : > { %11062 = vst [vmem:[#allocation36_spill] sm:$0xff] %v6967_v41  ;;  %v2741_v58 = vmul.f32 %v6764_v10, %v6950_v26  ;;  %v10832_v41 = vrot.slane %v6972_v51, 7  ;;  %v6984_v9 = vmin.f32 %v920_v20, 6.0  ;;  %v6986_v55 = vmin.f32 %v919_v22, 6.0 }
  0xf3   : > { %v6954_v12 = vpop.f32.mrf.mxu0  ;;  %v2733_v6 = vadd.f32 %v2729_v16, %v2721_v42  ;;  %v6990_v52 = vadd.f32 %v2519_v3, %v2511_v45  ;;  %v6994_v5 = vmul.f32 %v6728_v35, %v6867_v63  ;;  %v6998_v26 = vmul.f32 %v6728_v35, %v6904_v8 }
  0xf4   : > { %11063 = vst [vmem:[#allocation37_spill] sm:$0xff] %v6984_v9  ;;  %11064 = vst [vmem:[#allocation38_spill] sm:$0xff] %v6986_v55  ;;  %v11068_v42 = vrot.slane %v6784_v30, 7  ;;  %v11069_v16 = vrot.slane %v6777_v1, 7  ;;  %v2536_v22 = vadd.f32 %v2532_v31, %v2524_v14  ;;  %v2728_v3 = vmul.f32 %v6736_v46, %v6904_v8 }
  0xf5   : > { %v6974_v11 = vpop.f32.mrf.mxu0  ;;  %11065 = vst [vmem:[#allocation39_spill] sm:$0xff] %v6990_v52  ;;  %11066 = vst [vmem:[#allocation40_spill] sm:$0xff] %v6994_v5  ;;  %v2745_v45 = vadd.f32 %v2741_v58, %v2733_v6  ;;  %v7014_v5 = vsel %vm1102_vm2, %v10832_v41, %v10831_v17  ;;  %v2544_v30 = vmul.f32 %v6739_v49, %v6934_v4  ;;  %v1076_v6 = vrot.slane %v6984_v9, 7 }
  0xf6   : > { %11067 = vst [vmem:[#allocation41_spill] sm:$0xff] %v6998_v26  ;;  %v1137_v20 = vsel %vm1102_vm2, %v11069_v16, %v11068_v42  ;;  %11070 = vst [vmem:[#allocation42_spill] sm:$0xff] %v7014_v5  ;;  %v2720_v1 = vadd.f32 %v6750_v56, %v2716_v54  ;;  %v2753_v14 = vmul.f32 %v6739_v49, %v7014_v5  ;;  %v1044_v16 = vrot.slane %v6986_v55, 7 }
  0xf7   : > { %v6988_v0 = vpop.f32.mrf.mxu0  ;;  %v7030_v41 = vmul.f32 %v6741_v50, %v6928_v2  ;;  %v7034_v54 = vmul.f32 %v6728_v35, %v6928_v2  ;;  %v10837_v4 = vrot.slane %v6984_v9, 1  ;;  %v7039_v26 = vadd.f32 %v2544_v30, %v2536_v22 }
  0xf8   : > { %v7036_v42 = vadd.f32 %v2753_v14, %v2745_v45  ;;  %v7043_v58 = vmul.f32 %v6736_v46, %v6928_v2  ;;  %v1141_v17 = vsel %vm1102_vm2, %v1076_v6, %v1044_v16  ;;  %v922_v21 = vmax.f32 %v6916_v53, 0.0 }
  0xf9   : > { %v7022_v31 = vpop.f32.mrf.mxu0  ;;  %11071 = vst [vmem:[#allocation43_spill] sm:$0xff] %v7030_v41  ;;  %11072 = vst [vmem:[#allocation44_spill] sm:$0xff] %v7034_v54  ;;  %v2926_v41 = vmul.f32 %v6731_v36, %v7014_v5  ;;  %v7052_v45 = vsel %vm1102_vm2, %v1044_v16, %v1076_v6  ;;  %v7056_v30 = vsel %vm1169_vm3, %v1141_v17, 0.0  ;;  %v11078_v22 = vrot.slane %v6986_v55, 1 }
  0xfa   : > { %11073 = vst [vmem:[#allocation45_spill] sm:$0xff] %v7036_v42  ;;  %11074 = vst [vmem:[#allocation46_spill] sm:$0xff] %v7039_v26  ;;  %v7066_v53 = vadd.f32 %v2728_v3, %v2720_v1  ;;  %v11080_v42 = vrot.slane %v6972_v51, 1  ;;  %v11081_v6 = vrot.slane %v6928_v2, 1  ;;  %v7078_v17 = vmul.f32 %v6728_v35, %v6972_v51 }
  0xfb   : > { %11075 = vst [vmem:[#allocation47_spill] sm:$0xff] %v7043_v58  ;;  %11076 = vst [vmem:[#allocation48_spill] sm:$0xff] %v7052_v45  ;;  %v1475_v14 = vsel %vm1436_vm4, %v10837_v4, %v11078_v22  ;;  %v7064_v54 = vpop.f32.mrf.mxu0  ;;  %v7082_v5 = vmul.f32 %v6736_v46, %v6972_v51  ;;  %v7086_v1 = vmul.f32 %v6741_v50, %v6984_v9  ;;  %v1514_v52 = vsel %vm1506_vm5, %v6794_v38, 0.0 }
  0xfc   : > { %11077 = vst [vmem:[#allocation49_spill] sm:$0xff] %v7056_v30  ;;  %11079 = vst [vmem:[#allocation50_spill] sm:$0xff] %v7066_v53  ;;  %v7074_v16 = vsel %vm1436_vm4, %v11081_v6, %v11080_v42  ;;  %v7090_v3 = vmul.f32 %v6728_v35, %v6984_v9  ;;  %v3147_v42 = vmul.f32 %v6736_v46, %v6984_v9  ;;  %v7100_v6 = vsel %vm1506_vm5, %v1475_v14, 0.0 }
  0xfd   : > { %11082 = vst [vmem:[#allocation51_spill] sm:$0xff] %v7074_v16  ;;  %11083 = vst [vmem:[#allocation52_spill] sm:$0xff] %v7078_v17  ;;  %v7096_v22 = vmul.f32 %v6728_v35, %v6986_v55  ;;  %v3134_v4 = vmul.f32 %v6731_v36, %v7056_v30  ;;  %v1675_v17 = vmul.f32 %v6739_v49, %v6756_v62  ;;  %v7117_v9 = vpop.f32.mrf.mxu0  ;;  %v7125_v62 = vsel %vm1169_vm3, %v1137_v20, 0.0 }
  0xfe   : > { %11084 = vst [vmem:[#allocation53_spill] sm:$0xff] %v7082_v5  ;;  %11085 = vst [vmem:[#allocation54_spill] sm:$0xff] %v7086_v1  ;;  %v3135_v1 = vmul.f32 %v6731_v36, %v7052_v45  ;;  %v7109_v53 = vadd.f32 %v6750_v56, %v2926_v41  ;;  %v1904_v14 = vmul.f32 %v6764_v10, %v6805_v57  ;;  %v11092_v41 = vrot.slane %v6772_v18, 1 }
  0xff   : > { %11086 = vst [vmem:[#allocation55_spill] sm:$0xff] %v7090_v3  ;;  %11087 = vst [vmem:[#allocation56_spill] sm:$0xff] %v7096_v22  ;;  %v3146_v3 = vmul.f32 %v6736_v46, %v6986_v55  ;;  %v7113_v22 = vmin.f32 %v922_v21, 6.0  ;;  %v7121_v30 = vmul.f32 %v6739_v49, %v7052_v45  ;;  %v11093_v5 = vrot.slane %v6762_v7, 1 }
 0x100   : > { %11088 = vst [vmem:[#allocation57_spill] sm:$0xff] %v7100_v6  ;;  %11089 = vst [vmem:[#allocation58_spill] sm:$0xff] %v7109_v53  ;;  %v1679_v55 = vadd.f32 %v6750_v56, %v1675_v17  ;;  %v3159_v58 = vmul.f32 %v6764_v10, %v7100_v6  ;;  %v1908_v53 = vadd.f32 %v1904_v14, %v6781_v28  ;;  %v7151_v6 = vpop.f32.mrf.mxu0 }
 0x101   : > { %11090 = vst [vmem:[#allocation59_spill] sm:$0xff] %v7113_v22  ;;  %11091 = vst [vmem:[#allocation60_spill] sm:$0xff] %v7121_v30  ;;  %v1438_v21 = vsel %vm1436_vm4, %v11093_v5, %v11092_v41  ;;  %v1916_v45 = vmul.f32 %v6739_v49, %v6857_v29  ;;  %v2089_v20 = vmul.f32 %v6731_v36, %v6857_v29 }
 0x102   : > { %v3138_v30 = vadd.f32 %v6750_v56, %v3134_v4  ;;  %v3139_v16 = vadd.f32 %v6750_v56, %v3135_v1  ;;  %v1695_v26 = vadd.f32 %v6797_v39, %v1679_v55  ;;  %v1707_v5 = vmul.f32 %v6779_v24, %v6805_v57  ;;  %v7156_v4 = vld [vmem:[%s10791_s2 + $0x8] ss:$0 sm:$0xff] }
 0x103   : > { %v1920_v17 = vadd.f32 %v1916_v45, %v1908_v53  ;;  %v1928_v41 = vmul.f32 %v6728_v35, %v6762_v7  ;;  %v2093_v28 = vadd.f32 %v6750_v56, %v2089_v20  ;;  %v2101_v14 = vmul.f32 %v6736_v46, %v6762_v7 }
 0x104   : > { %v1711_v39 = vadd.f32 %v1707_v5, %v1695_v26  ;;  %v1724_v57 = vmul.f32 %v6786_v33, %v6857_v29  ;;  %v1940_v55 = vmul.f32 %v6779_v24, %v1438_v21  ;;  %v2113_v45 = vmul.f32 %v6764_v10, %v1438_v21 }
 0x105   : > { %v1932_v53 = vadd.f32 %v1928_v41, %v1920_v17  ;;  %v2105_v1 = vadd.f32 %v2101_v14, %v2093_v28  ;;  %v921_v20 = vmax.f32 %v6930_v61, 0.0  ;;  %v3151_v8 = vadd.f32 %v3147_v42, %v3139_v16  ;;  %v7181_v16 = vpop.f32.mrf.mxu0 }
 0x106   : > { %v1728_v63 = vadd.f32 %v1724_v57, %v1711_v39  ;;  %v1741_v26 = vmul.f32 %v6741_v50, %v6762_v7  ;;  %v1680_v29 = vadd.f32 %v6750_v56, %v6808_v25  ;;  %v1758_v5 = vmul.f32 %v7156_v4, %v1438_v21 }
 0x107   : > { %v7171_v2 = vadd.f32 %v1940_v55, %v1932_v53  ;;  %v7173_v17 = vadd.f32 %v2113_v45, %v2105_v1  ;;  %v11094_v61 = vrot.slane %v6772_v18, 7  ;;  %v11095_v41 = vrot.slane %v6762_v7, 7 }
 0x108   : > { %v1745_v42 = vadd.f32 %v1741_v26, %v1728_v63  ;;  %v11096_v28 = vrot.slane %v6762_v7, 1  ;;  %v11097_v25 = vrot.slane %v6772_v18, 1  ;;  %v1696_v14 = vadd.f32 %v6790_v34, %v1680_v29 }
 0x109   : > { %v1104_v38 = vsel %vm1102_vm2, %v11095_v41, %v11094_v61  ;;  %v1708_v39 = vmul.f32 %v6779_v24, %v1514_v52  ;;  %v10851_v57 = vrot.slane %v7113_v22, 7  ;;  %v7195_v45 = vmul.f32 %v6741_v50, %v7113_v22  ;;  %v7213_v41 = vpop.f32.mrf.mxu0 }
 0x10a   : > { %v1470_v21 = vsel %vm1436_vm4, %v11097_v25, %v11096_v28  ;;  %v7197_v63 = vmin.f32 %v921_v20, 6.0  ;;  %v7201_v7 = vmul.f32 %v6728_v35, %v7113_v22  ;;  %v1762_v53 = vadd.f32 %v1758_v5, %v1745_v42 }
 0x10b   : > { %11098 = vst [vmem:[#allocation61_spill] sm:$0xff] %v7195_v45  ;;  %v1712_v1 = vadd.f32 %v1708_v39, %v1696_v14  ;;  %v1725_v34 = vmul.f32 %v6786_v33, %v1104_v38  ;;  %v7204_v26 = vadd.f32 %v3146_v3, %v3138_v30  ;;  %v7208_v29 = vmul.f32 %v6736_v46, %v7113_v22 }
 0x10c   : > { %11099 = vst [vmem:[#allocation62_spill] sm:$0xff] %v7197_v63  ;;  %11100 = vst [vmem:[#allocation63_spill] sm:$0xff] %v7201_v7  ;;  %v1516_v61 = vsel %vm1506_vm5, %v1470_v21, 0.0  ;;  %v1905_v20 = vmul.f32 %v6764_v10, %v1514_v52  ;;  %v7215_v28 = vadd.f32 %v3159_v58, %v3151_v8  ;;  %v1766_v25 = vmax.f32 %v1762_v53, 0.0 }
 0x10d   : > { %11101 = vst [vmem:[#allocation64_spill] sm:$0xff] %v7204_v26  ;;  %11102 = vst [vmem:[#allocation65_spill] sm:$0xff] %v7208_v29  ;;  %v1729_v5 = vadd.f32 %v1725_v34, %v1712_v1  ;;  %v1742_v42 = vmul.f32 %v6741_v50, %v6772_v18  ;;  %v10854_v30 = vrot.slane %v7197_v63, 7  ;;  %v1917_v14 = vmul.f32 %v6739_v49, %v1104_v38  ;;  %v7229_v34 = vpop.f32.mrf.mxu0 }
 0x10e   : > { %v1909_v3 = vadd.f32 %v1905_v20, %v6775_v23  ;;  %v2090_v39 = vmul.f32 %v6731_v36, %v1104_v38  ;;  %v1770_v21 = vmin.f32 %v1766_v25, 6.0  ;;  %v1759_v52 = vmul.f32 %v7156_v4, %v1516_v61 }
 0x10f   : > { %v1746_v55 = vadd.f32 %v1742_v42, %v1729_v5  ;;  %v924_v8 = vmax.f32 %v6954_v12, 0.0  ;;  %v2125_v58 = vmul.f32 %v6739_v49, %v7125_v62  ;;  %v923_v1 = vmax.f32 %v6974_v11, 0.0 }
 0x110   : > { %v1921_v53 = vadd.f32 %v1917_v14, %v1909_v3  ;;  %v2094_v18 = vadd.f32 %v6750_v56, %v2090_v39  ;;  %5687 = vmatprep.mubr.f32.mxu1 %v1770_v21  ;;  %v7233_v23 = vmul.f32 %v6731_v36, %v7125_v62  ;;  %v1941_v20 = vmul.f32 %v6779_v24, %v1516_v61 }
 0x111   : > { %v1763_v38 = vadd.f32 %v1759_v52, %v1746_v55  ;;  %v7236_v25 = vmin.f32 %v924_v8, 6.0  ;;  %v2114_v42 = vmul.f32 %v6764_v10, %v1516_v61  ;;  %v7241_v3 = vmin.f32 %v923_v1, 6.0  ;;  %v7260_v52 = vpop.f32.mrf.mxu0 }
 0x112   : > { %v1933_v12 = vadd.f32 %v6812_v59, %v1921_v53  ;;  %v2106_v5 = vadd.f32 %v6816_v32, %v2094_v18  ;;  %v7249_v11 = vsel %vm1102_vm2, %v10854_v30, %v10851_v57  ;;  %v10855_v55 = vrot.slane %v7197_v63, 1 }
 0x113   : > { %11103 = vst [vmem:[#allocation66_spill] sm:$0xff] %v7236_v25  ;;  %11104 = vst [vmem:[#allocation67_spill] sm:$0xff] %v7241_v3  ;;  %v7254_v14 = vmul.f32 %v6728_v35, %v7197_v63  ;;  %v1767_v59 = vmax.f32 %v1763_v38, 0.0  ;;  %v1954_v61 = vmul.f32 %v6786_v33, %v6839_v13  ;;  %v2126_v21 = vmul.f32 %v6739_v49, %v6839_v13 }
 0x114   : > { %11105 = vst [vmem:[#allocation68_spill] sm:$0xff] %v7249_v11  ;;  %v1945_v32 = vadd.f32 %v1941_v20, %v1933_v12  ;;  %v2118_v39 = vadd.f32 %v2114_v42, %v2106_v5  ;;  %v1078_v53 = vrot.slane %v7236_v25, 7  ;;  %v1046_v18 = vrot.slane %v7241_v3, 7 }
 0x115   : > { %11106 = vst [vmem:[#allocation69_spill] sm:$0xff] %v7254_v14  ;;  %v1771_v8 = vmin.f32 %v1767_v59, 6.0  ;;  %v10852_v1 = vrot.slane %v7241_v3, 1  ;;  %v926_v20 = vmax.f32 %v6988_v0, 0.0  ;;  %v925_v12 = vmax.f32 %v7022_v31, 0.0 }
 0x116   : > { %v7265_v57 = vadd.f32 %v1954_v61, %v1945_v32  ;;  %v2130_v38 = vadd.f32 %v2126_v21, %v2118_v39  ;;  %v3344_v5 = vmul.f32 %v6731_v36, %v7249_v11  ;;  %v10853_v13 = vrot.slane %v7236_v25, 1  ;;  %v7292_v39 = vpop.f32.mrf.mxu0  ;;  %v7297_v21 = vld [vmem:[%s10793_s4 + $0x78] sm:$0xff] }
 0x117   : > { %5688 = vmatmul.mubr.f32.vlgmr.msra.gmra.mxu1 %v1771_v8  ;;  %v7274_v42 = vsel %vm1102_vm2, %v1046_v18, %v1078_v53  ;;  %v1143_v59 = vsel %vm1102_vm2, %v1078_v53, %v1046_v18  ;;  %v7279_v32 = vadd.f32 %v2125_v58, %v7173_v17  ;;  %v7283_v0 = vmul.f32 %v6736_v46, %v7197_v63 }
 0x118   : > { %11107 = vst [vmem:[#allocation70_spill] sm:$0xff] %v7274_v42  ;;  %v7286_v31 = vadd.f32 %v6845_v15, %v2130_v38  ;;  %v7290_v61 = vsel %vm1169_vm3, %v1143_v59, 0.0  ;;  %5694 = vmatpush3.msra.mxu1 %v7297_v21  ;;  %v3171_v17 = vmul.f32 %v6739_v49, %v7249_v11  ;;  %v1477_v15 = vsel %vm1436_vm4, %v10853_v13, %v10852_v1 }
 0x119   : > { %11108 = vst [vmem:[#allocation71_spill] sm:$0xff] %v7283_v0  ;;  %11110 = vst [vmem:[#allocation73_spill] sm:$0xff] %v7290_v61  ;;  %v3552_v58 = vmul.f32 %v6731_v36, %v7290_v61  ;;  %v3553_v8 = vmul.f32 %v6731_v36, %v7274_v42  ;;  %5695 = vmatprep.subr.mxu1 %v6518_v37  ;;  %v11111_v53 = vrot.slane %v7113_v22, 1  ;;  %v7321_v38 = vmin.f32 %v926_v20, 6.0 }
 0x11a   : > { %11109 = vst [vmem:[#allocation72_spill] sm:$0xff] %v7286_v31  ;;  %v7323_v59 = vmin.f32 %v925_v12, 6.0  ;;  %v928_v1 = vmax.f32 %v7064_v54, 0.0  ;;  %5696 = vmatpush3.msra.mxu1 %v6518_v37  ;;  %v7328_v13 = vadd.f32 %v3171_v17, %v7215_v28  ;;  %v7331_v30 = vadd.f32 %v6750_v56, %v3344_v5  ;;  %v7347_v12 = vpop.f32.mrf.mxu0  ;;  %v11159_v31 = vld [vmem:[#allocation32_spill] sm:$0xff] }
 0x11b   : > { %v7319_v18 = vsel %vm1436_vm4, %v11111_v53, %v10855_v55  ;;  %11113 = vst [vmem:[#allocation75_spill] sm:$0xff] %v7321_v38  ;;  %v7335_v7 = vmul.f32 %v6741_v50, %v7236_v25  ;;  %v3557_v53 = vadd.f32 %v6750_v56, %v3553_v8  ;;  %5697 = vmatprep.subr.mxu1 %v6529_v40  ;;  %v7343_v37 = vsel %vm1506_vm5, %v1477_v15, 0.0 }
 0x11c   : > { %11112 = vst [vmem:[#allocation74_spill] sm:$0xff] %v7319_v18  ;;  %11114 = vst [vmem:[#allocation76_spill] sm:$0xff] %v7323_v59  ;;  %v3565_v20 = vmul.f32 %v6736_v46, %v7236_v25  ;;  %v927_v28 = vmax.f32 %v7117_v9, 0.0  ;;  %5698 = vmatpush3.msra.mxu1 %v6529_v40  ;;  %v7352_v5 = vmul.f32 %v6728_v35, %v7236_v25  ;;  %v10857_v55 = vrot.slane %v7321_v38, 7 }
 0x11d   : > { %11115 = vst [vmem:[#allocation77_spill] sm:$0xff] %v7328_v13  ;;  %11116 = vst [vmem:[#allocation78_spill] sm:$0xff] %v7331_v30  ;;  %v7356_v17 = vmul.f32 %v6728_v35, %v7241_v3  ;;  %v3556_v8 = vadd.f32 %v6750_v56, %v3552_v58  ;;  %v3564_v15 = vmul.f32 %v6736_v46, %v7241_v3  ;;  %5699 = vmatprep.subr.mxu1 %v6543_v43  ;;  %v11180_v30 = vld [vmem:[#allocation42_spill] sm:$0xff] }
 0x11e   : > { %11117 = vst [vmem:[#allocation79_spill] sm:$0xff] %v7335_v7  ;;  %11118 = vst [vmem:[#allocation80_spill] sm:$0xff] %v7343_v37  ;;  %v3569_v9 = vadd.f32 %v3565_v20, %v3557_v53  ;;  %v7364_v54 = vmin.f32 %v928_v1, 6.0  ;;  %5700 = vmatpush3.msra.mxu1 %v6543_v43  ;;  %v7369_v7 = vmul.f32 %v6739_v49, %v7274_v42  ;;  %v11126_v20 = vrot.slane %v7323_v59, 7  ;;  %v7397_v53 = vpop.f32.mrf.mxu0 }
 0x11f   : > { %11119 = vst [vmem:[#allocation81_spill] sm:$0xff] %v7352_v5  ;;  %11120 = vst [vmem:[#allocation82_spill] sm:$0xff] %v7356_v17  ;;  %v3577_v58 = vmul.f32 %v6764_v10, %v7343_v37  ;;  %v7375_v13 = vmul.f32 %v6741_v50, %v7321_v38  ;;  %5701 = vmatprep.subr.mxu1 %v6553_v44  ;;  %v7381_v1 = vmul.f32 %v6728_v35, %v7321_v38 }
 0x120   : > { %11121 = vst [vmem:[#allocation83_spill] sm:$0xff] %v7364_v54  ;;  %11122 = vst [vmem:[#allocation84_spill] sm:$0xff] %v7369_v7  ;;  %v7385_v43 = vmul.f32 %v6736_v46, %v7321_v38  ;;  %v7393_v40 = vsel %vm1102_vm2, %v11126_v20, %v10857_v55  ;;  %v7395_v42 = vmin.f32 %v927_v28, 6.0  ;;  %5702 = vmatpush3.msra.mxu1 %v6553_v44  ;;  %v1080_v20 = vrot.slane %v7364_v54, 7 }
 0x121   : > { %11123 = vst [vmem:[#allocation85_spill] sm:$0xff] %v7375_v13  ;;  %11124 = vst [vmem:[#allocation86_spill] sm:$0xff] %v7381_v1  ;;  %v7400_v14 = vadd.f32 %v3564_v15, %v3556_v8  ;;  %v7404_v1 = vmul.f32 %v6728_v35, %v7323_v59  ;;  %v7408_v26 = vmul.f32 %v6736_v46, %v7323_v59  ;;  %5703 = vmatprep.subr.mxu1 %v6563_v47 }
 0x122   : > { %11125 = vst [vmem:[#allocation87_spill] sm:$0xff] %v7385_v43  ;;  %11127 = vst [vmem:[#allocation88_spill] sm:$0xff] %v7393_v40  ;;  %v930_v43 = vmax.f32 %v7151_v6, 0.0  ;;  %v3581_v28 = vadd.f32 %v3577_v58, %v3569_v9  ;;  %v1048_v55 = vrot.slane %v7395_v42, 7  ;;  %5704 = vmatpush3.msra.mxu1 %v6563_v47  ;;  %v11132_v8 = vrot.slane %v7323_v59, 1  ;;  %v11179_v59 = vld [vmem:[#allocation53_spill] sm:$0xff] }
 0x123   : > { %11128 = vst [vmem:[#allocation89_spill] sm:$0xff] %v7395_v42  ;;  %11129 = vst [vmem:[#allocation90_spill] sm:$0xff] %v7400_v14  ;;  %v11133_v15 = vrot.slane %v7321_v38, 1  ;;  %v3589_v6 = vmul.f32 %v6739_v49, %v7393_v40  ;;  %v3762_v9 = vmul.f32 %v6731_v36, %v7393_v40  ;;  %5705 = vmatprep.subr.mxu1 %v6573_v48  ;;  %v11137_v14 = vld [vmem:[#allocation30_spill] sm:$0xff]  ;;  %v7443_v40 = vpop.f32.mrf.mxu0 }
 0x124   : > { %11130 = vst [vmem:[#allocation91_spill] sm:$0xff] %v7404_v1  ;;  %11131 = vst [vmem:[#allocation92_spill] sm:$0xff] %v7408_v26  ;;  %v7432_v47 = vsel %vm1102_vm2, %v1048_v55, %v1080_v20  ;;  %v1145_v44 = vsel %vm1102_vm2, %v1080_v20, %v1048_v55  ;;  %v11138_v13 = vrot.slane %v11137_v14, 7  ;;  %5706 = vmatpush3.msra.mxu1 %v6573_v48  ;;  %v11142_v20 = vrot.slane %v7364_v54, 1  ;;  %v11154_v26 = vld [vmem:[#allocation4_spill] sm:$0xff] }
 0x125   : > { %v7422_v1 = vsel %vm1436_vm4, %v11133_v15, %v11132_v8  ;;  %11135 = vst [vmem:[#allocation94_spill] sm:$0xff] %v7432_v47  ;;  %v929_v8 = vmax.f32 %v7181_v16, 0.0  ;;  %v11136_v15 = vrot.slane %v6972_v51, 7  ;;  %v7448_v58 = vmul.f32 %v6741_v50, %v7364_v54 }
 0x126   : > { %11134 = vst [vmem:[#allocation93_spill] sm:$0xff] %v7422_v1  ;;  %v7452_v55 = vsel %vm1169_vm3, %v1145_v44, 0.0  ;;  %v11141_v16 = vrot.slane %v7395_v42, 1  ;;  %v7463_v48 = vadd.f32 %v3589_v6, %v3581_v28  ;;  %v3983_v44 = vmul.f32 %v6736_v46, %v7364_v54  ;;  %v11148_v28 = vld [vmem:[#allocation19_spill] sm:$0xff] }
 0x127   : > { %v1140_v1 = vsel %vm1102_vm2, %v11138_v13, %v11136_v15  ;;  %11139 = vst [vmem:[#allocation30_spill] sm:$0xff] %v7448_v58  ;;  %11140 = vst [vmem:[#allocation95_spill] sm:$0xff] %v7452_v55  ;;  %v7460_v13 = vmin.f32 %v930_v43, 6.0  ;;  %v11144_v15 = vld [vmem:[#allocation3_spill] sm:$0xff]  ;;  %v7467_v58 = vmul.f32 %v6728_v35, %v7364_v54  ;;  %v3971_v5 = vmul.f32 %v6731_v36, %v7432_v47  ;;  %v11153_v54 = vld [vmem:[#allocation34_spill] sm:$0xff] }
 0x128   : > { %v1479_v37 = vsel %vm1436_vm4, %v11142_v20, %v11141_v16  ;;  %5707 = vmatprep.subr.mxu1 %v11144_v15  ;;  %11145 = vst [vmem:[#allocation3_spill] sm:$0xff] %v7463_v48  ;;  %v7475_v16 = vadd.f32 %v6750_v56, %v3762_v9  ;;  %v7479_v43 = vsel %vm1169_vm3, %v1140_v1, 0.0  ;;  %v11149_v6 = vrot.slane %v11148_v28, 1  ;;  %v11150_v20 = vld [vmem:[#allocation26_spill] sm:$0xff] }
 0x129   : > { %11143 = vst [vmem:[#allocation96_spill] sm:$0xff] %v7460_v13  ;;  %11146 = vst [vmem:[#allocation97_spill] sm:$0xff] %v7467_v58  ;;  %5708 = vmatpush3.msra.mxu1 %v11144_v15  ;;  %v11151_v48 = vrot.slane %v11150_v20, 1  ;;  %v2531_v7 = vmul.f32 %v6764_v10, %v11153_v54  ;;  %v7494_v9 = vsel %vm1506_vm5, %v1479_v37, 0.0  ;;  %v7498_v1 = vmul.f32 %v6728_v35, %v7395_v42  ;;  %v11158_v37 = vld [vmem:[#allocation39_spill] sm:$0xff] }
 0x12a   : > { %11147 = vst [vmem:[#allocation98_spill] sm:$0xff] %v7475_v16  ;;  %5709 = vmatprep.subr.mxu1 %v11154_v26  ;;  %11155 = vst [vmem:[#allocation34_spill] sm:$0xff] %v7494_v9  ;;  %v3970_v15 = vmul.f32 %v6731_v36, %v7452_v55  ;;  %v7502_v28 = vmin.f32 %v929_v8, 6.0  ;;  %v2543_v17 = vmul.f32 %v6739_v49, %v11159_v31  ;;  %v11165_v16 = vld [vmem:[#allocation6_spill] sm:$0xff]  ;;  %v11173_v31 = vld [vmem:[#allocation40_spill] sm:$0xff] }
 0x12b   : > { %v7487_v58 = vsel %vm1436_vm4, %v11151_v48, %v11149_v6  ;;  %11156 = vst [vmem:[#allocation4_spill] sm:$0xff] %v7498_v1  ;;  %v7504_v48 = vpop.f32.mrf.mxu0  ;;  %5710 = vmatpush3.msra.mxu1 %v11154_v26  ;;  %v3982_v6 = vmul.f32 %v6736_v46, %v7395_v42  ;;  %v2535_v20 = vadd.f32 %v2531_v7, %v11158_v37  ;;  %v11160_v1 = vld [vmem:[#allocation5_spill] sm:$0xff]  ;;  %v11167_v42 = vrot.slane %v6972_v51, 1 }
 0x12c   : > { %11152 = vst [vmem:[#allocation19_spill] sm:$0xff] %v7487_v58  ;;  %11157 = vst [vmem:[#allocation99_spill] sm:$0xff] %v7502_v28  ;;  %5711 = vmatprep.subr.mxu1 %v11160_v1  ;;  %v3975_v55 = vadd.f32 %v6750_v56, %v3971_v5  ;;  %v7518_v3 = vmul.f32 %v6741_v50, %v7460_v13  ;;  %v7522_v26 = vmul.f32 %v6728_v35, %v7460_v13 }
 0x12d   : > { %5712 = vmatpush3.msra.mxu1 %v11160_v1  ;;  %v7527_v7 = vmul.f32 %v6739_v49, %v7432_v47  ;;  %v3995_v37 = vmul.f32 %v6764_v10, %v7494_v9  ;;  %v7533_v5 = vmul.f32 %v6736_v46, %v7460_v13  ;;  %v2547_v8 = vadd.f32 %v2543_v17, %v2535_v20  ;;  %v11172_v17 = vld [vmem:[#allocation46_spill] sm:$0xff] }
 0x12e   : > { %11161 = vst [vmem:[#allocation39_spill] sm:$0xff] %v7518_v3  ;;  %11162 = vst [vmem:[#allocation5_spill] sm:$0xff] %v7522_v26  ;;  %5713 = vmatprep.subr.mxu1 %v11165_v16  ;;  %v3974_v3 = vadd.f32 %v6750_v56, %v3970_v15  ;;  %v11166_v1 = vrot.slane %v11137_v14, 1  ;;  %v2567_v9 = vmul.f32 %v6779_v24, %v7487_v58  ;;  %v11169_v14 = vld [vmem:[#allocation41_spill] sm:$0xff]  ;;  %v11184_v11 = vrot.slane %v7502_v28, 7 }
 0x12f   : > { %11163 = vst [vmem:[#allocation100_spill] sm:$0xff] %v7527_v7  ;;  %11164 = vst [vmem:[#allocation101_spill] sm:$0xff] %v7533_v5  ;;  %v7548_v7 = vpop.f32.mrf.mxu0  ;;  %5714 = vmatpush3.msra.mxu1 %v11165_v16  ;;  %v7554_v20 = vmul.f32 %v6728_v35, %v7502_v28  ;;  %v2559_v15 = vadd.f32 %v11169_v14, %v2547_v8  ;;  %v2925_v26 = vmul.f32 %v6731_v36, %v7479_v43  ;;  %v11174_v14 = vld [vmem:[#allocation51_spill] sm:$0xff] }
 0x130   : > { %v7544_v47 = vsel %vm1436_vm4, %v11167_v42, %v11166_v1  ;;  %v11170_v42 = vld [vmem:[#allocation7_spill] sm:$0xff]  ;;  %v3987_v1 = vadd.f32 %v3983_v44, %v3975_v55  ;;  %v7562_v5 = vmul.f32 %v6736_v46, %v7502_v28  ;;  %v2580_v16 = vmul.f32 %v6786_v33, %v7479_v43  ;;  %v11175_v55 = vld [vmem:[#allocation33_spill] sm:$0xff] }
 0x131   : > { %11168 = vst [vmem:[#allocation6_spill] sm:$0xff] %v7554_v20  ;;  %5715 = vmatprep.subr.mxu1 %v11170_v42  ;;  %v2560_v25 = vadd.f32 %v11173_v31, %v11172_v17  ;;  %v2571_v20 = vadd.f32 %v2567_v9, %v2559_v15  ;;  %v2929_v8 = vadd.f32 %v6750_v56, %v2925_v26  ;;  %v7573_v61 = vsel %vm1506_vm5, %v11174_v14, 0.0  ;;  %v11177_v17 = vld [vmem:[#allocation58_spill] sm:$0xff]  ;;  %v11178_v26 = vld [vmem:[#allocation47_spill] sm:$0xff] }
 0x132   : > { %11171 = vst [vmem:[#allocation41_spill] sm:$0xff] %v7562_v5  ;;  %5716 = vmatpush3.msra.mxu1 %v11170_v42  ;;  %v2568_v44 = vmul.f32 %v6779_v24, %v11175_v55  ;;  %v11176_v5 = vld [vmem:[#allocation8_spill] sm:$0xff]  ;;  %v2593_v38 = vmul.f32 %v6741_v50, %v6972_v51  ;;  %v2949_v31 = vmul.f32 %v6764_v10, %v7544_v47  ;;  %v932_v9 = vmax.f32 %v7213_v41, 0.0  ;;  %v7585_v42 = vpop.f32.mrf.mxu0  ;;  %v11181_v51 = vld [vmem:[#allocation9_spill] sm:$0xff] }
 0x133   : > { %5717 = vmatprep.subr.mxu1 %v11176_v5  ;;  %v2942_v15 = vadd.f32 %v11178_v26, %v11177_v17  ;;  %v2584_v14 = vadd.f32 %v2580_v16, %v2571_v20  ;;  %v2941_v55 = vadd.f32 %v11179_v59, %v2929_v8  ;;  %v2581_v0 = vmul.f32 %v6786_v33, %v11180_v30  ;;  %v11190_v16 = vld [vmem:[#allocation10_spill] sm:$0xff] }
 0x134   : > { %5718 = vmatpush3.msra.mxu1 %v11176_v5  ;;  %v2572_v29 = vadd.f32 %v2568_v44, %v2560_v25  ;;  %v7592_v45 = vadd.f32 %v3982_v6, %v3974_v3  ;;  %v11183_v41 = vrot.slane %v7460_v13, 7  ;;  %v11186_v5 = vrot.slane %v7502_v28, 1 }
 0x135   : > { %5719 = vmatprep.subr.mxu1 %v11181_v51  ;;  %v11187_v59 = vrot.slane %v7460_v13, 1  ;;  %v2950_v30 = vmul.f32 %v6764_v10, %v7573_v61  ;;  %v2597_v3 = vadd.f32 %v2593_v38, %v2584_v14  ;;  %v2606_v6 = vmul.f32 %v7156_v4, %v7544_v47  ;;  %v11193_v14 = vld [vmem:[#allocation43_spill] sm:$0xff] }
 0x136   : > { %11182 = vst [vmem:[#allocation7_spill] sm:$0xff] %v7592_v45  ;;  %v7600_v17 = vsel %vm1102_vm2, %v11184_v11, %v11183_v41  ;;  %5720 = vmatpush3.msra.mxu1 %v11181_v51  ;;  %v7615_v20 = vadd.f32 %v2949_v31, %v2941_v55  ;;  %v2585_v11 = vadd.f32 %v2581_v0, %v2572_v29  ;;  %v7618_v8 = vmin.f32 %v932_v9, 6.0  ;;  %v11194_v55 = vld [vmem:[#allocation11_spill] sm:$0xff] }
 0x137   : > { %11185 = vst [vmem:[#allocation46_spill] sm:$0xff] %v7600_v17  ;;  %v7608_v25 = vsel %vm1436_vm4, %v11187_v59, %v11186_v5  ;;  %5721 = vmatprep.subr.mxu1 %v11190_v16  ;;  %v7620_v44 = vadd.f32 %v2950_v30, %v2942_v15  ;;  %v931_v26 = vmax.f32 %v7229_v34, 0.0  ;;  %v934_v41 = vmax.f32 %v7260_v52, 0.0  ;;  %v7624_v5 = vpop.f32.mrf.mxu0  ;;  %v7888_v13 = vld [vmem:[%s10793_s4 + $0x40] sm:$0xff] }
 0x138   : > { %11188 = vst [vmem:[#allocation40_spill] sm:$0xff] %v7608_v25  ;;  %11189 = vst [vmem:[#allocation51_spill] sm:$0xff] %v7615_v20  ;;  %5722 = vmatpush3.msra.mxu1 %v11190_v16  ;;  %v2610_v38 = vadd.f32 %v2606_v6, %v2597_v3  ;;  %v2598_v51 = vadd.f32 %v11193_v14, %v2585_v11  ;;  %v2607_v29 = vmul.f32 %v7156_v4, %v7573_v61 }
 0x139   : > { %11191 = vst [vmem:[#allocation8_spill] sm:$0xff] %v7618_v8  ;;  %11192 = vst [vmem:[#allocation58_spill] sm:$0xff] %v7620_v44  ;;  %v933_v0 = vmax.f32 %v7292_v39, 0.0  ;;  %5723 = vmatprep.subr.mxu1 %v11194_v55  ;;  %v3999_v31 = vadd.f32 %v3995_v37, %v3987_v1  ;;  %v4007_v34 = vmul.f32 %v6739_v49, %v7600_v17  ;;  %v7636_v9 = vmin.f32 %v931_v26, 6.0  ;;  %v7653_v6 = vpop.f32.mrf.mxu0 }
 0x13a   : > { %v4180_v52 = vmul.f32 %v6731_v36, %v7600_v17  ;;  %5724 = vmatpush3.msra.mxu1 %v11194_v55  ;;  %v2614_v15 = vmax.f32 %v2610_v38, 0.0  ;;  %v7641_v59 = vmul.f32 %v6764_v10, %v7487_v58  ;;  %v7645_v4 = vmul.f32 %v6739_v49, %v7479_v43  ;;  %11231 = vst [vmem:[#allocation125_spill] sm:$0xff] %v7888_v13 }
 0x13b   : > { %11195 = vst [vmem:[#allocation47_spill] sm:$0xff] %v7636_v9  ;;  %v2611_v39 = vadd.f32 %v2607_v29, %v2598_v51  ;;  %5731 = vmatprep.subr.mxu1 %v7297_v21  ;;  %v1082_v37 = vrot.slane %v7618_v8, 7  ;;  %v1050_v1 = vrot.slane %v7636_v9, 7  ;;  %v7650_v30 = vmin.f32 %v934_v41, 6.0 }
 0x13c   : > { %11196 = vst [vmem:[#allocation53_spill] sm:$0xff] %v7641_v59  ;;  %11197 = vst [vmem:[#allocation42_spill] sm:$0xff] %v7645_v4  ;;  %v936_v3 = vmax.f32 %v7347_v12, 0.0  ;;  %v2618_v11 = vmin.f32 %v2614_v15, 6.0  ;;  %v10879_v26 = vrot.slane %v7636_v9, 1  ;;  %v7656_v38 = vmin.f32 %v933_v0, 6.0 }
 0x13d   : > { %11198 = vst [vmem:[#allocation9_spill] sm:$0xff] %v7650_v30  ;;  %v2615_v16 = vmax.f32 %v2611_v39, 0.0  ;;  %v7658_v43 = vadd.f32 %v4007_v34, %v3999_v31  ;;  %v7662_v14 = vmul.f32 %v6779_v24, %v7544_v47  ;;  %v7666_v41 = vsel %vm1102_vm2, %v1050_v1, %v1082_v37 }
 0x13e   : > { %11199 = vst [vmem:[#allocation10_spill] sm:$0xff] %v7656_v38  ;;  %11202 = vst [vmem:[#allocation102_spill] sm:$0xff] %v7666_v41  ;;  %v935_v12 = vmax.f32 %v7397_v53, 0.0  ;;  %v7670_v51 = vadd.f32 %v6750_v56, %v4180_v52  ;;  %5839 = vmatprep.mubr.f32.mxu0 %v2618_v11  ;;  %v10880_v29 = vrot.slane %v7618_v8, 1  ;;  %v1147_v55 = vsel %vm1102_vm2, %v1082_v37, %v1050_v1  ;;  %v7683_v53 = vpop.f32.mrf.mxu0 }
 0x13f   : > { %11200 = vst [vmem:[#allocation43_spill] sm:$0xff] %v7658_v43  ;;  %11201 = vst [vmem:[#allocation11_spill] sm:$0xff] %v7662_v14  ;;  %v2619_v0 = vmin.f32 %v2615_v16, 6.0  ;;  %v7677_v47 = vmul.f32 %v6779_v24, %v7573_v61  ;;  %v10881_v31 = vrot.slane %v7650_v30, 7  ;;  %v10884_v34 = vrot.slane %v7650_v30, 1 }
 0x140   : > { %11203 = vst [vmem:[#allocation103_spill] sm:$0xff] %v7670_v51  ;;  %v7681_v15 = vmin.f32 %v936_v3, 6.0  ;;  %v1481_v52 = vsel %vm1436_vm4, %v10880_v29, %v10879_v26  ;;  %v4389_v61 = vmul.f32 %v6731_v36, %v7666_v41  ;;  %v10882_v39 = vrot.slane %v7656_v38, 7  ;;  %v7730_v29 = vld [vmem:[%s10793_s4 + $0x70] sm:$0xff] }
 0x141   : > { %11204 = vst [vmem:[#allocation104_spill] sm:$0xff] %v7677_v47  ;;  %5840 = vmatmul.mubr.f32.vlgmr.msra.gmra.mxu0 %v2619_v0  ;;  %v10883_v37 = vrot.slane %v7656_v38, 1  ;;  %v7697_v1 = vmul.f32 %v6741_v50, %v7618_v8  ;;  %v7701_v3 = vmul.f32 %v6728_v35, %v7618_v8  ;;  %v7705_v11 = vsel %vm1169_vm3, %v1147_v55, 0.0  ;;  %v7783_v47 = vld [vmem:[%s10793_s4 + $0x60] sm:$0xff] }
 0x142   : > { %11205 = vst [vmem:[#allocation105_spill] sm:$0xff] %v7681_v15  ;;  %11208 = vst [vmem:[#allocation108_spill] sm:$0xff] %v7705_v11  ;;  %v7707_v16 = vmin.f32 %v935_v12, 6.0  ;;  %5884 = vmatpush3.msra.mxu0 %v7297_v21  ;;  %v4401_v0 = vmul.f32 %v6736_v46, %v7618_v8  ;;  %v7718_v26 = vsel %vm1102_vm2, %v10882_v39, %v10881_v31  ;;  %v938_v55 = vmax.f32 %v7443_v40, 0.0 }
 0x143   : > { %11206 = vst [vmem:[#allocation106_spill] sm:$0xff] %v7697_v1  ;;  %11207 = vst [vmem:[#allocation107_spill] sm:$0xff] %v7701_v3  ;;  %v1482_v12 = vsel %vm1436_vm4, %v10884_v34, %v10883_v37  ;;  %5885 = vmatprep.subr.mxu0 %v7730_v29  ;;  %v7735_v31 = vsel %vm1506_vm5, %v1481_v52, 0.0  ;;  %v7739_v39 = vmul.f32 %v6728_v35, %v7636_v9  ;;  %v7749_v34 = vpop.f32.mrf.mxu0  ;;  %v7761_v3 = vld [vmem:[%s10793_s4 + $0x68] sm:$0xff] }
 0x144   : > { %11209 = vst [vmem:[#allocation109_spill] sm:$0xff] %v7707_v16  ;;  %11210 = vst [vmem:[#allocation110_spill] sm:$0xff] %v7718_v26  ;;  %v7743_v37 = vmul.f32 %v6736_v46, %v7636_v9  ;;  %v7747_v40 = vmul.f32 %v6741_v50, %v7650_v30  ;;  %5886 = vmatpush3.msra.mxu0 %v7730_v29  ;;  %v4388_v52 = vmul.f32 %v6731_v36, %v7705_v11 }
 0x145   : > { %11211 = vst [vmem:[#allocation111_spill] sm:$0xff] %v7735_v31  ;;  %11212 = vst [vmem:[#allocation112_spill] sm:$0xff] %v7739_v39  ;;  %v4393_v1 = vadd.f32 %v6750_v56, %v4389_v61  ;;  %v4598_v43 = vmul.f32 %v6731_v36, %v7718_v26  ;;  %5887 = vmatprep.subr.mxu0 %v7761_v3  ;;  %v7774_v45 = vmul.f32 %v6739_v49, %v7666_v41  ;;  %v7804_v14 = vpop.f32.mrf.mxu0 }
 0x146   : > { %11213 = vst [vmem:[#allocation113_spill] sm:$0xff] %v7747_v40  ;;  %v7766_v40 = vsel %vm1506_vm5, %v1482_v12, 0.0  ;;  %5888 = vmatpush3.msra.mxu0 %v7761_v3  ;;  %v4610_v9 = vmul.f32 %v6736_v46, %v7650_v30  ;;  %v937_v12 = vmax.f32 %v7504_v48, 0.0  ;;  %v4413_v39 = vmul.f32 %v6764_v10, %v7735_v31 }
 0x147   : > { %11214 = vst [vmem:[#allocation114_spill] sm:$0xff] %v7766_v40  ;;  %11215 = vst [vmem:[#allocation115_spill] sm:$0xff] %v7774_v45  ;;  %v4602_v8 = vadd.f32 %v6750_v56, %v4598_v43  ;;  %5889 = vmatprep.subr.mxu0 %v7783_v47  ;;  %v11216_v61 = vrot.slane %v7681_v15, 7  ;;  %v11217_v41 = vrot.slane %v7707_v16, 7  ;;  %v11219_v48 = vrot.slane %v7707_v16, 1 }
 0x148   : > { %v11220_v43 = vrot.slane %v7681_v15, 1  ;;  %v7802_v51 = vmin.f32 %v938_v55, 6.0  ;;  %5890 = vmatpush3.msra.mxu0 %v7783_v47  ;;  %v4392_v31 = vadd.f32 %v6750_v56, %v4388_v52  ;;  %v7810_v17 = vmul.f32 %v6728_v35, %v7650_v30 }
 0x149   : > { %v7794_v45 = vsel %vm1102_vm2, %v11217_v41, %v11216_v61  ;;  %v4614_v41 = vadd.f32 %v4610_v9, %v4602_v8  ;;  %v4622_v61 = vmul.f32 %v6764_v10, %v7766_v40  ;;  %v4405_v55 = vadd.f32 %v4401_v0, %v4393_v1  ;;  %v7838_v0 = vld [vmem:[%s10793_s4 + $0x50] sm:$0xff]  ;;  %v7850_v40 = vpop.f32.mrf.mxu0 }
 0x14a   : > { %11218 = vst [vmem:[#allocation116_spill] sm:$0xff] %v7794_v45  ;;  %v1483_v11 = vsel %vm1436_vm4, %v11220_v43, %v11219_v48  ;;  %11221 = vst [vmem:[#allocation117_spill] sm:$0xff] %v7802_v51  ;;  %v7817_v48 = vld [vmem:[%s10793_s4 + $0x58] sm:$0xff]  ;;  %v4646_v43 = vmul.f32 %v6728_v35, %v7681_v15  ;;  %v4819_v56 = vmul.f32 %v6736_v46, %v7681_v15  ;;  %v7833_v1 = vmin.f32 %v937_v12, 6.0 }
 0x14b   : > { %11222 = vst [vmem:[#allocation118_spill] sm:$0xff] %v7810_v17  ;;  %11223 = vst [vmem:[#allocation119_spill] sm:$0xff] %v7817_v48  ;;  %5891 = vmatprep.subr.mxu0 %v7817_v48  ;;  %v4807_v8 = vmul.f32 %v6731_v36, %v7794_v45  ;;  %v4626_v9 = vadd.f32 %v4622_v61, %v4614_v41  ;;  %v7829_v52 = vsel %vm1506_vm5, %v1483_v11, 0.0  ;;  %v7844_v41 = vld [vmem:[%s10792_s3] ss:$0 sm:$0xff]  ;;  %v939_v12 = vmax.f32 %v7585_v42, 0.0 }
 0x14c   : > { %5892 = vmatpush3.msra.mxu0 %v7817_v48  ;;  %11224 = vst [vmem:[#allocation120_spill] sm:$0xff] %v7829_v52  ;;  %v4634_v17 = vmul.f32 %v6739_v49, %v7794_v45  ;;  %11225 = vst [vmem:[#allocation121_spill] sm:$0xff] %v7833_v1  ;;  %v940_v45 = vmax.f32 %v7548_v7, 0.0  ;;  %v10901_v4 = vrot.slane %v7833_v1, 7  ;;  %v10904_v59 = vrot.slane %v7833_v1, 1 }
 0x14d   : > { %11226 = vst [vmem:[#allocation122_spill] sm:$0xff] %v7838_v0  ;;  %5893 = vmatprep.subr.mxu0 %v7838_v0  ;;  %v4811_v11 = vadd.f32 %v7844_v41, %v4807_v8  ;;  %v7859_v8 = vld [vmem:[%s10793_s4 + $0x48] sm:$0xff]  ;;  %v4831_v42 = vmul.f32 %v6764_v10, %v7829_v52  ;;  %v945_v58 = vmax.f32 %v7850_v40, 0.0 }
 0x14e   : > { %5894 = vmatpush3.msra.mxu0 %v7838_v0  ;;  %v4638_v30 = vadd.f32 %v4634_v17, %v4626_v9  ;;  %11227 = vst [vmem:[#allocation123_spill] sm:$0xff] %v7859_v8  ;;  %v7864_v61 = vmin.f32 %v940_v45, 6.0  ;;  %v7866_v17 = vmin.f32 %v939_v12, 6.0  ;;  %v11228_v9 = vrot.slane %v7802_v51, 7 }
 0x14f   : > { %5895 = vmatprep.subr.mxu0 %v7859_v8  ;;  %v4823_v7 = vadd.f32 %v4819_v56, %v4811_v11  ;;  %v11229_v56 = vrot.slane %v7802_v51, 1  ;;  %v4658_v12 = vmul.f32 %v6779_v24, %v7829_v52 }
 0x150   : > { %5896 = vmatpush3.msra.mxu0 %v7859_v8  ;;  %v1118_v25 = vsel %vm1102_vm2, %v10901_v4, %v11228_v9  ;;  %v4650_v45 = vadd.f32 %v4646_v43, %v4638_v30  ;;  %v4417_v9 = vadd.f32 %v4413_v39, %v4405_v55  ;;  %v7893_v4 = vmul.f32 %v6728_v35, %v7656_v38  ;;  %v7909_v55 = vld [vmem:[%s10793_s4 + $0x38] sm:$0xff] }
 0x151   : > { %v7881_v11 = vsel %vm1436_vm4, %v11229_v56, %v10904_v59  ;;  %5897 = vmatprep.subr.mxu0 %v7888_v13  ;;  %v4835_v1 = vadd.f32 %v4831_v42, %v4823_v7  ;;  %v4843_v56 = vmul.f32 %v6739_v49, %v1118_v25  ;;  %v7896_v59 = vpop.f32.mrf.mxu0  ;;  %v4425_v30 = vmul.f32 %v6739_v49, %v7718_v26 }
 0x152   : > { %11230 = vst [vmem:[#allocation124_spill] sm:$0xff] %v7881_v11  ;;  %11232 = vst [vmem:[#allocation126_spill] sm:$0xff] %v7893_v4  ;;  %5898 = vmatpush3.msra.mxu0 %v7888_v13  ;;  %v7903_v43 = vmul.f32 %v6736_v46, %v7656_v38  ;;  %v4662_v52 = vadd.f32 %v4658_v12, %v4650_v45  ;;  %v4671_v39 = vmul.f32 %v6786_v33, %v1118_v25 }
 0x153   : > { %11234 = vst [vmem:[#allocation128_spill] sm:$0xff] %v7909_v55  ;;  %5899 = vmatprep.subr.mxu0 %v7909_v55  ;;  %v7912_v7 = vadd.f32 %v4843_v56, %v4835_v1  ;;  %v1086_v42 = vrot.slane %v7864_v61, 7  ;;  %v1054_v4 = vrot.slane %v7866_v17, 7  ;;  %v942_v11 = vmax.f32 %v7624_v5, 0.0  ;;  %v7934_v56 = vld [vmem:[%s10793_s4 + $0x30] sm:$0xff] }
 0x154   : > { %11233 = vst [vmem:[#allocation127_spill] sm:$0xff] %v7903_v43  ;;  %5900 = vmatpush3.msra.mxu0 %v7909_v55  ;;  %v7919_v45 = vadd.f32 %v7743_v37, %v4392_v31  ;;  %v7923_v25 = vmul.f32 %v6741_v50, %v7681_v15  ;;  %v7927_v12 = vmul.f32 %v6728_v35, %v7707_v16  ;;  %11240 = vst [vmem:[#allocation134_spill] sm:$0xff] %v7934_v56 }
 0x155   : > { %11235 = vst [vmem:[#allocation129_spill] sm:$0xff] %v7912_v7  ;;  %v7929_v1 = vadd.f32 %v4671_v39, %v4662_v52  ;;  %5901 = vmatprep.subr.mxu0 %v7934_v56  ;;  %v7937_v5 = vadd.f32 %v4425_v30, %v4417_v9  ;;  %v7941_v31 = vmul.f32 %v6736_v46, %v7707_v16  ;;  %v7947_v39 = vpop.f32.mrf.mxu0  ;;  %v1388_v9 = vrot.slane %v7866_v17, 1 }
 0x156   : > { %11236 = vst [vmem:[#allocation130_spill] sm:$0xff] %v7919_v45  ;;  %11237 = vst [vmem:[#allocation131_spill] sm:$0xff] %v7923_v25  ;;  %v1119_v37 = vsel %vm1102_vm2, %v1054_v4, %v1086_v42  ;;  %v1151_v52 = vsel %vm1102_vm2, %v1086_v42, %v1054_v4  ;;  %5902 = vmatpush3.msra.mxu0 %v7934_v56  ;;  %v7958_v45 = vld [vmem:[%s10793_s4 + $0x28] sm:$0xff]  ;;  %v11244_v4 = vrot.slane %v7707_v16, 7  ;;  %v11245_v42 = vrot.slane %v7681_v15, 7 }
 0x157   : > { %11238 = vst [vmem:[#allocation132_spill] sm:$0xff] %v7927_v12  ;;  %11239 = vst [vmem:[#allocation133_spill] sm:$0xff] %v7929_v1  ;;  %v1211_v25 = vsel %vm1169_vm3, %v1151_v52, 0.0  ;;  %v1875_v30 = vmul.f32 %v6731_v36, %v1119_v37  ;;  %5903 = vmatprep.subr.mxu0 %v7958_v45  ;;  %v7971_v7 = vmul.f32 %v6741_v50, %v7802_v51  ;;  %v1420_v12 = vrot.slane %v7864_v61, 1 }
 0x158   : > { %11241 = vst [vmem:[#allocation135_spill] sm:$0xff] %v7937_v5  ;;  %11242 = vst [vmem:[#allocation136_spill] sm:$0xff] %v7941_v31  ;;  %v941_v5 = vmax.f32 %v7653_v6, 0.0  ;;  %v7967_v52 = vsel %vm1102_vm2, %v11245_v42, %v11244_v4  ;;  %v1874_v6 = vmul.f32 %v6731_v36, %v1211_v25  ;;  %v7974_v31 = vmin.f32 %v942_v11, 6.0  ;;  %5904 = vmatpush3.msra.mxu0 %v7958_v45 }
 0x159   : > { %11243 = vst [vmem:[#allocation137_spill] sm:$0xff] %v7958_v45  ;;  %11246 = vst [vmem:[#allocation138_spill] sm:$0xff] %v7967_v52  ;;  %v7979_v1 = vmul.f32 %v6728_v35, %v7802_v51  ;;  %v7984_v4 = vmul.f32 %v6728_v35, %v7864_v61  ;;  %v1677_v42 = vmul.f32 %v6739_v49, %v1211_v25  ;;  %v944_v16 = vmax.f32 %v7683_v53, 0.0  ;;  %v7998_v51 = vpop.f32.mrf.mxu0  ;;  %v8013_v53 = vld [vmem:[%s10793_s4 + $0x18] sm:$0xff] }
 0x15a   : > { %11247 = vst [vmem:[#allocation139_spill] sm:$0xff] %v7971_v7  ;;  %v7990_v7 = vld [vmem:[%s10793_s4 + $0x20] sm:$0xff]  ;;  %v1891_v11 = vmul.f32 %v6736_v46, %v7864_v61  ;;  %v946_v15 = vmax.f32 %v7804_v14, 0.0  ;;  %v8003_v25 = vsel %vm1436_vm4, %v1388_v9, %v1420_v12  ;;  %v1693_v43 = vmul.f32 %v6728_v35, %v7866_v17  ;;  %11250 = vst [vmem:[#allocation142_spill] sm:$0xff] %v8013_v53 }
 0x15b   : > { %11248 = vst [vmem:[#allocation140_spill] sm:$0xff] %v7979_v1  ;;  %11249 = vst [vmem:[#allocation141_spill] sm:$0xff] %v7990_v7  ;;  %5905 = vmatprep.subr.mxu0 %v7990_v7  ;;  %v1878_v1 = vadd.f32 %v7844_v41, %v1874_v6  ;;  %v1879_v52 = vadd.f32 %v7844_v41, %v1875_v30  ;;  %v8008_v61 = vmin.f32 %v941_v5, 6.0  ;;  %v943_v30 = vmax.f32 %v7749_v34, 0.0 }
 0x15c   : > { %5906 = vmatpush3.msra.mxu0 %v7990_v7  ;;  %v8018_v14 = vsel %vm1436_vm4, %v1420_v12, %v1388_v9  ;;  %v1890_v6 = vmul.f32 %v6736_v46, %v7866_v17  ;;  %v8026_v5 = vmul.f32 %v6739_v49, %v1119_v37  ;;  %v1681_v38 = vadd.f32 %v7844_v41, %v1677_v42  ;;  %v8035_v12 = vld [vmem:[%s10793_s4 + $0x10] sm:$0xff]  ;;  %v798_v42 = vpop.f32.mrf.mxu0 }
 0x15d   : > { %5907 = vmatprep.subr.mxu0 %v8013_v53  ;;  %v8029_v28 = vmin.f32 %v946_v15, 6.0  ;;  %11252 = vst [vmem:[#allocation144_spill] sm:$0xff] %v8035_v12  ;;  %v1906_v34 = vmul.f32 %v6764_v10, %v8003_v25  ;;  %v8041_v9 = vmin.f32 %v944_v16, 6.0  ;;  %v8044_v15 = vadd.f32 %v1891_v11, %v1879_v52  ;;  %v8058_v16 = vld [vmem:[%s10793_s4 + $0x8] sm:$0xff] }
 0x15e   : > { %5908 = vmatpush3.msra.mxu0 %v8013_v53  ;;  %v1894_v17 = vadd.f32 %v1890_v6, %v1878_v1  ;;  %v8048_v40 = vmul.f32 %v6728_v35, %v7974_v31  ;;  %v8052_v26 = vmul.f32 %v6736_v46, %v7974_v31  ;;  %11253 = vst [vmem:[#allocation145_spill] sm:$0xff] %v8058_v16  ;;  %v8066_v6 = vmin.f32 %v943_v30, 6.0  ;;  %v8082_v30 = vld [vmem:[%s10793_s4] sm:$0xff] }
 0x15f   : > { %11251 = vst [vmem:[#allocation143_spill] sm:$0xff] %v8029_v28  ;;  %5909 = vmatprep.subr.mxu0 %v8035_v12  ;;  %v8064_v11 = vmul.f32 %v6728_v35, %v8008_v61  ;;  %v948_v37 = vmax.f32 %v7896_v59, 0.0  ;;  %v8070_v1 = vadd.f32 %v1693_v43, %v1681_v38  ;;  %v8074_v44 = vmul.f32 %v6736_v46, %v8008_v61 }
 0x160   : > { %5910 = vmatpush3.msra.mxu0 %v8035_v12  ;;  %v5627_v12 = vpop.f32.mrf.mxu0  ;;  %v1089_v53 = vrot.slane %v8029_v28, 7  ;;  %v8077_v52 = vmin.f32 %v945_v58, 6.0  ;;  %11255 = vst [vmem:[#allocation147_spill] sm:$0xff] %v8082_v30  ;;  %v8085_v59 = vadd.f32 %v1906_v34, %v1894_v17  ;;  %v8093_v58 = vmul.f32 %v6728_v35, %v8041_v9 }
 0x161   : > { %5911 = vmatprep.subr.mxu0 %v8058_v16  ;;  %v1423_v7 = vrot.slane %v8029_v28, 1  ;;  %v8101_v17 = vmul.f32 %v6736_v46, %v8041_v9  ;;  %v8105_v43 = vmin.f32 %v948_v37, 6.0  ;;  %v950_v22 = vmax.f32 %v7998_v51, 0.0 }
 0x162   : > { %5912 = vmatpush3.msra.mxu0 %v8058_v16  ;;  %11254 = vst [vmem:[#allocation146_spill] sm:$0xff] %v8077_v52  ;;  %v947_v16 = vmax.f32 %v7947_v39, 0.0  ;;  %11256 = vst [vmem:[#allocation148_spill] sm:$0xff] %v8093_v58  ;;  %v1057_v20 = vrot.slane %v8077_v52, 7  ;;  %v1391_v45 = vrot.slane %v8077_v52, 1  ;;  %v808_v38 = vpop.f32.mrf.mxu0  ;;  %v8109_v58 = vmul.f32 %v6728_v35, %v8066_v6 }
 0x163   : > { %5913 = vmatprep.subr.mxu0 %v8082_v30  ;;  %11257 = vst [vmem:[#allocation149_spill] sm:$0xff] %v8105_v43  ;;  %v8120_v39 = vmul.f32 %v6728_v35, %v8029_v28  ;;  %v8124_v37 = vmul.f32 %v6736_v46, %v8029_v28  ;;  %v949_v18 = vmax.f32 %v798_v42, 0.0  ;;  %v952_v56 = vmax.f32 %v5627_v12, 0.0 }
 0x164   : > { %5914 = vmatpush3.msra.mxu0 %v8082_v30  ;;  %11258 = vst [vmem:[#allocation150_spill] sm:$0xff] %v8109_v58  ;;  %v8113_v30 = vmul.f32 %v6736_v46, %v8066_v6  ;;  %v8130_v58 = vmin.f32 %v947_v16, 6.0  ;;  %v1488_v63 = vsel %vm1436_vm4, %v1423_v7, %v1391_v45  ;;  %v951_v51 = vmax.f32 %v808_v38, 0.0 }
 0x165   : > { %5959 = vmatprep.subr.mxu0 %v7297_v21  ;;  %v1154_v21 = vsel %vm1102_vm2, %v1089_v53, %v1057_v20  ;;  %11259 = vst [vmem:[#allocation151_spill] sm:$0xff] %v8120_v39  ;;  %11260 = vst [vmem:[#allocation152_spill] sm:$0xff] %v8124_v37  ;;  %v8136_v55 = vsel %vm1102_vm2, %v1057_v20, %v1089_v53  ;;  %v1090_v28 = vrot.slane %v8105_v43, 7  ;;  %v8149_v38 = vmin.f32 %v950_v22, 6.0 }
 0x166   : > { %v8128_v34 = vsel %vm1169_vm3, %v1154_v21, 0.0  ;;  %11262 = vst [vmem:[#allocation154_spill] sm:$0xff] %v8130_v58  ;;  %11263 = vst [vmem:[#allocation155_spill] sm:$0xff] %v8136_v55  ;;  %v1058_v21 = vrot.slane %v8130_v58, 7  ;;  %v8144_v16 = vmul.f32 %v6728_v35, %v8077_v52  ;;  %v2521_v42 = vmul.f32 %v6736_v46, %v8077_v52 }
 0x167   : > { %11261 = vst [vmem:[#allocation153_spill] sm:$0xff] %v8128_v34  ;;  %v2509_v39 = vmul.f32 %v6731_v36, %v8128_v34  ;;  %v8153_v20 = vsel %vm1436_vm4, %v1391_v45, %v1423_v7  ;;  %v8157_v53 = vsel %vm1506_vm5, %v1488_v63, 0.0  ;;  %v8161_v34 = vmul.f32 %v6728_v35, %v8105_v43 }
 0x168   : > { %11264 = vst [vmem:[#allocation156_spill] sm:$0xff] %v8144_v16  ;;  %11265 = vst [vmem:[#allocation157_spill] sm:$0xff] %v8153_v20  ;;  %v8165_v16 = vmul.f32 %v6736_v46, %v8105_v43  ;;  %v8169_v22 = vmul.f32 %v6731_v36, %v8136_v55  ;;  %v8172_v7 = vmin.f32 %v949_v18, 6.0  ;;  %v8174_v45 = vmin.f32 %v952_v56, 6.0 }
 0x169   : > { %11266 = vst [vmem:[#allocation158_spill] sm:$0xff] %v8157_v53  ;;  %11267 = vst [vmem:[#allocation159_spill] sm:$0xff] %v8161_v34  ;;  %v2513_v63 = vadd.f32 %v7844_v41, %v2509_v39  ;;  %v1155_v52 = vsel %vm1102_vm2, %v1090_v28, %v1058_v21  ;;  %v8181_v34 = vmul.f32 %v6728_v35, %v8130_v58  ;;  %v8193_v39 = vmin.f32 %v951_v51, 6.0 }
 0x16a   : > { %11268 = vst [vmem:[#allocation160_spill] sm:$0xff] %v8165_v16  ;;  %11269 = vst [vmem:[#allocation161_spill] sm:$0xff] %v8169_v22  ;;  %v8185_v16 = vmul.f32 %v6736_v46, %v8130_v58  ;;  %v8191_v56 = vmul.f32 %v6728_v35, %v8149_v38  ;;  %v8197_v12 = vsel %vm1102_vm2, %v1058_v21, %v1090_v28  ;;  %v11276_v37 = vrot.slane %v8008_v61, 7 }
 0x16b   : > { %11270 = vst [vmem:[#allocation162_spill] sm:$0xff] %v8174_v45  ;;  %11271 = vst [vmem:[#allocation163_spill] sm:$0xff] %v8181_v34  ;;  %v8201_v53 = vmul.f32 %v6736_v46, %v8149_v38  ;;  %v11277_v55 = vrot.slane %v7974_v31, 7  ;;  %v8213_v51 = vsel %vm1169_vm3, %v1155_v52, 0.0  ;;  %v1092_v21 = vrot.slane %v8174_v45, 7 }
 0x16c   : > { %11272 = vst [vmem:[#allocation164_spill] sm:$0xff] %v8191_v56  ;;  %11273 = vst [vmem:[#allocation165_spill] sm:$0xff] %v8193_v39  ;;  %v1709_v56 = vmul.f32 %v6779_v24, %v8003_v25  ;;  %v8218_v22 = vadd.f32 %v2521_v42, %v2513_v63  ;;  %v2718_v13 = vmul.f32 %v6731_v36, %v8213_v51 }
 0x16d   : > { %11274 = vst [vmem:[#allocation166_spill] sm:$0xff] %v8197_v12  ;;  %11275 = vst [vmem:[#allocation167_spill] sm:$0xff] %v8201_v53  ;;  %v1152_v18 = vsel %vm1102_vm2, %v11277_v55, %v11276_v37  ;;  %v1060_v53 = vrot.slane %v8193_v39, 7  ;;  %v8229_v52 = vmul.f32 %v6731_v36, %v8197_v12  ;;  %v8234_v28 = vmul.f32 %v6728_v35, %v8172_v7 }
 0x16e   : > { %11278 = vst [vmem:[#allocation168_spill] sm:$0xff] %v8213_v51  ;;  %11279 = vst [vmem:[#allocation169_spill] sm:$0xff] %v8218_v22  ;;  %v8224_v55 = vsel %vm1169_vm3, %v1152_v18, 0.0  ;;  %v1713_v25 = vadd.f32 %v1709_v56, %v8070_v1  ;;  %v8240_v63 = vmul.f32 %v6736_v46, %v8172_v7  ;;  %v8245_v1 = vmul.f32 %v6728_v35, %v8174_v45 }
 0x16f   : > { %11280 = vst [vmem:[#allocation170_spill] sm:$0xff] %v8229_v52  ;;  %11281 = vst [vmem:[#allocation171_spill] sm:$0xff] %v8234_v28  ;;  %v1726_v42 = vmul.f32 %v6786_v33, %v8224_v55  ;;  %v11284_v56 = vrot.slane %v7974_v31, 1  ;;  %v11285_v37 = vrot.slane %v8008_v61, 1  ;;  %v1157_v52 = vsel %vm1102_vm2, %v1092_v21, %v1060_v53 }
 0x170   : > { %11282 = vst [vmem:[#allocation172_spill] sm:$0xff] %v8240_v63  ;;  %11283 = vst [vmem:[#allocation173_spill] sm:$0xff] %v8245_v1  ;;  %v1743_v63 = vmul.f32 %v6741_v50, %v8008_v61  ;;  %v2091_v18 = vmul.f32 %v6731_v36, %v8224_v55  ;;  %v2722_v34 = vadd.f32 %v7844_v41, %v2718_v13 }
 0x171   : > { %v1454_v28 = vsel %vm1436_vm4, %v11285_v37, %v11284_v56  ;;  %v1730_v12 = vadd.f32 %v1726_v42, %v1713_v25  ;;  %v8262_v1 = vmul.f32 %v6736_v46, %v8174_v45  ;;  %v1546_v37 = vsel %vm1506_vm5, %v8018_v14, 0.0  ;;  %v8272_v42 = vld [vmem:[%s10791_s2 + $0x8] ss:$0 sm:$0xff] }
 0x172   : > { %v1682_v56 = vadd.f32 %v7844_v41, %v8026_v5  ;;  %v1760_v8 = vmul.f32 %v8272_v42, %v1454_v28  ;;  %v2095_v13 = vadd.f32 %v7844_v41, %v2091_v18  ;;  %v11287_v45 = vrot.slane %v7974_v31, 7 }
 0x173   : > { %11286 = vst [vmem:[#allocation174_spill] sm:$0xff] %v8262_v1  ;;  %v1747_v25 = vadd.f32 %v1743_v63, %v1730_v12  ;;  %v11288_v1 = vrot.slane %v8008_v61, 7  ;;  %v8284_v5 = vsel %vm1169_vm3, %v1157_v52, 0.0  ;;  %v11290_v12 = vrot.slane %v8008_v61, 1 }
 0x174   : > { %11289 = vst [vmem:[#allocation175_spill] sm:$0xff] %v8284_v5  ;;  %v11291_v63 = vrot.slane %v7974_v31, 1  ;;  %v1698_v18 = vadd.f32 %v7984_v4, %v1682_v56  ;;  %v1710_v22 = vmul.f32 %v6779_v24, %v1546_v37  ;;  %v3136_v51 = vmul.f32 %v6731_v36, %v8284_v5  ;;  %v11294_v5 = vld [vmem:[#allocation14_spill] sm:$0xff] }
 0x175   : > { %v1120_v14 = vsel %vm1102_vm2, %v11288_v1, %v11287_v45  ;;  %v1764_v58 = vadd.f32 %v1760_v8, %v1747_v25  ;;  %v2107_v45 = vadd.f32 %v8074_v44, %v2095_v13  ;;  %v2115_v52 = vmul.f32 %v6764_v10, %v1454_v28  ;;  %v11292_v13 = vld [vmem:[#allocation13_spill] sm:$0xff] }
 0x176   : > { %v1486_v0 = vsel %vm1436_vm4, %v11291_v63, %v11290_v12  ;;  %v3148_v61 = vmul.f32 %v6736_v46, %v8193_v39  ;;  %v1714_v43 = vadd.f32 %v1710_v22, %v1698_v18  ;;  %v1727_v12 = vmul.f32 %v6786_v33, %v1120_v14 }
 0x177   : > { %v1768_v63 = vmax.f32 %v1764_v58, 0.0  ;;  %v8302_v4 = vadd.f32 %v2115_v52, %v2107_v45  ;;  %v1548_v56 = vsel %vm1506_vm5, %v1486_v0, 0.0  ;;  %v2092_v8 = vmul.f32 %v6731_v36, %v1120_v14 }
 0x178   : > { %v1731_v25 = vadd.f32 %v1727_v12, %v1714_v43  ;;  %v1744_v44 = vmul.f32 %v6741_v50, %v7974_v31  ;;  %v11293_v1 = vrot.slane %v11292_v13, 1  ;;  %v11295_v48 = vrot.slane %v11294_v5, 1  ;;  %v5630_v31 = vpop.f32.mrf.mxu0 }
 0x179   : > { %v1953_v58 = vmul.f32 %v6786_v33, %v7125_v62  ;;  %v8319_v18 = vsel %vm1102_vm2, %v1060_v53, %v1092_v21  ;;  %v3140_v0 = vadd.f32 %v7844_v41, %v3136_v51  ;;  %v1772_v43 = vmin.f32 %v1768_v63, 6.0 }
 0x17a   : > { %v1439_v22 = vsel %vm1436_vm4, %v11295_v48, %v11293_v1  ;;  %11296 = vst [vmem:[#allocation13_spill] sm:$0xff] %v8319_v18  ;;  %v2096_v45 = vadd.f32 %v7844_v41, %v2092_v8  ;;  %v1748_v52 = vadd.f32 %v1744_v44, %v1731_v25  ;;  %v1761_v12 = vmul.f32 %v8272_v42, %v1548_v56  ;;  %v11297_v8 = vld [vmem:[#allocation25_spill] sm:$0xff] }
 0x17b   : > { %v1957_v13 = vadd.f32 %v1953_v58, %v7171_v2  ;;  %v1966_v48 = vmul.f32 %v6741_v50, %v11294_v5  ;;  %5690 = vmatprep.mubr.f32.mxu1 %v1772_v43  ;;  %v2116_v53 = vmul.f32 %v6764_v10, %v1548_v56  ;;  %v1979_v21 = vmul.f32 %v8272_v42, %v1439_v22  ;;  %v11298_v2 = vld [vmem:[#allocation16_spill] sm:$0xff]  ;;  %v818_v43 = vpop.f32.mrf.mxu0 }
 0x17c   : > { %v2108_v62 = vadd.f32 %v8052_v26, %v2096_v45  ;;  %v2302_v51 = vadd.f32 %v7844_v41, %v7233_v23  ;;  %v1765_v1 = vadd.f32 %v1761_v12, %v1748_v52  ;;  %v1518_v25 = vsel %vm1506_vm5, %v11297_v8, 0.0 }
 0x17d   : > { %v1970_v63 = vadd.f32 %v1966_v48, %v1957_v13  ;;  %v1971_v44 = vadd.f32 %v11298_v2, %v7265_v57  ;;  %v8338_v5 = vadd.f32 %v8185_v16, %v2722_v34  ;;  %v8342_v26 = vmul.f32 %v6728_v35, %v8193_v39 }
 0x17e   : > { %v8346_v58 = vmul.f32 %v6731_v36, %v8319_v18  ;;  %v8348_v23 = vadd.f32 %v2116_v53, %v2108_v62  ;;  %v1918_v45 = vmul.f32 %v6739_v49, %v8224_v55  ;;  %v1942_v52 = vmul.f32 %v6779_v24, %v1454_v28  ;;  %v11304_v28 = vld [vmem:[#allocation27_spill] sm:$0xff] }
 0x17f   : > { %11299 = vst [vmem:[#allocation14_spill] sm:$0xff] %v8338_v5  ;;  %v1769_v57 = vmax.f32 %v1765_v1, 0.0  ;;  %v1983_v12 = vadd.f32 %v1979_v21, %v1970_v63  ;;  %v8353_v34 = vadd.f32 %v3148_v61, %v3140_v0  ;;  %v1907_v16 = vmul.f32 %v6764_v10, %v1546_v37  ;;  %v11305_v1 = vld [vmem:[#allocation17_spill] sm:$0xff] }
 0x180   : > { %11300 = vst [vmem:[#allocation25_spill] sm:$0xff] %v8346_v58  ;;  %11301 = vst [vmem:[#allocation16_spill] sm:$0xff] %v8348_v23  ;;  %v954_v13 = vmax.f32 %v5630_v31, 0.0  ;;  %v1980_v48 = vmul.f32 %v8272_v42, %v1518_v25  ;;  %v11303_v58 = vld [vmem:[#allocation21_spill] sm:$0xff]  ;;  %v953_v53 = vmax.f32 %v818_v43, 0.0  ;;  %v1919_v5 = vmul.f32 %v6739_v49, %v1120_v14 }
 0x181   : > { %11302 = vst [vmem:[#allocation176_spill] sm:$0xff] %v8353_v34  ;;  %v1773_v8 = vmin.f32 %v1769_v57, 6.0  ;;  %v1987_v2 = vmax.f32 %v1983_v12, 0.0  ;;  %v2314_v62 = vadd.f32 %v11303_v58, %v2302_v51  ;;  %v1943_v55 = vmul.f32 %v6779_v24, %v1548_v56  ;;  %v11350_v34 = vld [vmem:[#allocation134_spill] sm:$0xff] }
 0x182   : > { %v1984_v23 = vadd.f32 %v1980_v48, %v1971_v44  ;;  %v2315_v21 = vadd.f32 %v11305_v1, %v11304_v28  ;;  %v2322_v37 = vmul.f32 %v6764_v10, %v1439_v22  ;;  %v2323_v0 = vmul.f32 %v6764_v10, %v1518_v25 }
 0x183   : > { %5691 = vmatmul.mubr.f32.gmra.mxu1 %v1773_v8  ;;  %v1991_v61 = vmin.f32 %v1987_v2, 6.0  ;;  %v11306_v31 = vrot.slane %v8066_v6, 7  ;;  %v11307_v63 = vrot.slane %v8041_v9, 7  ;;  %v2149_v14 = vmul.f32 %v6779_v24, %v1439_v22 }
 0x184   : > { %v8371_v56 = vmin.f32 %v954_v13, 6.0  ;;  %v1988_v44 = vmax.f32 %v1984_v23, 0.0  ;;  %v1922_v58 = vadd.f32 %v1918_v45, %v8085_v59  ;;  %v8374_v43 = vadd.f32 %v2322_v37, %v2314_v62 }
 0x185   : > { %v1153_v51 = vsel %vm1102_vm2, %v11307_v63, %v11306_v31  ;;  %5725 = vmatprep.mubr.f32.mxu1 %v1991_v61  ;;  %v8376_v57 = vmin.f32 %v953_v53, 6.0  ;;  %v8378_v12 = vadd.f32 %v2323_v0, %v2315_v21  ;;  %v8390_v23 = vmul.f32 %v6779_v24, %v1518_v25  ;;  %v8416_v31 = vld [vmem:[%s10793_s4 + $0x78] sm:$0xff] }
 0x186   : > { %v8382_v48 = vsel %vm1169_vm3, %v1153_v51, 0.0  ;;  %v1992_v8 = vmin.f32 %v1988_v44, 6.0  ;;  %v1934_v2 = vadd.f32 %v8064_v11, %v1922_v58  ;;  %v11308_v45 = vrot.slane %v8041_v9, 1 }
 0x187   : > { %v1955_v22 = vmul.f32 %v6786_v33, %v8382_v48  ;;  %v2300_v59 = vmul.f32 %v6731_v36, %v8382_v48  ;;  %v11309_v13 = vrot.slane %v8066_v6, 1  ;;  %v1911_v1 = vadd.f32 %v1907_v16, %v8044_v15 }
 0x188   : > { %v11311_v11 = vmov %v11308_v45  ;;  %5726 = vmatmul.mubr.f32.vlgmr.msra.gmra.mxu1 %v1992_v8  ;;  %v1946_v25 = vadd.f32 %v1942_v52, %v1934_v2  ;;  %v1968_v21 = vmul.f32 %v6741_v50, %v8066_v6  ;;  %v11312_v52 = vmov %v11307_v63 }
 0x189   : > { %v8398_v62 = vsel %vm1436_vm4, %v11309_v13, %v11308_v45  ;;  %v11310_v53 = vmov %v11309_v13  ;;  %v2304_v61 = vadd.f32 %v7844_v41, %v2300_v59  ;;  %5732 = vmatpush3.msra.mxu1 %v8416_v31  ;;  %v11313_v16 = vrot.slane %v8066_v6, 7 }
 0x18a   : > { %v1487_v28 = vsel %vm1436_vm4, %v11311_v11, %v11310_v53  ;;  %v2324_v37 = vmul.f32 %v6764_v10, %v8398_v62  ;;  %v1981_v15 = vmul.f32 %v8272_v42, %v8398_v62  ;;  %v1923_v51 = vadd.f32 %v1919_v5, %v1911_v1  ;;  %5733 = vmatprep.subr.mxu1 %v7730_v29 }
 0x18b   : > { %v8427_v63 = vsel %vm1102_vm2, %v11313_v16, %v11312_v52  ;;  %v1959_v44 = vadd.f32 %v1955_v22, %v1946_v25  ;;  %v2316_v58 = vadd.f32 %v8113_v30, %v2304_v61  ;;  %v8433_v8 = vsel %vm1506_vm5, %v1487_v28, 0.0  ;;  %5734 = vmatpush3.msra.mxu1 %v7730_v29  ;;  %v11314_v30 = vld [vmem:[#allocation20_spill] sm:$0xff] }
 0x18c   : > { %v2301_v2 = vmul.f32 %v6731_v36, %v8427_v63  ;;  %v1935_v6 = vadd.f32 %v8048_v40, %v1923_v51  ;;  %v1956_v59 = vmul.f32 %v6786_v33, %v8427_v63  ;;  %v1969_v5 = vmul.f32 %v6741_v50, %v8041_v9  ;;  %5735 = vmatprep.subr.mxu1 %v7761_v3  ;;  %v11315_v28 = vld [vmem:[#allocation24_spill] sm:$0xff] }
 0x18d   : > { %v2141_v22 = vadd.f32 %v11314_v30, %v7279_v32  ;;  %v1972_v45 = vadd.f32 %v1968_v21, %v1959_v44  ;;  %v8445_v13 = vadd.f32 %v2324_v37, %v2316_v58  ;;  %v2325_v29 = vmul.f32 %v6764_v10, %v8433_v8  ;;  %5736 = vmatpush3.msra.mxu1 %v7761_v3  ;;  %v11316_v21 = vld [vmem:[#allocation15_spill] sm:$0xff]  ;;  %v11321_v58 = vld [vmem:[#allocation149_spill] sm:$0xff] }
 0x18e   : > { %v2305_v53 = vadd.f32 %v7844_v41, %v2301_v2  ;;  %v1947_v40 = vadd.f32 %v1943_v55, %v1935_v6  ;;  %v1982_v11 = vmul.f32 %v8272_v42, %v8433_v8  ;;  %v2162_v32 = vmul.f32 %v6786_v33, %v11315_v28  ;;  %5737 = vmatprep.subr.mxu1 %v7783_v47  ;;  %v11320_v44 = vld [vmem:[#allocation119_spill] sm:$0xff]  ;;  %v11323_v6 = vld [vmem:[#allocation154_spill] sm:$0xff] }
 0x18f   : > { %v2153_v9 = vadd.f32 %v2149_v14, %v2141_v22  ;;  %v1985_v1 = vadd.f32 %v1981_v15, %v1972_v45  ;;  %v2175_v61 = vmul.f32 %v6741_v50, %v11316_v21  ;;  %v11317_v37 = vrot.slane %v8172_v7, 7  ;;  %5738 = vmatpush3.msra.mxu1 %v7783_v47  ;;  %v11326_v22 = vld [vmem:[#allocation168_spill] sm:$0xff] }
 0x190   : > { %v2317_v25 = vadd.f32 %v8101_v17, %v2305_v53  ;;  %v11318_v55 = vrot.slane %v8149_v38, 7  ;;  %v1960_v3 = vadd.f32 %v1956_v59, %v1947_v40  ;;  %v2188_v16 = vmul.f32 %v8272_v42, %v11153_v54  ;;  %5739 = vmatprep.subr.mxu1 %v11320_v44  ;;  %v11327_v40 = vld [vmem:[#allocation169_spill] sm:$0xff] }
 0x191   : > { %v2166_v14 = vadd.f32 %v2162_v32, %v2153_v9  ;;  %v2533_v17 = vmul.f32 %v6764_v10, %v8153_v20  ;;  %v1989_v15 = vmax.f32 %v1985_v1, 0.0  ;;  %v11322_v2 = vrot.slane %v11321_v58, 1  ;;  %5740 = vmatpush3.msra.mxu1 %v11320_v44 }
 0x192   : > { %v1156_v52 = vsel %vm1102_vm2, %v11318_v55, %v11317_v37  ;;  %v8471_v51 = vadd.f32 %v2325_v29, %v2317_v25  ;;  %v11324_v30 = vrot.slane %v11323_v6, 1  ;;  %v2545_v45 = vmul.f32 %v6739_v49, %v11326_v22  ;;  %v8994_v22 = vld [vmem:[%s10793_s4 + $0x28] sm:$0xff] }
 0x193   : > { %v1973_v47 = vadd.f32 %v1969_v5, %v1960_v3  ;;  %v2179_v53 = vadd.f32 %v2175_v61, %v2166_v14  ;;  %v1221_v29 = vsel %vm1169_vm3, %v1156_v52, 0.0  ;;  %v2537_v9 = vadd.f32 %v2533_v17, %v11327_v40  ;;  %v11329_v5 = vld [vmem:[#allocation122_spill] sm:$0xff]  ;;  %v11333_v40 = vld [vmem:[#allocation125_spill] sm:$0xff] }
 0x194   : > { %11319 = vst [vmem:[#allocation21_spill] sm:$0xff] %v8471_v51  ;;  %v8480_v59 = vsel %vm1436_vm4, %v11324_v30, %v11322_v2  ;;  %v8491_v1 = vmul.f32 %v6728_v35, %v8371_v56  ;;  %v8495_v25 = vmul.f32 %v6736_v46, %v8371_v56  ;;  %v1993_v21 = vmin.f32 %v1989_v15, 6.0  ;;  %5741 = vmatprep.subr.mxu1 %v11329_v5  ;;  %v11331_v15 = vld [vmem:[#allocation123_spill] sm:$0xff] }
 0x195   : > { %11325 = vst [vmem:[#allocation27_spill] sm:$0xff] %v8480_v59  ;;  %v1986_v61 = vadd.f32 %v1982_v11, %v1973_v47  ;;  %v2192_v37 = vadd.f32 %v2188_v16, %v2179_v53  ;;  %5742 = vmatpush3.msra.mxu1 %v11329_v5  ;;  %v2549_v55 = vadd.f32 %v2545_v45, %v2537_v9  ;;  %v11332_v2 = vld [vmem:[#allocation163_spill] sm:$0xff]  ;;  %v11334_v9 = vrot.slane %v11323_v6, 1 }
 0x196   : > { %11328 = vst [vmem:[#allocation17_spill] sm:$0xff] %v8491_v1  ;;  %v2569_v52 = vmul.f32 %v6779_v24, %v8480_v59  ;;  %v8505_v17 = vmul.f32 %v6728_v35, %v8376_v57  ;;  %5728 = vmatprep.mubr.f32.mxu1 %v1993_v21  ;;  %5743 = vmatprep.subr.mxu1 %v11331_v15  ;;  %v11335_v21 = vrot.slane %v11321_v58, 1  ;;  %v11341_v1 = vld [vmem:[#allocation128_spill] sm:$0xff]  ;;  %v11363_v58 = vld [vmem:[#allocation38_spill] sm:$0xff] }
 0x197   : > { %v2927_v11 = vmul.f32 %v6731_v36, %v1221_v29  ;;  %v1990_v16 = vmax.f32 %v1986_v61, 0.0  ;;  %v2196_v44 = vmax.f32 %v2192_v37, 0.0  ;;  %5744 = vmatpush3.msra.mxu1 %v11331_v15  ;;  %v2561_v30 = vadd.f32 %v11332_v2, %v2549_v55  ;;  %v11336_v61 = vld [vmem:[#allocation161_spill] sm:$0xff] }
 0x198   : > { %11330 = vst [vmem:[#allocation20_spill] sm:$0xff] %v8505_v17  ;;  %v2582_v45 = vmul.f32 %v6786_v33, %v1221_v29  ;;  %v8514_v47 = vmul.f32 %v6736_v46, %v8376_v57  ;;  %v8518_v53 = vmul.f32 %v6739_v49, %v8382_v48  ;;  %5745 = vmatprep.subr.mxu1 %v11333_v40  ;;  %v11337_v15 = vrot.slane %v8149_v38, 1 }
 0x199   : > { %v1489_v5 = vsel %vm1436_vm4, %v11335_v21, %v11334_v9  ;;  %v2514_v37 = vadd.f32 %v7844_v41, %v11336_v61  ;;  %v1994_v55 = vmin.f32 %v1990_v16, 6.0  ;;  %v11338_v2 = vrot.slane %v8172_v7, 1  ;;  %5746 = vmatpush3.msra.mxu1 %v11333_v40  ;;  %v11339_v21 = vld [vmem:[#allocation152_spill] sm:$0xff]  ;;  %v11340_v61 = vld [vmem:[#allocation158_spill] sm:$0xff] }
 0x19a   : > { %v2573_v14 = vadd.f32 %v2569_v52, %v2561_v30  ;;  %v2595_v32 = vmul.f32 %v6741_v50, %v8172_v7  ;;  %v2200_v0 = vmin.f32 %v2196_v44, 6.0  ;;  %v2931_v9 = vadd.f32 %v7844_v41, %v2927_v11  ;;  %5747 = vmatprep.subr.mxu1 %v11341_v1  ;;  %v11343_v30 = vld [vmem:[#allocation166_spill] sm:$0xff] }
 0x19b   : > { %v1458_v48 = vsel %vm1436_vm4, %v11338_v2, %v11337_v15  ;;  %v2526_v3 = vadd.f32 %v11339_v21, %v2514_v37  ;;  %v2534_v16 = vmul.f32 %v6764_v10, %v11340_v61  ;;  %5729 = vmatmul.mubr.f32.gmra.mxu1 %v1994_v55  ;;  %v8546_v52 = vsel %vm1506_vm5, %v1489_v5, 0.0 }
 0x19c   : > { %v2586_v17 = vadd.f32 %v2582_v45, %v2573_v14  ;;  %v2608_v15 = vmul.f32 %v8272_v42, %v1458_v48  ;;  %11342 = vst [vmem:[#allocation24_spill] sm:$0xff] %v8546_v52  ;;  %v2546_v44 = vmul.f32 %v6739_v49, %v11343_v30  ;;  %v8552_v11 = vmul.f32 %v6779_v24, %v8398_v62 }
 0x19d   : > { %v8556_v40 = vmul.f32 %v6739_v49, %v8427_v63  ;;  %v8560_v14 = vmul.f32 %v6779_v24, %v8433_v8  ;;  %5763 = vmatprep.mubr.f32.mxu1 %v2200_v0  ;;  %v2538_v45 = vadd.f32 %v2534_v16, %v2526_v3  ;;  %v8564_v5 = vmul.f32 %v6764_v10, %v8480_v59  ;;  %v11347_v8 = vld [vmem:[#allocation172_spill] sm:$0xff] }
 0x19e   : > { %v2599_v37 = vadd.f32 %v2595_v32, %v2586_v17  ;;  %v2951_v55 = vmul.f32 %v6764_v10, %v1458_v48  ;;  %v11345_v62 = vrot.slane %v8149_v38, 7  ;;  %v11346_v2 = vrot.slane %v8172_v7, 7  ;;  %5748 = vmatpush3.msra.mxu1 %v11341_v1 }
 0x19f   : > { %11344 = vst [vmem:[#allocation15_spill] sm:$0xff] %v8564_v5  ;;  %v2943_v21 = vadd.f32 %v11347_v8, %v2931_v9  ;;  %v11348_v0 = vrot.slane %v8172_v7, 1  ;;  %v11349_v32 = vrot.slane %v8149_v38, 1  ;;  %v2550_v17 = vadd.f32 %v2546_v44, %v2538_v45  ;;  %5749 = vmatprep.subr.mxu1 %v11350_v34  ;;  %v11353_v7 = vld [vmem:[#allocation74_spill] sm:$0xff]  ;;  %v11354_v44 = vld [vmem:[#allocation159_spill] sm:$0xff] }
 0x1a0   : > { %v1124_v63 = vsel %vm1102_vm2, %v11346_v2, %v11345_v62  ;;  %v2570_v16 = vmul.f32 %v6779_v24, %v8546_v52  ;;  %v2612_v5 = vadd.f32 %v2608_v15, %v2599_v37  ;;  %v8585_v62 = vmul.f32 %v6739_v49, %v1221_v29  ;;  %5750 = vmatpush3.msra.mxu1 %v11350_v34  ;;  %v11355_v8 = vld [vmem:[#allocation62_spill] sm:$0xff]  ;;  %v11357_v15 = vld [vmem:[#allocation59_spill] sm:$0xff]  ;;  %v11360_v34 = vld [vmem:[#allocation137_spill] sm:$0xff] }
 0x1a1   : > { %v1490_v3 = vsel %vm1436_vm4, %v11349_v32, %v11348_v0  ;;  %v8588_v1 = vmul.f32 %v6779_v24, %v1458_v48  ;;  %v8594_v9 = vsel %vm1506_vm5, %v11353_v7, 0.0  ;;  %v2562_v45 = vadd.f32 %v11354_v44, %v2550_v17  ;;  %v11359_v48 = vld [vmem:[#allocation49_spill] sm:$0xff]  ;;  %5751 = vmatprep.subr.mxu1 %v11360_v34 }
 0x1a2   : > { %11351 = vst [vmem:[#allocation119_spill] sm:$0xff] %v8585_v62  ;;  %v2583_v2 = vmul.f32 %v6786_v33, %v1124_v63  ;;  %v11356_v0 = vrot.slane %v11355_v8, 7  ;;  %v11358_v37 = vrot.slane %v11357_v15, 7  ;;  %v2961_v32 = vmul.f32 %v6739_v49, %v11359_v48  ;;  %v11361_v44 = vld [vmem:[#allocation37_spill] sm:$0xff]  ;;  %5752 = vmatpush3.msra.mxu1 %v11360_v34  ;;  %v11366_v48 = vld [vmem:[#allocation51_spill] sm:$0xff] }
 0x1a3   : > { %11352 = vst [vmem:[#allocation169_spill] sm:$0xff] %v8588_v1  ;;  %v2616_v1 = vmax.f32 %v2612_v5, 0.0  ;;  %v1556_v7 = vsel %vm1506_vm5, %v1490_v3, 0.0  ;;  %v2928_v17 = vmul.f32 %v6731_v36, %v1124_v63  ;;  %v11362_v62 = vrot.slane %v11361_v44, 1  ;;  %v11367_v3 = vld [vmem:[#allocation141_spill] sm:$0xff] }
 0x1a4   : > { %v1142_v29 = vsel %vm1102_vm2, %v11358_v37, %v11356_v0  ;;  %v11364_v59 = vrot.slane %v11363_v58, 1  ;;  %v2955_v0 = vadd.f32 %v2951_v55, %v2943_v21  ;;  %v2574_v37 = vadd.f32 %v2570_v16, %v2562_v45  ;;  %5753 = vmatprep.subr.mxu1 %v11367_v3 }
 0x1a5   : > { %v2596_v5 = vmul.f32 %v6741_v50, %v8149_v38  ;;  %v2965_v6 = vadd.f32 %v2961_v32, %v11366_v48  ;;  %v2620_v51 = vmin.f32 %v2616_v1, 6.0  ;;  %v2609_v44 = vmul.f32 %v8272_v42, %v1556_v7  ;;  %5754 = vmatpush3.msra.mxu1 %v11367_v3  ;;  %v11370_v38 = vld [vmem:[#allocation56_spill] sm:$0xff]  ;;  %v11371_v1 = vld [vmem:[#allocation142_spill] sm:$0xff] }
 0x1a6   : > { %v8616_v30 = vsel %vm1436_vm4, %v11364_v59, %v11362_v62  ;;  %v8626_v58 = vmul.f32 %v6764_v10, %v8546_v52  ;;  %v1193_v59 = vsel %vm1169_vm3, %v1142_v29, 0.0  ;;  %v2587_v55 = vadd.f32 %v2583_v2, %v2574_v37  ;;  %5755 = vmatprep.subr.mxu1 %v11371_v1  ;;  %v11376_v32 = vld [vmem:[#allocation60_spill] sm:$0xff] }
 0x1a7   : > { %11365 = vst [vmem:[#allocation122_spill] sm:$0xff] %v8616_v30  ;;  %v8632_v21 = vmul.f32 %v6739_v49, %v1124_v63  ;;  %v2977_v16 = vadd.f32 %v11370_v38, %v2965_v6  ;;  %v2985_v62 = vmul.f32 %v6779_v24, %v8616_v30  ;;  %5842 = vmatprep.mubr.f32.mxu0 %v2620_v51  ;;  %v11373_v29 = vrot.slane %v11357_v15, 1  ;;  %v11375_v6 = vld [vmem:[#allocation58_spill] sm:$0xff] }
 0x1a8   : > { %11368 = vst [vmem:[#allocation123_spill] sm:$0xff] %v8626_v58  ;;  %v8639_v45 = vmul.f32 %v6779_v24, %v1556_v7  ;;  %v2932_v48 = vadd.f32 %v7844_v41, %v2928_v17  ;;  %v11374_v2 = vrot.slane %v11355_v8, 1  ;;  %v2966_v34 = vadd.f32 %v11376_v32, %v11375_v6  ;;  %5756 = vmatpush3.msra.mxu1 %v11371_v1  ;;  %v11379_v58 = vld [vmem:[#allocation144_spill] sm:$0xff] }
 0x1a9   : > { %11369 = vst [vmem:[#allocation163_spill] sm:$0xff] %v8632_v21  ;;  %v2600_v37 = vadd.f32 %v2596_v5, %v2587_v55  ;;  %v2989_v3 = vadd.f32 %v2985_v62, %v2977_v16  ;;  %v2998_v51 = vmul.f32 %v6786_v33, %v1193_v59  ;;  %v3343_v38 = vmul.f32 %v6731_v36, %v1193_v59  ;;  %v11383_v32 = vld [vmem:[#allocation68_spill] sm:$0xff] }
 0x1aa   : > { %11372 = vst [vmem:[#allocation125_spill] sm:$0xff] %v8639_v45  ;;  %v8648_v63 = vsel %vm1436_vm4, %v11374_v2, %v11373_v29  ;;  %v2952_v17 = vmul.f32 %v6764_v10, %v1556_v7  ;;  %v3011_v15 = vmul.f32 %v6741_v50, %v11355_v8  ;;  %v11377_v45 = vld [vmem:[#allocation55_spill] sm:$0xff]  ;;  %v11378_v29 = vld [vmem:[#allocation57_spill] sm:$0xff]  ;;  %5757 = vmatprep.subr.mxu1 %v11379_v58  ;;  %v11380_v62 = vrot.slane %v8376_v57, 7 }
 0x1ab   : > { %v2978_v21 = vadd.f32 %v11377_v45, %v2966_v34  ;;  %v2986_v2 = vmul.f32 %v6779_v24, %v11378_v29  ;;  %v2613_v5 = vadd.f32 %v2609_v44, %v2600_v37  ;;  %v3002_v55 = vadd.f32 %v2998_v51, %v2989_v3  ;;  %5758 = vmatpush3.msra.mxu1 %v11379_v58  ;;  %v11382_v8 = vld [vmem:[#allocation167_spill] sm:$0xff]  ;;  %v11384_v44 = vld [vmem:[#allocation162_spill] sm:$0xff]  ;;  %v11388_v29 = vld [vmem:[#allocation145_spill] sm:$0xff] }
 0x1ac   : > { %v3024_v16 = vmul.f32 %v8272_v42, %v8648_v63  ;;  %v11381_v1 = vrot.slane %v8371_v56, 7  ;;  %v2944_v45 = vadd.f32 %v11382_v8, %v2932_v48  ;;  %v2999_v34 = vmul.f32 %v6786_v33, %v11383_v32  ;;  %5759 = vmatprep.subr.mxu1 %v11388_v29 }
 0x1ad   : > { %v2990_v6 = vadd.f32 %v2986_v2, %v2978_v21  ;;  %v11385_v37 = vrot.slane %v11384_v44, 1  ;;  %v11386_v3 = vrot.slane %v8193_v39, 1  ;;  %v2617_v52 = vmax.f32 %v2613_v5, 0.0  ;;  %5760 = vmatpush3.msra.mxu1 %v11388_v29  ;;  %v11392_v5 = vld [vmem:[#allocation147_spill] sm:$0xff] }
 0x1ae   : > { %v1158_v7 = vsel %vm1102_vm2, %v11381_v1, %v11380_v62  ;;  %v3015_v62 = vadd.f32 %v3011_v15, %v3002_v55  ;;  %v3347_v58 = vadd.f32 %v7844_v41, %v3343_v38  ;;  %v11389_v1 = vld [vmem:[#allocation175_spill] sm:$0xff]  ;;  %v8689_v48 = vmul.f32 %v6764_v10, %v8616_v30  ;;  %5761 = vmatprep.subr.mxu1 %v11392_v5  ;;  %v11451_v30 = vld [vmem:[#allocation146_spill] sm:$0xff] }
 0x1af   : > { %v8680_v51 = vsel %vm1436_vm4, %v11386_v3, %v11385_v37  ;;  %v2963_v21 = vmul.f32 %v6739_v49, %v11389_v1  ;;  %v8692_v2 = vmul.f32 %v6739_v49, %v1193_v59  ;;  %v3003_v8 = vadd.f32 %v2999_v34, %v2990_v6  ;;  %5762 = vmatpush3.msra.mxu1 %v11392_v5  ;;  %v11393_v59 = vld [vmem:[#allocation61_spill] sm:$0xff] }
 0x1b0   : > { %11387 = vst [vmem:[#allocation161_spill] sm:$0xff] %v8680_v51  ;;  %11390 = vst [vmem:[#allocation152_spill] sm:$0xff] %v8689_v48  ;;  %v1225_v32 = vsel %vm1169_vm3, %v1158_v7, 0.0  ;;  %v2621_v15 = vmin.f32 %v2617_v52, 6.0  ;;  %v3028_v38 = vadd.f32 %v3024_v16, %v3015_v62  ;;  %v2987_v37 = vmul.f32 %v6779_v24, %v8680_v51  ;;  %5769 = vmatprep.subr.mxu1 %v8416_v31  ;;  %v11394_v16 = vld [vmem:[#allocation71_spill] sm:$0xff] }
 0x1b1   : > { %11391 = vst [vmem:[#allocation128_spill] sm:$0xff] %v8692_v2  ;;  %v2967_v55 = vadd.f32 %v2963_v21, %v2955_v0  ;;  %v2956_v29 = vadd.f32 %v2952_v17, %v2944_v45  ;;  %v3367_v3 = vmul.f32 %v6764_v10, %v8648_v63  ;;  %v3016_v2 = vadd.f32 %v11393_v59, %v3003_v8 }
 0x1b2   : > { %v3025_v6 = vmul.f32 %v8272_v42, %v8594_v9  ;;  %5843 = vmatmul.mubr.f32.gmra.mxu0 %v2621_v15  ;;  %v3032_v52 = vmax.f32 %v3028_v38, 0.0  ;;  %v3359_v0 = vadd.f32 %v11394_v16, %v3347_v58  ;;  %v3000_v34 = vmul.f32 %v6786_v33, %v1225_v32  ;;  %v11401_v16 = vld [vmem:[#allocation65_spill] sm:$0xff] }
 0x1b3   : > { %v2979_v7 = vadd.f32 %v8342_v26, %v2967_v55  ;;  %v11395_v17 = vrot.slane %v8371_v56, 1  ;;  %v11396_v45 = vrot.slane %v8376_v57, 1  ;;  %v3345_v8 = vmul.f32 %v6731_v36, %v1225_v32 }
 0x1b4   : > { %v3029_v62 = vadd.f32 %v3025_v6, %v3016_v2  ;;  %v11397_v5 = vrot.slane %v8193_v39, 1  ;;  %v11398_v15 = vrot.slane %v11384_v44, 1  ;;  %v3036_v26 = vmin.f32 %v3032_v52, 6.0  ;;  %v11400_v6 = vld [vmem:[#allocation78_spill] sm:$0xff] }
 0x1b5   : > { %v1460_v21 = vsel %vm1436_vm4, %v11396_v45, %v11395_v17  ;;  %v2991_v38 = vadd.f32 %v2987_v37, %v2979_v7  ;;  %v3013_v2 = vmul.f32 %v6741_v50, %v8376_v57  ;;  %v3360_v17 = vadd.f32 %v11401_v16, %v11400_v6 }
 0x1b6   : > { %v1491_v58 = vsel %vm1436_vm4, %v11398_v15, %v11397_v5  ;;  %v3033_v59 = vmax.f32 %v3029_v62, 0.0  ;;  %v3368_v45 = vmul.f32 %v6764_v10, %v8594_v9  ;;  %v2964_v44 = vmul.f32 %v6739_v49, %v8319_v18  ;;  %5915 = vmatprep.mubr.f32.mxu0 %v3036_v26 }
 0x1b7   : > { %v8726_v55 = vsel %vm1506_vm5, %v1491_v58, 0.0  ;;  %v3004_v52 = vadd.f32 %v3000_v34, %v2991_v38  ;;  %v3026_v37 = vmul.f32 %v8272_v42, %v1460_v21  ;;  %v11402_v7 = vrot.slane %v8371_v56, 7 }
 0x1b8   : > { %11399 = vst [vmem:[#allocation172_spill] sm:$0xff] %v8726_v55  ;;  %v11403_v5 = vrot.slane %v8376_v57, 7  ;;  %v11404_v15 = vrot.slane %v8376_v57, 1  ;;  %v11405_v58 = vrot.slane %v8371_v56, 1  ;;  %v3037_v16 = vmin.f32 %v3033_v59, 6.0 }
 0x1b9   : > { %v3349_v26 = vadd.f32 %v7844_v41, %v3345_v8  ;;  %v2968_v34 = vadd.f32 %v2964_v44, %v2956_v29  ;;  %v2988_v38 = vmul.f32 %v6779_v24, %v8726_v55  ;;  %v8752_v18 = vmul.f32 %v6779_v24, %v8648_v63  ;;  %v11409_v29 = vld [vmem:[#allocation173_spill] sm:$0xff] }
 0x1ba   : > { %v1126_v62 = vsel %vm1102_vm2, %v11403_v5, %v11402_v7  ;;  %v1492_v6 = vsel %vm1436_vm4, %v11405_v58, %v11404_v15  ;;  %v3371_v48 = vadd.f32 %v3367_v3, %v3359_v0  ;;  %v8756_v57 = vmul.f32 %v6779_v24, %v8594_v9  ;;  %v5633_v5 = vpop.f32.mrf.mxu0  ;;  %5916 = vmatmul.mubr.f32.vlgmr.msra.gmra.mxu0 %v3037_v16  ;;  %v11412_v16 = vld [vmem:[#allocation75_spill] sm:$0xff] }
 0x1bb   : > { %11406 = vst [vmem:[#allocation134_spill] sm:$0xff] %v8752_v18  ;;  %v3017_v7 = vadd.f32 %v3013_v2, %v3004_v52  ;;  %v8758_v15 = vadd.f32 %v3368_v45, %v3360_v17  ;;  %v8762_v44 = vmul.f32 %v6764_v10, %v8680_v51  ;;  %v2980_v8 = vadd.f32 %v11409_v29, %v2968_v34  ;;  %v8774_v2 = vld [vmem:[%s10793_s4 + $0x70] sm:$0xff] }
 0x1bc   : > { %11407 = vst [vmem:[#allocation74_spill] sm:$0xff] %v8756_v57  ;;  %v3001_v59 = vmul.f32 %v6786_v33, %v1126_v62  ;;  %5960 = vmatpush3.msra.mxu0 %v8416_v31  ;;  %v3369_v3 = vmul.f32 %v6764_v10, %v1460_v21  ;;  %v1560_v9 = vsel %vm1506_vm5, %v1492_v6, 0.0  ;;  %v3346_v0 = vmul.f32 %v6731_v36, %v1126_v62 }
 0x1bd   : > { %11408 = vst [vmem:[#allocation159_spill] sm:$0xff] %v8762_v44  ;;  %v3030_v63 = vadd.f32 %v3026_v37, %v3017_v7  ;;  %5961 = vmatprep.subr.mxu0 %v8774_v2  ;;  %v3361_v17 = vadd.f32 %v8514_v47, %v3349_v26  ;;  %v2992_v45 = vadd.f32 %v2988_v38, %v2980_v8  ;;  %v11410_v37 = vld [vmem:[#allocation76_spill] sm:$0xff]  ;;  %v11413_v34 = vrot.slane %v11412_v16, 7  ;;  %v11415_v44 = vld [vmem:[#allocation73_spill] sm:$0xff]  ;;  %v828_v26 = vpop.f32.mrf.mxu0 }
 0x1be   : > { %v3014_v52 = vmul.f32 %v6741_v50, %v8371_v56  ;;  %v11411_v58 = vrot.slane %v11410_v37, 7  ;;  %5962 = vmatpush3.msra.mxu0 %v8774_v2  ;;  %v8788_v29 = vmul.f32 %v6739_v49, %v1225_v32  ;;  %v956_v57 = vmax.f32 %v5633_v5, 0.0  ;;  %v8798_v38 = vld [vmem:[%s10793_s4 + $0x68] sm:$0xff]  ;;  %v11417_v32 = vld [vmem:[#allocation66_spill] sm:$0xff]  ;;  %v11419_v5 = vld [vmem:[#allocation67_spill] sm:$0xff] }
 0x1bf   : > { %v3034_v7 = vmax.f32 %v3030_v63, 0.0  ;;  %v3379_v47 = vmul.f32 %v6739_v49, %v11415_v44  ;;  %v8793_v56 = vmul.f32 %v6779_v24, %v1460_v21  ;;  %5963 = vmatprep.subr.mxu0 %v8798_v38  ;;  %v3005_v8 = vadd.f32 %v3001_v59, %v2992_v45  ;;  %v5636_v59 = vpop.f32.mrf.mxu0 }
 0x1c0   : > { %v1144_v6 = vsel %vm1102_vm2, %v11413_v34, %v11411_v58  ;;  %11414 = vst [vmem:[#allocation62_spill] sm:$0xff] %v8788_v29  ;;  %v3027_v63 = vmul.f32 %v8272_v42, %v1560_v9  ;;  %v11418_v58 = vrot.slane %v11417_v32, 1  ;;  %v11420_v34 = vrot.slane %v11419_v5, 1  ;;  %5964 = vmatpush3.msra.mxu0 %v8798_v38 }
 0x1c1   : > { %11416 = vst [vmem:[#allocation59_spill] sm:$0xff] %v8793_v56  ;;  %v3038_v21 = vmin.f32 %v3034_v7, 6.0  ;;  %v3350_v56 = vadd.f32 %v7844_v41, %v3346_v0  ;;  %v1197_v18 = vsel %vm1169_vm3, %v1144_v6, 0.0  ;;  %v3383_v44 = vadd.f32 %v3379_v47, %v3371_v48  ;;  %v8826_v41 = vld [vmem:[%s10793_s4 + $0x60] sm:$0xff]  ;;  %v11425_v0 = vld [vmem:[#allocation82_spill] sm:$0xff] }
 0x1c2   : > { %v8808_v29 = vsel %vm1436_vm4, %v11420_v34, %v11418_v58  ;;  %v8814_v45 = vadd.f32 %v3369_v3, %v3361_v17  ;;  %v3018_v51 = vadd.f32 %v3014_v52, %v3005_v8  ;;  %v8818_v32 = vmul.f32 %v6764_v10, %v8726_v55  ;;  %5965 = vmatprep.subr.mxu0 %v8826_v41  ;;  %v11447_v55 = vld [vmem:[#allocation153_spill] sm:$0xff] }
 0x1c3   : > { %11421 = vst [vmem:[#allocation137_spill] sm:$0xff] %v8808_v29  ;;  %v8821_v58 = vmul.f32 %v6739_v49, %v1126_v62  ;;  %5918 = vmatprep.mubr.f32.mxu0 %v3038_v21  ;;  %v3370_v48 = vmul.f32 %v6764_v10, %v1560_v9  ;;  %v8830_v3 = vmin.f32 %v956_v57, 6.0  ;;  %v3395_v17 = vadd.f32 %v11425_v0, %v3383_v44 }
 0x1c4   : > { %11422 = vst [vmem:[#allocation37_spill] sm:$0xff] %v8818_v32  ;;  %v3403_v52 = vmul.f32 %v6779_v24, %v8808_v29  ;;  %v3031_v6 = vadd.f32 %v3027_v63, %v3018_v51  ;;  %v11426_v62 = vrot.slane %v11412_v16, 1  ;;  %v11427_v7 = vrot.slane %v11410_v37, 1  ;;  %5966 = vmatpush3.msra.mxu0 %v8826_v41  ;;  %v8848_v51 = vld [vmem:[%s10793_s4 + $0x58] sm:$0xff]  ;;  %v838_v16 = vpop.f32.mrf.mxu0  ;;  %v11428_v63 = vld [vmem:[#allocation72_spill] sm:$0xff] }
 0x1c5   : > { %11423 = vst [vmem:[#allocation51_spill] sm:$0xff] %v8821_v58  ;;  %11424 = vst [vmem:[#allocation141_spill] sm:$0xff] %v8830_v3  ;;  %v3761_v8 = vmul.f32 %v6731_v36, %v1197_v18  ;;  %v955_v34 = vmax.f32 %v828_v26, 0.0  ;;  %v3362_v57 = vadd.f32 %v8495_v25, %v3350_v56  ;;  %v3416_v44 = vmul.f32 %v6786_v33, %v1197_v18  ;;  %v8856_v26 = vld [vmem:[%s10792_s3] ss:$0 sm:$0xff] }
 0x1c6   : > { %v1446_v47 = vsel %vm1436_vm4, %v11427_v7, %v11426_v62  ;;  %v3407_v21 = vadd.f32 %v3403_v52, %v3395_v17  ;;  %5967 = vmatprep.subr.mxu0 %v8848_v51  ;;  %v2154_v0 = vadd.f32 %v8390_v23, %v11428_v63  ;;  %v3035_v62 = vmax.f32 %v3031_v6, 0.0  ;;  %v8871_v6 = vld [vmem:[%s10793_s4 + $0x50] sm:$0xff] }
 0x1c7   : > { %v3765_v25 = vadd.f32 %v8856_v26, %v3761_v8  ;;  %v8859_v56 = vmin.f32 %v955_v34, 6.0  ;;  %5968 = vmatpush3.msra.mxu0 %v8848_v51  ;;  %v958_v17 = vmax.f32 %v5636_v59, 0.0  ;;  %v8863_v52 = vmul.f32 %v6779_v24, %v1560_v9 }
 0x1c8   : > { %v1094_v7 = vrot.slane %v8830_v3, 7  ;;  %v3420_v58 = vadd.f32 %v3416_v44, %v3407_v21  ;;  %v3429_v23 = vmul.f32 %v6741_v50, %v11410_v37  ;;  %5969 = vmatprep.subr.mxu0 %v8871_v6  ;;  %v3039_v8 = vmin.f32 %v3035_v62, 6.0  ;;  %v8889_v62 = vld [vmem:[%s10793_s4 + $0x48] sm:$0xff] }
 0x1c9   : > { %11429 = vst [vmem:[#allocation56_spill] sm:$0xff] %v8859_v56  ;;  %11430 = vst [vmem:[#allocation142_spill] sm:$0xff] %v8863_v52  ;;  %v1062_v59 = vrot.slane %v8859_v56, 7  ;;  %5970 = vmatpush3.msra.mxu0 %v8871_v6  ;;  %v957_v9 = vmax.f32 %v838_v16, 0.0  ;;  %v8879_v21 = vmul.f32 %v6728_v35, %v8830_v3  ;;  %v8883_v37 = vmul.f32 %v6736_v46, %v8830_v3  ;;  %v11433_v52 = vld [vmem:[#allocation92_spill] sm:$0xff] }
 0x1ca   : > { %v3433_v44 = vadd.f32 %v3429_v23, %v3420_v58  ;;  %v3442_v63 = vmul.f32 %v8272_v42, %v1446_v47  ;;  %5971 = vmatprep.subr.mxu0 %v8889_v62  ;;  %5919 = vmatmul.mubr.f32.gmra.mxu0 %v3039_v8  ;;  %v8892_v16 = vadd.f32 %v3370_v48, %v3362_v57  ;;  %v11436_v8 = vld [vmem:[#allocation18_spill] sm:$0xff] }
 0x1cb   : > { %11431 = vst [vmem:[#allocation58_spill] sm:$0xff] %v8883_v37  ;;  %v8896_v34 = vmul.f32 %v6764_v10, %v8808_v29  ;;  %v3777_v32 = vadd.f32 %v11433_v52, %v3765_v25  ;;  %v8899_v37 = vmin.f32 %v958_v17, 6.0  ;;  %v8902_v23 = vmul.f32 %v6739_v49, %v1197_v18  ;;  %5972 = vmatpush3.msra.mxu0 %v8889_v62  ;;  %v11437_v17 = vld [vmem:[#allocation29_spill] sm:$0xff]  ;;  %v8920_v18 = vld [vmem:[%s10793_s4 + $0x40] sm:$0xff]  ;;  %v8944_v29 = vld [vmem:[%s10793_s4 + $0x38] sm:$0xff] }
 0x1cc   : > { %v3446_v58 = vadd.f32 %v3442_v63, %v3433_v44  ;;  %v8905_v5 = vmul.f32 %v6779_v24, %v1446_v47  ;;  %v2163_v48 = vmul.f32 %v6786_v33, %v11436_v8  ;;  %v3785_v57 = vmul.f32 %v6764_v10, %v1446_v47  ;;  %11438 = vst [vmem:[#allocation167_spill] sm:$0xff] %v8920_v18 }
 0x1cd   : > { %11432 = vst [vmem:[#allocation60_spill] sm:$0xff] %v8896_v34  ;;  %11434 = vst [vmem:[#allocation55_spill] sm:$0xff] %v8902_v23  ;;  %v1159_v34 = vsel %vm1102_vm2, %v1094_v7, %v1062_v59  ;;  %v8913_v25 = vmin.f32 %v957_v9, 6.0  ;;  %v2189_v52 = vmul.f32 %v8272_v42, %v11437_v17  ;;  %5973 = vmatprep.subr.mxu0 %v8920_v18 }
 0x1ce   : > { %11435 = vst [vmem:[#allocation144_spill] sm:$0xff] %v8905_v5  ;;  %v3450_v44 = vmax.f32 %v3446_v58, 0.0  ;;  %v8925_v63 = vmul.f32 %v6728_v35, %v8859_v56  ;;  %v8929_v47 = vmul.f32 %v6736_v46, %v8859_v56  ;;  %v2167_v9 = vadd.f32 %v2163_v48, %v2154_v0  ;;  %5974 = vmatpush3.msra.mxu0 %v8920_v18  ;;  %v11442_v48 = vld [vmem:[#allocation22_spill] sm:$0xff] }
 0x1cf   : > { %v8932_v8 = vadd.f32 %v3785_v57, %v3777_v32  ;;  %v8936_v5 = vsel %vm1102_vm2, %v1062_v59, %v1094_v7  ;;  %v2131_v58 = vadd.f32 %v8518_v53, %v8302_v4  ;;  %11440 = vst [vmem:[#allocation145_spill] sm:$0xff] %v8944_v29  ;;  %5975 = vmatprep.subr.mxu0 %v8944_v29  ;;  %v8949_v32 = vsel %vm1169_vm3, %v1159_v34, 0.0  ;;  %v11443_v59 = vld [vmem:[#allocation16_spill] sm:$0xff] }
 0x1d0   : > { %11439 = vst [vmem:[#allocation68_spill] sm:$0xff] %v8936_v5  ;;  %v3454_v0 = vmin.f32 %v3450_v44, 6.0  ;;  %11441 = vst [vmem:[#allocation147_spill] sm:$0xff] %v8949_v32  ;;  %v2180_v7 = vadd.f32 %v11442_v48, %v2167_v9  ;;  %5976 = vmatpush3.msra.mxu0 %v8944_v29  ;;  %v2132_v57 = vadd.f32 %v8556_v40, %v11443_v59  ;;  %v11446_v44 = vld [vmem:[#allocation150_spill] sm:$0xff]  ;;  %v8969_v9 = vld [vmem:[%s10793_s4 + $0x30] sm:$0xff] }
 0x1d1   : > { %v8957_v4 = vmul.f32 %v6731_v36, %v8936_v5  ;;  %v8961_v53 = vmul.f32 %v6728_v35, %v8899_v37  ;;  %v2143_v23 = vadd.f32 %v11446_v44, %v2131_v58  ;;  %v2164_v34 = vmul.f32 %v6786_v33, %v11447_v55  ;;  %11448 = vst [vmem:[#allocation78_spill] sm:$0xff] %v8969_v9  ;;  %v11449_v48 = vld [vmem:[#allocation148_spill] sm:$0xff] }
 0x1d2   : > { %5977 = vmatprep.subr.mxu0 %v8969_v9  ;;  %5991 = vmatprep.mubr.f32.mxu0 %v3454_v0  ;;  %v2193_v40 = vadd.f32 %v2189_v52, %v2180_v7  ;;  %v2144_v59 = vadd.f32 %v11449_v48, %v2132_v57  ;;  %v2334_v58 = vmul.f32 %v6739_v49, %v11315_v28  ;;  %v11452_v57 = vld [vmem:[#allocation143_spill] sm:$0xff] }
 0x1d3   : > { %11444 = vst [vmem:[#allocation61_spill] sm:$0xff] %v8957_v4  ;;  %11445 = vst [vmem:[#allocation71_spill] sm:$0xff] %v8961_v53  ;;  %v11450_v4 = vld [vmem:[#allocation155_spill] sm:$0xff]  ;;  %v3554_v44 = vmul.f32 %v6731_v36, %v8949_v32  ;;  %v8981_v53 = vmul.f32 %v6736_v46, %v8899_v37  ;;  %v2155_v1 = vadd.f32 %v8552_v11, %v2143_v23  ;;  %5978 = vmatpush3.msra.mxu0 %v8969_v9 }
 0x1d4   : > { %v2165_v39 = vmul.f32 %v6786_v33, %v11450_v4  ;;  %v2177_v52 = vmul.f32 %v6741_v50, %v11451_v30  ;;  %v2197_v0 = vmax.f32 %v2193_v40, 0.0  ;;  %v2156_v7 = vadd.f32 %v8560_v14, %v2144_v59  ;;  %5979 = vmatprep.subr.mxu0 %v8994_v22  ;;  %v11453_v14 = vld [vmem:[#allocation84_spill] sm:$0xff] }
 0x1d5   : > { %v2178_v28 = vmul.f32 %v6741_v50, %v11452_v57  ;;  %v2338_v48 = vadd.f32 %v2334_v58, %v8374_v43  ;;  %v2168_v11 = vadd.f32 %v2164_v34, %v2155_v1  ;;  %v2190_v30 = vmul.f32 %v8272_v42, %v8153_v20  ;;  %5980 = vmatpush3.msra.mxu0 %v8994_v22  ;;  %v11454_v58 = vld [vmem:[#allocation28_spill] sm:$0xff]  ;;  %v9010_v1 = vld [vmem:[%s10793_s4 + $0x20] sm:$0xff]  ;;  %v9024_v34 = vld [vmem:[%s10793_s4 + $0x18] sm:$0xff] }
 0x1d6   : > { %v2191_v23 = vmul.f32 %v8272_v42, %v11340_v61  ;;  %v3384_v40 = vadd.f32 %v11453_v14, %v8758_v15  ;;  %v2201_v43 = vmin.f32 %v2197_v0, 6.0  ;;  %v2169_v59 = vadd.f32 %v2165_v39, %v2156_v7  ;;  %5981 = vmatprep.subr.mxu0 %v9010_v1  ;;  %v11455_v15 = vld [vmem:[#allocation81_spill] sm:$0xff]  ;;  %v11456_v39 = vld [vmem:[#allocation80_spill] sm:$0xff] }
 0x1d7   : > { %v2350_v57 = vadd.f32 %v11454_v58, %v2338_v48  ;;  %v2358_v4 = vmul.f32 %v6779_v24, %v11153_v54  ;;  %v2181_v61 = vadd.f32 %v2177_v52, %v2168_v11  ;;  %5982 = vmatpush3.msra.mxu0 %v9010_v1  ;;  %v3404_v7 = vmul.f32 %v6779_v24, %v11456_v39  ;;  %v11457_v58 = vld [vmem:[#allocation32_spill] sm:$0xff] }
 0x1d8   : > { %v3396_v0 = vadd.f32 %v11455_v15, %v3384_v40  ;;  %v10977_v48 = vrot.slane %v8859_v56, 1  ;;  %5764 = vmatmul.mubr.f32.vlgmr.msra.gmra.mxu1 %v2201_v43  ;;  %v2182_v54 = vadd.f32 %v2178_v28, %v2169_v59  ;;  %v2371_v20 = vmul.f32 %v6786_v33, %v11457_v58  ;;  %5983 = vmatprep.subr.mxu0 %v9024_v34  ;;  %v11458_v28 = vld [vmem:[#allocation88_spill] sm:$0xff]  ;;  %v9038_v58 = vld [vmem:[%s10793_s4 + $0x10] sm:$0xff] }
 0x1d9   : > { %v2362_v14 = vadd.f32 %v2358_v4, %v2350_v57  ;;  %v2194_v11 = vadd.f32 %v2190_v30, %v2181_v61  ;;  %5770 = vmatpush3.msra.mxu1 %v8416_v31  ;;  %5984 = vmatpush3.msra.mxu0 %v9024_v34  ;;  %v3417_v4 = vmul.f32 %v6786_v33, %v11458_v28  ;;  %v11459_v57 = vld [vmem:[#allocation26_spill] sm:$0xff]  ;;  %v11460_v61 = vld [vmem:[#allocation93_spill] sm:$0xff] }
 0x1da   : > { %v3408_v40 = vadd.f32 %v3404_v7, %v3396_v0  ;;  %5771 = vmatprep.subr.mxu1 %v8774_v2  ;;  %v2195_v43 = vadd.f32 %v2191_v23, %v2182_v54  ;;  %v2384_v15 = vmul.f32 %v6741_v50, %v11459_v57  ;;  %5985 = vmatprep.subr.mxu0 %v9038_v58  ;;  %v1532_v30 = vsel %vm1506_vm5, %v11460_v61, 0.0  ;;  %v11463_v61 = vld [vmem:[#allocation19_spill] sm:$0xff] }
 0x1db   : > { %v2375_v59 = vadd.f32 %v2371_v20, %v2362_v14  ;;  %v3558_v0 = vadd.f32 %v8856_v26, %v3554_v44  ;;  %v2198_v7 = vmax.f32 %v2194_v11, 0.0  ;;  %5772 = vmatpush3.msra.mxu1 %v8774_v2  ;;  %5986 = vmatpush3.msra.mxu0 %v9038_v58  ;;  %v11461_v23 = vrot.slane %v8913_v25, 7  ;;  %v9059_v11 = vld [vmem:[%s10793_s4 + $0x8] sm:$0xff] }
 0x1dc   : > { %v3421_v20 = vadd.f32 %v3417_v4, %v3408_v40  ;;  %v11462_v54 = vrot.slane %v8899_v37, 7  ;;  %v2199_v28 = vmax.f32 %v2195_v43, 0.0  ;;  %5773 = vmatprep.subr.mxu1 %v8798_v38  ;;  %v2397_v44 = vmul.f32 %v8272_v42, %v11463_v61  ;;  %5987 = vmatprep.subr.mxu0 %v9059_v11 }
 0x1dd   : > { %v2388_v57 = vadd.f32 %v2384_v15, %v2375_v59  ;;  %v11464_v40 = vrot.slane %v8830_v3, 1  ;;  %v2202_v43 = vmin.f32 %v2198_v7, 6.0  ;;  %5774 = vmatpush3.msra.mxu1 %v8798_v38  ;;  %5988 = vmatpush3.msra.mxu0 %v9059_v11  ;;  %v11466_v59 = vld [vmem:[#allocation85_spill] sm:$0xff]  ;;  %v1397_v61 = vrot.slane %v8913_v25, 1  ;;  %v9081_v7 = vld [vmem:[%s10793_s4] sm:$0xff] }
 0x1de   : > { %v1160_v14 = vsel %vm1102_vm2, %v11462_v54, %v11461_v23  ;;  %v3434_v15 = vadd.f32 %v11466_v59, %v3421_v20  ;;  %v3443_v23 = vmul.f32 %v8272_v42, %v1532_v30  ;;  %v3381_v54 = vmul.f32 %v6739_v49, %v8949_v32  ;;  %5775 = vmatprep.subr.mxu1 %v8826_v41 }
 0x1df   : > { %v9068_v4 = vsel %vm1436_vm4, %v10977_v48, %v11464_v40  ;;  %v2203_v52 = vmin.f32 %v2199_v28, 6.0  ;;  %v2401_v39 = vadd.f32 %v2397_v44, %v2388_v57  ;;  %5989 = vmatprep.subr.mxu0 %v9081_v7  ;;  %v1229_v20 = vsel %vm1169_vm3, %v1160_v14, 0.0  ;;  %5766 = vmatprep.mubr.f32.mxu1 %v2202_v43  ;;  %v11469_v43 = vld [vmem:[#allocation98_spill] sm:$0xff] }
 0x1e0   : > { %11465 = vst [vmem:[#allocation65_spill] sm:$0xff] %v9068_v4  ;;  %5776 = vmatpush3.msra.mxu1 %v8826_v41  ;;  %v3447_v42 = vadd.f32 %v3443_v23, %v3434_v15  ;;  %v3385_v40 = vadd.f32 %v3381_v54, %v8814_v45  ;;  %v3405_v28 = vmul.f32 %v6779_v24, %v9068_v4  ;;  %v5639_v54 = vpop.f32.mrf.mxu0 }
 0x1e1   : > { %v9091_v57 = vadd.f32 %v8929_v47, %v3558_v0  ;;  %v9095_v44 = vmul.f32 %v6728_v35, %v8913_v25  ;;  %v9099_v59 = vmul.f32 %v6736_v46, %v8913_v25  ;;  %5767 = vmatmul.mubr.f32.gmra.mxu1 %v2203_v52  ;;  %v2405_v14 = vmax.f32 %v2401_v39, 0.0  ;;  %5777 = vmatprep.subr.mxu1 %v8848_v51  ;;  %v11470_v47 = vld [vmem:[#allocation87_spill] sm:$0xff] }
 0x1e2   : > { %5778 = vmatpush3.msra.mxu1 %v8848_v51  ;;  %5990 = vmatpush3.msra.mxu0 %v9081_v7  ;;  %v3451_v45 = vmax.f32 %v3447_v42, 0.0  ;;  %v3778_v0 = vadd.f32 %v11470_v47, %v11469_v43  ;;  %v3397_v15 = vadd.f32 %v8925_v63, %v3385_v40  ;;  %v3418_v23 = vmul.f32 %v6786_v33, %v1229_v20 }
 0x1e3   : > { %11467 = vst [vmem:[#allocation173_spill] sm:$0xff] %v9091_v57  ;;  %11468 = vst [vmem:[#allocation76_spill] sm:$0xff] %v9095_v44  ;;  %v2409_v48 = vmin.f32 %v2405_v14, 6.0  ;;  %5779 = vmatprep.subr.mxu1 %v8871_v6  ;;  %6035 = vmatprep.subr.mxu0 %v8416_v31  ;;  %v11471_v39 = vrot.slane %v8899_v37, 1  ;;  %v3431_v42 = vmul.f32 %v6741_v50, %v8913_v25  ;;  %v11472_v43 = vrot.slane %v8859_v56, 1 }
 0x1e4   : > { %v11473_v63 = vrot.slane %v8830_v3, 1  ;;  %5780 = vmatpush3.msra.mxu1 %v8871_v6  ;;  %v3455_v14 = vmin.f32 %v3451_v45, 6.0  ;;  %v3409_v47 = vadd.f32 %v3405_v28, %v3397_v15  ;;  %v3763_v44 = vmul.f32 %v6731_v36, %v1229_v20  ;;  %v9139_v45 = vld [vmem:[%s10791_s2 + $0x8] ss:$0 sm:$0xff] }
 0x1e5   : > { %v1462_v52 = vsel %vm1436_vm4, %v1397_v61, %v11471_v39  ;;  %5801 = vmatprep.mubr.f32.mxu1 %v2409_v48  ;;  %5781 = vmatprep.subr.mxu1 %v8889_v62  ;;  %v9130_v39 = vmul.f32 %v6779_v24, %v1532_v30  ;;  %v3786_v3 = vmul.f32 %v6764_v10, %v1532_v30  ;;  %v11476_v15 = vrot.slane %v8899_v37, 7 }
 0x1e6   : > { %v1493_v40 = vsel %vm1436_vm4, %v11473_v63, %v11472_v43  ;;  %v3382_v43 = vmul.f32 %v6739_v49, %v8936_v5  ;;  %5782 = vmatpush3.msra.mxu1 %v8889_v62  ;;  %5992 = vmatmul.mubr.f32.vlgmr.msra.gmra.mxu0 %v3455_v14  ;;  %v3422_v28 = vadd.f32 %v3418_v23, %v3409_v47  ;;  %v11477_v63 = vrot.slane %v8913_v25, 7 }
 0x1e7   : > { %v9126_v57 = vsel %vm1506_vm5, %v1493_v40, 0.0  ;;  %11475 = vst [vmem:[#allocation66_spill] sm:$0xff] %v9130_v39  ;;  %v3444_v48 = vmul.f32 %v9139_v45, %v1462_v52  ;;  %v848_v40 = vpop.f32.mrf.mxu0  ;;  %5783 = vmatprep.subr.mxu1 %v8920_v18  ;;  %6036 = vmatpush3.msra.mxu0 %v8416_v31  ;;  %v11478_v23 = vrot.slane %v8899_v37, 1  ;;  %v960_v5 = vmax.f32 %v5639_v54, 0.0 }
 0x1e8   : > { %11474 = vst [vmem:[#allocation75_spill] sm:$0xff] %v9126_v57  ;;  %v1128_v30 = vsel %vm1102_vm2, %v11477_v63, %v11476_v15  ;;  %v3386_v47 = vadd.f32 %v3382_v43, %v8892_v16  ;;  %v3406_v39 = vmul.f32 %v6779_v24, %v9126_v57  ;;  %5784 = vmatpush3.msra.mxu1 %v8920_v18  ;;  %v959_v54 = vmax.f32 %v848_v40, 0.0 }
 0x1e9   : > { %v1494_v14 = vsel %vm1436_vm4, %v11478_v23, %v1397_v61  ;;  %v9158_v25 = vadd.f32 %v3786_v3, %v3778_v0  ;;  %6037 = vmatprep.subr.mxu0 %v8774_v2  ;;  %v3435_v15 = vadd.f32 %v3431_v42, %v3422_v28  ;;  %v3767_v31 = vadd.f32 %v8856_v26, %v3763_v44  ;;  %v11482_v23 = vld [vmem:[#allocation99_spill] sm:$0xff] }
 0x1ea   : > { %5785 = vmatprep.subr.mxu1 %v8944_v29  ;;  %6038 = vmatpush3.msra.mxu0 %v8774_v2  ;;  %v3398_v61 = vadd.f32 %v8879_v21, %v3386_v47  ;;  %v3419_v16 = vmul.f32 %v6786_v33, %v1128_v30  ;;  %v3764_v43 = vmul.f32 %v6731_v36, %v1128_v30  ;;  %v1564_v42 = vsel %vm1506_vm5, %v1494_v14, 0.0  ;;  %v11484_v47 = vld [vmem:[#allocation96_spill] sm:$0xff] }
 0x1eb   : > { %5786 = vmatpush3.msra.mxu1 %v8944_v29  ;;  %v3448_v3 = vadd.f32 %v3444_v48, %v3435_v15  ;;  %v9170_v0 = vmul.f32 %v6764_v10, %v9068_v4  ;;  %v9173_v44 = vmul.f32 %v6739_v49, %v1229_v20  ;;  %6039 = vmatprep.subr.mxu0 %v8798_v38  ;;  %v9183_v63 = vmin.f32 %v960_v5, 6.0  ;;  %v11489_v4 = vld [vmem:[#allocation89_spill] sm:$0xff] }
 0x1ec   : > { %5787 = vmatprep.subr.mxu1 %v8969_v9  ;;  %v3787_v21 = vmul.f32 %v6764_v10, %v1462_v52  ;;  %v3410_v28 = vadd.f32 %v3406_v39, %v3398_v61  ;;  %v3432_v48 = vmul.f32 %v6741_v50, %v8899_v37  ;;  %6040 = vmatpush3.msra.mxu0 %v8798_v38  ;;  %v11483_v14 = vrot.slane %v11482_v23, 7  ;;  %v11486_v39 = vld [vmem:[#allocation95_spill] sm:$0xff] }
 0x1ed   : > { %11479 = vst [vmem:[#allocation82_spill] sm:$0xff] %v9170_v0  ;;  %11480 = vst [vmem:[#allocation72_spill] sm:$0xff] %v9173_v44  ;;  %5788 = vmatpush3.msra.mxu1 %v8969_v9  ;;  %v3452_v20 = vmax.f32 %v3448_v3, 0.0  ;;  %v3768_v40 = vadd.f32 %v8856_v26, %v3764_v43  ;;  %v11485_v15 = vrot.slane %v11484_v47, 7  ;;  %v3797_v61 = vmul.f32 %v6739_v49, %v11486_v39  ;;  %v11487_v43 = vld [vmem:[#allocation83_spill] sm:$0xff] }
 0x1ee   : > { %11481 = vst [vmem:[#allocation92_spill] sm:$0xff] %v9183_v63  ;;  %6041 = vmatprep.subr.mxu0 %v8826_v41  ;;  %5789 = vmatprep.subr.mxu1 %v8994_v22  ;;  %v3779_v5 = vadd.f32 %v9099_v59, %v3767_v31  ;;  %v3423_v37 = vadd.f32 %v3419_v16, %v3410_v28  ;;  %v11488_v0 = vrot.slane %v11487_v43, 1  ;;  %v11490_v56 = vrot.slane %v11489_v4, 1  ;;  %v11516_v4 = vld [vmem:[#allocation158_spill] sm:$0xff] }
 0x1ef   : > { %v1146_v44 = vsel %vm1102_vm2, %v11485_v15, %v11483_v14  ;;  %v3445_v3 = vmul.f32 %v9139_v45, %v1564_v42  ;;  %5790 = vmatpush3.msra.mxu1 %v8994_v22  ;;  %v3456_v14 = vmin.f32 %v3452_v20, 6.0  ;;  %v9209_v15 = vmul.f32 %v6779_v24, %v1462_v52  ;;  %6042 = vmatpush3.msra.mxu0 %v8826_v41 }
 0x1f0   : > { %v9205_v32 = vsel %vm1436_vm4, %v11490_v56, %v11488_v0  ;;  %v3801_v39 = vadd.f32 %v3797_v61, %v8932_v8  ;;  %v9213_v59 = vmin.f32 %v959_v54, 6.0  ;;  %5791 = vmatprep.subr.mxu1 %v9010_v1  ;;  %v3436_v31 = vadd.f32 %v3432_v48, %v3423_v37  ;;  %v11496_v54 = vld [vmem:[#allocation4_spill] sm:$0xff]  ;;  %6043 = vmatprep.subr.mxu0 %v8848_v51 }
 0x1f1   : > { %11491 = vst [vmem:[#allocation18_spill] sm:$0xff] %v9205_v32  ;;  %11492 = vst [vmem:[#allocation29_spill] sm:$0xff] %v9209_v15  ;;  %v3788_v16 = vmul.f32 %v6764_v10, %v1564_v42  ;;  %v1201_v56 = vsel %vm1169_vm3, %v1146_v44, 0.0  ;;  %v11494_v0 = vrot.slane %v11484_v47, 1  ;;  %v11495_v28 = vrot.slane %v11482_v23, 1  ;;  %5994 = vmatprep.mubr.f32.mxu0 %v3456_v14  ;;  %5792 = vmatpush3.msra.mxu1 %v9010_v1  ;;  %v11515_v15 = vld [vmem:[#allocation21_spill] sm:$0xff] }
 0x1f2   : > { %11493 = vst [vmem:[#allocation22_spill] sm:$0xff] %v9213_v59  ;;  %v3780_v8 = vadd.f32 %v8981_v53, %v3768_v40  ;;  %v3813_v20 = vadd.f32 %v11496_v54, %v3801_v39  ;;  %v3821_v48 = vmul.f32 %v6779_v24, %v9205_v32  ;;  %v1096_v61 = vrot.slane %v9183_v63, 7  ;;  %5793 = vmatprep.subr.mxu1 %v9024_v34  ;;  %v5642_v53 = vpop.f32.mrf.mxu0 }
 0x1f3   : > { %v1448_v52 = vsel %vm1436_vm4, %v11495_v28, %v11494_v0  ;;  %v9231_v44 = vadd.f32 %v3787_v21, %v3779_v5  ;;  %v3449_v47 = vadd.f32 %v3445_v3, %v3436_v31  ;;  %v9235_v37 = vmul.f32 %v6764_v10, %v9126_v57  ;;  %5794 = vmatpush3.msra.mxu1 %v9024_v34 }
 0x1f4   : > { %v9238_v43 = vmul.f32 %v6739_v49, %v1128_v30  ;;  %v9242_v40 = vmul.f32 %v6779_v24, %v1564_v42  ;;  %v3825_v39 = vadd.f32 %v3821_v48, %v3813_v20  ;;  %v3834_v14 = vmul.f32 %v6786_v33, %v1201_v56  ;;  %5795 = vmatprep.subr.mxu1 %v9038_v58 }
 0x1f5   : > { %11497 = vst [vmem:[#allocation16_spill] sm:$0xff] %v9235_v37  ;;  %v1064_v21 = vrot.slane %v9213_v59, 7  ;;  %v3453_v5 = vmax.f32 %v3449_v47, 0.0  ;;  %v3847_v3 = vmul.f32 %v6741_v50, %v11482_v23  ;;  %v3860_v30 = vmul.f32 %v9139_v45, %v1448_v52  ;;  %5796 = vmatpush3.msra.mxu1 %v9038_v58  ;;  %6044 = vmatpush3.msra.mxu0 %v8848_v51 }
 0x1f6   : > { %11498 = vst [vmem:[#allocation150_spill] sm:$0xff] %v9238_v43  ;;  %11499 = vst [vmem:[#allocation153_spill] sm:$0xff] %v9242_v40  ;;  %v9252_v31 = vmul.f32 %v6764_v10, %v9205_v32  ;;  %v9256_v42 = vadd.f32 %v3788_v16, %v3780_v8  ;;  %v3838_v0 = vadd.f32 %v3834_v14, %v3825_v39  ;;  %v962_v23 = vmax.f32 %v5642_v53, 0.0  ;;  %v858_v16 = vpop.f32.mrf.mxu0 }
 0x1f7   : > { %v4179_v28 = vmul.f32 %v6731_v36, %v1201_v56  ;;  %v3457_v54 = vmin.f32 %v3453_v5, 6.0  ;;  %v9262_v20 = vmul.f32 %v6739_v49, %v1201_v56  ;;  %v9265_v48 = vmul.f32 %v6779_v24, %v1448_v52  ;;  %5797 = vmatprep.subr.mxu1 %v9059_v11  ;;  %6045 = vmatprep.subr.mxu0 %v8871_v6  ;;  %v11506_v5 = vld [vmem:[#allocation23_spill] sm:$0xff] }
 0x1f8   : > { %11500 = vst [vmem:[#allocation148_spill] sm:$0xff] %v9252_v31  ;;  %v9268_v47 = vmul.f32 %v6764_v10, %v1448_v52  ;;  %v3851_v8 = vadd.f32 %v3847_v3, %v3838_v0  ;;  %v9275_v53 = vmul.f32 %v6728_v35, %v9183_v63  ;;  %v9279_v56 = vmul.f32 %v6736_v46, %v9183_v63  ;;  %v11505_v3 = vld [vmem:[#allocation35_spill] sm:$0xff] }
 0x1f9   : > { %11501 = vst [vmem:[#allocation146_spill] sm:$0xff] %v9262_v20  ;;  %11502 = vst [vmem:[#allocation143_spill] sm:$0xff] %v9265_v48  ;;  %5798 = vmatpush3.msra.mxu1 %v9059_v11  ;;  %6046 = vmatpush3.msra.mxu0 %v8871_v6  ;;  %v9285_v52 = vsel %vm1102_vm2, %v1064_v21, %v1096_v61  ;;  %v1161_v14 = vsel %vm1102_vm2, %v1096_v61, %v1064_v21  ;;  %v961_v61 = vmax.f32 %v858_v16, 0.0 }
 0x1fa   : > { %11503 = vst [vmem:[#allocation84_spill] sm:$0xff] %v9279_v56  ;;  %5995 = vmatmul.mubr.f32.gmra.mxu0 %v3457_v54  ;;  %11504 = vst [vmem:[#allocation28_spill] sm:$0xff] %v9285_v52  ;;  %5799 = vmatprep.subr.mxu1 %v9081_v7  ;;  %v2339_v0 = vadd.f32 %v11505_v3, %v8378_v12  ;;  %v3864_v39 = vadd.f32 %v3860_v30, %v3851_v8  ;;  %v9302_v21 = vmin.f32 %v962_v23, 6.0  ;;  %v9311_v30 = vld [vmem:[%s10793_s4 + $0x78] sm:$0xff]  ;;  %v11509_v3 = vld [vmem:[#allocation31_spill] sm:$0xff] }
 0x1fb   : > { %v9294_v56 = vadd.f32 %v8856_v26, %v4179_v28  ;;  %v9298_v54 = vmul.f32 %v6728_v35, %v9213_v59  ;;  %6047 = vmatprep.subr.mxu0 %v8889_v62  ;;  %5800 = vmatpush3.msra.mxu1 %v9081_v7  ;;  %v2359_v12 = vmul.f32 %v6779_v24, %v11437_v17  ;;  %v9318_v23 = vsel %vm1169_vm3, %v1161_v14, 0.0 }
 0x1fc   : > { %6048 = vmatpush3.msra.mxu0 %v8889_v62  ;;  %v2351_v40 = vadd.f32 %v11506_v5, %v2339_v0  ;;  %5845 = vmatprep.subr.mxu1 %v9311_v30  ;;  %v2336_v28 = vmul.f32 %v6739_v49, %v11447_v55  ;;  %v3868_v16 = vmax.f32 %v3864_v39, 0.0  ;;  %11507 = vst [vmem:[#allocation81_spill] sm:$0xff] %v9318_v23  ;;  %v11510_v39 = vld [vmem:[#allocation157_spill] sm:$0xff]  ;;  %v9339_v43 = vmin.f32 %v961_v61, 6.0 }
 0x1fd   : > { %v9322_v8 = vmul.f32 %v6731_v36, %v9285_v52  ;;  %v9326_v17 = vmul.f32 %v6736_v46, %v9213_v59  ;;  %6049 = vmatprep.subr.mxu0 %v8920_v18  ;;  %v2372_v0 = vmul.f32 %v6786_v33, %v11509_v3  ;;  %v2360_v14 = vmul.f32 %v6779_v24, %v11510_v39  ;;  %v11513_v39 = vld [vmem:[#allocation168_spill] sm:$0xff]  ;;  %v11514_v61 = vld [vmem:[#allocation33_spill] sm:$0xff]  ;;  %v11519_v3 = vld [vmem:[#allocation50_spill] sm:$0xff] }
 0x1fe   : > { %v2363_v5 = vadd.f32 %v2359_v12, %v2351_v40  ;;  %v2340_v55 = vadd.f32 %v2336_v28, %v8445_v13  ;;  %6050 = vmatpush3.msra.mxu0 %v8920_v18  ;;  %v3872_v48 = vmin.f32 %v3868_v16, 6.0  ;;  %v11511_v40 = vld [vmem:[#allocation155_spill] sm:$0xff]  ;;  %v11512_v28 = vld [vmem:[#allocation156_spill] sm:$0xff]  ;;  %v2373_v37 = vmul.f32 %v6786_v33, %v11513_v39  ;;  %v11528_v18 = vld [vmem:[#allocation34_spill] sm:$0xff] }
 0x1ff   : > { %11508 = vst [vmem:[#allocation32_spill] sm:$0xff] %v9322_v8  ;;  %v9337_v8 = vmul.f32 %v6731_v36, %v9318_v23  ;;  %6051 = vmatprep.subr.mxu0 %v8944_v29  ;;  %v2337_v12 = vmul.f32 %v6739_v49, %v11511_v40  ;;  %v2398_v31 = vmul.f32 %v9139_v45, %v11514_v61  ;;  %v11521_v16 = vld [vmem:[#allocation151_spill] sm:$0xff] }
 0x200   : > { %v2376_v13 = vadd.f32 %v2372_v0, %v2363_v5  ;;  %v2352_v20 = vadd.f32 %v11512_v28, %v2340_v55  ;;  %6052 = vmatpush3.msra.mxu0 %v8944_v29  ;;  %6067 = vmatprep.mubr.f32.mxu0 %v3872_v48  ;;  %v2361_v40 = vmul.f32 %v6779_v24, %v11516_v4  ;;  %v11517_v5 = vld [vmem:[#allocation36_spill] sm:$0xff]  ;;  %v11518_v28 = vld [vmem:[#allocation154_spill] sm:$0xff]  ;;  %v11520_v48 = vld [vmem:[#allocation53_spill] sm:$0xff] }
 0x201   : > { %v2341_v32 = vadd.f32 %v2337_v12, %v11515_v15  ;;  %6053 = vmatprep.subr.mxu0 %v8969_v9  ;;  %v2386_v39 = vmul.f32 %v6741_v50, %v11518_v28  ;;  %v2744_v57 = vadd.f32 %v11520_v48, %v11519_v3  ;;  %v11522_v12 = vld [vmem:[#allocation166_spill] sm:$0xff]  ;;  %v11524_v28 = vld [vmem:[#allocation27_spill] sm:$0xff] }
 0x202   : > { %v2389_v0 = vadd.f32 %v11517_v5, %v2376_v13  ;;  %v2364_v55 = vadd.f32 %v2360_v14, %v2352_v20  ;;  %6054 = vmatpush3.msra.mxu0 %v8969_v9  ;;  %v2374_v4 = vmul.f32 %v6786_v33, %v11522_v12  ;;  %v11523_v13 = vld [vmem:[#allocation100_spill] sm:$0xff]  ;;  %v2399_v29 = vmul.f32 %v9139_v45, %v11524_v28  ;;  %v11525_v3 = vld [vmem:[#allocation42_spill] sm:$0xff]  ;;  %v11526_v9 = vld [vmem:[#allocation149_spill] sm:$0xff] }
 0x203   : > { %v2353_v15 = vadd.f32 %v11521_v16, %v2341_v32  ;;  %6055 = vmatprep.subr.mxu0 %v8994_v22  ;;  %v3802_v20 = vadd.f32 %v11523_v13, %v9158_v25  ;;  %v2756_v48 = vadd.f32 %v11525_v3, %v2744_v57  ;;  %v2387_v32 = vmul.f32 %v6741_v50, %v11526_v9  ;;  %v11527_v16 = vld [vmem:[#allocation97_spill] sm:$0xff]  ;;  %v11530_v57 = vld [vmem:[#allocation40_spill] sm:$0xff]  ;;  %v11532_v28 = vld [vmem:[#allocation46_spill] sm:$0xff] }
 0x204   : > { %v2402_v14 = vadd.f32 %v2398_v31, %v2389_v0  ;;  %v2377_v5 = vadd.f32 %v2373_v37, %v2364_v55  ;;  %6056 = vmatpush3.msra.mxu0 %v8994_v22  ;;  %v3822_v25 = vmul.f32 %v6779_v24, %v11528_v18  ;;  %v11529_v0 = vld [vmem:[#allocation52_spill] sm:$0xff]  ;;  %v11533_v3 = vld [vmem:[#allocation11_spill] sm:$0xff] }
 0x205   : > { %v2365_v61 = vadd.f32 %v2361_v40, %v2353_v15  ;;  %6057 = vmatprep.subr.mxu0 %v9010_v1  ;;  %v3814_v12 = vadd.f32 %v11527_v16, %v3802_v20  ;;  %v2768_v55 = vadd.f32 %v11529_v0, %v2756_v48  ;;  %v9384_v40 = vsel %vm1506_vm5, %v11530_v57, 0.0  ;;  %v11531_v9 = vld [vmem:[#allocation24_spill] sm:$0xff]  ;;  %v11534_v16 = vld [vmem:[#allocation49_spill] sm:$0xff] }
 0x206   : > { %v2406_v31 = vmax.f32 %v2402_v14, 0.0  ;;  %v2390_v37 = vadd.f32 %v2386_v39, %v2377_v5  ;;  %6058 = vmatpush3.msra.mxu0 %v9010_v1  ;;  %v2400_v13 = vmul.f32 %v9139_v45, %v11531_v9  ;;  %v3835_v14 = vmul.f32 %v6786_v33, %v11532_v28 }
 0x207   : > { %v2378_v15 = vadd.f32 %v2374_v4, %v2365_v61  ;;  %6059 = vmatprep.subr.mxu0 %v9024_v34  ;;  %v3826_v20 = vadd.f32 %v3822_v25, %v3814_v12  ;;  %v2780_v48 = vadd.f32 %v11533_v3, %v2768_v55  ;;  %v2789_v0 = vmul.f32 %v6786_v33, %v11534_v16  ;;  %v11535_v61 = vld [vmem:[#allocation38_spill] sm:$0xff] }
 0x208   : > { %v2410_v39 = vmin.f32 %v2406_v31, 6.0  ;;  %v2403_v5 = vadd.f32 %v2399_v29, %v2390_v37  ;;  %6060 = vmatpush3.msra.mxu0 %v9024_v34  ;;  %v2802_v4 = vmul.f32 %v6741_v50, %v11535_v61  ;;  %v11536_v12 = vrot.slane %v9339_v43, 7 }
 0x209   : > { %v2391_v57 = vadd.f32 %v2387_v32, %v2378_v15  ;;  %6061 = vmatprep.subr.mxu0 %v9038_v58  ;;  %v3839_v9 = vadd.f32 %v3835_v14, %v3826_v20  ;;  %v11537_v25 = vrot.slane %v9302_v21, 7  ;;  %v2793_v37 = vadd.f32 %v2789_v0, %v2780_v48  ;;  %v11542_v0 = vld [vmem:[#allocation122_spill] sm:$0xff] }
 0x20a   : > { %5802 = vmatmul.mubr.f32.vlgmr.msra.gmra.mxu1 %v2410_v39  ;;  %v2407_v31 = vmax.f32 %v2403_v5, 0.0  ;;  %6062 = vmatpush3.msra.mxu0 %v9038_v58  ;;  %v3861_v32 = vmul.f32 %v9139_v45, %v9384_v40  ;;  %v11538_v55 = vrot.slane %v9183_v63, 1  ;;  %v11539_v15 = vrot.slane %v9213_v59, 1  ;;  %v11541_v39 = vld [vmem:[#allocation39_spill] sm:$0xff] }
 0x20b   : > { %v1162_v29 = vsel %vm1102_vm2, %v11537_v25, %v11536_v12  ;;  %v1399_v28 = vrot.slane %v9339_v43, 1  ;;  %5846 = vmatpush3.msra.mxu1 %v9311_v30  ;;  %v2404_v14 = vadd.f32 %v2400_v13, %v2391_v57  ;;  %6063 = vmatprep.subr.mxu0 %v9059_v11  ;;  %v3852_v5 = vadd.f32 %v11541_v39, %v3839_v9  ;;  %v11543_v25 = vld [vmem:[#allocation41_spill] sm:$0xff] }
 0x20c   : > { %v9413_v20 = vsel %vm1436_vm4, %v11539_v15, %v11538_v55  ;;  %v3799_v3 = vmul.f32 %v6739_v49, %v9318_v23  ;;  %v2411_v48 = vmin.f32 %v2407_v31, 6.0  ;;  %5847 = vmatprep.subr.mxu1 %v8774_v2  ;;  %v2806_v16 = vadd.f32 %v2802_v4, %v2793_v37  ;;  %6064 = vmatpush3.msra.mxu0 %v9059_v11 }
 0x20d   : > { %11540 = vst [vmem:[#allocation88_spill] sm:$0xff] %v9413_v20  ;;  %v2815_v61 = vmul.f32 %v9139_v45, %v11542_v0  ;;  %v9427_v12 = vsel %vm1169_vm3, %v1162_v29, 0.0  ;;  %5848 = vmatpush3.msra.mxu1 %v8774_v2  ;;  %v2408_v13 = vmax.f32 %v2404_v14, 0.0  ;;  %6065 = vmatprep.subr.mxu0 %v9081_v7  ;;  %v3865_v57 = vadd.f32 %v3861_v32, %v3852_v5 }
 0x20e   : > { %v3803_v9 = vadd.f32 %v3799_v3, %v9231_v44  ;;  %v3823_v4 = vmul.f32 %v6779_v24, %v9413_v20  ;;  %v4195_v31 = vadd.f32 %v11543_v25, %v9294_v56  ;;  %v9438_v37 = vmul.f32 %v6728_v35, %v9302_v21  ;;  %5804 = vmatprep.mubr.f32.mxu1 %v2411_v48  ;;  %v5645_v25 = vpop.f32.mrf.mxu0 }
 0x20f   : > { %5849 = vmatprep.subr.mxu1 %v8798_v38  ;;  %v2819_v29 = vadd.f32 %v2815_v61, %v2806_v16  ;;  %v2412_v55 = vmin.f32 %v2408_v13, 6.0  ;;  %6066 = vmatpush3.msra.mxu0 %v9081_v7  ;;  %v3869_v44 = vmax.f32 %v3865_v57, 0.0  ;;  %v3836_v15 = vmul.f32 %v6786_v33, %v9427_v12 }
 0x210   : > { %11544 = vst [vmem:[#allocation26_spill] sm:$0xff] %v9438_v37  ;;  %5850 = vmatpush3.msra.mxu1 %v8798_v38  ;;  %v3815_v32 = vadd.f32 %v9298_v54, %v3803_v9  ;;  %v3976_v56 = vadd.f32 %v8856_v26, %v9337_v8  ;;  %v9450_v14 = vmul.f32 %v6736_v46, %v9302_v21  ;;  %v11545_v5 = vrot.slane %v9302_v21, 1 }
 0x211   : > { %v2823_v39 = vmax.f32 %v2819_v29, 0.0  ;;  %5851 = vmatprep.subr.mxu1 %v8826_v41  ;;  %6111 = vmatprep.subr.mxu0 %v9311_v30  ;;  %v3873_v3 = vmin.f32 %v3869_v44, 6.0  ;;  %v3849_v8 = vmul.f32 %v6741_v50, %v9339_v43  ;;  %v11546_v16 = vrot.slane %v9213_v59, 1  ;;  %v11675_v59 = vld [vmem:[#allocation79_spill] sm:$0xff] }
 0x212   : > { %v9458_v54 = vsel %vm1436_vm4, %v1399_v28, %v11545_v5  ;;  %5805 = vmatmul.mubr.f32.gmra.mxu1 %v2412_v55  ;;  %v3827_v48 = vadd.f32 %v3823_v4, %v3815_v32  ;;  %v11547_v0 = vrot.slane %v9183_v63, 1  ;;  %v4207_v13 = vadd.f32 %v9268_v47, %v4195_v31 }
 0x213   : > { %v2827_v57 = vmin.f32 %v2823_v39, 6.0  ;;  %5852 = vmatpush3.msra.mxu1 %v8826_v41  ;;  %v4181_v9 = vmul.f32 %v6731_v36, %v9427_v12  ;;  %6068 = vmatmul.mubr.f32.vlgmr.msra.gmra.mxu0 %v3873_v3  ;;  %v3862_v55 = vmul.f32 %v9139_v45, %v9458_v54  ;;  %v3800_v47 = vmul.f32 %v6739_v49, %v9285_v52 }
 0x214   : > { %v1495_v61 = vsel %vm1436_vm4, %v11547_v0, %v11546_v16  ;;  %5853 = vmatprep.subr.mxu1 %v8848_v51  ;;  %v3840_v29 = vadd.f32 %v3836_v15, %v3827_v48  ;;  %v964_v31 = vmax.f32 %v5645_v25, 0.0  ;;  %v9482_v44 = vadd.f32 %v9326_v17, %v3976_v56  ;;  %6112 = vmatpush3.msra.mxu0 %v9311_v30 }
 0x215   : > { %v9474_v4 = vsel %vm1506_vm5, %v1495_v61, 0.0  ;;  %5877 = vmatprep.mubr.f32.mxu1 %v2827_v57  ;;  %5854 = vmatpush3.msra.mxu1 %v8848_v51  ;;  %v11550_v32 = vrot.slane %v9302_v21, 7  ;;  %v11551_v39 = vrot.slane %v9339_v43, 7  ;;  %v1496_v3 = vsel %vm1436_vm4, %v11545_v5, %v1399_v28  ;;  %v868_v61 = vpop.f32.mrf.mxu0 }
 0x216   : > { %11548 = vst [vmem:[#allocation93_spill] sm:$0xff] %v9474_v4  ;;  %11549 = vst [vmem:[#allocation19_spill] sm:$0xff] %v9482_v44  ;;  %5855 = vmatprep.subr.mxu1 %v8871_v6  ;;  %v3853_v17 = vadd.f32 %v3849_v8, %v3840_v29  ;;  %v3804_v56 = vadd.f32 %v3800_v47, %v9256_v42  ;;  %v3824_v48 = vmul.f32 %v6779_v24, %v9474_v4  ;;  %v11555_v29 = vld [vmem:[#allocation101_spill] sm:$0xff]  ;;  %v11565_v44 = vld [vmem:[#allocation47_spill] sm:$0xff] }
 0x217   : > { %v9491_v15 = vsel %vm1102_vm2, %v11551_v39, %v11550_v32  ;;  %v9504_v16 = vmul.f32 %v6728_v35, %v9339_v43  ;;  %v4193_v0 = vmul.f32 %v6736_v46, %v9339_v43  ;;  %5856 = vmatpush3.msra.mxu1 %v8871_v6  ;;  %6113 = vmatprep.subr.mxu0 %v8774_v2  ;;  %v9516_v25 = vmin.f32 %v964_v31, 6.0  ;;  %v11554_v43 = vld [vmem:[#allocation103_spill] sm:$0xff] }
 0x218   : > { %v4185_v28 = vadd.f32 %v8856_v26, %v4181_v9  ;;  %5857 = vmatprep.subr.mxu1 %v8889_v62  ;;  %v3866_v42 = vadd.f32 %v3862_v55, %v3853_v17  ;;  %6114 = vmatpush3.msra.mxu0 %v8774_v2  ;;  %v3816_v8 = vadd.f32 %v9275_v53, %v3804_v56  ;;  %v1568_v2 = vsel %vm1506_vm5, %v1496_v3, 0.0  ;;  %v11556_v53 = vld [vmem:[#allocation167_spill] sm:$0xff] }
 0x219   : > { %11552 = vst [vmem:[#allocation85_spill] sm:$0xff] %v9504_v16  ;;  %v3837_v57 = vmul.f32 %v6786_v33, %v9491_v15  ;;  %11553 = vst [vmem:[#allocation98_spill] sm:$0xff] %v9516_v25  ;;  %5858 = vmatpush3.msra.mxu1 %v8889_v62  ;;  %v4196_v47 = vadd.f32 %v11555_v29, %v11554_v43  ;;  %v4204_v9 = vmul.f32 %v6764_v10, %v9384_v40  ;;  %v11557_v43 = vld [vmem:[#allocation10_spill] sm:$0xff]  ;;  %v11559_v29 = vld [vmem:[#allocation9_spill] sm:$0xff] }
 0x21a   : > { %v4205_v55 = vmul.f32 %v6764_v10, %v9458_v54  ;;  %6115 = vmatprep.subr.mxu0 %v8798_v38  ;;  %5859 = vmatprep.subr.mxu1 %v11556_v53  ;;  %v3870_v31 = vmax.f32 %v3866_v42, 0.0  ;;  %v3828_v32 = vadd.f32 %v3824_v48, %v3816_v8  ;;  %v3850_v39 = vmul.f32 %v6741_v50, %v9302_v21  ;;  %v11561_v48 = vld [vmem:[#allocation108_spill] sm:$0xff]  ;;  %v11562_v21 = vld [vmem:[#allocation145_spill] sm:$0xff] }
 0x21b   : > { %6116 = vmatpush3.msra.mxu0 %v8798_v38  ;;  %v963_v5 = vmax.f32 %v868_v61, 0.0  ;;  %5860 = vmatpush3.msra.mxu1 %v11556_v53  ;;  %v4197_v17 = vadd.f32 %v4193_v0, %v4185_v28  ;;  %v4182_v56 = vmul.f32 %v6731_v36, %v9491_v15  ;;  %v11558_v3 = vrot.slane %v11557_v43, 7  ;;  %v11563_v0 = vld [vmem:[#allocation8_spill] sm:$0xff] }
 0x21c   : > { %v11560_v37 = vrot.slane %v11559_v29, 7  ;;  %v4215_v8 = vmul.f32 %v6739_v49, %v11561_v48  ;;  %5861 = vmatprep.subr.mxu1 %v11562_v21  ;;  %v3874_v38 = vmin.f32 %v3870_v31, 6.0  ;;  %v3841_v61 = vadd.f32 %v3837_v57, %v3828_v32  ;;  %6117 = vmatprep.subr.mxu0 %v8826_v41 }
 0x21d   : > { %v3863_v16 = vmul.f32 %v9139_v45, %v1568_v2  ;;  %v11564_v28 = vrot.slane %v11563_v0, 1  ;;  %v11566_v63 = vrot.slane %v11565_v44, 1  ;;  %5862 = vmatpush3.msra.mxu1 %v11562_v21  ;;  %v9559_v31 = vadd.f32 %v4204_v9, %v4196_v47  ;;  %v11569_v0 = vld [vmem:[#allocation78_spill] sm:$0xff]  ;;  %v11573_v47 = vld [vmem:[#allocation112_spill] sm:$0xff]  ;;  %6118 = vmatpush3.msra.mxu0 %v8826_v41 }
 0x21e   : > { %v1148_v42 = vsel %vm1102_vm2, %v11560_v37, %v11558_v3  ;;  %v9557_v37 = vmul.f32 %v6779_v24, %v9384_v40  ;;  %v4219_v57 = vadd.f32 %v4215_v8, %v4207_v13  ;;  %v10994_v32 = vrot.slane %v9516_v25, 7  ;;  %v5648_v3 = vpop.f32.mrf.mxu0  ;;  %5863 = vmatprep.subr.mxu1 %v11569_v0  ;;  %6070 = vmatprep.mubr.f32.mxu0 %v3874_v38 }
 0x21f   : > { %v9551_v52 = vsel %vm1436_vm4, %v11566_v63, %v11564_v28  ;;  %v9565_v63 = vmul.f32 %v6764_v10, %v9413_v20  ;;  %v3854_v28 = vadd.f32 %v3850_v39, %v3841_v61  ;;  %v1205_v44 = vsel %vm1169_vm3, %v1148_v42, 0.0  ;;  %5864 = vmatpush3.msra.mxu1 %v11569_v0  ;;  %6119 = vmatprep.subr.mxu0 %v8848_v51 }
 0x220   : > { %11567 = vst [vmem:[#allocation87_spill] sm:$0xff] %v9551_v52  ;;  %11568 = vst [vmem:[#allocation99_spill] sm:$0xff] %v9557_v37  ;;  %v9569_v48 = vmin.f32 %v963_v5, 6.0  ;;  %v9574_v40 = vmul.f32 %v6739_v49, %v9427_v12  ;;  %v4186_v13 = vadd.f32 %v8856_v26, %v4182_v56  ;;  %v4231_v9 = vadd.f32 %v11573_v47, %v4219_v57  ;;  %v11611_v37 = vld [vmem:[#allocation67_spill] sm:$0xff] }
 0x221   : > { %11570 = vst [vmem:[#allocation96_spill] sm:$0xff] %v9565_v63  ;;  %v4239_v8 = vmul.f32 %v6779_v24, %v9551_v52  ;;  %5865 = vmatprep.subr.mxu1 %v8994_v22  ;;  %v9583_v39 = vmul.f32 %v6779_v24, %v9458_v54  ;;  %v9585_v5 = vadd.f32 %v4205_v55, %v4197_v17  ;;  %v966_v12 = vmax.f32 %v5648_v3, 0.0 }
 0x222   : > { %11571 = vst [vmem:[#allocation83_spill] sm:$0xff] %v9569_v48  ;;  %11572 = vst [vmem:[#allocation4_spill] sm:$0xff] %v9574_v40  ;;  %v3867_v42 = vadd.f32 %v3863_v16, %v3854_v28  ;;  %5866 = vmatpush3.msra.mxu1 %v8994_v22  ;;  %v9591_v26 = vmul.f32 %v6764_v10, %v9474_v4  ;;  %v11576_v56 = vrot.slane %v11559_v29, 1  ;;  %v11577_v38 = vrot.slane %v11557_v43, 1  ;;  %v878_v16 = vpop.f32.mrf.mxu0  ;;  %v11605_v40 = vld [vmem:[#allocation162_spill] sm:$0xff]  ;;  %v11610_v4 = vld [vmem:[#allocation73_spill] sm:$0xff] }
 0x223   : > { %11574 = vst [vmem:[#allocation35_spill] sm:$0xff] %v9583_v39  ;;  %v4243_v61 = vadd.f32 %v4239_v8, %v4231_v9  ;;  %v4252_v55 = vmul.f32 %v6786_v33, %v1205_v44  ;;  %5867 = vmatprep.subr.mxu1 %v9010_v1  ;;  %v9603_v17 = vmul.f32 %v6739_v49, %v9491_v15  ;;  %v10993_v29 = vrot.slane %v9569_v48, 7 }
 0x224   : > { %11575 = vst [vmem:[#allocation23_spill] sm:$0xff] %v9591_v26  ;;  %v1450_v54 = vsel %vm1436_vm4, %v11577_v38, %v11576_v56  ;;  %v3871_v41 = vmax.f32 %v3867_v42, 0.0  ;;  %v9606_v57 = vmul.f32 %v6779_v24, %v1568_v2  ;;  %v4198_v3 = vadd.f32 %v9450_v14, %v4186_v13  ;;  %5868 = vmatpush3.msra.mxu1 %v9010_v1  ;;  %v9615_v8 = vpop.f32.mrf.mxu0 }
 0x225   : > { %11578 = vst [vmem:[#allocation31_spill] sm:$0xff] %v9603_v17  ;;  %v4206_v28 = vmul.f32 %v6764_v10, %v1568_v2  ;;  %v4256_v47 = vadd.f32 %v4252_v55, %v4243_v61  ;;  %v4265_v9 = vmul.f32 %v6741_v50, %v11557_v43  ;;  %v4278_v42 = vmul.f32 %v9139_v45, %v1450_v54  ;;  %v11587_v55 = vld [vmem:[#allocation15_spill] sm:$0xff]  ;;  %v11595_v17 = vld [vmem:[#allocation170_spill] sm:$0xff] }
 0x226   : > { %11579 = vst [vmem:[#allocation157_spill] sm:$0xff] %v9606_v57  ;;  %v3875_v15 = vmin.f32 %v3871_v41, 6.0  ;;  %v9620_v56 = vmul.f32 %v6764_v10, %v9551_v52  ;;  %5869 = vmatprep.subr.mxu1 %v9024_v34  ;;  %6120 = vmatpush3.msra.mxu0 %v8848_v51  ;;  %v9624_v14 = vmin.f32 %v966_v12, 6.0  ;;  %v9627_v13 = vmul.f32 %v6739_v49, %v1205_v44  ;;  %v11585_v12 = vld [vmem:[#allocation44_spill] sm:$0xff]  ;;  %v11604_v52 = vld [vmem:[#allocation13_spill] sm:$0xff] }
 0x227   : > { %v4269_v2 = vadd.f32 %v4265_v9, %v4256_v47  ;;  %v4597_v43 = vmul.f32 %v6731_v36, %v1205_v44  ;;  %5870 = vmatpush3.msra.mxu1 %v9024_v34  ;;  %6121 = vmatprep.subr.mxu0 %v8871_v6  ;;  %v965_v38 = vmax.f32 %v878_v16, 0.0  ;;  %v9633_v61 = vmul.f32 %v6779_v24, %v1450_v54  ;;  %v11584_v44 = vld [vmem:[#allocation45_spill] sm:$0xff]  ;;  %v11594_v9 = vld [vmem:[#allocation175_spill] sm:$0xff] }
 0x228   : > { %11580 = vst [vmem:[#allocation155_spill] sm:$0xff] %v9620_v56  ;;  %11581 = vst [vmem:[#allocation156_spill] sm:$0xff] %v9624_v14  ;;  %6071 = vmatmul.mubr.f32.gmra.mxu0 %v3875_v15  ;;  %v1163_v51 = vsel %vm1102_vm2, %v10994_v32, %v10993_v29  ;;  %5871 = vmatprep.subr.mxu1 %v9038_v58  ;;  %v2769_v41 = vadd.f32 %v11585_v12, %v11584_v44  ;;  %v11586_v15 = vld [vmem:[#allocation14_spill] sm:$0xff]  ;;  %v11593_v32 = vld [vmem:[#allocation57_spill] sm:$0xff] }
 0x229   : > { %11582 = vst [vmem:[#allocation168_spill] sm:$0xff] %v9627_v13  ;;  %11583 = vst [vmem:[#allocation33_spill] sm:$0xff] %v9633_v61  ;;  %v9645_v47 = vadd.f32 %v4206_v28, %v4198_v3  ;;  %v4282_v16 = vadd.f32 %v4278_v42, %v4269_v2  ;;  %5872 = vmatpush3.msra.mxu1 %v9038_v58  ;;  %6122 = vmatpush3.msra.mxu0 %v8871_v6  ;;  %v9652_v61 = vpop.f32.mrf.mxu0  ;;  %v9659_v3 = vmin.f32 %v965_v38, 6.0  ;;  %v11589_v28 = vld [vmem:[#allocation104_spill] sm:$0xff] }
 0x22a   : > { %v2746_v57 = vadd.f32 %v11587_v55, %v11586_v15  ;;  %v9655_v29 = vmul.f32 %v6764_v10, %v1450_v54  ;;  %5873 = vmatprep.subr.mxu1 %v9059_v11  ;;  %6123 = vmatprep.subr.mxu0 %v8889_v62  ;;  %v2781_v42 = vadd.f32 %v11589_v28, %v2769_v41  ;;  %v11590_v2 = vld [vmem:[#allocation48_spill] sm:$0xff]  ;;  %v9667_v55 = vld [vmem:[%s10792_s3] ss:$0 sm:$0xff]  ;;  %v9674_v12 = vsel %vm1169_vm3, %v1163_v51, 0.0 }
 0x22b   : > { %11588 = vst [vmem:[#allocation21_spill] sm:$0xff] %v9659_v3  ;;  %v2790_v44 = vmul.f32 %v6786_v33, %v11590_v2  ;;  %v4286_v6 = vmax.f32 %v4282_v16, 0.0  ;;  %v9670_v54 = vadd.f32 %v9667_v55, %v4597_v43  ;;  %11591 = vst [vmem:[#allocation158_spill] sm:$0xff] %v9674_v12  ;;  %5874 = vmatpush3.msra.mxu1 %v9059_v11  ;;  %6124 = vmatpush3.msra.mxu0 %v8889_v62  ;;  %v9679_v41 = vpop.f32.mrf.mxu0  ;;  %v11592_v51 = vld [vmem:[#allocation119_spill] sm:$0xff] }
 0x22c   : > { %v9683_v16 = vmul.f32 %v6728_v35, %v9569_v48  ;;  %5875 = vmatprep.subr.mxu1 %v9081_v7  ;;  %6125 = vmatprep.subr.mxu0 %v11556_v53  ;;  %v2758_v28 = vadd.f32 %v11592_v51, %v2746_v57  ;;  %v2816_v62 = vmul.f32 %v9139_v45, %v11593_v32  ;;  %v11597_v57 = vld [vmem:[#allocation171_spill] sm:$0xff]  ;;  %v11598_v51 = vld [vmem:[#allocation165_spill] sm:$0xff]  ;;  %v11617_v20 = vrot.slane %v9659_v3, 7 }
 0x22d   : > { %v2794_v43 = vadd.f32 %v2790_v44, %v2781_v42  ;;  %v4290_v2 = vmin.f32 %v4286_v6, 6.0  ;;  %5876 = vmatpush3.msra.mxu1 %v9081_v7  ;;  %v2791_v38 = vmul.f32 %v6786_v33, %v11594_v9  ;;  %6126 = vmatpush3.msra.mxu0 %v11556_v53  ;;  %v2723_v15 = vadd.f32 %v9667_v55, %v11595_v17  ;;  %v11596_v44 = vld [vmem:[#allocation54_spill] sm:$0xff]  ;;  %v11599_v53 = vld [vmem:[#allocation161_spill] sm:$0xff]  ;;  %v11600_v17 = vld [vmem:[#allocation160_spill] sm:$0xff]  ;;  %v9711_v39 = vpop.f32.mrf.mxu0 }
 0x22e   : > { %5921 = vmatprep.subr.mxu1 %v9311_v30  ;;  %v2770_v6 = vadd.f32 %v11597_v57, %v2758_v28  ;;  %v2804_v26 = vmul.f32 %v6741_v50, %v11598_v51  ;;  %6127 = vmatprep.subr.mxu0 %v11562_v21  ;;  %v2817_v9 = vmul.f32 %v9139_v45, %v11599_v53  ;;  %v11603_v57 = vld [vmem:[#allocation169_spill] sm:$0xff] }
 0x22f   : > { %v2807_v13 = vadd.f32 %v11596_v44, %v2794_v43  ;;  %6143 = vmatprep.mubr.f32.mxu0 %v4290_v2  ;;  %6128 = vmatpush3.msra.mxu0 %v11562_v21  ;;  %v2735_v42 = vadd.f32 %v11600_v17, %v2723_v15  ;;  %v11601_v43 = vld [vmem:[#allocation64_spill] sm:$0xff]  ;;  %v2792_v2 = vmul.f32 %v6786_v33, %v11604_v52  ;;  %v11606_v21 = vld [vmem:[#allocation123_spill] sm:$0xff]  ;;  %v5689_v52 = vpop.f32.mrf.mxu1 }
 0x230   : > { %v11602_v44 = vld [vmem:[#allocation152_spill] sm:$0xff]  ;;  %v2782_v51 = vadd.f32 %v11603_v57, %v2770_v6  ;;  %v9718_v32 = vmul.f32 %v6741_v50, %v11605_v40  ;;  %6129 = vmatprep.subr.mxu0 %v11569_v0  ;;  %v5841_v6 = vpop.f32.mrf.mxu0  ;;  %v3207_v63 = vmul.f32 %v6786_v33, %v11610_v4  ;;  %v11616_v4 = vld [vmem:[#allocation110_spill] sm:$0xff]  ;;  %1861 = vst.msk [vmem:[%s9766_s12 + $0x8] sm:$0xff] %vm1859_vm6, %v5689_v52  ;;  %v11629_v52 = vrot.slane %v9624_v14, 1 }
 0x231   : > { %v3162_v56 = vadd.f32 %v11602_v44, %v11601_v43  ;;  %v2820_v28 = vadd.f32 %v2816_v62, %v2807_v13  ;;  %v2747_v53 = vadd.f32 %v11606_v21, %v2735_v42  ;;  %v11607_v15 = vld [vmem:[#allocation172_spill] sm:$0xff]  ;;  %6130 = vmatpush3.msra.mxu0 %v11569_v0  ;;  %v11609_v13 = vld [vmem:[#allocation115_spill] sm:$0xff]  ;;  %v3220_v42 = vmul.f32 %v6741_v50, %v11611_v37 }
 0x232   : > { %v9724_v17 = vmul.f32 %v9139_v45, %v11607_v15  ;;  %v11608_v43 = vld [vmem:[#allocation128_spill] sm:$0xff]  ;;  %v4220_v62 = vadd.f32 %v11609_v13, %v9559_v31  ;;  %v2795_v40 = vadd.f32 %v2791_v38, %v2782_v51  ;;  %6131 = vmatprep.subr.mxu0 %v8994_v22  ;;  %v11612_v21 = vld [vmem:[#allocation163_spill] sm:$0xff]  ;;  %v11613_v15 = vld [vmem:[#allocation69_spill] sm:$0xff]  ;;  %v4253_v37 = vmul.f32 %v6786_v33, %v11616_v4 }
 0x233   : > { %v3174_v44 = vadd.f32 %v11608_v43, %v3162_v56  ;;  %v2824_v57 = vmax.f32 %v2820_v28, 0.0  ;;  %v2759_v56 = vadd.f32 %v11612_v21, %v2747_v53  ;;  %6132 = vmatpush3.msra.mxu0 %v8994_v22  ;;  %v11614_v31 = vld [vmem:[#allocation107_spill] sm:$0xff]  ;;  %v11618_v53 = vrot.slane %v9624_v14, 7  ;;  %v11619_v22 = vld [vmem:[#allocation164_spill] sm:$0xff]  ;;  %5121 = vst.msk [vmem:[%s9766_s12 + $0x48] sm:$0xff] %vm1859_vm6, %v5841_v6 }
 0x234   : > { %v4232_v43 = vadd.f32 %v11614_v31, %v4220_v62  ;;  %v11615_v13 = vld [vmem:[#allocation111_spill] sm:$0xff]  ;;  %v2808_v51 = vadd.f32 %v2804_v26, %v2795_v40  ;;  %6133 = vmatprep.subr.mxu0 %v9010_v1  ;;  %v11620_v62 = vld [vmem:[#allocation134_spill] sm:$0xff]  ;;  %v11621_v26 = vrot.slane %v9516_v25, 1  ;;  %v11622_v40 = vrot.slane %v9569_v48, 1 }
 0x235   : > { %v3186_v0 = vadd.f32 %v11613_v15, %v3174_v44  ;;  %v4240_v38 = vmul.f32 %v6779_v24, %v11615_v13  ;;  %v2828_v28 = vmin.f32 %v2824_v57, 6.0  ;;  %v1164_v44 = vsel %vm1102_vm2, %v11618_v53, %v11617_v20  ;;  %6134 = vmatpush3.msra.mxu0 %v9010_v1  ;;  %v1840_v20 = vpop.f32.mrf.mxu1  ;;  %v11624_v1 = vld [vmem:[#allocation137_spill] sm:$0xff] }
 0x236   : > { %v2771_v21 = vadd.f32 %v11619_v22, %v2759_v56  ;;  %v9759_v31 = vsel %vm1436_vm4, %v11622_v40, %v11621_v26  ;;  %v2688_v56 = vpop.f32.mrf.mxu0  ;;  %6135 = vmatprep.subr.mxu0 %v9024_v34  ;;  %v4217_v4 = vmul.f32 %v6739_v49, %v9674_v12  ;;  %v11626_v53 = vld [vmem:[#allocation125_spill] sm:$0xff]  ;;  %1860 = vst.msk [vmem:[%s9766_s12] sm:$0xff] %vm1859_vm6, %v1840_v20  ;;  %v9806_v40 = vld [vmem:[%s10793_s4 + $0x68] sm:$0xff]  ;;  %v11630_v6 = vrot.slane %v9659_v3, 1  ;;  %v11632_v20 = vld [vmem:[#allocation138_spill] sm:$0xff] }
 0x237   : > { %v3198_v15 = vadd.f32 %v11620_v62, %v3186_v0  ;;  %v4244_v57 = vadd.f32 %v4240_v38, %v4232_v43  ;;  %11623 = vst [vmem:[#allocation36_spill] sm:$0xff] %v9759_v31  ;;  %5878 = vmatmul.mubr.f32.vlgmr.msra.gmra.mxu1 %v2828_v28  ;;  %v2821_v0 = vadd.f32 %v2817_v9, %v2808_v51  ;;  %v9773_v38 = vsel %vm1169_vm3, %v1164_v44, 0.0  ;;  %v9783_v44 = vld [vmem:[%s10793_s4 + $0x70] sm:$0xff]  ;;  %v11627_v62 = vld [vmem:[#allocation114_spill] sm:$0xff] }
 0x238   : > { %v3233_v43 = vmul.f32 %v9139_v45, %v11624_v1  ;;  %11625 = vst [vmem:[#allocation154_spill] sm:$0xff] %v9773_v38  ;;  %5922 = vmatpush3.msra.mxu1 %v9311_v30  ;;  %v2783_v9 = vadd.f32 %v11626_v53, %v2771_v21  ;;  %6136 = vmatpush3.msra.mxu0 %v9024_v34  ;;  %5120 = vst.msk [vmem:[%s9766_s12 + $0x40] sm:$0xff] %vm1859_vm6, %v2688_v56  ;;  %v9824_v56 = vsel %vm1169_vm3, %v11632_v20, 0.0  ;;  %v11633_v53 = vld [vmem:[#allocation124_spill] sm:$0xff]  ;;  %v11657_v13 = vld [vmem:[#allocation109_spill] sm:$0xff] }
 0x239   : > { %v3211_v28 = vadd.f32 %v3207_v63, %v3198_v15  ;;  %v4257_v51 = vadd.f32 %v4253_v37, %v4244_v57  ;;  %v2825_v22 = vmax.f32 %v2821_v0, 0.0  ;;  %5923 = vmatprep.subr.mxu1 %v9783_v44  ;;  %6137 = vmatprep.subr.mxu0 %v9038_v58  ;;  %v4279_v26 = vmul.f32 %v9139_v45, %v11627_v62  ;;  %v11628_v15 = vld [vmem:[#allocation113_spill] sm:$0xff] }
 0x23a   : > { %v4221_v21 = vadd.f32 %v4217_v4, %v9585_v5  ;;  %v4241_v34 = vmul.f32 %v6779_v24, %v9759_v31  ;;  %5924 = vmatpush3.msra.mxu1 %v9783_v44  ;;  %v2796_v63 = vadd.f32 %v2792_v2, %v2783_v9  ;;  %6138 = vmatpush3.msra.mxu0 %v9038_v58 }
 0x23b   : > { %v3224_v37 = vadd.f32 %v3220_v42, %v3211_v28  ;;  %v4270_v57 = vadd.f32 %v11628_v15, %v4257_v51  ;;  %v2829_v5 = vmin.f32 %v2825_v22, 6.0  ;;  %5925 = vmatprep.subr.mxu1 %v9806_v40  ;;  %6139 = vmatprep.subr.mxu0 %v9059_v11  ;;  %v9816_v2 = vsel %vm1436_vm4, %v11630_v6, %v11629_v52  ;;  %v9839_v28 = vld [vmem:[%s10793_s4 + $0x60] sm:$0xff] }
 0x23c   : > { %11631 = vst [vmem:[#allocation50_spill] sm:$0xff] %v9816_v2  ;;  %v4233_v58 = vadd.f32 %v9683_v16, %v4221_v21  ;;  %v4254_v42 = vmul.f32 %v6786_v33, %v9773_v38  ;;  %v2809_v0 = vadd.f32 %v9718_v32, %v2796_v63  ;;  %5926 = vmatpush3.msra.mxu1 %v9806_v40  ;;  %v9832_v16 = vsel %vm1506_vm5, %v11633_v53, 0.0  ;;  %v9868_v15 = vld [vmem:[%s10793_s4] sm:$0xff] }
 0x23d   : > { %v3237_v1 = vadd.f32 %v3233_v43, %v3224_v37  ;;  %6140 = vmatpush3.msra.mxu0 %v9059_v11  ;;  %v4283_v4 = vadd.f32 %v4279_v26, %v4270_v57  ;;  %11634 = vst [vmem:[#allocation53_spill] sm:$0xff] %v9832_v16  ;;  %v4230_v9 = vmul.f32 %v6728_v35, %v9516_v25  ;;  %v11636_v51 = vrot.slane %v9516_v25, 7  ;;  %v9862_v37 = vld [vmem:[%s10793_s4 + $0x58] sm:$0xff] }
 0x23e   : > { %5880 = vmatprep.mubr.f32.mxu1 %v2829_v5  ;;  %5927 = vmatprep.subr.mxu1 %v9839_v28  ;;  %v4245_v32 = vadd.f32 %v4241_v34, %v4233_v58  ;;  %v4267_v11 = vmul.f32 %v6741_v50, %v9659_v3  ;;  %v9846_v43 = vmul.f32 %v6736_v46, %v9516_v25  ;;  %v11637_v22 = vrot.slane %v9569_v48, 7  ;;  %v11639_v5 = vld [vmem:[#allocation127_spill] sm:$0xff] }
 0x23f   : > { %v2822_v21 = vadd.f32 %v9724_v17, %v2809_v0  ;;  %5928 = vmatpush3.msra.mxu1 %v9839_v28  ;;  %6141 = vmatprep.subr.mxu0 %v9081_v7  ;;  %v4287_v34 = vmax.f32 %v4283_v4, 0.0  ;;  %v3241_v63 = vmax.f32 %v3237_v1, 0.0  ;;  %v4280_v7 = vmul.f32 %v9139_v45, %v9816_v2  ;;  %v9888_v45 = vld [vmem:[%s10793_s4 + $0x50] sm:$0xff] }
 0x240   : > { %11635 = vst [vmem:[#allocation151_spill] sm:$0xff] %v9846_v43  ;;  %v9854_v26 = vsel %vm1102_vm2, %v11637_v22, %v11636_v51  ;;  %5929 = vmatprep.subr.mxu1 %v9862_v37  ;;  %6142 = vmatpush3.msra.mxu0 %v9868_v15  ;;  %v4258_v17 = vadd.f32 %v4254_v42, %v4245_v32  ;;  %v11641_v0 = vrot.slane %v9569_v48, 1  ;;  %v11642_v1 = vrot.slane %v9516_v25, 1  ;;  %v11676_v48 = vld [vmem:[#allocation174_spill] sm:$0xff] }
 0x241   : > { %11638 = vst [vmem:[#allocation166_spill] sm:$0xff] %v9854_v26  ;;  %v4599_v57 = vmul.f32 %v6731_v36, %v9773_v38  ;;  %v4613_v52 = vadd.f32 %v11639_v5, %v9670_v54  ;;  %v9879_v6 = vmul.f32 %v6731_v36, %v9674_v12  ;;  %v2826_v58 = vmax.f32 %v2822_v21, 0.0  ;;  %5930 = vmatpush3.msra.mxu1 %v9862_v37 }
 0x242   : > { %v4291_v20 = vmin.f32 %v4287_v34, 6.0  ;;  %6187 = vmatprep.subr.mxu0 %v9311_v30  ;;  %v4611_v42 = vmul.f32 %v6736_v46, %v9659_v3  ;;  %5931 = vmatprep.subr.mxu1 %v9888_v45  ;;  %v4271_v54 = vadd.f32 %v4267_v11, %v4258_v17  ;;  %v1497_v4 = vsel %vm1436_vm4, %v11642_v1, %v11641_v0  ;;  %v9909_v34 = vld [vmem:[%s10793_s4 + $0x48] sm:$0xff] }
 0x243   : > { %11640 = vst [vmem:[#allocation100_spill] sm:$0xff] %v9879_v6  ;;  %v968_v53 = vmax.f32 %v9615_v8, 0.0  ;;  %v2830_v32 = vmin.f32 %v2826_v58, 6.0  ;;  %5932 = vmatpush3.msra.mxu1 %v9888_v45  ;;  %v4603_v51 = vadd.f32 %v9667_v55, %v4599_v57  ;;  %v9902_v22 = vsel %vm1506_vm5, %v1497_v4, 0.0  ;;  %v5692_v23 = vpop.f32.mrf.mxu1 }
 0x244   : > { %6144 = vmatmul.mubr.f32.vlgmr.msra.gmra.mxu0 %v4291_v20  ;;  %11643 = vst [vmem:[#allocation27_spill] sm:$0xff] %v9902_v22  ;;  %v4218_v11 = vmul.f32 %v6739_v49, %v9854_v26  ;;  %v3245_v21 = vmin.f32 %v3241_v63, 6.0  ;;  %5933 = vmatprep.subr.mxu1 %v9909_v34  ;;  %v4284_v8 = vadd.f32 %v4280_v7, %v4271_v54  ;;  %v11644_v17 = vrot.slane %v9624_v14, 7 }
 0x245   : > { %6188 = vmatpush3.msra.mxu0 %v9311_v30  ;;  %v11645_v57 = vrot.slane %v9659_v3, 7  ;;  %v11647_v63 = vrot.slane %v9659_v3, 1  ;;  %v11648_v58 = vrot.slane %v9624_v14, 1  ;;  %v4612_v0 = vmul.f32 %v6736_v46, %v9624_v14  ;;  %5881 = vmatmul.mubr.f32.gmra.mxu1 %v2830_v32  ;;  %1863 = vst.msk [vmem:[%s9766_s12 + $0x108] sm:$0xff] %vm1859_vm6, %v5692_v23 }
 0x246   : > { %6189 = vmatprep.subr.mxu0 %v9783_v44  ;;  %v4222_v30 = vadd.f32 %v4218_v11, %v9645_v47  ;;  %v4242_v7 = vmul.f32 %v6779_v24, %v9902_v22  ;;  %v967_v54 = vmax.f32 %v9652_v61, 0.0  ;;  %v4625_v1 = vadd.f32 %v9655_v29, %v4613_v52  ;;  %5953 = vmatprep.mubr.f32.mxu1 %v3245_v21  ;;  %v9943_v47 = vld [vmem:[%s10793_s4 + $0x40] sm:$0xff] }
 0x247   : > { %v9919_v5 = vsel %vm1102_vm2, %v11645_v57, %v11644_v17  ;;  %v1498_v20 = vsel %vm1436_vm4, %v11648_v58, %v11647_v63  ;;  %5934 = vmatpush3.msra.mxu1 %v9909_v34  ;;  %v4288_v4 = vmax.f32 %v4284_v8, 0.0  ;;  %v4623_v17 = vmul.f32 %v6764_v10, %v9816_v2  ;;  %6190 = vmatpush3.msra.mxu0 %v9783_v44  ;;  %v11652_v8 = vld [vmem:[#allocation117_spill] sm:$0xff]  ;;  %v9968_v58 = vld [vmem:[%s10793_s4 + $0x38] sm:$0xff]  ;;  %v11665_v22 = vld [vmem:[#allocation63_spill] sm:$0xff] }
 0x248   : > { %11646 = vst [vmem:[#allocation42_spill] sm:$0xff] %v9919_v5  ;;  %v9938_v57 = vmin.f32 %v968_v53, 6.0  ;;  %5935 = vmatprep.subr.mxu1 %v9943_v47  ;;  %v4615_v32 = vadd.f32 %v4611_v42, %v4603_v51  ;;  %v9949_v29 = vsel %vm1506_vm5, %v1498_v20, 0.0  ;;  %v4234_v61 = vadd.f32 %v4230_v9, %v4222_v30  ;;  %6191 = vmatprep.subr.mxu0 %v9806_v40  ;;  %v11650_v42 = vld [vmem:[#allocation121_spill] sm:$0xff] }
 0x249   : > { %11649 = vst [vmem:[#allocation149_spill] sm:$0xff] %v9949_v29  ;;  %v4255_v52 = vmul.f32 %v6786_v33, %v9919_v5  ;;  %5936 = vmatpush3.msra.mxu1 %v9943_v47  ;;  %v4292_v53 = vmin.f32 %v4288_v4, 6.0  ;;  %v4268_v11 = vmul.f32 %v6741_v50, %v9624_v14  ;;  %v4600_v21 = vmul.f32 %v6731_v36, %v9919_v5  ;;  %v11655_v30 = vld [vmem:[#allocation105_spill] sm:$0xff] }
 0x24a   : > { %v11651_v51 = vrot.slane %v11650_v42, 7  ;;  %v11653_v63 = vrot.slane %v11652_v8, 7  ;;  %11654 = vst [vmem:[#allocation97_spill] sm:$0xff] %v9968_v58  ;;  %5937 = vmatprep.subr.mxu1 %v9968_v58  ;;  %v4246_v20 = vadd.f32 %v4242_v7, %v4234_v61  ;;  %6192 = vmatpush3.msra.mxu0 %v9806_v40  ;;  %v11656_v4 = vrot.slane %v11655_v30, 1  ;;  %v10002_v30 = vld [vmem:[%s10793_s4 + $0x30] sm:$0xff] }
 0x24b   : > { %v11658_v14 = vrot.slane %v11657_v13, 1  ;;  %v9988_v25 = vmin.f32 %v967_v54, 6.0  ;;  %5938 = vmatpush3.msra.mxu1 %v9968_v58  ;;  %6146 = vmatprep.mubr.f32.mxu0 %v4292_v53  ;;  %v4604_v7 = vadd.f32 %v9667_v55, %v4600_v21  ;;  %v10008_v53 = vld [vmem:[%s10791_s2 + $0x8] ss:$0 sm:$0xff] }
 0x24c   : > { %v1150_v9 = vsel %vm1102_vm2, %v11653_v63, %v11651_v51  ;;  %v11659_v51 = vrot.slane %v11652_v8, 1  ;;  %v11660_v63 = vrot.slane %v11650_v42, 1  ;;  %v1100_v8 = vrot.slane %v9938_v57, 7  ;;  %5939 = vmatprep.subr.mxu1 %v10002_v30  ;;  %v10024_v13 = vld [vmem:[%s10793_s4 + $0x28] sm:$0xff]  ;;  %6193 = vmatprep.subr.mxu0 %v9839_v28 }
 0x24d   : > { %v9978_v43 = vsel %vm1436_vm4, %v11658_v14, %v11656_v4  ;;  %v9994_v61 = vsel %vm1169_vm3, %v1150_v9, 0.0  ;;  %v4633_v14 = vmul.f32 %v6739_v49, %v9824_v56  ;;  %v4259_v54 = vadd.f32 %v4255_v52, %v4246_v20  ;;  %5940 = vmatpush3.msra.mxu1 %v10002_v30  ;;  %6194 = vmatpush3.msra.mxu0 %v9839_v28 }
 0x24e   : > { %v9986_v62 = vsel %vm1436_vm4, %v11660_v63, %v11659_v51  ;;  %11662 = vst [vmem:[#allocation40_spill] sm:$0xff] %v9994_v61  ;;  %v4281_v21 = vmul.f32 %v10008_v53, %v9949_v29  ;;  %v970_v4 = vmax.f32 %v9679_v41, 0.0  ;;  %v10015_v51 = vadd.f32 %v4623_v17, %v4615_v32  ;;  %5941 = vmatprep.subr.mxu1 %v10024_v13 }
 0x24f   : > { %11661 = vst [vmem:[#allocation52_spill] sm:$0xff] %v9986_v62  ;;  %v4624_v63 = vmul.f32 %v6764_v10, %v9949_v29  ;;  %v4637_v52 = vadd.f32 %v4633_v14, %v4625_v1  ;;  %v4657_v20 = vmul.f32 %v6779_v24, %v9978_v43  ;;  %v4272_v9 = vadd.f32 %v4268_v11, %v4259_v54  ;;  %v11663_v1 = vld [vmem:[#allocation132_spill] sm:$0xff]  ;;  %v10042_v11 = vld [vmem:[%s10793_s4 + $0x20] sm:$0xff] }
 0x250   : > { %v4616_v41 = vadd.f32 %v4612_v0, %v4604_v7  ;;  %v4670_v17 = vmul.f32 %v6786_v33, %v9994_v61  ;;  %v1068_v32 = vrot.slane %v9988_v25, 7  ;;  %5942 = vmatpush3.msra.mxu1 %v10024_v13  ;;  %v4683_v29 = vmul.f32 %v6741_v50, %v11650_v42  ;;  %6195 = vmatprep.subr.mxu0 %v9862_v37 }
 0x251   : > { %v4649_v14 = vadd.f32 %v11663_v1, %v4637_v52  ;;  %v4696_v12 = vmul.f32 %v10008_v53, %v9986_v62  ;;  %v969_v0 = vmax.f32 %v9711_v39, 0.0  ;;  %5943 = vmatprep.subr.mxu1 %v10042_v11  ;;  %v4285_v7 = vadd.f32 %v4281_v21, %v4272_v9  ;;  %6196 = vmatpush3.msra.mxu0 %v9862_v37  ;;  %v11664_v9 = vld [vmem:[#allocation77_spill] sm:$0xff]  ;;  %v10070_v1 = vld [vmem:[%s10793_s4 + $0x18] sm:$0xff] }
 0x252   : > { %v10047_v54 = vmul.f32 %v6728_v35, %v9938_v57  ;;  %v10051_v52 = vmul.f32 %v6736_v46, %v9938_v57  ;;  %5944 = vmatpush3.msra.mxu1 %v10042_v11  ;;  %v10058_v5 = vsel %vm1102_vm2, %v1068_v32, %v1100_v8  ;;  %v10061_v21 = vmin.f32 %v970_v4, 6.0  ;;  %6197 = vmatprep.subr.mxu0 %v9888_v45  ;;  %v11666_v4 = vld [vmem:[#allocation176_spill] sm:$0xff]  ;;  %v11687_v62 = vld [vmem:[#allocation141_spill] sm:$0xff] }
 0x253   : > { %v4661_v39 = vadd.f32 %v4657_v20, %v4649_v14  ;;  %v3187_v2 = vadd.f32 %v11665_v22, %v11664_v9  ;;  %v4289_v38 = vmax.f32 %v4285_v7, 0.0  ;;  %v10065_v31 = vadd.f32 %v4624_v63, %v4616_v41  ;;  %5945 = vmatprep.subr.mxu1 %v10070_v1  ;;  %v11667_v14 = vld [vmem:[#allocation159_spill] sm:$0xff]  ;;  %6198 = vmatpush3.msra.mxu0 %v9888_v45  ;;  %v11668_v63 = vld [vmem:[#allocation74_spill] sm:$0xff] }
 0x254   : > { %v1165_v20 = vsel %vm1102_vm2, %v1100_v8, %v1068_v32  ;;  %v3164_v3 = vadd.f32 %v11667_v14, %v11666_v4  ;;  %5946 = vmatpush3.msra.mxu1 %v10070_v1  ;;  %v10080_v22 = vmin.f32 %v969_v0, 6.0  ;;  %v11669_v7 = vld [vmem:[#allocation70_spill] sm:$0xff]  ;;  %v10087_v8 = vmul.f32 %v6728_v35, %v9988_v25  ;;  %6199 = vmatprep.subr.mxu0 %v9909_v34  ;;  %v11671_v14 = vld [vmem:[#allocation25_spill] sm:$0xff] }
 0x255   : > { %v4674_v26 = vadd.f32 %v4670_v17, %v4661_v39  ;;  %v3199_v41 = vadd.f32 %v11668_v63, %v3187_v2  ;;  %v3208_v9 = vmul.f32 %v6786_v33, %v11669_v7  ;;  %v4293_v6 = vmin.f32 %v4289_v38, 6.0  ;;  %v10096_v17 = vld [vmem:[%s10793_s4 + $0x10] sm:$0xff]  ;;  %v11670_v2 = vld [vmem:[#allocation62_spill] sm:$0xff]  ;;  %6200 = vmatpush3.msra.mxu0 %v9909_v34  ;;  %v10109_v7 = vld [vmem:[%s10793_s4 + $0x8] sm:$0xff] }
 0x256   : > { %v10091_v32 = vmul.f32 %v6731_v36, %v10058_v5  ;;  %5947 = vmatprep.subr.mxu1 %v10096_v17  ;;  %v3176_v0 = vadd.f32 %v11670_v2, %v3164_v3  ;;  %v3141_v63 = vadd.f32 %v9667_v55, %v11671_v14  ;;  %v11673_v2 = vld [vmem:[#allocation20_spill] sm:$0xff]  ;;  %6201 = vmatprep.subr.mxu0 %v9943_v47  ;;  %v11702_v27 = vrot.slane %v10061_v21, 1 }
 0x257   : > { %v4687_v38 = vadd.f32 %v4683_v29, %v4674_v26  ;;  %5948 = vmatpush3.msra.mxu1 %v10096_v17  ;;  %v3212_v4 = vadd.f32 %v3208_v9, %v3199_v41  ;;  %6147 = vmatmul.mubr.f32.gmra.mxu0 %v4293_v6  ;;  %v11672_v26 = vld [vmem:[#allocation80_spill] sm:$0xff]  ;;  %v11674_v41 = vld [vmem:[#allocation147_spill] sm:$0xff]  ;;  %v3223_v42 = vmul.f32 %v6741_v50, %v11687_v62 }
 0x258   : > { %5949 = vmatprep.subr.mxu1 %v10109_v7  ;;  %v3234_v29 = vmul.f32 %v10008_v53, %v11672_v26  ;;  %v3188_v39 = vadd.f32 %v11673_v2, %v3176_v0  ;;  %v3209_v9 = vmul.f32 %v6786_v33, %v11674_v41  ;;  %v3153_v3 = vadd.f32 %v11676_v48, %v3141_v63  ;;  %v11677_v0 = vld [vmem:[#allocation59_spill] sm:$0xff]  ;;  %v11679_v41 = vld [vmem:[#allocation90_spill] sm:$0xff]  ;;  %v11681_v63 = vld [vmem:[#allocation65_spill] sm:$0xff] }
 0x259   : > { %v4700_v14 = vadd.f32 %v4696_v12, %v4687_v38  ;;  %5950 = vmatpush3.msra.mxu1 %v10109_v7  ;;  %v3225_v46 = vadd.f32 %v11675_v59, %v3212_v4  ;;  %v10125_v26 = vsel %vm1169_vm3, %v1165_v20, 0.0  ;;  %v11678_v12 = vld [vmem:[#allocation56_spill] sm:$0xff]  ;;  %6202 = vmatpush3.msra.mxu0 %v9943_v47  ;;  %v3235_v6 = vmul.f32 %v10008_v53, %v11681_v63 }
 0x25a   : > { %5951 = vmatprep.subr.mxu1 %v9868_v15  ;;  %v3200_v2 = vadd.f32 %v11677_v0, %v3188_v39  ;;  %v3222_v38 = vmul.f32 %v6741_v50, %v11678_v12  ;;  %v11680_v59 = vld [vmem:[#allocation60_spill] sm:$0xff]  ;;  %6203 = vmatprep.subr.mxu0 %v9968_v58  ;;  %v11682_v39 = vld [vmem:[#allocation37_spill] sm:$0xff]  ;;  %v1850_v12 = vpop.f32.mrf.mxu1 }
 0x25b   : > { %v3580_v4 = vadd.f32 %v11680_v59, %v11679_v41  ;;  %v4704_v48 = vmax.f32 %v4700_v14, 0.0  ;;  %5952 = vmatpush3.msra.mxu1 %v9868_v15  ;;  %v3238_v20 = vadd.f32 %v3234_v29, %v3225_v46  ;;  %v3165_v0 = vadd.f32 %v11682_v39, %v3153_v3  ;;  %v10145_v41 = vld [vmem:[%s10793_s4 + $0x78] sm:$0xff]  ;;  %6204 = vmatpush3.msra.mxu0 %v9968_v58  ;;  %v11684_v46 = vld [vmem:[#allocation68_spill] sm:$0xff]  ;;  %v11685_v14 = vld [vmem:[#allocation55_spill] sm:$0xff] }
 0x25c   : > { %11683 = vst [vmem:[#allocation24_spill] sm:$0xff] %v10145_v41  ;;  %5997 = vmatprep.subr.mxu1 %v10145_v41  ;;  %v3213_v23 = vadd.f32 %v3209_v9, %v3200_v2  ;;  %v3210_v29 = vmul.f32 %v6786_v33, %v11684_v46  ;;  %1862 = vst.msk [vmem:[%s9766_s12 + $0x100] sm:$0xff] %vm1859_vm6, %v1850_v12  ;;  %v11686_v39 = vld [vmem:[#allocation51_spill] sm:$0xff]  ;;  %6205 = vmatprep.subr.mxu0 %v10002_v30  ;;  %v11689_v46 = vld [vmem:[#allocation133_spill] sm:$0xff] }
 0x25d   : > { %v3592_v59 = vadd.f32 %v11685_v14, %v3580_v4  ;;  %v4708_v3 = vmin.f32 %v4704_v48, 6.0  ;;  %v3242_v63 = vmax.f32 %v3238_v20, 0.0  ;;  %v3177_v18 = vadd.f32 %v11686_v39, %v3165_v0  ;;  %v11688_v2 = vld [vmem:[#allocation91_spill] sm:$0xff]  ;;  %6206 = vmatpush3.msra.mxu0 %v10002_v30  ;;  %v5727_v20 = vpop.f32.mrf.mxu1  ;;  %v11691_v0 = vld [vmem:[#allocation17_spill] sm:$0xff] }
 0x25e   : > { %v3226_v9 = vadd.f32 %v3222_v38, %v3213_v23  ;;  %v11690_v58 = vld [vmem:[#allocation139_spill] sm:$0xff]  ;;  %v4697_v48 = vmul.f32 %v10008_v53, %v9832_v16  ;;  %6207 = vmatprep.subr.mxu0 %v10024_v13  ;;  %v11693_v38 = vrot.slane %v10080_v22, 7  ;;  %v11694_v23 = vrot.slane %v10061_v21, 7  ;;  %5109 = vst.msk [vmem:[%s9766_s12 + $0x18] sm:$0xff] %vm1859_vm6, %v5727_v20  ;;  %v11698_v16 = vld [vmem:[#allocation142_spill] sm:$0xff] }
 0x25f   : > { %v3604_v61 = vadd.f32 %v11688_v2, %v3592_v59  ;;  %v4688_v4 = vadd.f32 %v11690_v58, %v11689_v46  ;;  %6219 = vmatprep.mubr.f32.mxu0 %v4708_v3  ;;  %v3246_v12 = vmin.f32 %v3242_v63, 6.0  ;;  %v3189_v14 = vadd.f32 %v11691_v0, %v3177_v18  ;;  %v11692_v39 = vld [vmem:[#allocation95_spill] sm:$0xff]  ;;  %v11695_v3 = vld [vmem:[#allocation144_spill] sm:$0xff]  ;;  %6208 = vmatpush3.msra.mxu0 %v10024_v13 }
 0x260   : > { %v3625_v62 = vmul.f32 %v6786_v33, %v11692_v39  ;;  %v1166_v58 = vsel %vm1102_vm2, %v11694_v23, %v11693_v38  ;;  %v3239_v59 = vadd.f32 %v3235_v6, %v3226_v9  ;;  %v11696_v2 = vrot.slane %v9938_v57, 1  ;;  %v2061_v39 = vpop.f32.mrf.mxu1  ;;  %v11699_v23 = vld [vmem:[#allocation75_spill] sm:$0xff]  ;;  %6209 = vmatprep.subr.mxu0 %v10042_v11 }
 0x261   : > { %v3616_v63 = vadd.f32 %v11695_v3, %v3604_v61  ;;  %v4701_v18 = vadd.f32 %v4697_v48, %v4688_v4  ;;  %v11697_v46 = vrot.slane %v9988_v25, 1  ;;  %5954 = vmatmul.mubr.f32.vlgmr.msra.gmra.mxu1 %v3246_v12  ;;  %v3201_v38 = vadd.f32 %v11698_v16, %v3189_v14  ;;  %5108 = vst.msk [vmem:[%s9766_s12 + $0x10] sm:$0xff] %vm1859_vm6, %v2061_v39  ;;  %v11700_v48 = vld [vmem:[#allocation89_spill] sm:$0xff] }
 0x262   : > { %v3236_v6 = vmul.f32 %v10008_v53, %v11699_v23  ;;  %v4635_v61 = vmul.f32 %v6739_v49, %v10125_v26  ;;  %v3243_v9 = vmax.f32 %v3239_v59, 0.0  ;;  %5998 = vmatpush3.msra.mxu1 %v10145_v41  ;;  %v3638_v20 = vmul.f32 %v6741_v50, %v11700_v48  ;;  %6210 = vmatpush3.msra.mxu0 %v10042_v11 }
 0x263   : > { %v10184_v0 = vsel %vm1436_vm4, %v11697_v46, %v11696_v2  ;;  %v3629_v4 = vadd.f32 %v3625_v62, %v3616_v63  ;;  %v10200_v16 = vsel %vm1169_vm3, %v1166_v58, 0.0  ;;  %5999 = vmatprep.subr.mxu1 %v9783_v44  ;;  %v3214_v12 = vadd.f32 %v3210_v29, %v3201_v38  ;;  %6211 = vmatprep.subr.mxu0 %v10070_v1  ;;  %v11701_v63 = vld [vmem:[#allocation18_spill] sm:$0xff] }
 0x264   : > { %v4639_v14 = vadd.f32 %v4635_v61, %v10015_v51  ;;  %v4659_v59 = vmul.f32 %v6779_v24, %v10184_v0  ;;  %v3247_v62 = vmin.f32 %v3243_v9, 6.0  ;;  %6000 = vmatpush3.msra.mxu1 %v9783_v44  ;;  %v3651_v2 = vmul.f32 %v10008_v53, %v11701_v63  ;;  %6212 = vmatpush3.msra.mxu0 %v10070_v1 }
 0x265   : > { %v3642_v3 = vadd.f32 %v3638_v20, %v3629_v4  ;;  %v11703_v29 = vrot.slane %v10080_v22, 1  ;;  %v3227_v51 = vadd.f32 %v3223_v42, %v3214_v12  ;;  %6001 = vmatprep.subr.mxu1 %v9806_v40  ;;  %6213 = vmatprep.subr.mxu0 %v10096_v17  ;;  %v4705_v46 = vmax.f32 %v4701_v18, 0.0 }
 0x266   : > { %v4651_v39 = vadd.f32 %v10087_v8, %v4639_v14  ;;  %v4672_v38 = vmul.f32 %v6786_v33, %v10200_v16  ;;  %5956 = vmatprep.mubr.f32.mxu1 %v3247_v62  ;;  %6002 = vmatpush3.msra.mxu1 %v9806_v40  ;;  %v4685_v61 = vmul.f32 %v6741_v50, %v10080_v22  ;;  %v11704_v9 = vrot.slane %v9988_v25, 1 }
 0x267   : > { %v10217_v58 = vsel %vm1436_vm4, %v11703_v29, %v11702_v27  ;;  %v3655_v23 = vadd.f32 %v3651_v2, %v3642_v3  ;;  %v11705_v42 = vrot.slane %v9938_v57, 1  ;;  %v3240_v18 = vadd.f32 %v3236_v6, %v3227_v51  ;;  %6003 = vmatprep.subr.mxu1 %v9839_v28  ;;  %6214 = vmatpush3.msra.mxu0 %v10096_v17 }
 0x268   : > { %v4663_v8 = vadd.f32 %v4659_v59, %v4651_v39  ;;  %v11706_v48 = vmov %v11703_v29  ;;  %v11707_v20 = vmov %v11702_v27  ;;  %v10247_v62 = vmul.f32 %v6728_v35, %v10061_v21  ;;  %6004 = vmatpush3.msra.mxu1 %v9839_v28  ;;  %6215 = vmatprep.subr.mxu0 %v10109_v7 }
 0x269   : > { %v1499_v4 = vsel %vm1436_vm4, %v11705_v42, %v11704_v9  ;;  %v1500_v12 = vsel %vm1436_vm4, %v11707_v20, %v11706_v48  ;;  %v3659_v6 = vmax.f32 %v3655_v23, 0.0  ;;  %v11708_v59 = vrot.slane %v10061_v21, 7  ;;  %6005 = vmatprep.subr.mxu1 %v9862_v37  ;;  %6216 = vmatpush3.msra.mxu0 %v10109_v7 }
 0x26a   : > { %v10243_v14 = vsel %vm1506_vm5, %v1499_v4, 0.0  ;;  %v11709_v3 = vrot.slane %v10080_v22, 7  ;;  %v4636_v2 = vmul.f32 %v6739_v49, %v10058_v5  ;;  %v3244_v27 = vmax.f32 %v3240_v18, 0.0  ;;  %6006 = vmatpush3.msra.mxu1 %v9862_v37  ;;  %6217 = vmatprep.subr.mxu0 %v9868_v15 }
 0x26b   : > { %v4709_v29 = vmin.f32 %v4705_v46, 6.0  ;;  %v4676_v51 = vadd.f32 %v4672_v38, %v4663_v8  ;;  %v4698_v39 = vmul.f32 %v10008_v53, %v10217_v58  ;;  %v1576_v19 = vsel %vm1506_vm5, %v1500_v12, 0.0  ;;  %6007 = vmatprep.subr.mxu1 %v9888_v45  ;;  %6218 = vmatpush3.msra.mxu0 %v9868_v15 }
 0x26c   : > { %v1134_v63 = vsel %vm1102_vm2, %v11709_v3, %v11708_v59  ;;  %v4640_v23 = vadd.f32 %v4636_v2, %v10065_v31  ;;  %v4660_v9 = vmul.f32 %v6779_v24, %v10243_v14  ;;  %v4813_v42 = vadd.f32 %v9667_v55, %v10091_v32  ;;  %6008 = vmatpush3.msra.mxu1 %v9888_v45 }
 0x26d   : > { %v3248_v46 = vmin.f32 %v3244_v27, 6.0  ;;  %v4689_v38 = vadd.f32 %v4685_v61, %v4676_v51  ;;  %v4673_v4 = vmul.f32 %v6786_v33, %v1134_v63  ;;  %v4833_v60 = vmul.f32 %v6764_v10, %v10243_v14  ;;  %6220 = vmatmul.mubr.f32.vlgmr.msra.gmra.mxu0 %v4709_v29  ;;  %6009 = vmatprep.subr.mxu1 %v9909_v34  ;;  %v11710_v29 = vld [vmem:[#allocation3_spill] sm:$0xff]  ;;  %v11711_v51 = vld [vmem:[#allocation86_spill] sm:$0xff] }
 0x26e   : > { %v3663_v18 = vmin.f32 %v3659_v6, 6.0  ;;  %v4652_v31 = vadd.f32 %v10047_v54, %v4640_v23  ;;  %v4825_v8 = vadd.f32 %v10051_v52, %v4813_v42  ;;  %v4845_v32 = vmul.f32 %v6739_v49, %v1134_v63  ;;  %6010 = vmatpush3.msra.mxu1 %v9909_v34  ;;  %6225 = vmatprep.subr.mxu0 %v10145_v41  ;;  %v5730_v63 = vpop.f32.mrf.mxu1  ;;  %v11712_v23 = vld [vmem:[#allocation97_spill] sm:$0xff] }
 0x26f   : > { %5957 = vmatmul.mubr.f32.gmra.mxu1 %v3248_v46  ;;  %v4702_v48 = vadd.f32 %v4698_v39, %v4689_v38  ;;  %v4686_v61 = vmul.f32 %v6741_v50, %v10061_v21  ;;  %v4806_v20 = vmul.f32 %v6731_v36, %v9824_v56  ;;  %v4699_v54 = vmul.f32 %v10008_v53, %v1576_v19  ;;  %v11714_v46 = vld [vmem:[#allocation40_spill] sm:$0xff] }
 0x270   : > { %6029 = vmatprep.mubr.f32.mxu1 %v3663_v18  ;;  %v4664_v12 = vadd.f32 %v4660_v9, %v4652_v31  ;;  %v4837_v52 = vadd.f32 %v4833_v60, %v4825_v8  ;;  %6011 = vmatprep.subr.mxu1 %v9943_v47  ;;  %v4869_v59 = vmul.f32 %v6779_v24, %v1576_v19  ;;  %v11713_v9 = vld [vmem:[#allocation136_spill] sm:$0xff]  ;;  %v11715_v60 = vld [vmem:[#allocation94_spill] sm:$0xff]  ;;  %v2071_v18 = vpop.f32.mrf.mxu1 }
 0x271   : > { %v4706_v6 = vmax.f32 %v4702_v48, 0.0  ;;  %v4810_v21 = vadd.f32 %v9667_v55, %v4806_v20  ;;  %v4830_v3 = vmul.f32 %v6764_v10, %v9978_v43  ;;  %6012 = vmatpush3.msra.mxu1 %v9943_v47  ;;  %6226 = vmatpush3.msra.mxu0 %v10145_v41  ;;  %v3605_v39 = vadd.f32 %v11711_v51, %v11710_v29  ;;  %v11722_v51 = vld [vmem:[#allocation72_spill] sm:$0xff] }
 0x272   : > { %v4677_v2 = vadd.f32 %v4673_v4, %v4664_v12  ;;  %v4849_v27 = vadd.f32 %v4845_v32, %v4837_v52  ;;  %5111 = vst.msk [vmem:[%s9766_s12 + $0x118] sm:$0xff] %vm1859_vm6, %v5730_v63  ;;  %6013 = vmatprep.subr.mxu1 %v11712_v23  ;;  %6227 = vmatprep.subr.mxu0 %v9783_v44  ;;  %v11716_v32 = vld [vmem:[#allocation66_spill] sm:$0xff]  ;;  %5110 = vst.msk [vmem:[%s9766_s12 + $0x110] sm:$0xff] %vm1859_vm6, %v2071_v18  ;;  %v11717_v12 = vld [vmem:[#allocation121_spill] sm:$0xff] }
 0x273   : > { %v4710_v19 = vmin.f32 %v4706_v6, 6.0  ;;  %v4822_v42 = vadd.f32 %v11713_v9, %v4810_v21  ;;  %v4842_v38 = vmul.f32 %v6739_v49, %v11714_v46  ;;  %v3626_v4 = vmul.f32 %v6786_v33, %v11715_v60  ;;  %6014 = vmatpush3.msra.mxu1 %v11712_v23  ;;  %6228 = vmatpush3.msra.mxu0 %v9783_v44  ;;  %v11718_v6 = vld [vmem:[#allocation173_spill] sm:$0xff]  ;;  %v11719_v21 = vld [vmem:[#allocation82_spill] sm:$0xff] }
 0x274   : > { %v4690_v31 = vadd.f32 %v4686_v61, %v4677_v2  ;;  %v4861_v8 = vadd.f32 %v10247_v62, %v4849_v27  ;;  %v3617_v48 = vadd.f32 %v11716_v32, %v3605_v39  ;;  %6015 = vmatprep.subr.mxu1 %v10002_v30  ;;  %v4854_v52 = vmul.f32 %v6728_v35, %v11717_v12  ;;  %v11724_v9 = vld [vmem:[#allocation34_spill] sm:$0xff]  ;;  %v11725_v46 = vld [vmem:[#allocation81_spill] sm:$0xff]  ;;  %v11728_v32 = vld [vmem:[#allocation83_spill] sm:$0xff] }
 0x275   : > { %6222 = vmatprep.mubr.f32.mxu0 %v4710_v19  ;;  %v4834_v20 = vadd.f32 %v4830_v3, %v4822_v42  ;;  %v3582_v63 = vadd.f32 %v11719_v21, %v11718_v6  ;;  %6016 = vmatpush3.msra.mxu1 %v10002_v30  ;;  %v11721_v3 = vld [vmem:[#allocation52_spill] sm:$0xff]  ;;  %v3652_v42 = vmul.f32 %v10008_v53, %v11724_v9  ;;  %v11730_v21 = vld [vmem:[#allocation22_spill] sm:$0xff] }
 0x276   : > { %v4703_v29 = vadd.f32 %v4699_v54, %v4690_v31  ;;  %v10319_v61 = vadd.f32 %v4869_v59, %v4861_v8  ;;  %6229 = vmatprep.subr.mxu0 %v9806_v40  ;;  %v3630_v62 = vadd.f32 %v3626_v4, %v3617_v48  ;;  %6017 = vmatprep.subr.mxu1 %v10024_v13  ;;  %v11723_v54 = vld [vmem:[#allocation30_spill] sm:$0xff]  ;;  %v11726_v4 = vld [vmem:[#allocation76_spill] sm:$0xff]  ;;  %v11727_v31 = vld [vmem:[#allocation61_spill] sm:$0xff] }
 0x277   : > { %6230 = vmatpush3.msra.mxu0 %v9806_v40  ;;  %v4846_v2 = vadd.f32 %v4842_v38, %v4834_v20  ;;  %v4866_v27 = vmul.f32 %v6779_v24, %v11721_v3  ;;  %v3594_v39 = vadd.f32 %v11722_v51, %v3582_v63  ;;  %6018 = vmatpush3.msra.mxu1 %v10024_v13  ;;  %v11729_v48 = vld [vmem:[#allocation12_spill] sm:$0xff] }
 0x278   : > { %11720 = vst [vmem:[#allocation46_spill] sm:$0xff] %v10319_v61  ;;  %v4707_v19 = vmax.f32 %v4703_v29, 0.0  ;;  %6231 = vmatprep.subr.mxu0 %v9839_v28  ;;  %v3643_v59 = vadd.f32 %v11723_v54, %v3630_v62  ;;  %v3627_v60 = vmul.f32 %v6786_v33, %v11725_v46  ;;  %6019 = vmatprep.subr.mxu1 %v10042_v11  ;;  %v11731_v29 = vld [vmem:[#allocation29_spill] sm:$0xff]  ;;  %v11733_v51 = vld [vmem:[#allocation100_spill] sm:$0xff] }
 0x279   : > { %v4858_v38 = vadd.f32 %v4854_v52, %v4846_v2  ;;  %6232 = vmatpush3.msra.mxu0 %v9839_v28  ;;  %v3606_v18 = vadd.f32 %v11726_v4, %v3594_v39  ;;  %v3559_v8 = vadd.f32 %v9667_v55, %v11727_v31  ;;  %v10341_v20 = vmul.f32 %v11729_v48, %v11728_v32  ;;  %v11732_v2 = vld [vmem:[#allocation58_spill] sm:$0xff]  ;;  %v11737_v4 = vld [vmem:[#allocation16_spill] sm:$0xff] }
 0x27a   : > { %v4711_v12 = vmin.f32 %v4707_v19, 6.0  ;;  %6020 = vmatpush3.msra.mxu1 %v10042_v11  ;;  %6233 = vmatprep.subr.mxu0 %v9862_v37  ;;  %v3656_v6 = vadd.f32 %v3652_v42, %v3643_v59  ;;  %v3640_v52 = vmul.f32 %v6741_v50, %v11730_v21  ;;  %v10353_v39 = vadd.f32 %v9667_v55, %v11733_v51  ;;  %v11734_v19 = vld [vmem:[#allocation88_spill] sm:$0xff]  ;;  %v11735_v59 = vld [vmem:[#allocation7_spill] sm:$0xff]  ;;  %v11740_v21 = vld [vmem:[#allocation129_spill] sm:$0xff] }
 0x27b   : > { %v4870_v63 = vadd.f32 %v4866_v27, %v4858_v38  ;;  %6021 = vmatprep.subr.mxu1 %v10070_v1  ;;  %6234 = vmatpush3.msra.mxu0 %v9862_v37  ;;  %v3618_v62 = vadd.f32 %v11731_v29, %v3606_v18  ;;  %v3571_v3 = vadd.f32 %v11732_v2, %v3559_v8  ;;  %v11736_v27 = vld [vmem:[#allocation148_spill] sm:$0xff]  ;;  %v11739_v8 = vld [vmem:[#allocation146_spill] sm:$0xff] }
 0x27c   : > { %6223 = vmatmul.mubr.f32.gmra.mxu0 %v4711_v12  ;;  %6022 = vmatpush3.msra.mxu1 %v10070_v1  ;;  %v3653_v54 = vmul.f32 %v10008_v53, %v11734_v19  ;;  %v3998_v9 = vadd.f32 %v11736_v27, %v11735_v59  ;;  %v3660_v46 = vmax.f32 %v3656_v6, 0.0  ;;  %v11738_v55 = vld [vmem:[#allocation28_spill] sm:$0xff]  ;;  %v11742_v6 = vld [vmem:[#allocation150_spill] sm:$0xff] }
 0x27d   : > { %v4874_v42 = vmax.f32 %v4870_v63, 0.0  ;;  %6023 = vmatprep.subr.mxu1 %v10096_v17  ;;  %6235 = vmatprep.subr.mxu0 %v9888_v45  ;;  %v3631_v38 = vadd.f32 %v3627_v60, %v3618_v62  ;;  %v3583_v18 = vadd.f32 %v11737_v4, %v3571_v3  ;;  %v3628_v31 = vmul.f32 %v6786_v33, %v11738_v55  ;;  %v11741_v29 = vld [vmem:[#allocation140_spill] sm:$0xff]  ;;  %v11743_v3 = vld [vmem:[#allocation53_spill] sm:$0xff]  ;;  %v11744_v19 = vld [vmem:[#allocation6_spill] sm:$0xff] }
 0x27e   : > { %6024 = vmatpush3.msra.mxu1 %v10096_v17  ;;  %6236 = vmatpush3.msra.mxu0 %v9888_v45  ;;  %v4010_v12 = vadd.f32 %v11739_v8, %v3998_v9  ;;  %v4859_v63 = vadd.f32 %v11741_v29, %v11740_v21  ;;  %v4867_v51 = vmul.f32 %v6779_v24, %v11743_v3  ;;  %v11745_v27 = vld [vmem:[#allocation108_spill] sm:$0xff]  ;;  %v11747_v4 = vld [vmem:[#allocation5_spill] sm:$0xff] }
 0x27f   : > { %v4878_v2 = vmin.f32 %v4874_v42, 6.0  ;;  %6025 = vmatprep.subr.mxu1 %v10109_v7  ;;  %6237 = vmatprep.subr.mxu0 %v9909_v34  ;;  %v3644_v60 = vadd.f32 %v3640_v52, %v3631_v38  ;;  %v3595_v62 = vadd.f32 %v11742_v6, %v3583_v18  ;;  %v4043_v9 = vmul.f32 %v6786_v33, %v11745_v27  ;;  %v11746_v42 = vld [vmem:[#allocation43_spill] sm:$0xff] }
 0x280   : > { %6026 = vmatpush3.msra.mxu1 %v10109_v7  ;;  %6238 = vmatpush3.msra.mxu0 %v9909_v34  ;;  %v4022_v59 = vadd.f32 %v11744_v19, %v4010_v12  ;;  %v4023_v55 = vadd.f32 %v11747_v4, %v11746_v42  ;;  %v3664_v52 = vmin.f32 %v3660_v46, 6.0  ;;  %v11748_v18 = vld [vmem:[#allocation71_spill] sm:$0xff]  ;;  %v10384_v21 = vadd.f32 %v4867_v51, %v4859_v63  ;;  %v11751_v19 = vld [vmem:[#allocation102_spill] sm:$0xff]  ;;  %v11753_v63 = vld [vmem:[#allocation92_spill] sm:$0xff] }
 0x281   : > { %6257 = vmatprep.mubr.f32.mxu0 %v4878_v2  ;;  %6027 = vmatprep.subr.mxu1 %v9868_v15  ;;  %v3657_v38 = vadd.f32 %v3653_v54, %v3644_v60  ;;  %v3607_v8 = vadd.f32 %v11748_v18, %v3595_v62  ;;  %v11749_v12 = vld [vmem:[#allocation143_spill] sm:$0xff]  ;;  %v4044_v27 = vmul.f32 %v6786_v33, %v11751_v19  ;;  %v11752_v54 = vld [vmem:[#allocation153_spill] sm:$0xff]  ;;  %v11755_v51 = vld [vmem:[#allocation96_spill] sm:$0xff]  ;;  %v5844_v18 = vpop.f32.mrf.mxu0 }
 0x282   : > { %6028 = vmatpush3.msra.mxu1 %v9868_v15  ;;  %6239 = vmatprep.subr.mxu0 %v9943_v47  ;;  %v4034_v29 = vadd.f32 %v11749_v12, %v4022_v59  ;;  %v11750_v6 = vld [vmem:[#allocation99_spill] sm:$0xff]  ;;  %v3641_v60 = vmul.f32 %v6741_v50, %v11753_v63  ;;  %v11757_v12 = vld [vmem:[#allocation93_spill] sm:$0xff]  ;;  %v11758_v19 = vld [vmem:[#allocation4_spill] sm:$0xff]  ;;  %5123 = vst.msk [vmem:[%s9766_s12 + $0x148] sm:$0xff] %vm1859_vm6, %v5844_v18 }
 0x283   : > { %v4035_v3 = vadd.f32 %v11750_v6, %v4023_v55  ;;  %6030 = vmatmul.mubr.f32.vlgmr.msra.gmra.mxu1 %v3664_v52  ;;  %6073 = vmatprep.subr.mxu1 %v10145_v41  ;;  %v3661_v46 = vmax.f32 %v3657_v38, 0.0  ;;  %v3619_v2 = vadd.f32 %v11752_v54, %v3607_v8  ;;  %v11754_v62 = vld [vmem:[#allocation19_spill] sm:$0xff]  ;;  %v3654_v6 = vmul.f32 %v10008_v53, %v11757_v12  ;;  %v2698_v63 = vpop.f32.mrf.mxu0  ;;  %v11767_v12 = vld [vmem:[#allocation154_spill] sm:$0xff] }
 0x284   : > { %v4000_v42 = vadd.f32 %v11755_v51, %v11754_v62  ;;  %6074 = vmatpush3.msra.mxu1 %v10145_v41  ;;  %6240 = vmatpush3.msra.mxu0 %v9943_v47  ;;  %v4047_v59 = vadd.f32 %v4043_v9, %v4034_v29  ;;  %v11756_v4 = vld [vmem:[#allocation47_spill] sm:$0xff]  ;;  %v11762_v51 = vld [vmem:[#allocation85_spill] sm:$0xff]  ;;  %5122 = vst.msk [vmem:[%s9766_s12 + $0x140] sm:$0xff] %vm1859_vm6, %v2698_v63  ;;  %v11782_v41 = vld [vmem:[#allocation114_spill] sm:$0xff] }
 0x285   : > { %v4056_v55 = vmul.f32 %v6741_v50, %v11756_v4  ;;  %v4048_v52 = vadd.f32 %v4044_v27, %v4035_v3  ;;  %v3665_v38 = vmin.f32 %v3661_v46, 6.0  ;;  %6075 = vmatprep.subr.mxu1 %v9783_v44  ;;  %6241 = vmatprep.subr.mxu0 %v11712_v23  ;;  %v3632_v8 = vadd.f32 %v3628_v31, %v3619_v2  ;;  %v11759_v29 = vld [vmem:[#allocation87_spill] sm:$0xff]  ;;  %v11760_v27 = vld [vmem:[#allocation106_spill] sm:$0xff] }
 0x286   : > { %v4012_v54 = vadd.f32 %v11758_v19, %v4000_v42  ;;  %6076 = vmatpush3.msra.mxu1 %v9783_v44  ;;  %6242 = vmatpush3.msra.mxu0 %v11712_v23  ;;  %v4069_v3 = vmul.f32 %v10008_v53, %v11759_v29  ;;  %v11761_v31 = vld [vmem:[#allocation166_spill] sm:$0xff]  ;;  %v4406_v42 = vadd.f32 %v10341_v20, %v10353_v39  ;;  %v10431_v4 = vld [vmem:[%s10792_s3] ss:$0 sm:$0xff]  ;;  %v11766_v39 = vld [vmem:[#allocation36_spill] sm:$0xff] }
 0x287   : > { %v4060_v9 = vadd.f32 %v4056_v55, %v4047_v59  ;;  %v10414_v46 = vadd.f32 %v11760_v27, %v4048_v52  ;;  %v10418_v2 = vmul.f32 %v6731_v36, %v11761_v31  ;;  %6032 = vmatprep.mubr.f32.mxu1 %v3665_v38  ;;  %v3645_v62 = vadd.f32 %v3641_v60, %v3632_v8  ;;  %v11763_v60 = vld [vmem:[#allocation32_spill] sm:$0xff]  ;;  %v11764_v52 = vld [vmem:[#allocation21_spill] sm:$0xff]  ;;  %v11765_v20 = vld [vmem:[#allocation35_spill] sm:$0xff] }
 0x288   : > { %6077 = vmatprep.subr.mxu1 %v9806_v40  ;;  %v4024_v44 = vadd.f32 %v11762_v51, %v4012_v54  ;;  %6243 = vmatprep.subr.mxu0 %v10002_v30  ;;  %v3977_v55 = vadd.f32 %v10431_v4, %v11763_v60  ;;  %v10437_v18 = vmul.f32 %v6728_v35, %v11764_v52  ;;  %v11769_v29 = vld [vmem:[#allocation50_spill] sm:$0xff]  ;;  %v11770_v27 = vld [vmem:[#allocation27_spill] sm:$0xff]  ;;  %v5917_v60 = vpop.f32.mrf.mxu0 }
 0x289   : > { %6078 = vmatpush3.msra.mxu1 %v9806_v40  ;;  %v4073_v59 = vadd.f32 %v4069_v3, %v4060_v9  ;;  %v3658_v38 = vadd.f32 %v3654_v6, %v3645_v62  ;;  %6244 = vmatpush3.msra.mxu0 %v10002_v30  ;;  %v4414_v8 = vmul.f32 %v6764_v10, %v11766_v39  ;;  %v11768_v9 = vld [vmem:[#allocation84_spill] sm:$0xff]  ;;  %v11771_v51 = vld [vmem:[#allocation130_spill] sm:$0xff] }
 0x28a   : > { %6079 = vmatprep.subr.mxu1 %v9839_v28  ;;  %v4036_v40 = vadd.f32 %v11765_v20, %v4024_v44  ;;  %v4426_v19 = vmul.f32 %v6739_v49, %v11767_v12  ;;  %6245 = vmatprep.subr.mxu0 %v10024_v13  ;;  %v3989_v6 = vadd.f32 %v11768_v9, %v3977_v55  ;;  %v11772_v44 = vld [vmem:[#allocation155_spill] sm:$0xff]  ;;  %v11774_v52 = vld [vmem:[#allocation158_spill] sm:$0xff] }
 0x28b   : > { %v4077_v54 = vmax.f32 %v4073_v59, 0.0  ;;  %6080 = vmatpush3.msra.mxu1 %v9839_v28  ;;  %v10451_v3 = vmul.f32 %v6779_v24, %v11769_v29  ;;  %v10455_v63 = vmul.f32 %v6764_v10, %v11770_v27  ;;  %v3662_v62 = vmax.f32 %v3658_v38, 0.0  ;;  %6246 = vmatpush3.msra.mxu0 %v10024_v13  ;;  %v11773_v28 = vld [vmem:[#allocation42_spill] sm:$0xff]  ;;  %v11775_v20 = vld [vmem:[#allocation23_spill] sm:$0xff]  ;;  %5129 = vst.msk [vmem:[%s9766_s12 + $0x68] sm:$0xff] %vm1859_vm6, %v5917_v60 }
 0x28c   : > { %6081 = vmatprep.subr.mxu1 %v9862_v37  ;;  %v4416_v59 = vadd.f32 %v11772_v44, %v11771_v51  ;;  %v10463_v55 = vmul.f32 %v6739_v49, %v11773_v28  ;;  %6247 = vmatprep.subr.mxu0 %v10042_v11  ;;  %v4045_v38 = vmul.f32 %v6786_v33, %v11774_v52  ;;  %v3106_v28 = vpop.f32.mrf.mxu0 }
 0x28d   : > { %6082 = vmatpush3.msra.mxu1 %v9862_v37  ;;  %v4001_v12 = vadd.f32 %v11775_v20, %v3989_v6  ;;  %v3666_v9 = vmin.f32 %v3662_v62, 6.0  ;;  %6248 = vmatpush3.msra.mxu0 %v10042_v11  ;;  %v4058_v29 = vmul.f32 %v6741_v50, %v11728_v32  ;;  %v10478_v51 = vmul.f32 %v10008_v53, %v11766_v39  ;;  %v11776_v37 = vld [vmem:[#allocation168_spill] sm:$0xff]  ;;  %v11777_v6 = vld [vmem:[#allocation31_spill] sm:$0xff]  ;;  %v11779_v20 = vld [vmem:[#allocation118_spill] sm:$0xff] }
 0x28e   : > { %6083 = vmatprep.subr.mxu1 %v9888_v45  ;;  %v4428_v44 = vadd.f32 %v11776_v37, %v4416_v59  ;;  %v4081_v52 = vmin.f32 %v4077_v54, 6.0  ;;  %6249 = vmatprep.subr.mxu0 %v10070_v1  ;;  %v4046_v60 = vmul.f32 %v6786_v33, %v11761_v31  ;;  %5128 = vst.msk [vmem:[%s9766_s12 + $0x60] sm:$0xff] %vm1859_vm6, %v3106_v28  ;;  %v11778_v32 = vld [vmem:[#allocation135_spill] sm:$0xff]  ;;  %v11780_v39 = vld [vmem:[#allocation98_spill] sm:$0xff] }
 0x28f   : > { %6084 = vmatpush3.msra.mxu1 %v9888_v45  ;;  %v4013_v62 = vadd.f32 %v11777_v6, %v4001_v12  ;;  %v4441_v61 = vadd.f32 %v11779_v20, %v11778_v32  ;;  %6250 = vmatpush3.msra.mxu0 %v10070_v1  ;;  %v4059_v54 = vmul.f32 %v6741_v50, %v11780_v39  ;;  %v11781_v59 = vld [vmem:[#allocation126_spill] sm:$0xff]  ;;  %v11784_v6 = vld [vmem:[#allocation116_spill] sm:$0xff]  ;;  %v11785_v32 = vld [vmem:[#allocation33_spill] sm:$0xff] }
 0x290   : > { %6033 = vmatmul.mubr.f32.gmra.mxu1 %v3666_v9  ;;  %v4440_v37 = vadd.f32 %v11781_v59, %v4428_v44  ;;  %v4449_v45 = vmul.f32 %v6779_v24, %v11782_v41  ;;  %6085 = vmatprep.subr.mxu1 %v9909_v34  ;;  %v11783_v31 = vld [vmem:[#allocation26_spill] sm:$0xff]  ;;  %v4461_v28 = vmul.f32 %v6786_v33, %v9824_v56  ;;  %v4875_v44 = vmax.f32 %v10384_v21, 0.0  ;;  %v11786_v39 = vld [vmem:[#allocation157_spill] sm:$0xff] }
 0x291   : > { %6105 = vmatprep.mubr.f32.mxu1 %v4081_v52  ;;  %v4025_v12 = vadd.f32 %v11783_v31, %v4013_v62  ;;  %v4462_v9 = vmul.f32 %v6786_v33, %v11784_v6  ;;  %6251 = vmatprep.subr.mxu0 %v10096_v17  ;;  %v4418_v52 = vadd.f32 %v4414_v8, %v4406_v42  ;;  %v11787_v59 = vld [vmem:[#allocation109_spill] sm:$0xff] }
 0x292   : > { %6086 = vmatpush3.msra.mxu1 %v9909_v34  ;;  %v4452_v20 = vadd.f32 %v11785_v32, %v4440_v37  ;;  %v4453_v41 = vadd.f32 %v4449_v45, %v4441_v61  ;;  %6252 = vmatpush3.msra.mxu0 %v10096_v17  ;;  %v4049_v62 = vadd.f32 %v4045_v38, %v4036_v40 }
 0x293   : > { %6087 = vmatprep.subr.mxu1 %v9943_v47  ;;  %v4037_v56 = vadd.f32 %v11786_v39, %v4025_v12  ;;  %v4474_v31 = vmul.f32 %v6741_v50, %v11787_v59  ;;  %6253 = vmatprep.subr.mxu0 %v10109_v7  ;;  %v4430_v6 = vadd.f32 %v4426_v19, %v4418_v52  ;;  %v11788_v19 = vld [vmem:[#allocation131_spill] sm:$0xff] }
 0x294   : > { %6088 = vmatpush3.msra.mxu1 %v9943_v47  ;;  %v4465_v34 = vadd.f32 %v4461_v28, %v4452_v20  ;;  %v4466_v21 = vadd.f32 %v4462_v9, %v4453_v41  ;;  %6254 = vmatpush3.msra.mxu0 %v10109_v7  ;;  %v4487_v61 = vmul.f32 %v10008_v53, %v9978_v43  ;;  %v4879_v47 = vmin.f32 %v4875_v44, 6.0  ;;  %v11789_v12 = vld [vmem:[#allocation151_spill] sm:$0xff]  ;;  %v11790_v44 = vld [vmem:[#allocation156_spill] sm:$0xff] }
 0x295   : > { %6089 = vmatprep.subr.mxu1 %v11712_v23  ;;  %v4463_v42 = vmul.f32 %v6786_v33, %v10125_v26  ;;  %v4395_v40 = vadd.f32 %v10431_v4, %v10418_v2  ;;  %6255 = vmatprep.subr.mxu0 %v9868_v15  ;;  %v4442_v37 = vadd.f32 %v10437_v18, %v4430_v6 }
 0x296   : > { %6090 = vmatpush3.msra.mxu1 %v11712_v23  ;;  %v4478_v8 = vadd.f32 %v4474_v31, %v4465_v34  ;;  %v10524_v38 = vadd.f32 %v11788_v19, %v4466_v21  ;;  %6256 = vmatpush3.msra.mxu0 %v9868_v15  ;;  %v4062_v43 = vadd.f32 %v4058_v29, %v4049_v62  ;;  %v11791_v15 = vld [vmem:[#allocation149_spill] sm:$0xff]  ;;  %v5920_v62 = vpop.f32.mrf.mxu0 }
 0x297   : > { %6091 = vmatprep.subr.mxu1 %v10002_v30  ;;  %v4050_v45 = vadd.f32 %v4046_v60, %v4037_v56  ;;  %v4407_v28 = vadd.f32 %v11789_v12, %v4395_v40  ;;  %6258 = vmatmul.mubr.f32.vlgmr.msra.gmra.mxu0 %v4879_v47  ;;  %v4454_v23 = vadd.f32 %v10451_v3, %v4442_v37  ;;  %v11792_v60 = vld [vmem:[#allocation111_spill] sm:$0xff]  ;;  %v10602_v19 = vld [vmem:[%s10793_s4 + $0x70] sm:$0xff]  ;;  %v10611_v12 = vld [vmem:[%s10793_s4 + $0x68] sm:$0xff] }
 0x298   : > { %6092 = vmatpush3.msra.mxu1 %v10002_v30  ;;  %v10531_v2 = vadd.f32 %v4487_v61, %v4478_v8  ;;  %v4476_v9 = vmul.f32 %v6741_v50, %v9988_v25  ;;  %v4439_v18 = vmul.f32 %v6728_v35, %v11790_v44  ;;  %v4451_v29 = vmul.f32 %v6779_v24, %v11791_v15  ;;  %v3116_v34 = vpop.f32.mrf.mxu0  ;;  %v11793_v8 = vld [vmem:[#allocation24_spill] sm:$0xff] }
 0x299   : > { %6093 = vmatprep.subr.mxu1 %v10024_v13  ;;  %v4070_v32 = vmul.f32 %v10008_v53, %v11792_v60  ;;  %v4419_v20 = vadd.f32 %v10455_v63, %v4407_v28  ;;  %v4820_v3 = vmul.f32 %v11729_v48, %v9988_v25  ;;  %v4467_v41 = vadd.f32 %v4463_v42, %v4454_v23  ;;  %v10627_v23 = vld [vmem:[%s10793_s4 + $0x58] sm:$0xff] }
 0x29a   : > { %6094 = vmatpush3.msra.mxu1 %v10024_v13  ;;  %v4489_v52 = vmul.f32 %v10008_v53, %v10184_v0  ;;  %v4808_v39 = vmul.f32 %v6731_v36, %v10125_v26  ;;  %v4063_v59 = vadd.f32 %v4059_v54, %v4050_v45  ;;  %v4072_v63 = vmul.f32 %v10008_v53, %v11770_v27 }
 0x29b   : > { %6095 = vmatprep.subr.mxu1 %v10042_v11  ;;  %v4074_v56 = vadd.f32 %v4070_v32, %v10414_v46  ;;  %v4431_v25 = vadd.f32 %v10463_v55, %v4419_v20  ;;  %5131 = vst.msk [vmem:[%s9766_s12 + $0x168] sm:$0xff] %vm1859_vm6, %v5920_v62  ;;  %v4075_v48 = vadd.f32 %v10478_v51, %v4062_v43  ;;  %5130 = vst.msk [vmem:[%s9766_s12 + $0x160] sm:$0xff] %vm1859_vm6, %v3116_v34  ;;  %v5765_v43 = vpop.f32.mrf.mxu1  ;;  %v6367_v32 = vld [vmem:[%s10793_s4 + $0x38] sm:$0xff] }
 0x29c   : > { %6096 = vmatpush3.msra.mxu1 %v10042_v11  ;;  %v4480_v31 = vadd.f32 %v4476_v9, %v4467_v41  ;;  %v4812_v36 = vadd.f32 %v10431_v4, %v4808_v39  ;;  %v4832_v26 = vmul.f32 %v6764_v10, %v10184_v0  ;;  %v4464_v27 = vmul.f32 %v6786_v33, %v10058_v5  ;;  %v6364_v9 = vld [vmem:[%s10793_s4 + $0x50] sm:$0xff]  ;;  %v6371_v34 = vld [vmem:[%s10793_s4 + $0x18] sm:$0xff] }
 0x29d   : > { %6097 = vmatprep.subr.mxu1 %v10070_v1  ;;  %v4443_v46 = vadd.f32 %v4439_v18, %v4431_v25  ;;  %v4844_v54 = vmul.f32 %v6739_v49, %v10200_v16  ;;  %v4078_v4 = vmax.f32 %v4074_v56, 0.0  ;;  %v4076_v10 = vadd.f32 %v4072_v63, %v4063_v59  ;;  %5113 = vst.msk [vmem:[%s9766_s12 + $0x28] sm:$0xff] %vm1859_vm6, %v5765_v43  ;;  %v2270_v28 = vpop.f32.mrf.mxu1  ;;  %v6365_v18 = vld [vmem:[%s10793_s4 + $0x48] sm:$0xff]  ;;  %v6368_v59 = vld [vmem:[%s10793_s4 + $0x30] sm:$0xff] }
 0x29e   : > { %6098 = vmatpush3.msra.mxu1 %v10070_v1  ;;  %v10569_v55 = vadd.f32 %v4489_v52, %v4480_v31  ;;  %v4824_v51 = vadd.f32 %v4820_v3, %v4812_v36  ;;  %v4477_v21 = vmul.f32 %v6741_v50, %v9938_v57  ;;  %v4079_v33 = vmax.f32 %v4075_v48, 0.0  ;;  %v10588_v50 = vld [vmem:[%s10793_s4] sm:$0xff]  ;;  %5112 = vst.msk [vmem:[%s9766_s12 + $0x20] sm:$0xff] %vm1859_vm6, %v2270_v28  ;;  %v11794_v3 = vld [vmem:[#allocation120_spill] sm:$0xff] }
 0x29f   : > { %6099 = vmatprep.subr.mxu1 %v10096_v17  ;;  %v4455_v0 = vadd.f32 %v4451_v29, %v4443_v46  ;;  %v4856_v6 = vmul.f32 %v6728_v35, %v10080_v22  ;;  %v4490_v49 = vmul.f32 %v10008_v53, %v10243_v14  ;;  %v4868_v42 = vmul.f32 %v6779_v24, %v10217_v58  ;;  %v6366_v29 = vld [vmem:[%s10793_s4 + $0x40] sm:$0xff]  ;;  %v6369_v25 = vld [vmem:[%s10793_s4 + $0x28] sm:$0xff]  ;;  %v11795_v46 = vld [vmem:[#allocation46_spill] sm:$0xff] }
 0x2a0   : > { %6100 = vmatpush3.msra.mxu1 %v10096_v17  ;;  %v4836_v5 = vadd.f32 %v4832_v26, %v4824_v51  ;;  %v4082_v35 = vmin.f32 %v4078_v4, 6.0  ;;  %v4080_v57 = vmax.f32 %v4076_v10, 0.0  ;;  %v4083_v14 = vmin.f32 %v4079_v33, 6.0  ;;  %v6370_v48 = vld [vmem:[%s10793_s4 + $0x20] sm:$0xff] }
 0x2a1   : > { %6101 = vmatprep.subr.mxu1 %v10109_v7  ;;  %v4468_v61 = vadd.f32 %v4464_v27, %v4455_v0  ;;  %v4495_v40 = vmax.f32 %v10531_v2, 0.0  ;;  %v10620_v2 = vld [vmem:[%s10793_s4 + $0x60] sm:$0xff]  ;;  %v5768_v44 = vpop.f32.mrf.mxu1  ;;  %v4488_v41 = vmul.f32 %v10008_v53, %v11794_v3  ;;  %v4497_v53 = vmax.f32 %v10569_v55, 0.0  ;;  %v6372_v55 = vld [vmem:[%s10793_s4 + $0x10] sm:$0xff] }
 0x2a2   : > { %6102 = vmatpush3.msra.mxu1 %v10109_v7  ;;  %v4848_v16 = vadd.f32 %v4844_v54, %v4836_v5  ;;  %v4084_v37 = vmin.f32 %v4080_v57, 6.0  ;;  %5115 = vst.msk [vmem:[%s9766_s12 + $0x128] sm:$0xff] %vm1859_vm6, %v5768_v44  ;;  %v4877_v27 = vmax.f32 %v11795_v46, 0.0  ;;  %v6373_v54 = vld [vmem:[%s10793_s4 + $0x8] sm:$0xff] }
 0x2a3   : > { %6103 = vmatprep.subr.mxu1 %v10588_v50  ;;  %v4481_v22 = vadd.f32 %v4477_v21, %v4468_v61  ;;  %v4499_v45 = vmin.f32 %v4495_v40, 6.0  ;;  %v2280_v15 = vpop.f32.mrf.mxu1  ;;  %v4492_v52 = vadd.f32 %v4488_v41, %v10524_v38  ;;  %v4501_v38 = vmin.f32 %v4497_v53, 6.0 }
 0x2a4   : > { %6104 = vmatpush3.msra.mxu1 %v10588_v50  ;;  %v4860_v47 = vadd.f32 %v4856_v6, %v4848_v16  ;;  %5114 = vst.msk [vmem:[%s9766_s12 + $0x120] sm:$0xff] %vm1859_vm6, %v2280_v15  ;;  %v4881_v4 = vmin.f32 %v4877_v27, 6.0 }
 0x2a5   : > { %6106 = vmatmul.mubr.f32.vlgmr.msra.gmra.mxu1 %v4082_v35  ;;  %6149 = vmatprep.subr.mxu1 %v11793_v8  ;;  %v10594_v24 = vadd.f32 %v4490_v49, %v4481_v22 }
 0x2a6   : > { %6108 = vmatprep.mubr.f32.mxu1 %v4083_v14  ;;  %6150 = vmatpush3.msra.mxu1 %v11793_v8  ;;  %v10597_v58 = vadd.f32 %v4868_v42, %v4860_v47  ;;  %v5993_v60 = vpop.f32.mrf.mxu0 }
 0x2a7   : > { %6151 = vmatprep.subr.mxu1 %v10602_v19  ;;  %5137 = vst.msk [vmem:[%s9766_s12 + $0x88] sm:$0xff] %vm1859_vm6, %v5993_v60 }
 0x2a8   : > { %6152 = vmatpush3.msra.mxu1 %v10602_v19  ;;  %v3524_v20 = vpop.f32.mrf.mxu0 }
 0x2a9   : > { %6109 = vmatmul.mubr.f32.gmra.mxu1 %v4084_v37  ;;  %6153 = vmatprep.subr.mxu1 %v10611_v12  ;;  %5136 = vst.msk [vmem:[%s9766_s12 + $0x80] sm:$0xff] %vm1859_vm6, %v3524_v20 }
 0x2aa   : > { %6154 = vmatpush3.msra.mxu1 %v10611_v12  ;;  %6181 = vmatprep.mubr.f32.mxu1 %v4499_v45 }
 0x2ab   : > { %6155 = vmatprep.subr.mxu1 %v10620_v2 }
 0x2ac   : > { %6156 = vmatpush3.msra.mxu1 %v10620_v2 }
 0x2ad   : > { %6157 = vmatprep.subr.mxu1 %v10627_v23 }
 0x2ae   : > { %6158 = vmatpush3.msra.mxu1 %v10627_v23 }
 0x2af   : > { %6159 = vmatprep.subr.mxu1 %v6364_v9 }
 0x2b0   : > { %6160 = vmatpush3.msra.mxu1 %v6364_v9 }
 0x2b1   : > { %6161 = vmatprep.subr.mxu1 %v6365_v18 }
 0x2b2   : > { %6162 = vmatpush3.msra.mxu1 %v6365_v18 }
 0x2b3   : > { %6163 = vmatprep.subr.mxu1 %v6366_v29 }
 0x2b4   : > { %6164 = vmatpush3.msra.mxu1 %v6366_v29 }
 0x2b5   : > { %6165 = vmatprep.subr.mxu1 %v6367_v32 }
 0x2b6   : > { %6166 = vmatpush3.msra.mxu1 %v6367_v32 }
 0x2b7   : > { %6167 = vmatprep.subr.mxu1 %v10002_v30 }
 0x2b8   : > { %6168 = vmatpush3.msra.mxu1 %v10002_v30  ;;  %v4496_v30 = vmax.f32 %v4492_v52, 0.0 }
 0x2b9   : > { %6169 = vmatprep.subr.mxu1 %v10024_v13 }
 0x2ba   : > { %6170 = vmatpush3.msra.mxu1 %v10024_v13  ;;  %v4876_v13 = vmax.f32 %v10597_v58, 0.0 }
 0x2bb   : > { %6171 = vmatprep.subr.mxu1 %v10042_v11 }
 0x2bc   : > { %6172 = vmatpush3.msra.mxu1 %v10042_v11  ;;  %v4500_v11 = vmin.f32 %v4496_v30, 6.0  ;;  %v4880_v62 = vmin.f32 %v4876_v13, 6.0 }
 0x2bd   : > { %6173 = vmatprep.subr.mxu1 %v10070_v1 }
 0x2be   : > { %6174 = vmatpush3.msra.mxu1 %v10070_v1  ;;  %v4498_v1 = vmax.f32 %v10594_v24, 0.0 }
 0x2bf   : > { %6175 = vmatprep.subr.mxu1 %v10096_v17 }
 0x2c0   : > { %6176 = vmatpush3.msra.mxu1 %v10096_v17  ;;  %v5996_v17 = vpop.f32.mrf.mxu0 }
 0x2c1   : > { %6177 = vmatprep.subr.mxu1 %v10109_v7  ;;  %5139 = vst.msk [vmem:[%s9766_s12 + $0x188] sm:$0xff] %vm1859_vm6, %v5996_v17 }
 0x2c2   : > { %6178 = vmatpush3.msra.mxu1 %v10109_v7  ;;  %v4502_v7 = vmin.f32 %v4498_v1, 6.0  ;;  %v3534_v39 = vpop.f32.mrf.mxu0 }
 0x2c3   : > { %6179 = vmatprep.subr.mxu1 %v10588_v50  ;;  %5138 = vst.msk [vmem:[%s9766_s12 + $0x180] sm:$0xff] %vm1859_vm6, %v3534_v39 }
 0x2c4   : > { %6180 = vmatpush3.msra.mxu1 %v10588_v50 }
 0x2c5   : > { %6182 = vmatmul.mubr.f32.vlgmr.msra.gmra.mxu1 %v4500_v11  ;;  %6263 = vmatprep.subr.mxu1 %v11793_v8 }
 0x2c6   : > { %6184 = vmatprep.mubr.f32.mxu1 %v4501_v38  ;;  %6279 = vmatpush3.msra.mxu1 %v11793_v8 }
 0x2c7   : > { %6264 = vmatprep.subr.mxu1 %v10602_v19 }
 0x2c8   : > { %6280 = vmatpush3.msra.mxu1 %v10602_v19 }
 0x2c9   : > { %6185 = vmatmul.mubr.f32.gmra.mxu1 %v4502_v7  ;;  %6265 = vmatprep.subr.mxu1 %v10611_v12 }
 0x2ca   : > { %6281 = vmatpush3.msra.mxu1 %v10611_v12  ;;  %6260 = vmatprep.mubr.f32.mxu1 %v4880_v62  ;;  %v5803_v56 = vpop.f32.mrf.mxu1 }
 0x2cb   : > { %6266 = vmatprep.subr.mxu1 %v10620_v2  ;;  %5117 = vst.msk [vmem:[%s9766_s12 + $0x38] sm:$0xff] %vm1859_vm6, %v5803_v56 }
 0x2cc   : > { %6282 = vmatpush3.msra.mxu1 %v10620_v2  ;;  %v2479_v63 = vpop.f32.mrf.mxu1 }
 0x2cd   : > { %6267 = vmatprep.subr.mxu1 %v10627_v23  ;;  %5116 = vst.msk [vmem:[%s9766_s12 + $0x30] sm:$0xff] %vm1859_vm6, %v2479_v63 }
 0x2ce   : > { %6283 = vmatpush3.msra.mxu1 %v10627_v23 }
 0x2cf   : > { %6268 = vmatprep.subr.mxu1 %v6364_v9 }
 0x2d0   : > { %6284 = vmatpush3.msra.mxu1 %v6364_v9 }
 0x2d1   : > { %6269 = vmatprep.subr.mxu1 %v6365_v18 }
 0x2d2   : > { %6285 = vmatpush3.msra.mxu1 %v6365_v18  ;;  %v5806_v31 = vpop.f32.mrf.mxu1 }
 0x2d3   : > { %6270 = vmatprep.subr.mxu1 %v6366_v29  ;;  %5119 = vst.msk [vmem:[%s9766_s12 + $0x138] sm:$0xff] %vm1859_vm6, %v5806_v31  ;;  %v6069_v26 = vpop.f32.mrf.mxu0 }
 0x2d4   : > { %6286 = vmatpush3.msra.mxu1 %v6366_v29  ;;  %v2489_v36 = vpop.f32.mrf.mxu1  ;;  %5145 = vst.msk [vmem:[%s9766_s12 + $0xa8] sm:$0xff] %vm1859_vm6, %v6069_v26 }
 0x2d5   : > { %6271 = vmatprep.subr.mxu1 %v6367_v32  ;;  %5118 = vst.msk [vmem:[%s9766_s12 + $0x130] sm:$0xff] %vm1859_vm6, %v2489_v36  ;;  %v3942_v51 = vpop.f32.mrf.mxu0 }
 0x2d6   : > { %6287 = vmatpush3.msra.mxu1 %v6367_v32  ;;  %5144 = vst.msk [vmem:[%s9766_s12 + $0xa0] sm:$0xff] %vm1859_vm6, %v3942_v51 }
 0x2d7   : > { %6272 = vmatprep.subr.mxu1 %v6368_v59 }
 0x2d8   : > { %6288 = vmatpush3.msra.mxu1 %v6368_v59 }
 0x2d9   : > { %6273 = vmatprep.subr.mxu1 %v6369_v25 }
 0x2da   : > { %6289 = vmatpush3.msra.mxu1 %v6369_v25 }
 0x2db   : > { %6274 = vmatprep.subr.mxu1 %v6370_v48 }
 0x2dc   : > { %6290 = vmatpush3.msra.mxu1 %v6370_v48 }
 0x2dd   : > { %6275 = vmatprep.subr.mxu1 %v6371_v34 }
 0x2de   : > { %6291 = vmatpush3.msra.mxu1 %v6371_v34 }
 0x2df   : > { %6276 = vmatprep.subr.mxu1 %v6372_v55 }
 0x2e0   : > { %6292 = vmatpush3.msra.mxu1 %v6372_v55 }
 0x2e1   : > { %6277 = vmatprep.subr.mxu1 %v6373_v54 }
 0x2e2   : > { %6293 = vmatpush3.msra.mxu1 %v6373_v54 }
 0x2e3   : > { %6278 = vmatprep.subr.mxu1 %v10588_v50 }
 0x2e4   : > { %6294 = vmatpush3.msra.mxu1 %v10588_v50 }
 0x2e5   : > { %6261 = vmatmul.mubr.f32.vlgmr.msra.gmra.mxu1 %v4881_v4 }
 0x2e8   : > { %v6072_v10 = vpop.f32.mrf.mxu0 }
 0x2e9   : > { %5147 = vst.msk [vmem:[%s9766_s12 + $0x1a8] sm:$0xff] %vm1859_vm6, %v6072_v10 }
 0x2ea   : > { %v3952_v0 = vpop.f32.mrf.mxu0 }
 0x2eb   : > { %5146 = vst.msk [vmem:[%s9766_s12 + $0x1a0] sm:$0xff] %vm1859_vm6, %v3952_v0 }
 0x2f7   : > { %v5879_v21 = vpop.f32.mrf.mxu1 }
 0x2f8   : > { %5125 = vst.msk [vmem:[%s9766_s12 + $0x58] sm:$0xff] %vm1859_vm6, %v5879_v21 }
 0x2f9   : > { %v2897_v33 = vpop.f32.mrf.mxu1 }
 0x2fa   : > { %5124 = vst.msk [vmem:[%s9766_s12 + $0x50] sm:$0xff] %vm1859_vm6, %v2897_v33 }
 0x304   : > { %v6145_v5 = vpop.f32.mrf.mxu0 }
 0x305   : > { %5153 = vst.msk [vmem:[%s9766_s12 + $0xc8] sm:$0xff] %vm1859_vm6, %v6145_v5  ;;  %v5882_v6 = vpop.f32.mrf.mxu1 }
 0x306   : > { %v4360_v61 = vpop.f32.mrf.mxu0  ;;  %5127 = vst.msk [vmem:[%s9766_s12 + $0x158] sm:$0xff] %vm1859_vm6, %v5882_v6 }
 0x307   : > { %5152 = vst.msk [vmem:[%s9766_s12 + $0xc0] sm:$0xff] %vm1859_vm6, %v4360_v61  ;;  %v2907_v49 = vpop.f32.mrf.mxu1 }
 0x308   : > { %5126 = vst.msk [vmem:[%s9766_s12 + $0x150] sm:$0xff] %vm1859_vm6, %v2907_v49 }
 0x317   : > { %v6148_v16 = vpop.f32.mrf.mxu0 }
 0x318   : > { %5155 = vst.msk [vmem:[%s9766_s12 + $0x1c8] sm:$0xff] %vm1859_vm6, %v6148_v16 }
 0x319   : > { %v4370_v42 = vpop.f32.mrf.mxu0 }
 0x31a   : > { %5154 = vst.msk [vmem:[%s9766_s12 + $0x1c0] sm:$0xff] %vm1859_vm6, %v4370_v42 }
 0x321   : > { %v5955_v50 = vpop.f32.mrf.mxu1 }
 0x322   : > { %5133 = vst.msk [vmem:[%s9766_s12 + $0x78] sm:$0xff] %vm1859_vm6, %v5955_v50 }
 0x323   : > { %v3315_v35 = vpop.f32.mrf.mxu1 }
 0x324   : > { %5132 = vst.msk [vmem:[%s9766_s12 + $0x70] sm:$0xff] %vm1859_vm6, %v3315_v35 }
 0x32d   : > { %v6221_v57 = vpop.f32.mrf.mxu0 }
 0x32e   : > { %5161 = vst.msk [vmem:[%s9766_s12 + $0xe8] sm:$0xff] %vm1859_vm6, %v6221_v57 }
 0x32f   : > { %v5958_v22 = vpop.f32.mrf.mxu1  ;;  %v4778_v14 = vpop.f32.mrf.mxu0 }
 0x330   : > { %5135 = vst.msk [vmem:[%s9766_s12 + $0x178] sm:$0xff] %vm1859_vm6, %v5958_v22  ;;  %5160 = vst.msk [vmem:[%s9766_s12 + $0xe0] sm:$0xff] %vm1859_vm6, %v4778_v14 }
 0x331   : > { %v3325_v40 = vpop.f32.mrf.mxu1 }
 0x332   : > { %5134 = vst.msk [vmem:[%s9766_s12 + $0x170] sm:$0xff] %vm1859_vm6, %v3325_v40 }
 0x33c   : > { %v6224_v47 = vpop.f32.mrf.mxu0 }
 0x33d   : > { %5163 = vst.msk [vmem:[%s9766_s12 + $0x1e8] sm:$0xff] %vm1859_vm6, %v6224_v47 }
 0x33e   : > { %v4788_v8 = vpop.f32.mrf.mxu0 }
 0x33f   : > { %5162 = vst.msk [vmem:[%s9766_s12 + $0x1e0] sm:$0xff] %vm1859_vm6, %v4788_v8 }
 0x343   : > { %v6031_v24 = vpop.f32.mrf.mxu1 }
 0x344   : > { %5141 = vst.msk [vmem:[%s9766_s12 + $0x98] sm:$0xff] %vm1859_vm6, %v6031_v24 }
 0x345   : > { %v3733_v58 = vpop.f32.mrf.mxu1 }
 0x346   : > { %5140 = vst.msk [vmem:[%s9766_s12 + $0x90] sm:$0xff] %vm1859_vm6, %v3733_v58 }
 0x350   : > { %v6034_v19 = vpop.f32.mrf.mxu1 }
 0x351   : > { %5143 = vst.msk [vmem:[%s9766_s12 + $0x198] sm:$0xff] %vm1859_vm6, %v6034_v19 }
 0x352   : > { %v3743_v37 = vpop.f32.mrf.mxu1 }
 0x353   : > { %5142 = vst.msk [vmem:[%s9766_s12 + $0x190] sm:$0xff] %vm1859_vm6, %v3743_v37 }
 0x357   : > { %v6259_v43 = vpop.f32.mrf.mxu0 }
 0x358   : > { %5165 = vst.msk [vmem:[%s9766_s12 + $0xf8] sm:$0xff] %vm1859_vm6, %v6259_v43 }
 0x359   : > { %v4948_v45 = vpop.f32.mrf.mxu0 }
 0x35a   : > { %5164 = vst.msk [vmem:[%s9766_s12 + $0xf0] sm:$0xff] %vm1859_vm6, %v4948_v45 }
 0x365   : > { %v6107_v12 = vpop.f32.mrf.mxu1 }
 0x366   : > { %5149 = vst.msk [vmem:[%s9766_s12 + $0xb8] sm:$0xff] %vm1859_vm6, %v6107_v12 }
 0x367   : > { %v4151_v28 = vpop.f32.mrf.mxu1 }
 0x368   : > { %5148 = vst.msk [vmem:[%s9766_s12 + $0xb0] sm:$0xff] %vm1859_vm6, %v4151_v28 }
 0x369   : > { %v6110_v2 = vpop.f32.mrf.mxu1 }
 0x36a   : > { %5151 = vst.msk [vmem:[%s9766_s12 + $0x1b8] sm:$0xff] %vm1859_vm6, %v6110_v2 }
 0x36b   : > { %v4161_v23 = vpop.f32.mrf.mxu1 }
 0x36c   : > { %5150 = vst.msk [vmem:[%s9766_s12 + $0x1b0] sm:$0xff] %vm1859_vm6, %v4161_v23 }
 0x385   : > { %v6183_v9 = vpop.f32.mrf.mxu1 }
 0x386   : > { %5157 = vst.msk [vmem:[%s9766_s12 + $0xd8] sm:$0xff] %vm1859_vm6, %v6183_v9 }
 0x387   : > { %v4569_v44 = vpop.f32.mrf.mxu1 }
 0x388   : > { %5156 = vst.msk [vmem:[%s9766_s12 + $0xd0] sm:$0xff] %vm1859_vm6, %v4569_v44 }
 0x389   : > { %v6186_v18 = vpop.f32.mrf.mxu1 }
 0x38a   : > { %5159 = vst.msk [vmem:[%s9766_s12 + $0x1d8] sm:$0xff] %vm1859_vm6, %v6186_v18 }
 0x38b   : > { %v4579_v15 = vpop.f32.mrf.mxu1 }
 0x38c   : > { %5158 = vst.msk [vmem:[%s9766_s12 + $0x1d0] sm:$0xff] %vm1859_vm6, %v4579_v15 }
 0x3a5   : > { %v6262_v29 = vpop.f32.mrf.mxu1 }
 0x3a6   : > { %5167 = vst.msk [vmem:[%s9766_s12 + $0x1f8] sm:$0xff] %vm1859_vm6, %v6262_v29 }
 0x3a7   : > { %v4958_v60 = vpop.f32.mrf.mxu1 }
 0x3a8   : > { %5166 = vst.msk [vmem:[%s9766_s12 + $0x1f0] sm:$0xff] %vm1859_vm6, %v4958_v60 }
 0x3a9 PF: > { %s16_s21 = sadd.s32 1, %s6380_s21  }
 0x3aa   : > { %p13_p4 = scmp.ge.s32.totalorder %s16_s21, 4  }
 0x3ac   :  { %15 = sbr.rel (!%p13_p4) target bundleno = 1 (0x1), region = 136 }

</bundles_post_ra>
